<compile_context>
chip_gen: v6e
topology: v6e:2x2x1
jax: 0.10.0
libtpu: 0.0.40
codegen_flags: <defaults>
</compile_context>

<pallas_src>
import functools
import jax
import jax.numpy as jnp
from jax.experimental import pallas as pl
from jax.experimental.pallas import tpu as pltpu


# ----------------------------------------------------------------------------
# Pallas kernels
# ----------------------------------------------------------------------------
def _gemm_t_act_kernel(w_ref, a_ref, o_ref, *, act):
    # out[O, tn] = act(W[O, K] @ A[K, tn]); lane axis = tn (= B*Ho*Wo tile).
    acc = jnp.dot(w_ref[...], a_ref[...], preferred_element_type=jnp.float32)
    if act == "lrelu":
        acc = jnp.where(acc > 0, acc, 0.2 * acc)
    elif act == "sigmoid":
        # exp + reciprocal both go to the EUP slot (free next to the MXU work)
        acc = pl.reciprocal(1.0 + jnp.exp(-acc), approx=True)
    o_ref[...] = acc.astype(o_ref.dtype)


def _gemm_t_bn_lrelu_kernel(w_ref, a_ref, g_ref, b_ref, o_ref):
    # out = LeakyReLU(BatchNorm(W @ A)).  Batch stats are per output channel
    # (rows) over the lane axis (= B*H*W).  Must be invoked as a SINGLE block
    # along lanes, otherwise the stats silently become per-tile stats.
    acc = jnp.dot(w_ref[...], a_ref[...], preferred_element_type=jnp.float32)
    mean = jnp.mean(acc, axis=1, keepdims=True)
    d = acc - mean
    var = jnp.mean(d * d, axis=1, keepdims=True)       # biased, two-pass (f32)
    y = d * jax.lax.rsqrt(var + 1e-5) * g_ref[...] + b_ref[...]
    o_ref[...] = jnp.where(y > 0, y, 0.2 * y).astype(o_ref.dtype)


def _gemm_bias_act_kernel(a_ref, w_ref, b_ref, o_ref, *, act):
    # Small fc-style GEMM (normal orientation) + bias + optional ReLU.
    acc = jnp.dot(a_ref[...], w_ref[...], preferred_element_type=jnp.float32)
    acc = acc + b_ref[...]
    if act == "relu":
        acc = jnp.maximum(acc, 0.0)
    o_ref[...] = acc.astype(o_ref.dtype)


# ----------------------------------------------------------------------------
# Pallas wrappers
# ----------------------------------------------------------------------------
def gemm_t_act(w, a, act="none", out_dtype=jnp.bfloat16, tn_max=1024):
    """out[O, M] = act(w[O, K] @ a[K, M]); grid only over the lane axis M."""
    O, K = w.shape
    K2, M = a.shape
    assert K == K2
    tn = tn_max if (M > tn_max and M % tn_max == 0) else M
    return pl.pallas_call(
        functools.partial(_gemm_t_act_kernel, act=act),
        out_shape=jax.ShapeDtypeStruct((O, M), out_dtype),
        grid_spec=pltpu.PrefetchScalarGridSpec(
            num_scalar_prefetch=0,
            grid=(M // tn,),
            in_specs=[
                pl.BlockSpec((O, K), lambda i: (0, 0)),
                pl.BlockSpec((K, tn), lambda i: (0, i)),
            ],
            out_specs=pl.BlockSpec((O, tn), lambda i: (0, i)),
        ),
        compiler_params=pltpu.CompilerParams(
            dimension_semantics=("parallel",)),
    )(w, a)


def gemm_t_bn_lrelu(w, a, gamma, beta, out_dtype=jnp.bfloat16):
    """out[O, M] = LeakyReLU(BatchNorm(w @ a)).  Single block (full arrays)."""
    O, K = w.shape
    _, M = a.shape
    return pl.pallas_call(
        _gemm_t_bn_lrelu_kernel,
        out_shape=jax.ShapeDtypeStruct((O, M), out_dtype),
    )(w, a, gamma, beta)


def gemm_bias_act(a, w, bias, act="none", out_dtype=jnp.float32):
    """Tiny fc GEMM: out[M, N] = act(a @ w + bias).  Single block."""
    M, K = a.shape
    _, N = w.shape
    return pl.pallas_call(
        functools.partial(_gemm_bias_act_kernel, act=act),
        out_shape=jax.ShapeDtypeStruct((M, N), out_dtype),
    )(a, w, bias.reshape(1, N).astype(jnp.float32))


# ----------------------------------------------------------------------------
# Conv / ConvTranspose via transposed im2col (layout in XLA, GEMM in Pallas)
# ----------------------------------------------------------------------------
def _im2col_t_conv(x_cbhw):
    """Conv2d(k=4, s=2, p=1): [C,B,H,W] -> A^T [16*C, B*Ho*Wo]."""
    C, B, H, W = x_cbhw.shape
    Ho, Wo = H // 2, W // 2
    xp = jnp.pad(x_cbhw, ((0, 0), (0, 0), (1, 1), (1, 1)))
    patches = [xp[:, :, kh:kh + 2 * Ho - 1:2, kw:kw + 2 * Wo - 1:2]
               for kh in range(4) for kw in range(4)]
    A = jnp.concatenate(patches, axis=0).reshape(16 * C, B * Ho * Wo)
    return A, (B, Ho, Wo)


def _im2col_t_convT(x_cbhw):
    """ConvTranspose2d(k=4, s=2, p=1) == forward conv (k=4, s=1, p=2) on the
    zero-dilated input with spatially-flipped weights (flip is pre-folded
    into the weight layout)."""
    C, B, H, W = x_cbhw.shape
    Ho, Wo = 2 * H, 2 * W
    xd = jnp.zeros((C, B, 2 * H - 1, 2 * W - 1), x_cbhw.dtype)
    xd = xd.at[:, :, ::2, ::2].set(x_cbhw)
    xp = jnp.pad(xd, ((0, 0), (0, 0), (2, 2), (2, 2)))
    patches = [xp[:, :, kh:kh + Ho, kw:kw + Wo]
               for kh in range(4) for kw in range(4)]
    A = jnp.concatenate(patches, axis=0).reshape(16 * C, B * Ho * Wo)
    return A, (B, Ho, Wo)


def conv_lrelu(x_cbhw, w_t):
    A, (B, Ho, Wo) = _im2col_t_conv(x_cbhw)
    out = gemm_t_act(w_t, A, act="lrelu")
    return out.reshape(-1, B, Ho, Wo)


def conv_bn_lrelu(x_cbhw, w_t, gamma, beta):
    A, (B, Ho, Wo) = _im2col_t_conv(x_cbhw)
    out = gemm_t_bn_lrelu(w_t, A, gamma, beta)
    return out.reshape(-1, B, Ho, Wo)


def convT_bn_lrelu(x_cbhw, w_t, gamma, beta):
    A, (B, Ho, Wo) = _im2col_t_convT(x_cbhw)
    out = gemm_t_bn_lrelu(w_t, A, gamma, beta)
    return out.reshape(-1, B, Ho, Wo)


def convT_sigmoid(x_cbhw, w_t):
    A, (B, Ho, Wo) = _im2col_t_convT(x_cbhw)
    out = gemm_t_act(w_t, A, act="sigmoid", out_dtype=jnp.float32)
    return out.reshape(-1, B, Ho, Wo)


# ----------------------------------------------------------------------------
# VAE forward
# ----------------------------------------------------------------------------
@jax.jit
def vae_forward(params, x_nchw, eps):
    p = params
    B = x_nchw.shape[0]
    latent = eps.shape[1]

    # encode (channels-first layout, bf16 activations) ----------------------
    x = jnp.transpose(x_nchw, (1, 0, 2, 3)).astype(jnp.bfloat16)  # [C,B,H,W]
    h = conv_lrelu(x, p["e_w1"])
    for i in (2, 3, 4, 5):
        h = conv_bn_lrelu(h, p[f"e_w{i}"], p[f"e_g{i}"], p[f"e_b{i}"])
    # torch flattens NCHW -> [B, ndf*8*2*2]
    hf = jnp.transpose(h, (1, 0, 2, 3)).reshape(B, -1)
    ml = gemm_bias_act(hf, p["fc_w"], p["fc_b"])                 # fused fc1|fc2
    mu, logvar = ml[:, :latent], ml[:, latent:]
    # TODO(synk): batchnorm=False path only; bn_mean (BatchNorm1d on mu) skipped.

    # reparametrize (tiny -> plain jnp, fuses in XLA) ------------------------
    z = eps * jnp.exp(0.5 * logvar) + mu

    # decode -----------------------------------------------------------------
    h = gemm_bias_act(z.astype(jnp.bfloat16), p["d1_w"], p["d1_b"],
                      act="relu", out_dtype=jnp.bfloat16)
    h = h.reshape(B, -1, 2, 2)                       # torch NCHW view
    h = jnp.transpose(h, (1, 0, 2, 3))               # -> [C,B,H,W]
    for i in (1, 2, 3, 4):
        h = convT_bn_lrelu(h, p[f"d_w{i}"], p[f"d_g{i}"], p[f"d_b{i}"])
    h = convT_sigmoid(h, p["d_w5"])                  # [nc, B, H, W] f32
    res = jnp.transpose(h, (1, 0, 2, 3))             # -> NCHW
    return res, z, mu, logvar


# ----------------------------------------------------------------------------
# Deterministic parameter construction (GEMM-ready, bf16 weights)
# ----------------------------------------------------------------------------
def _conv_w_t(w_oihw):
    # Conv2d weight [O, I, 4, 4] -> W^T [O, (kh, kw, I)] bf16
    O = w_oihw.shape[0]
    return jnp.transpose(w_oihw, (0, 2, 3, 1)).reshape(O, -1).astype(jnp.bfloat16)


def _convT_w_t(w_iohw):
    # ConvTranspose2d weight [I, O, 4, 4] -> equivalent fwd-conv weight
    # (swap in/out channels, flip spatially) -> W^T [O, (kh, kw, I)] bf16
    weq = jnp.flip(jnp.transpose(w_iohw, (1, 0, 2, 3)), axis=(2, 3))
    return _conv_w_t(weq)


def init_params(key, nc=1, ndf=8, ngf=8, latent=32):
    ks = iter(jax.random.split(key, 64))
    nrm = lambda shape, s=0.05: s * jax.random.normal(next(ks), shape, jnp.float32)

    p = {}
    # encoder conv weights [O, I, 4, 4] -> GEMM-ready bf16 (transposed)
    enc_ch = [nc, ndf, ndf * 2, ndf * 4, ndf * 8, ndf * 8]
    for i in range(1, 6):
        w = nrm((enc_ch[i], enc_ch[i - 1], 4, 4))
        p[f"e_w{i}"] = _conv_w_t(w)
        if i >= 2:
            p[f"e_g{i}"] = jnp.ones((enc_ch[i], 1), jnp.float32)
            p[f"e_b{i}"] = jnp.zeros((enc_ch[i], 1), jnp.float32)
    # fc1 / fc2 fused into one [in, 2*latent] GEMM (mu | logvar)
    fin = ndf * 8 * 2 * 2
    fc1_w, fc1_b = nrm((fin, latent)), nrm((latent,))
    fc2_w, fc2_b = nrm((fin, latent)), nrm((latent,))
    p["fc_w"] = jnp.concatenate([fc1_w, fc2_w], axis=1).astype(jnp.bfloat16)
    p["fc_b"] = jnp.concatenate([fc1_b, fc2_b], axis=0)
    # d1
    p["d1_w"] = nrm((latent, ngf * 8 * 2 * 2)).astype(jnp.bfloat16)
    p["d1_b"] = nrm((ngf * 8 * 2 * 2,))
    # decoder conv-transpose weights [I, O, 4, 4] -> GEMM-ready bf16 (transposed)
    dec_ch = [ngf * 8, ngf * 8, ngf * 4, ngf * 2, ngf, nc]
    for i in range(1, 6):
        w = nrm((dec_ch[i - 1], dec_ch[i], 4, 4))
        p[f"d_w{i}"] = _convT_w_t(w)
        if i <= 4:
            p[f"d_g{i}"] = jnp.ones((dec_ch[i], 1), jnp.float32)
            p[f"d_b{i}"] = jnp.zeros((dec_ch[i], 1), jnp.float32)
    return p


if __name__ == "__main__":
    key = jax.random.PRNGKey(0)
    k_param, k_x, k_eps = jax.random.split(key, 3)

    B, nc, imsize = 2, 1, 64          # imsize must be 64 (fc expects 2x2 spatial)
    ndf = ngf = 8
    latent = 32

    params = init_params(k_param, nc=nc, ndf=ndf, ngf=ngf, latent=latent)
    x = jax.random.normal(k_x, (B, nc, imsize, imsize), jnp.float32)
    eps = jax.random.normal(k_eps, (B, latent), jnp.float32)

    res, z, mu, logvar = vae_forward(params, x, eps)
    jax.block_until_ready((res, z, mu, logvar))

    assert res.shape == (B, nc, imsize, imsize)
    assert z.shape == (B, latent) and mu.shape == (B, latent)
    assert logvar.shape == (B, latent)
    assert bool(jnp.all(jnp.isfinite(res)))
    print("KERNEL_OK")
</pallas_src>

<mosaic_0001>
module attributes {stable_mosaic.version = 11 : i64} {
  func.func @_gemm_t_act_kernel(%arg0: i32, %arg1: memref<8x16xbf16, #tpu.memory_space<vmem>>, %arg2: memref<16x1024xbf16, #tpu.memory_space<vmem>>, %arg3: memref<8x1024xbf16, #tpu.memory_space<vmem>>) attributes {dimension_semantics = [#tpu.dimension_semantics<parallel>], iteration_bounds = array<i64: 2>, scalar_prefetch = 0 : i64, scratch_operands = 0 : i64, tpu.core_type = #tpu.core_type<tc>, window_params = [{pipeline_mode = #tpu.pipeline_mode<synchronous>, transform_indices = @transform_0, window_bounds = array<i64: 8, 16>}, {transform_indices = @transform_1, window_bounds = array<i64: 16, 1024>}, {transform_indices = @transform_2, window_bounds = array<i64: 8, 1024>}]} {
    %c0 = arith.constant 0 : index
    %c0_0 = arith.constant 0 : index
    %0 = vector.load %arg1[%c0, %c0_0] : memref<8x16xbf16, #tpu.memory_space<vmem>>, vector<8x16xbf16>
    %c0_1 = arith.constant 0 : index
    %c0_2 = arith.constant 0 : index
    %1 = vector.load %arg2[%c0_1, %c0_2] : memref<16x1024xbf16, #tpu.memory_space<vmem>>, vector<16x1024xbf16>
    %cst = arith.constant dense<0.000000e+00> : vector<8x1024xf32>
    %2 = tpu.matmul %0, %1, %cst {dimension_numbers = #tpu.dot_dimension_numbers<[1], [0], [0], [1], [0, 0, 1, 1], [], []>} : vector<8x16xbf16>, vector<16x1024xbf16>, vector<8x1024xf32> -> vector<8x1024xf32>
    %cst_3 = arith.constant 0.000000e+00 : f32
    %3 = vector.broadcast %cst_3 : f32 to vector<8x1024xf32>
    %4 = arith.cmpf ogt, %2, %3 : vector<8x1024xf32>
    %cst_4 = arith.constant 2.000000e-01 : f32
    %5 = vector.broadcast %cst_4 : f32 to vector<8x1024xf32>
    %6 = arith.mulf %5, %2 : vector<8x1024xf32>
    %7 = arith.select %4, %2, %6 : vector<8x1024xi1>, vector<8x1024xf32>
    %8 = arith.truncf %7 : vector<8x1024xf32> to vector<8x1024xbf16>
    %c0_5 = arith.constant 0 : index
    %c0_6 = arith.constant 0 : index
    %9 = vector.load %arg3[%c0_5, %c0_6] : memref<8x1024xbf16, #tpu.memory_space<vmem>>, vector<8x1024xbf16>
    tpu.vector_store %arg3[%c0_5, %c0_6], %8 {strides = array<i32>} : memref<8x1024xbf16, #tpu.memory_space<vmem>>, vector<8x1024xbf16>,
    return
  }
  func.func @transform_0(%arg0: i32) -> (i32, i32) {
    %c0_i32 = arith.constant 0 : i32
    %c0_i32_0 = arith.constant 0 : i32
    %c0_i32_1 = arith.constant 0 : i32
    return %c0_i32, %c0_i32_0 : i32, i32
  }
  func.func @transform_1(%arg0: i32) -> (i32, i32) {
    %c0_i32 = arith.constant 0 : i32
    %c0_i32_0 = arith.constant 0 : i32
    return %c0_i32, %arg0 : i32, i32
  }
  func.func @transform_2(%arg0: i32) -> (i32, i32) {
    %c0_i32 = arith.constant 0 : i32
    %c0_i32_0 = arith.constant 0 : i32
    return %c0_i32, %arg0 : i32, i32
  }
}

module attributes {stable_mosaic.version = 11 : i64} {
  func.func @_gemm_t_bn_lrelu_kernel(%arg0: memref<16x128xbf16, #tpu.memory_space<vmem>>, %arg1: memref<128x512xbf16, #tpu.memory_space<vmem>>, %arg2: memref<16x1xf32, #tpu.memory_space<vmem>>, %arg3: memref<16x1xf32, #tpu.memory_space<vmem>>, %arg4: memref<16x512xbf16, #tpu.memory_space<vmem>>) attributes {dimension_semantics = [], scalar_prefetch = 0 : i64, scratch_operands = 0 : i64, tpu.core_type = #tpu.core_type<tc>} {
    %c0 = arith.constant 0 : index
    %c0_0 = arith.constant 0 : index
    %0 = vector.load %arg0[%c0, %c0_0] : memref<16x128xbf16, #tpu.memory_space<vmem>>, vector<16x128xbf16>
    %c0_1 = arith.constant 0 : index
    %c0_2 = arith.constant 0 : index
    %1 = vector.load %arg1[%c0_1, %c0_2] : memref<128x512xbf16, #tpu.memory_space<vmem>>, vector<128x512xbf16>
    %cst = arith.constant dense<0.000000e+00> : vector<16x512xf32>
    %2 = tpu.matmul %0, %1, %cst {dimension_numbers = #tpu.dot_dimension_numbers<[1], [0], [0], [1], [0, 0, 1, 1], [], []>} : vector<16x128xbf16>, vector<128x512xbf16>, vector<16x512xf32> -> vector<16x512xf32>
    %cst_3 = arith.constant dense<0.000000e+00> : vector<16xf32>
    %3 = vector.multi_reduction <add>, %2, %cst_3 [1] : vector<16x512xf32> to vector<16xf32>
    %4 = vector.shape_cast %3 : vector<16xf32> to vector<16x1xf32>
    %cst_4 = arith.constant 5.120000e+02 : f32
    %5 = vector.broadcast %cst_4 : f32 to vector<16x1xf32>
    %6 = arith.divf %4, %5 : vector<16x1xf32>
    %7 = vector.broadcast %6 : vector<16x1xf32> to vector<16x512xf32>
    %8 = arith.subf %2, %7 : vector<16x512xf32>
    %9 = arith.mulf %8, %8 : vector<16x512xf32>
    %cst_5 = arith.constant dense<0.000000e+00> : vector<16xf32>
    %10 = vector.multi_reduction <add>, %9, %cst_5 [1] : vector<16x512xf32> to vector<16xf32>
    %11 = vector.shape_cast %10 : vector<16xf32> to vector<16x1xf32>
    %cst_6 = arith.constant 5.120000e+02 : f32
    %12 = vector.broadcast %cst_6 : f32 to vector<16x1xf32>
    %13 = arith.divf %11, %12 : vector<16x1xf32>
    %cst_7 = arith.constant 9.99999974E-6 : f32
    %14 = vector.broadcast %cst_7 : f32 to vector<16x1xf32>
    %15 = arith.addf %13, %14 : vector<16x1xf32>
    %16 = math.rsqrt %15 : vector<16x1xf32>
    %17 = vector.broadcast %16 : vector<16x1xf32> to vector<16x512xf32>
    %18 = arith.mulf %8, %17 : vector<16x512xf32>
    %c0_8 = arith.constant 0 : index
    %c0_9 = arith.constant 0 : index
    %19 = vector.load %arg2[%c0_8, %c0_9] : memref<16x1xf32, #tpu.memory_space<vmem>>, vector<16x1xf32>
    %20 = vector.broadcast %19 : vector<16x1xf32> to vector<16x512xf32>
    %21 = arith.mulf %18, %20 : vector<16x512xf32>
    %c0_10 = arith.constant 0 : index
    %c0_11 = arith.constant 0 : index
    %22 = vector.load %arg3[%c0_10, %c0_11] : memref<16x1xf32, #tpu.memory_space<vmem>>, vector<16x1xf32>
    %23 = vector.broadcast %22 : vector<16x1xf32> to vector<16x512xf32>
    %24 = arith.addf %21, %23 : vector<16x512xf32>
    %cst_12 = arith.constant 0.000000e+00 : f32
    %25 = vector.broadcast %cst_12 : f32 to vector<16x512xf32>
    %26 = arith.cmpf ogt, %24, %25 : vector<16x512xf32>
    %cst_13 = arith.constant 2.000000e-01 : f32
    %27 = vector.broadcast %cst_13 : f32 to vector<16x512xf32>
    %28 = arith.mulf %27, %24 : vector<16x512xf32>
    %29 = arith.select %26, %24, %28 : vector<16x512xi1>, vector<16x512xf32>
    %30 = arith.truncf %29 : vector<16x512xf32> to vector<16x512xbf16>
    %c0_14 = arith.constant 0 : index
    %c0_15 = arith.constant 0 : index
    %31 = vector.load %arg4[%c0_14, %c0_15] : memref<16x512xbf16, #tpu.memory_space<vmem>>, vector<16x512xbf16>
    tpu.vector_store %arg4[%c0_14, %c0_15], %30 {strides = array<i32>} : memref<16x512xbf16, #tpu.memory_space<vmem>>, vector<16x512xbf16>,
    return
  }
}

module attributes {stable_mosaic.version = 11 : i64} {
  func.func @_gemm_t_bn_lrelu_kernel(%arg0: memref<32x256xbf16, #tpu.memory_space<vmem>>, %arg1: memref<256x128xbf16, #tpu.memory_space<vmem>>, %arg2: memref<32x1xf32, #tpu.memory_space<vmem>>, %arg3: memref<32x1xf32, #tpu.memory_space<vmem>>, %arg4: memref<32x128xbf16, #tpu.memory_space<vmem>>) attributes {dimension_semantics = [], scalar_prefetch = 0 : i64, scratch_operands = 0 : i64, tpu.core_type = #tpu.core_type<tc>} {
    %c0 = arith.constant 0 : index
    %c0_0 = arith.constant 0 : index
    %0 = vector.load %arg0[%c0, %c0_0] : memref<32x256xbf16, #tpu.memory_space<vmem>>, vector<32x256xbf16>
    %c0_1 = arith.constant 0 : index
    %c0_2 = arith.constant 0 : index
    %1 = vector.load %arg1[%c0_1, %c0_2] : memref<256x128xbf16, #tpu.memory_space<vmem>>, vector<256x128xbf16>
    %cst = arith.constant dense<0.000000e+00> : vector<32x128xf32>
    %2 = tpu.matmul %0, %1, %cst {dimension_numbers = #tpu.dot_dimension_numbers<[1], [0], [0], [1], [0, 0, 1, 1], [], []>} : vector<32x256xbf16>, vector<256x128xbf16>, vector<32x128xf32> -> vector<32x128xf32>
    %cst_3 = arith.constant dense<0.000000e+00> : vector<32xf32>
    %3 = vector.multi_reduction <add>, %2, %cst_3 [1] : vector<32x128xf32> to vector<32xf32>
    %4 = vector.shape_cast %3 : vector<32xf32> to vector<32x1xf32>
    %cst_4 = arith.constant 1.280000e+02 : f32
    %5 = vector.broadcast %cst_4 : f32 to vector<32x1xf32>
    %6 = arith.divf %4, %5 : vector<32x1xf32>
    %7 = vector.broadcast %6 : vector<32x1xf32> to vector<32x128xf32>
    %8 = arith.subf %2, %7 : vector<32x128xf32>
    %9 = arith.mulf %8, %8 : vector<32x128xf32>
    %cst_5 = arith.constant dense<0.000000e+00> : vector<32xf32>
    %10 = vector.multi_reduction <add>, %9, %cst_5 [1] : vector<32x128xf32> to vector<32xf32>
    %11 = vector.shape_cast %10 : vector<32xf32> to vector<32x1xf32>
    %cst_6 = arith.constant 1.280000e+02 : f32
    %12 = vector.broadcast %cst_6 : f32 to vector<32x1xf32>
    %13 = arith.divf %11, %12 : vector<32x1xf32>
    %cst_7 = arith.constant 9.99999974E-6 : f32
    %14 = vector.broadcast %cst_7 : f32 to vector<32x1xf32>
    %15 = arith.addf %13, %14 : vector<32x1xf32>
    %16 = math.rsqrt %15 : vector<32x1xf32>
    %17 = vector.broadcast %16 : vector<32x1xf32> to vector<32x128xf32>
    %18 = arith.mulf %8, %17 : vector<32x128xf32>
    %c0_8 = arith.constant 0 : index
    %c0_9 = arith.constant 0 : index
    %19 = vector.load %arg2[%c0_8, %c0_9] : memref<32x1xf32, #tpu.memory_space<vmem>>, vector<32x1xf32>
    %20 = vector.broadcast %19 : vector<32x1xf32> to vector<32x128xf32>
    %21 = arith.mulf %18, %20 : vector<32x128xf32>
    %c0_10 = arith.constant 0 : index
    %c0_11 = arith.constant 0 : index
    %22 = vector.load %arg3[%c0_10, %c0_11] : memref<32x1xf32, #tpu.memory_space<vmem>>, vector<32x1xf32>
    %23 = vector.broadcast %22 : vector<32x1xf32> to vector<32x128xf32>
    %24 = arith.addf %21, %23 : vector<32x128xf32>
    %cst_12 = arith.constant 0.000000e+00 : f32
    %25 = vector.broadcast %cst_12 : f32 to vector<32x128xf32>
    %26 = arith.cmpf ogt, %24, %25 : vector<32x128xf32>
    %cst_13 = arith.constant 2.000000e-01 : f32
    %27 = vector.broadcast %cst_13 : f32 to vector<32x128xf32>
    %28 = arith.mulf %27, %24 : vector<32x128xf32>
    %29 = arith.select %26, %24, %28 : vector<32x128xi1>, vector<32x128xf32>
    %30 = arith.truncf %29 : vector<32x128xf32> to vector<32x128xbf16>
    %c0_14 = arith.constant 0 : index
    %c0_15 = arith.constant 0 : index
    %31 = vector.load %arg4[%c0_14, %c0_15] : memref<32x128xbf16, #tpu.memory_space<vmem>>, vector<32x128xbf16>
    tpu.vector_store %arg4[%c0_14, %c0_15], %30 {strides = array<i32>} : memref<32x128xbf16, #tpu.memory_space<vmem>>, vector<32x128xbf16>,
    return
  }
}

module attributes {stable_mosaic.version = 11 : i64} {
  func.func @_gemm_t_bn_lrelu_kernel(%arg0: memref<64x512xbf16, #tpu.memory_space<vmem>>, %arg1: memref<512x32xbf16, #tpu.memory_space<vmem>>, %arg2: memref<64x1xf32, #tpu.memory_space<vmem>>, %arg3: memref<64x1xf32, #tpu.memory_space<vmem>>, %arg4: memref<64x32xbf16, #tpu.memory_space<vmem>>) attributes {dimension_semantics = [], scalar_prefetch = 0 : i64, scratch_operands = 0 : i64, tpu.core_type = #tpu.core_type<tc>} {
    %c0 = arith.constant 0 : index
    %c0_0 = arith.constant 0 : index
    %0 = vector.load %arg0[%c0, %c0_0] : memref<64x512xbf16, #tpu.memory_space<vmem>>, vector<64x512xbf16>
    %c0_1 = arith.constant 0 : index
    %c0_2 = arith.constant 0 : index
    %1 = vector.load %arg1[%c0_1, %c0_2] : memref<512x32xbf16, #tpu.memory_space<vmem>>, vector<512x32xbf16>
    %cst = arith.constant dense<0.000000e+00> : vector<64x32xf32>
    %2 = tpu.matmul %0, %1, %cst {dimension_numbers = #tpu.dot_dimension_numbers<[1], [0], [0], [1], [0, 0, 1, 1], [], []>} : vector<64x512xbf16>, vector<512x32xbf16>, vector<64x32xf32> -> vector<64x32xf32>
    %cst_3 = arith.constant dense<0.000000e+00> : vector<64xf32>
    %3 = vector.multi_reduction <add>, %2, %cst_3 [1] : vector<64x32xf32> to vector<64xf32>
    %4 = vector.shape_cast %3 : vector<64xf32> to vector<64x1xf32>
    %cst_4 = arith.constant 3.200000e+01 : f32
    %5 = vector.broadcast %cst_4 : f32 to vector<64x1xf32>
    %6 = arith.divf %4, %5 : vector<64x1xf32>
    %7 = vector.broadcast %6 : vector<64x1xf32> to vector<64x32xf32>
    %8 = arith.subf %2, %7 : vector<64x32xf32>
    %9 = arith.mulf %8, %8 : vector<64x32xf32>
    %cst_5 = arith.constant dense<0.000000e+00> : vector<64xf32>
    %10 = vector.multi_reduction <add>, %9, %cst_5 [1] : vector<64x32xf32> to vector<64xf32>
    %11 = vector.shape_cast %10 : vector<64xf32> to vector<64x1xf32>
    %cst_6 = arith.constant 3.200000e+01 : f32
    %12 = vector.broadcast %cst_6 : f32 to vector<64x1xf32>
    %13 = arith.divf %11, %12 : vector<64x1xf32>
    %cst_7 = arith.constant 9.99999974E-6 : f32
    %14 = vector.broadcast %cst_7 : f32 to vector<64x1xf32>
    %15 = arith.addf %13, %14 : vector<64x1xf32>
    %16 = math.rsqrt %15 : vector<64x1xf32>
    %17 = vector.broadcast %16 : vector<64x1xf32> to vector<64x32xf32>
    %18 = arith.mulf %8, %17 : vector<64x32xf32>
    %c0_8 = arith.constant 0 : index
    %c0_9 = arith.constant 0 : index
    %19 = vector.load %arg2[%c0_8, %c0_9] : memref<64x1xf32, #tpu.memory_space<vmem>>, vector<64x1xf32>
    %20 = vector.broadcast %19 : vector<64x1xf32> to vector<64x32xf32>
    %21 = arith.mulf %18, %20 : vector<64x32xf32>
    %c0_10 = arith.constant 0 : index
    %c0_11 = arith.constant 0 : index
    %22 = vector.load %arg3[%c0_10, %c0_11] : memref<64x1xf32, #tpu.memory_space<vmem>>, vector<64x1xf32>
    %23 = vector.broadcast %22 : vector<64x1xf32> to vector<64x32xf32>
    %24 = arith.addf %21, %23 : vector<64x32xf32>
    %cst_12 = arith.constant 0.000000e+00 : f32
    %25 = vector.broadcast %cst_12 : f32 to vector<64x32xf32>
    %26 = arith.cmpf ogt, %24, %25 : vector<64x32xf32>
    %cst_13 = arith.constant 2.000000e-01 : f32
    %27 = vector.broadcast %cst_13 : f32 to vector<64x32xf32>
    %28 = arith.mulf %27, %24 : vector<64x32xf32>
    %29 = arith.select %26, %24, %28 : vector<64x32xi1>, vector<64x32xf32>
    %30 = arith.truncf %29 : vector<64x32xf32> to vector<64x32xbf16>
    %c0_14 = arith.constant 0 : index
    %c0_15 = arith.constant 0 : index
    %31 = vector.load %arg4[%c0_14, %c0_15] : memref<64x32xbf16, #tpu.memory_space<vmem>>, vector<64x32xbf16>
    tpu.vector_store %arg4[%c0_14, %c0_15], %30 {strides = array<i32>} : memref<64x32xbf16, #tpu.memory_space<vmem>>, vector<64x32xbf16>,
    return
  }
}

module attributes {stable_mosaic.version = 11 : i64} {
  func.func @_gemm_t_bn_lrelu_kernel(%arg0: memref<64x1024xbf16, #tpu.memory_space<vmem>>, %arg1: memref<1024x8xbf16, #tpu.memory_space<vmem>>, %arg2: memref<64x1xf32, #tpu.memory_space<vmem>>, %arg3: memref<64x1xf32, #tpu.memory_space<vmem>>, %arg4: memref<64x8xbf16, #tpu.memory_space<vmem>>) attributes {dimension_semantics = [], scalar_prefetch = 0 : i64, scratch_operands = 0 : i64, tpu.core_type = #tpu.core_type<tc>} {
    %c0 = arith.constant 0 : index
    %c0_0 = arith.constant 0 : index
    %0 = vector.load %arg0[%c0, %c0_0] : memref<64x1024xbf16, #tpu.memory_space<vmem>>, vector<64x1024xbf16>
    %c0_1 = arith.constant 0 : index
    %c0_2 = arith.constant 0 : index
    %1 = vector.load %arg1[%c0_1, %c0_2] : memref<1024x8xbf16, #tpu.memory_space<vmem>>, vector<1024x8xbf16>
    %cst = arith.constant dense<0.000000e+00> : vector<64x8xf32>
    %2 = tpu.matmul %0, %1, %cst {dimension_numbers = #tpu.dot_dimension_numbers<[1], [0], [0], [1], [0, 0, 1, 1], [], []>} : vector<64x1024xbf16>, vector<1024x8xbf16>, vector<64x8xf32> -> vector<64x8xf32>
    %cst_3 = arith.constant dense<0.000000e+00> : vector<64xf32>
    %3 = vector.multi_reduction <add>, %2, %cst_3 [1] : vector<64x8xf32> to vector<64xf32>
    %4 = vector.shape_cast %3 : vector<64xf32> to vector<64x1xf32>
    %cst_4 = arith.constant 8.000000e+00 : f32
    %5 = vector.broadcast %cst_4 : f32 to vector<64x1xf32>
    %6 = arith.divf %4, %5 : vector<64x1xf32>
    %7 = vector.broadcast %6 : vector<64x1xf32> to vector<64x8xf32>
    %8 = arith.subf %2, %7 : vector<64x8xf32>
    %9 = arith.mulf %8, %8 : vector<64x8xf32>
    %cst_5 = arith.constant dense<0.000000e+00> : vector<64xf32>
    %10 = vector.multi_reduction <add>, %9, %cst_5 [1] : vector<64x8xf32> to vector<64xf32>
    %11 = vector.shape_cast %10 : vector<64xf32> to vector<64x1xf32>
    %cst_6 = arith.constant 8.000000e+00 : f32
    %12 = vector.broadcast %cst_6 : f32 to vector<64x1xf32>
    %13 = arith.divf %11, %12 : vector<64x1xf32>
    %cst_7 = arith.constant 9.99999974E-6 : f32
    %14 = vector.broadcast %cst_7 : f32 to vector<64x1xf32>
    %15 = arith.addf %13, %14 : vector<64x1xf32>
    %16 = math.rsqrt %15 : vector<64x1xf32>
    %17 = vector.broadcast %16 : vector<64x1xf32> to vector<64x8xf32>
    %18 = arith.mulf %8, %17 : vector<64x8xf32>
    %c0_8 = arith.constant 0 : index
    %c0_9 = arith.constant 0 : index
    %19 = vector.load %arg2[%c0_8, %c0_9] : memref<64x1xf32, #tpu.memory_space<vmem>>, vector<64x1xf32>
    %20 = vector.broadcast %19 : vector<64x1xf32> to vector<64x8xf32>
    %21 = arith.mulf %18, %20 : vector<64x8xf32>
    %c0_10 = arith.constant 0 : index
    %c0_11 = arith.constant 0 : index
    %22 = vector.load %arg3[%c0_10, %c0_11] : memref<64x1xf32, #tpu.memory_space<vmem>>, vector<64x1xf32>
    %23 = vector.broadcast %22 : vector<64x1xf32> to vector<64x8xf32>
    %24 = arith.addf %21, %23 : vector<64x8xf32>
    %cst_12 = arith.constant 0.000000e+00 : f32
    %25 = vector.broadcast %cst_12 : f32 to vector<64x8xf32>
    %26 = arith.cmpf ogt, %24, %25 : vector<64x8xf32>
    %cst_13 = arith.constant 2.000000e-01 : f32
    %27 = vector.broadcast %cst_13 : f32 to vector<64x8xf32>
    %28 = arith.mulf %27, %24 : vector<64x8xf32>
    %29 = arith.select %26, %24, %28 : vector<64x8xi1>, vector<64x8xf32>
    %30 = arith.truncf %29 : vector<64x8xf32> to vector<64x8xbf16>
    %c0_14 = arith.constant 0 : index
    %c0_15 = arith.constant 0 : index
    %31 = vector.load %arg4[%c0_14, %c0_15] : memref<64x8xbf16, #tpu.memory_space<vmem>>, vector<64x8xbf16>
    tpu.vector_store %arg4[%c0_14, %c0_15], %30 {strides = array<i32>} : memref<64x8xbf16, #tpu.memory_space<vmem>>, vector<64x8xbf16>,
    return
  }
}

module attributes {stable_mosaic.version = 11 : i64} {
  func.func @_gemm_bias_act_kernel(%arg0: memref<2x256xbf16, #tpu.memory_space<vmem>>, %arg1: memref<256x64xbf16, #tpu.memory_space<vmem>>, %arg2: memref<1x64xf32, #tpu.memory_space<vmem>>, %arg3: memref<2x64xf32, #tpu.memory_space<vmem>>) attributes {dimension_semantics = [], scalar_prefetch = 0 : i64, scratch_operands = 0 : i64, tpu.core_type = #tpu.core_type<tc>} {
    %c0 = arith.constant 0 : index
    %c0_0 = arith.constant 0 : index
    %0 = vector.load %arg0[%c0, %c0_0] : memref<2x256xbf16, #tpu.memory_space<vmem>>, vector<2x256xbf16>
    %c0_1 = arith.constant 0 : index
    %c0_2 = arith.constant 0 : index
    %1 = vector.load %arg1[%c0_1, %c0_2] : memref<256x64xbf16, #tpu.memory_space<vmem>>, vector<256x64xbf16>
    %cst = arith.constant dense<0.000000e+00> : vector<2x64xf32>
    %2 = tpu.matmul %0, %1, %cst {dimension_numbers = #tpu.dot_dimension_numbers<[1], [0], [0], [1], [0, 0, 1, 1], [], []>} : vector<2x256xbf16>, vector<256x64xbf16>, vector<2x64xf32> -> vector<2x64xf32>
    %c0_3 = arith.constant 0 : index
    %c0_4 = arith.constant 0 : index
    %3 = vector.load %arg2[%c0_3, %c0_4] : memref<1x64xf32, #tpu.memory_space<vmem>>, vector<1x64xf32>
    %4 = vector.broadcast %3 : vector<1x64xf32> to vector<2x64xf32>
    %5 = arith.addf %2, %4 : vector<2x64xf32>
    %c0_5 = arith.constant 0 : index
    %c0_6 = arith.constant 0 : index
    %6 = vector.load %arg3[%c0_5, %c0_6] : memref<2x64xf32, #tpu.memory_space<vmem>>, vector<2x64xf32>
    tpu.vector_store %arg3[%c0_5, %c0_6], %5 {strides = array<i32>} : memref<2x64xf32, #tpu.memory_space<vmem>>, vector<2x64xf32>,
    return
  }
}

module attributes {stable_mosaic.version = 11 : i64} {
  func.func @_gemm_bias_act_kernel(%arg0: memref<2x32xbf16, #tpu.memory_space<vmem>>, %arg1: memref<32x256xbf16, #tpu.memory_space<vmem>>, %arg2: memref<1x256xf32, #tpu.memory_space<vmem>>, %arg3: memref<2x256xbf16, #tpu.memory_space<vmem>>) attributes {dimension_semantics = [], scalar_prefetch = 0 : i64, scratch_operands = 0 : i64, tpu.core_type = #tpu.core_type<tc>} {
    %c0 = arith.constant 0 : index
    %c0_0 = arith.constant 0 : index
    %0 = vector.load %arg0[%c0, %c0_0] : memref<2x32xbf16, #tpu.memory_space<vmem>>, vector<2x32xbf16>
    %c0_1 = arith.constant 0 : index
    %c0_2 = arith.constant 0 : index
    %1 = vector.load %arg1[%c0_1, %c0_2] : memref<32x256xbf16, #tpu.memory_space<vmem>>, vector<32x256xbf16>
    %cst = arith.constant dense<0.000000e+00> : vector<2x256xf32>
    %2 = tpu.matmul %0, %1, %cst {dimension_numbers = #tpu.dot_dimension_numbers<[1], [0], [0], [1], [0, 0, 1, 1], [], []>} : vector<2x32xbf16>, vector<32x256xbf16>, vector<2x256xf32> -> vector<2x256xf32>
    %c0_3 = arith.constant 0 : index
    %c0_4 = arith.constant 0 : index
    %3 = vector.load %arg2[%c0_3, %c0_4] : memref<1x256xf32, #tpu.memory_space<vmem>>, vector<1x256xf32>
    %4 = vector.broadcast %3 : vector<1x256xf32> to vector<2x256xf32>
    %5 = arith.addf %2, %4 : vector<2x256xf32>
    %cst_5 = arith.constant 0.000000e+00 : f32
    %6 = vector.broadcast %cst_5 : f32 to vector<2x256xf32>
    %7 = arith.maximumf %5, %6 : vector<2x256xf32>
    %8 = arith.truncf %7 : vector<2x256xf32> to vector<2x256xbf16>
    %c0_6 = arith.constant 0 : index
    %c0_7 = arith.constant 0 : index
    %9 = vector.load %arg3[%c0_6, %c0_7] : memref<2x256xbf16, #tpu.memory_space<vmem>>, vector<2x256xbf16>
    tpu.vector_store %arg3[%c0_6, %c0_7], %8 {strides = array<i32>} : memref<2x256xbf16, #tpu.memory_space<vmem>>, vector<2x256xbf16>,
    return
  }
}

module attributes {stable_mosaic.version = 11 : i64} {
  func.func @_gemm_t_bn_lrelu_kernel(%arg0: memref<64x1024xbf16, #tpu.memory_space<vmem>>, %arg1: memref<1024x32xbf16, #tpu.memory_space<vmem>>, %arg2: memref<64x1xf32, #tpu.memory_space<vmem>>, %arg3: memref<64x1xf32, #tpu.memory_space<vmem>>, %arg4: memref<64x32xbf16, #tpu.memory_space<vmem>>) attributes {dimension_semantics = [], scalar_prefetch = 0 : i64, scratch_operands = 0 : i64, tpu.core_type = #tpu.core_type<tc>} {
    %c0 = arith.constant 0 : index
    %c0_0 = arith.constant 0 : index
    %0 = vector.load %arg0[%c0, %c0_0] : memref<64x1024xbf16, #tpu.memory_space<vmem>>, vector<64x1024xbf16>
    %c0_1 = arith.constant 0 : index
    %c0_2 = arith.constant 0 : index
    %1 = vector.load %arg1[%c0_1, %c0_2] : memref<1024x32xbf16, #tpu.memory_space<vmem>>, vector<1024x32xbf16>
    %cst = arith.constant dense<0.000000e+00> : vector<64x32xf32>
    %2 = tpu.matmul %0, %1, %cst {dimension_numbers = #tpu.dot_dimension_numbers<[1], [0], [0], [1], [0, 0, 1, 1], [], []>} : vector<64x1024xbf16>, vector<1024x32xbf16>, vector<64x32xf32> -> vector<64x32xf32>
    %cst_3 = arith.constant dense<0.000000e+00> : vector<64xf32>
    %3 = vector.multi_reduction <add>, %2, %cst_3 [1] : vector<64x32xf32> to vector<64xf32>
    %4 = vector.shape_cast %3 : vector<64xf32> to vector<64x1xf32>
    %cst_4 = arith.constant 3.200000e+01 : f32
    %5 = vector.broadcast %cst_4 : f32 to vector<64x1xf32>
    %6 = arith.divf %4, %5 : vector<64x1xf32>
    %7 = vector.broadcast %6 : vector<64x1xf32> to vector<64x32xf32>
    %8 = arith.subf %2, %7 : vector<64x32xf32>
    %9 = arith.mulf %8, %8 : vector<64x32xf32>
    %cst_5 = arith.constant dense<0.000000e+00> : vector<64xf32>
    %10 = vector.multi_reduction <add>, %9, %cst_5 [1] : vector<64x32xf32> to vector<64xf32>
    %11 = vector.shape_cast %10 : vector<64xf32> to vector<64x1xf32>
    %cst_6 = arith.constant 3.200000e+01 : f32
    %12 = vector.broadcast %cst_6 : f32 to vector<64x1xf32>
    %13 = arith.divf %11, %12 : vector<64x1xf32>
    %cst_7 = arith.constant 9.99999974E-6 : f32
    %14 = vector.broadcast %cst_7 : f32 to vector<64x1xf32>
    %15 = arith.addf %13, %14 : vector<64x1xf32>
    %16 = math.rsqrt %15 : vector<64x1xf32>
    %17 = vector.broadcast %16 : vector<64x1xf32> to vector<64x32xf32>
    %18 = arith.mulf %8, %17 : vector<64x32xf32>
    %c0_8 = arith.constant 0 : index
    %c0_9 = arith.constant 0 : index
    %19 = vector.load %arg2[%c0_8, %c0_9] : memref<64x1xf32, #tpu.memory_space<vmem>>, vector<64x1xf32>
    %20 = vector.broadcast %19 : vector<64x1xf32> to vector<64x32xf32>
    %21 = arith.mulf %18, %20 : vector<64x32xf32>
    %c0_10 = arith.constant 0 : index
    %c0_11 = arith.constant 0 : index
    %22 = vector.load %arg3[%c0_10, %c0_11] : memref<64x1xf32, #tpu.memory_space<vmem>>, vector<64x1xf32>
    %23 = vector.broadcast %22 : vector<64x1xf32> to vector<64x32xf32>
    %24 = arith.addf %21, %23 : vector<64x32xf32>
    %cst_12 = arith.constant 0.000000e+00 : f32
    %25 = vector.broadcast %cst_12 : f32 to vector<64x32xf32>
    %26 = arith.cmpf ogt, %24, %25 : vector<64x32xf32>
    %cst_13 = arith.constant 2.000000e-01 : f32
    %27 = vector.broadcast %cst_13 : f32 to vector<64x32xf32>
    %28 = arith.mulf %27, %24 : vector<64x32xf32>
    %29 = arith.select %26, %24, %28 : vector<64x32xi1>, vector<64x32xf32>
    %30 = arith.truncf %29 : vector<64x32xf32> to vector<64x32xbf16>
    %c0_14 = arith.constant 0 : index
    %c0_15 = arith.constant 0 : index
    %31 = vector.load %arg4[%c0_14, %c0_15] : memref<64x32xbf16, #tpu.memory_space<vmem>>, vector<64x32xbf16>
    tpu.vector_store %arg4[%c0_14, %c0_15], %30 {strides = array<i32>} : memref<64x32xbf16, #tpu.memory_space<vmem>>, vector<64x32xbf16>,
    return
  }
}

module attributes {stable_mosaic.version = 11 : i64} {
  func.func @_gemm_t_bn_lrelu_kernel(%arg0: memref<32x1024xbf16, #tpu.memory_space<vmem>>, %arg1: memref<1024x128xbf16, #tpu.memory_space<vmem>>, %arg2: memref<32x1xf32, #tpu.memory_space<vmem>>, %arg3: memref<32x1xf32, #tpu.memory_space<vmem>>, %arg4: memref<32x128xbf16, #tpu.memory_space<vmem>>) attributes {dimension_semantics = [], scalar_prefetch = 0 : i64, scratch_operands = 0 : i64, tpu.core_type = #tpu.core_type<tc>} {
    %c0 = arith.constant 0 : index
    %c0_0 = arith.constant 0 : index
    %0 = vector.load %arg0[%c0, %c0_0] : memref<32x1024xbf16, #tpu.memory_space<vmem>>, vector<32x1024xbf16>
    %c0_1 = arith.constant 0 : index
    %c0_2 = arith.constant 0 : index
    %1 = vector.load %arg1[%c0_1, %c0_2] : memref<1024x128xbf16, #tpu.memory_space<vmem>>, vector<1024x128xbf16>
    %cst = arith.constant dense<0.000000e+00> : vector<32x128xf32>
    %2 = tpu.matmul %0, %1, %cst {dimension_numbers = #tpu.dot_dimension_numbers<[1], [0], [0], [1], [0, 0, 1, 1], [], []>} : vector<32x1024xbf16>, vector<1024x128xbf16>, vector<32x128xf32> -> vector<32x128xf32>
    %cst_3 = arith.constant dense<0.000000e+00> : vector<32xf32>
    %3 = vector.multi_reduction <add>, %2, %cst_3 [1] : vector<32x128xf32> to vector<32xf32>
    %4 = vector.shape_cast %3 : vector<32xf32> to vector<32x1xf32>
    %cst_4 = arith.constant 1.280000e+02 : f32
    %5 = vector.broadcast %cst_4 : f32 to vector<32x1xf32>
    %6 = arith.divf %4, %5 : vector<32x1xf32>
    %7 = vector.broadcast %6 : vector<32x1xf32> to vector<32x128xf32>
    %8 = arith.subf %2, %7 : vector<32x128xf32>
    %9 = arith.mulf %8, %8 : vector<32x128xf32>
    %cst_5 = arith.constant dense<0.000000e+00> : vector<32xf32>
    %10 = vector.multi_reduction <add>, %9, %cst_5 [1] : vector<32x128xf32> to vector<32xf32>
    %11 = vector.shape_cast %10 : vector<32xf32> to vector<32x1xf32>
    %cst_6 = arith.constant 1.280000e+02 : f32
    %12 = vector.broadcast %cst_6 : f32 to vector<32x1xf32>
    %13 = arith.divf %11, %12 : vector<32x1xf32>
    %cst_7 = arith.constant 9.99999974E-6 : f32
    %14 = vector.broadcast %cst_7 : f32 to vector<32x1xf32>
    %15 = arith.addf %13, %14 : vector<32x1xf32>
    %16 = math.rsqrt %15 : vector<32x1xf32>
    %17 = vector.broadcast %16 : vector<32x1xf32> to vector<32x128xf32>
    %18 = arith.mulf %8, %17 : vector<32x128xf32>
    %c0_8 = arith.constant 0 : index
    %c0_9 = arith.constant 0 : index
    %19 = vector.load %arg2[%c0_8, %c0_9] : memref<32x1xf32, #tpu.memory_space<vmem>>, vector<32x1xf32>
    %20 = vector.broadcast %19 : vector<32x1xf32> to vector<32x128xf32>
    %21 = arith.mulf %18, %20 : vector<32x128xf32>
    %c0_10 = arith.constant 0 : index
    %c0_11 = arith.constant 0 : index
    %22 = vector.load %arg3[%c0_10, %c0_11] : memref<32x1xf32, #tpu.memory_space<vmem>>, vector<32x1xf32>
    %23 = vector.broadcast %22 : vector<32x1xf32> to vector<32x128xf32>
    %24 = arith.addf %21, %23 : vector<32x128xf32>
    %cst_12 = arith.constant 0.000000e+00 : f32
    %25 = vector.broadcast %cst_12 : f32 to vector<32x128xf32>
    %26 = arith.cmpf ogt, %24, %25 : vector<32x128xf32>
    %cst_13 = arith.constant 2.000000e-01 : f32
    %27 = vector.broadcast %cst_13 : f32 to vector<32x128xf32>
    %28 = arith.mulf %27, %24 : vector<32x128xf32>
    %29 = arith.select %26, %24, %28 : vector<32x128xi1>, vector<32x128xf32>
    %30 = arith.truncf %29 : vector<32x128xf32> to vector<32x128xbf16>
    %c0_14 = arith.constant 0 : index
    %c0_15 = arith.constant 0 : index
    %31 = vector.load %arg4[%c0_14, %c0_15] : memref<32x128xbf16, #tpu.memory_space<vmem>>, vector<32x128xbf16>
    tpu.vector_store %arg4[%c0_14, %c0_15], %30 {strides = array<i32>} : memref<32x128xbf16, #tpu.memory_space<vmem>>, vector<32x128xbf16>,
    return
  }
}

module attributes {stable_mosaic.version = 11 : i64} {
  func.func @_gemm_t_bn_lrelu_kernel(%arg0: memref<16x512xbf16, #tpu.memory_space<vmem>>, %arg1: memref<512x512xbf16, #tpu.memory_space<vmem>>, %arg2: memref<16x1xf32, #tpu.memory_space<vmem>>, %arg3: memref<16x1xf32, #tpu.memory_space<vmem>>, %arg4: memref<16x512xbf16, #tpu.memory_space<vmem>>) attributes {dimension_semantics = [], scalar_prefetch = 0 : i64, scratch_operands = 0 : i64, tpu.core_type = #tpu.core_type<tc>} {
    %c0 = arith.constant 0 : index
    %c0_0 = arith.constant 0 : index
    %0 = vector.load %arg0[%c0, %c0_0] : memref<16x512xbf16, #tpu.memory_space<vmem>>, vector<16x512xbf16>
    %c0_1 = arith.constant 0 : index
    %c0_2 = arith.constant 0 : index
    %1 = vector.load %arg1[%c0_1, %c0_2] : memref<512x512xbf16, #tpu.memory_space<vmem>>, vector<512x512xbf16>
    %cst = arith.constant dense<0.000000e+00> : vector<16x512xf32>
    %2 = tpu.matmul %0, %1, %cst {dimension_numbers = #tpu.dot_dimension_numbers<[1], [0], [0], [1], [0, 0, 1, 1], [], []>} : vector<16x512xbf16>, vector<512x512xbf16>, vector<16x512xf32> -> vector<16x512xf32>
    %cst_3 = arith.constant dense<0.000000e+00> : vector<16xf32>
    %3 = vector.multi_reduction <add>, %2, %cst_3 [1] : vector<16x512xf32> to vector<16xf32>
    %4 = vector.shape_cast %3 : vector<16xf32> to vector<16x1xf32>
    %cst_4 = arith.constant 5.120000e+02 : f32
    %5 = vector.broadcast %cst_4 : f32 to vector<16x1xf32>
    %6 = arith.divf %4, %5 : vector<16x1xf32>
    %7 = vector.broadcast %6 : vector<16x1xf32> to vector<16x512xf32>
    %8 = arith.subf %2, %7 : vector<16x512xf32>
    %9 = arith.mulf %8, %8 : vector<16x512xf32>
    %cst_5 = arith.constant dense<0.000000e+00> : vector<16xf32>
    %10 = vector.multi_reduction <add>, %9, %cst_5 [1] : vector<16x512xf32> to vector<16xf32>
    %11 = vector.shape_cast %10 : vector<16xf32> to vector<16x1xf32>
    %cst_6 = arith.constant 5.120000e+02 : f32
    %12 = vector.broadcast %cst_6 : f32 to vector<16x1xf32>
    %13 = arith.divf %11, %12 : vector<16x1xf32>
    %cst_7 = arith.constant 9.99999974E-6 : f32
    %14 = vector.broadcast %cst_7 : f32 to vector<16x1xf32>
    %15 = arith.addf %13, %14 : vector<16x1xf32>
    %16 = math.rsqrt %15 : vector<16x1xf32>
    %17 = vector.broadcast %16 : vector<16x1xf32> to vector<16x512xf32>
    %18 = arith.mulf %8, %17 : vector<16x512xf32>
    %c0_8 = arith.constant 0 : index
    %c0_9 = arith.constant 0 : index
    %19 = vector.load %arg2[%c0_8, %c0_9] : memref<16x1xf32, #tpu.memory_space<vmem>>, vector<16x1xf32>
    %20 = vector.broadcast %19 : vector<16x1xf32> to vector<16x512xf32>
    %21 = arith.mulf %18, %20 : vector<16x512xf32>
    %c0_10 = arith.constant 0 : index
    %c0_11 = arith.constant 0 : index
    %22 = vector.load %arg3[%c0_10, %c0_11] : memref<16x1xf32, #tpu.memory_space<vmem>>, vector<16x1xf32>
    %23 = vector.broadcast %22 : vector<16x1xf32> to vector<16x512xf32>
    %24 = arith.addf %21, %23 : vector<16x512xf32>
    %cst_12 = arith.constant 0.000000e+00 : f32
    %25 = vector.broadcast %cst_12 : f32 to vector<16x512xf32>
    %26 = arith.cmpf ogt, %24, %25 : vector<16x512xf32>
    %cst_13 = arith.constant 2.000000e-01 : f32
    %27 = vector.broadcast %cst_13 : f32 to vector<16x512xf32>
    %28 = arith.mulf %27, %24 : vector<16x512xf32>
    %29 = arith.select %26, %24, %28 : vector<16x512xi1>, vector<16x512xf32>
    %30 = arith.truncf %29 : vector<16x512xf32> to vector<16x512xbf16>
    %c0_14 = arith.constant 0 : index
    %c0_15 = arith.constant 0 : index
    %31 = vector.load %arg4[%c0_14, %c0_15] : memref<16x512xbf16, #tpu.memory_space<vmem>>, vector<16x512xbf16>
    tpu.vector_store %arg4[%c0_14, %c0_15], %30 {strides = array<i32>} : memref<16x512xbf16, #tpu.memory_space<vmem>>, vector<16x512xbf16>,
    return
  }
}

module attributes {stable_mosaic.version = 11 : i64} {
  func.func @_gemm_t_bn_lrelu_kernel(%arg0: memref<8x256xbf16, #tpu.memory_space<vmem>>, %arg1: memref<256x2048xbf16, #tpu.memory_space<vmem>>, %arg2: memref<8x1xf32, #tpu.memory_space<vmem>>, %arg3: memref<8x1xf32, #tpu.memory_space<vmem>>, %arg4: memref<8x2048xbf16, #tpu.memory_space<vmem>>) attributes {dimension_semantics = [], scalar_prefetch = 0 : i64, scratch_operands = 0 : i64, tpu.core_type = #tpu.core_type<tc>} {
    %c0 = arith.constant 0 : index
    %c0_0 = arith.constant 0 : index
    %0 = vector.load %arg0[%c0, %c0_0] : memref<8x256xbf16, #tpu.memory_space<vmem>>, vector<8x256xbf16>
    %c0_1 = arith.constant 0 : index
    %c0_2 = arith.constant 0 : index
    %1 = vector.load %arg1[%c0_1, %c0_2] : memref<256x2048xbf16, #tpu.memory_space<vmem>>, vector<256x2048xbf16>
    %cst = arith.constant dense<0.000000e+00> : vector<8x2048xf32>
    %2 = tpu.matmul %0, %1, %cst {dimension_numbers = #tpu.dot_dimension_numbers<[1], [0], [0], [1], [0, 0, 1, 1], [], []>} : vector<8x256xbf16>, vector<256x2048xbf16>, vector<8x2048xf32> -> vector<8x2048xf32>
    %cst_3 = arith.constant dense<0.000000e+00> : vector<8xf32>
    %3 = vector.multi_reduction <add>, %2, %cst_3 [1] : vector<8x2048xf32> to vector<8xf32>
    %4 = vector.shape_cast %3 : vector<8xf32> to vector<8x1xf32>
    %cst_4 = arith.constant 2.048000e+03 : f32
    %5 = vector.broadcast %cst_4 : f32 to vector<8x1xf32>
    %6 = arith.divf %4, %5 : vector<8x1xf32>
    %7 = vector.broadcast %6 : vector<8x1xf32> to vector<8x2048xf32>
    %8 = arith.subf %2, %7 : vector<8x2048xf32>
    %9 = arith.mulf %8, %8 : vector<8x2048xf32>
    %cst_5 = arith.constant dense<0.000000e+00> : vector<8xf32>
    %10 = vector.multi_reduction <add>, %9, %cst_5 [1] : vector<8x2048xf32> to vector<8xf32>
    %11 = vector.shape_cast %10 : vector<8xf32> to vector<8x1xf32>
    %cst_6 = arith.constant 2.048000e+03 : f32
    %12 = vector.broadcast %cst_6 : f32 to vector<8x1xf32>
    %13 = arith.divf %11, %12 : vector<8x1xf32>
    %cst_7 = arith.constant 9.99999974E-6 : f32
    %14 = vector.broadcast %cst_7 : f32 to vector<8x1xf32>
    %15 = arith.addf %13, %14 : vector<8x1xf32>
    %16 = math.rsqrt %15 : vector<8x1xf32>
    %17 = vector.broadcast %16 : vector<8x1xf32> to vector<8x2048xf32>
    %18 = arith.mulf %8, %17 : vector<8x2048xf32>
    %c0_8 = arith.constant 0 : index
    %c0_9 = arith.constant 0 : index
    %19 = vector.load %arg2[%c0_8, %c0_9] : memref<8x1xf32, #tpu.memory_space<vmem>>, vector<8x1xf32>
    %20 = vector.broadcast %19 : vector<8x1xf32> to vector<8x2048xf32>
    %21 = arith.mulf %18, %20 : vector<8x2048xf32>
    %c0_10 = arith.constant 0 : index
    %c0_11 = arith.constant 0 : index
    %22 = vector.load %arg3[%c0_10, %c0_11] : memref<8x1xf32, #tpu.memory_space<vmem>>, vector<8x1xf32>
    %23 = vector.broadcast %22 : vector<8x1xf32> to vector<8x2048xf32>
    %24 = arith.addf %21, %23 : vector<8x2048xf32>
    %cst_12 = arith.constant 0.000000e+00 : f32
    %25 = vector.broadcast %cst_12 : f32 to vector<8x2048xf32>
    %26 = arith.cmpf ogt, %24, %25 : vector<8x2048xf32>
    %cst_13 = arith.constant 2.000000e-01 : f32
    %27 = vector.broadcast %cst_13 : f32 to vector<8x2048xf32>
    %28 = arith.mulf %27, %24 : vector<8x2048xf32>
    %29 = arith.select %26, %24, %28 : vector<8x2048xi1>, vector<8x2048xf32>
    %30 = arith.truncf %29 : vector<8x2048xf32> to vector<8x2048xbf16>
    %c0_14 = arith.constant 0 : index
    %c0_15 = arith.constant 0 : index
    %31 = vector.load %arg4[%c0_14, %c0_15] : memref<8x2048xbf16, #tpu.memory_space<vmem>>, vector<8x2048xbf16>
    tpu.vector_store %arg4[%c0_14, %c0_15], %30 {strides = array<i32>} : memref<8x2048xbf16, #tpu.memory_space<vmem>>, vector<8x2048xbf16>,
    return
  }
}

module attributes {stable_mosaic.version = 11 : i64} {
  func.func @_gemm_t_act_kernel(%arg0: i32, %arg1: memref<1x128xbf16, #tpu.memory_space<vmem>>, %arg2: memref<128x1024xbf16, #tpu.memory_space<vmem>>, %arg3: memref<1x1024xf32, #tpu.memory_space<vmem>>) attributes {dimension_semantics = [#tpu.dimension_semantics<parallel>], iteration_bounds = array<i64: 8>, scalar_prefetch = 0 : i64, scratch_operands = 0 : i64, tpu.core_type = #tpu.core_type<tc>, window_params = [{pipeline_mode = #tpu.pipeline_mode<synchronous>, transform_indices = @transform_0, window_bounds = array<i64: 1, 128>}, {transform_indices = @transform_1, window_bounds = array<i64: 128, 1024>}, {transform_indices = @transform_2, window_bounds = array<i64: 1, 1024>}]} {
    %c0 = arith.constant 0 : index
    %c0_0 = arith.constant 0 : index
    %0 = vector.load %arg1[%c0, %c0_0] : memref<1x128xbf16, #tpu.memory_space<vmem>>, vector<1x128xbf16>
    %c0_1 = arith.constant 0 : index
    %c0_2 = arith.constant 0 : index
    %1 = vector.load %arg2[%c0_1, %c0_2] : memref<128x1024xbf16, #tpu.memory_space<vmem>>, vector<128x1024xbf16>
    %cst = arith.constant dense<0.000000e+00> : vector<1x1024xf32>
    %2 = tpu.matmul %0, %1, %cst {dimension_numbers = #tpu.dot_dimension_numbers<[1], [0], [0], [1], [0, 0, 1, 1], [], []>} : vector<1x128xbf16>, vector<128x1024xbf16>, vector<1x1024xf32> -> vector<1x1024xf32>
    %cst_3 = arith.constant 0.000000e+00 : f32
    %3 = vector.broadcast %cst_3 : f32 to vector<1x1024xf32>
    %4 = arith.subf %3, %2 : vector<1x1024xf32>
    %5 = math.exp %4 : vector<1x1024xf32>
    %cst_4 = arith.constant 1.000000e+00 : f32
    %6 = vector.broadcast %cst_4 : f32 to vector<1x1024xf32>
    %7 = arith.addf %6, %5 : vector<1x1024xf32>
    %8 = tpu.reciprocal %7 {approx = true} : vector<1x1024xf32> -> vector<1x1024xf32>
    %c0_5 = arith.constant 0 : index
    %c0_6 = arith.constant 0 : index
    %9 = vector.load %arg3[%c0_5, %c0_6] : memref<1x1024xf32, #tpu.memory_space<vmem>>, vector<1x1024xf32>
    tpu.vector_store %arg3[%c0_5, %c0_6], %8 {strides = array<i32>} : memref<1x1024xf32, #tpu.memory_space<vmem>>, vector<1x1024xf32>,
    return
  }
  func.func @transform_0(%arg0: i32) -> (i32, i32) {
    %c0_i32 = arith.constant 0 : i32
    %c0_i32_0 = arith.constant 0 : i32
    %c0_i32_1 = arith.constant 0 : i32
    return %c0_i32, %c0_i32_0 : i32, i32
  }
  func.func @transform_1(%arg0: i32) -> (i32, i32) {
    %c0_i32 = arith.constant 0 : i32
    %c0_i32_0 = arith.constant 0 : i32
    return %c0_i32, %arg0 : i32, i32
  }
  func.func @transform_2(%arg0: i32) -> (i32, i32) {
    %c0_i32 = arith.constant 0 : i32
    %c0_i32_0 = arith.constant 0 : i32
    return %c0_i32, %arg0 : i32, i32
  }
}

</mosaic_0001>

<bundles_post_ra>
// kernel: vae_forward.12
= control target key start
LH: loop header
LB: loop body
LE: loop exit
PB: predicated region body
PF: predicated region fallthrough
CT: control target
= control target key end

     0   :  { %7 = vsyncpa [#allocation3], 0  ;;  %s688_s9 = smov 0   ;;  %s690_s10 = smov 0   ;;  %s775_s0 = inlined_call_operand.hbm [shape: bf16[8,16], index: 0, kind: input, shape index: {}]   ;;  %s776_s1 = inlined_call_operand.vmem [shape: bf16[16,2048], index: 1, kind: input, shape index: {}]   ;;  %s777_s2 = inlined_call_operand.vmem [shape: bf16[8,2048], index: 2, kind: output, shape index: {}]  }
   0x1   :  { %s692_s11 = smov 0  }
   0x2 LB: > { %s545_s12 = sadd.s32 4294967295, %s669_s11   ;;  %s705_s13 = sadd.s32 1, %s669_s11   ;;  %s669_s11 = sphi %s692_s11, %s783_s11   ;;  %s665_s10 = sphi %s690_s10, %s782_s10   ;;  %s661_s9 = sphi %s688_s9, %s781_s9  }
   0x3   : > { %s38_s14 = ssub.s32 %s669_s11, %s705_s13  ;;  %s41_s15 = sadd.s32 1, %s665_s10 }
   0x4   : > { %p39_p0 = scmp.eq.s32.totalorder %s38_s14, 0  ;;  %p48_p1 = scmp.ne.s32.totalorder %s665_s10, %s661_s9 }
   0x5   : > { %p49_p2 = scmp.eq.s32.totalorder %s669_s11, 0  ;;  %p547_p3 = scmp.ge.s32.totalorder %s669_s11, 1 }
   0x6   : > { %s715_s16 = scalar_select %p39_p0, %s665_s10, %s41_s15  }
   0x7   : > { %p717_p4 = por %p49_p2, %p48_p1  ;;  %p91_p5 = scmp.lt.s32.totalorder %s669_s11, 3 }
   0x8   : > { %p724_p6 = scmp.eq.s32.totalorder %s545_s12, 0  ;;  %s671_s20 = smov [#allocation2]  }
   0x9   : > { %p728_p7 = pnand %p547_p3, %p91_p5  ;;  %s104_s21 = sshll.u32 %s671_s20, 4  ;;  %s105_s21 = int_to_ptr.vmem [resolvable:$true] %s104_s21 }
   0xa   : > { %s628_s22 = scalar_lea.vmem %s105_s21, 64  ;;  %p636_p0 = scmp.lt.s32.totalorder %s105_s21, %s105_s21 }
   0xb   : > { %p585_p8 = pneg %p728_p7  ;;  %p629_p11 = scmp.ne.s32.totalorder %s105_s21, %s628_s22 }
   0xc   : > { %p637_p1 = scmp.lt.s32.totalorder %s628_s22, %s628_s22 }
   0xd   : > { %p586_p9 = pnand %p724_p6, %p585_p8 }
   0xe   : > { %p638_p2 = por %p637_p1, %p636_p0 }
   0xf   : > { %p619_p10 = pneg %p586_p9 }
  0x11   : > { %p631_p12 = pnand %p629_p11, %p619_p10 }
  0x13   : > { %p632_p13 = pneg %p631_p12 }
  0x15   : > { %p639_p3 = pnand %p638_p2, %p632_p13 }
  0x17   : > { %642 = shalt.err (!%p639_p3)
}
  0x18   : > { %588 = dma.hbm_to_vmem [thread:$0]  (!%p586_p9), %s775_s0, 64, %s105_s21, [#allocation3]  }
  0x19   : > { %p549_p5 = scmp.ge.s32.totalorder %s669_s11, 2 }
  0x1b   : > { %111 = sbr.rel (%p549_p5) target bundleno = 40 (0x28), region = 20 }
  0x20   : > { %114 = sbr.rel (!%p717_p4) target bundleno = 40 (0x28), region = 24  ;;  %s116_s25 = sand.u32 (%p717_p4), 1, %s665_s10  }
  0x21   : > { %s576_s26 = sshll.u32 (%p717_p4), %s669_s11, 5  ;;  %s550_s27 = sshll.u32 (%p717_p4), %s116_s25, 6 }
  0x22   : > { %s121_s30 = scalar_lea.vmem (%p717_p4), %s776_s1, %s576_s26  ;;  %s118_s3 = scalar_lea.vmem (%p717_p4), [#allocation4], %s550_s27 }
  0x23   : > { %v134_v0 = vld [vmem:[%s121_s30] sm:$0xff] (%p717_p4)  ;;  %v136_v1 = vld [vmem:[%s121_s30 + $0x8] sm:$0xff] (%p717_p4)  ;;  %v138_v2 = vld [vmem:[%s121_s30 + $0x10] sm:$0xff] (%p717_p4) }
  0x24   : > { %135 = vst [vmem:[%s118_s3] sm:$0xff] (%p717_p4), %v134_v0  ;;  %137 = vst [vmem:[%s118_s3 + $0x8] sm:$0xff] (%p717_p4), %v136_v1  ;;  %v140_v3 = vld [vmem:[%s121_s30 + $0x18] sm:$0xff] (%p717_p4)  ;;  %v142_v4 = vld [vmem:[%s121_s30 + $0x40] sm:$0xff] (%p717_p4) }
  0x25   : > { %139 = vst [vmem:[%s118_s3 + $0x10] sm:$0xff] %v138_v2  ;;  %v144_v5 = vld [vmem:[%s121_s30 + $0x48] sm:$0xff]  ;;  %141 = vst [vmem:[%s118_s3 + $0x18] sm:$0xff] %v140_v3  ;;  %v146_v6 = vld [vmem:[%s121_s30 + $0x50] sm:$0xff] }
  0x26   : > { %143 = vst [vmem:[%s118_s3 + $0x20] sm:$0xff] %v142_v4  ;;  %145 = vst [vmem:[%s118_s3 + $0x28] sm:$0xff] %v144_v5  ;;  %v148_v7 = vld [vmem:[%s121_s30 + $0x58] sm:$0xff] }
  0x27   : > { %147 = vst [vmem:[%s118_s3 + $0x30] sm:$0xff] %v146_v6  ;;  %149 = vst [vmem:[%s118_s3 + $0x38] sm:$0xff] %v148_v7 }
  0x28 PF: > { %158 = sbr.rel (%p728_p7) target bundleno = 266 (0x10a), region = 47 }
  0x2d   : > { %656 = dma.done.wait (%p724_p6), [#allocation3], 64  }
  0x2e   : > { %658 = vsyncadd (%p724_p6), [#allocation3], 4294967232  ;;  %s165_s4 = sand.u32 1, %s661_s9   ;;  %v672_v8 = vmov 0   ;;  %v194_v23 = vld [vmem:[#allocation2] sm:$0xf] }
  0x2f   : > { %s555_s5 = sshll.u32 %s165_s4, 6  ;;  %279 = vmatprep.mubr.bf16.mxu0 %v672_v8  ;;  %320 = vmatprep.mubr.bf16.mxu1 %v672_v8  ;;  %vm243_vm0 = vcmask 130048   ;;  %s556_s7 = sshll.u32 %s545_s12, 3 }
  0x30   : > { %s167_s6 = scalar_lea.vmem [#allocation4], %s555_s5  ;;  %p188_p4 = scmp.lt.s32.totalorder %s556_s7, 15 }
  0x31   : > { %v195_v9 = vld [vmem:[%s167_s6] sm:$0xff]  ;;  %v196_v11 = vld [vmem:[%s167_s6 + $0x8] sm:$0xff]  ;;  %v197_v15 = vld [vmem:[%s167_s6 + $0x10] sm:$0xff] }
  0x32   : > { %v199_v10 = vld [vmem:[%s167_s6 + $0x20] sm:$0xff]  ;;  %v200_v13 = vld [vmem:[%s167_s6 + $0x28] sm:$0xff]  ;;  %v201_v18 = vld [vmem:[%s167_s6 + $0x30] sm:$0xff]  ;;  %s785_s7 = smov (!%p188_p4, %s556_s7), 15 }
  0x33   : > { %v559_v12 = vcombine.high %v195_v9, %v199_v10  ;;  %v558_v14 = vcombine.low %v195_v9, %v199_v10  ;;  %v561_v16 = vcombine.high %v196_v11, %v200_v13  ;;  %v560_v17 = vcombine.low %v196_v11, %v200_v13  ;;  %v198_v19 = vld [vmem:[%s167_s6 + $0x18] sm:$0xff]  ;;  %s557_s8 = sshll.u32 %s785_s7, 2 }
  0x34   : > { %v202_v20 = vld [vmem:[%s167_s6 + $0x38] sm:$0xff]  ;;  %v563_v21 = vcombine.high %v197_v15, %v201_v18  ;;  %v562_v24 = vcombine.low %v197_v15, %v201_v18  ;;  %s759_s12 = scalar_lea.vmem %s777_s2, %s557_s8 }
  0x35   : > { %261 = vmatprep.subr.bf16.mxu0 %v559_v12  ;;  %v565_v22 = vcombine.high %v198_v19, %v202_v20  ;;  %302 = vmatprep.subr.bf16.mxu1 %v561_v16  ;;  %v564_v25 = vcombine.low %v198_v19, %v202_v20 }
  0x36   : > { %262 = vmatpush1.bf16.msra.mxu0 %v558_v14  ;;  %303 = vmatpush1.bf16.msra.mxu1 %v560_v17 }
  0x37   : > { %343 = vmatprep.subr.bf16.mxu0 %v563_v21  ;;  %384 = vmatprep.subr.bf16.mxu1 %v565_v22 }
  0x39   : > { %566 = vmatmul.mubr.msk.bf16.vlgmr.msra.gmra.mxu0 %vm243_vm0, %v194_v23  ;;  %567 = vmatmul.mubr.msk.bf16.vlgmr.msra.gmra.mxu1 %vm243_vm0, %v194_v23 }
  0x3a   : > { %344 = vmatpush1.bf16.msra.mxu0 %v562_v24  ;;  %385 = vmatpush1.bf16.msra.mxu1 %v564_v25 }
  0x3b   : > { %361 = vmatprep.mubr.bf16.mxu0 %v672_v8  ;;  %402 = vmatprep.mubr.bf16.mxu1 %v672_v8 }
  0x41   : > { %568 = vmatmul.mubr.msk.bf16.vlgmr.msra.gmra.mxu0 %vm243_vm0, %v194_v23  ;;  %569 = vmatmul.mubr.msk.bf16.vlgmr.msra.gmra.mxu1 %vm243_vm0, %v194_v23 }
  0xf9   : > { %v281_v26 = vpop.f32.mrf.mxu0  ;;  %v322_v28 = vpop.f32.mrf.mxu1 }
  0xfa   : > { %v419_v27 = vmul.f32 0.2, %v281_v26  ;;  %vm411_vm1 = vcmp.gt.f32.partialorder %v281_v26, 0.0  ;;  %v421_v29 = vmul.f32 0.2, %v322_v28  ;;  %vm413_vm2 = vcmp.gt.f32.partialorder %v322_v28, 0.0 }
  0xfb   : > { %v283_v30 = vpop.f32.mrf.mxu0  ;;  %v324_v32 = vpop.f32.mrf.mxu1 }
  0xfc   : > { %vm412_vm3 = vcmp.gt.f32.partialorder %v283_v30, 0.0  ;;  %v420_v31 = vmul.f32 0.2, %v283_v30  ;;  %vm414_vm4 = vcmp.gt.f32.partialorder %v324_v32, 0.0  ;;  %v422_v33 = vmul.f32 0.2, %v324_v32 }
  0xfd   : > { %v285_v34 = vpop.f32.mrf.mxu0  ;;  %v427_v35 = vsel %vm411_vm1, %v281_v26, %v419_v27  ;;  %v326_v37 = vpop.f32.mrf.mxu1  ;;  %v429_v38 = vsel %vm413_vm2, %v322_v28, %v421_v29 }
  0xfe   : > { %v428_v36 = vsel %vm412_vm3, %v283_v30, %v420_v31  ;;  %v430_v40 = vsel %vm414_vm4, %v324_v32, %v422_v33 }
  0xff   : > { %v577_v39 = vpack.c.bf16 %v428_v36, %v427_v35  ;;  %v286_v41 = vpop.f32.mrf.mxu0  ;;  %v578_v42 = vpack.c.bf16 %v430_v40, %v429_v38  ;;  %v327_v43 = vpop.f32.mrf.mxu1 }
 0x101   : > { %467 = vst [vmem:[%s759_s12] sm:$0xff] %v577_v39  ;;  %v363_v44 = vpop.f32.mrf.mxu0  ;;  %468 = vst [vmem:[%s759_s12 + $0x8] sm:$0xff] %v578_v42  ;;  %v404_v46 = vpop.f32.mrf.mxu1 }
 0x102   : > { %v423_v45 = vmul.f32 0.2, %v363_v44  ;;  %vm415_vm5 = vcmp.gt.f32.partialorder %v363_v44, 0.0  ;;  %v425_v47 = vmul.f32 0.2, %v404_v46  ;;  %vm417_vm6 = vcmp.gt.f32.partialorder %v404_v46, 0.0 }
 0x103   : > { %v365_v48 = vpop.f32.mrf.mxu0  ;;  %v406_v50 = vpop.f32.mrf.mxu1 }
 0x104   : > { %vm416_vm7 = vcmp.gt.f32.partialorder %v365_v48, 0.0  ;;  %v424_v49 = vmul.f32 0.2, %v365_v48  ;;  %vm418_vm8 = vcmp.gt.f32.partialorder %v406_v50, 0.0  ;;  %v426_v51 = vmul.f32 0.2, %v406_v50 }
 0x105   : > { %v367_v52 = vpop.f32.mrf.mxu0  ;;  %v431_v53 = vsel %vm415_vm5, %v363_v44, %v423_v45  ;;  %v408_v55 = vpop.f32.mrf.mxu1  ;;  %v433_v56 = vsel %vm417_vm6, %v404_v46, %v425_v47 }
 0x106   : > { %v432_v54 = vsel %vm416_vm7, %v365_v48, %v424_v49  ;;  %v434_v58 = vsel %vm418_vm8, %v406_v50, %v426_v51 }
 0x107   : > { %v579_v57 = vpack.c.bf16 %v432_v54, %v431_v53  ;;  %v368_v59 = vpop.f32.mrf.mxu0  ;;  %v580_v60 = vpack.c.bf16 %v434_v58, %v433_v56  ;;  %v409_v61 = vpop.f32.mrf.mxu1 }
 0x109   : > { %469 = vst [vmem:[%s759_s12 + $0x10] sm:$0xff] %v579_v57  ;;  %470 = vst [vmem:[%s759_s12 + $0x18] sm:$0xff] %v580_v60 }
 0x10a PF: > { %p10_p6 = scmp.ge.s32.totalorder %s705_s13, 4   ;;  %s781_s9 = smov %s665_s10 }
 0x10b   : > { %s782_s10 = smov %s715_s16  ;;  %s783_s11 = smov %s705_s13 }
 0x10c   :  { %12 = sbr.rel (!%p10_p6) target bundleno = 2 (0x2), region = 91 }
 0x111   :  { %493 = vsyncpa [#allocation3], 1 }
 0x112   :  { %495 = vsyncpa [#allocation3 + $0x1], 1 }

// kernel: vae_forward.13
= control target key start
LH: loop header
LB: loop body
LE: loop exit
PB: predicated region body
PF: predicated region fallthrough
CT: control target
= control target key end

     0   :  { %v550_v1 = vmov 0   ;;  %s703_s1 = inlined_call_operand.vmem [shape: bf16[128,512], index: 1, kind: input, shape index: {}]   ;;  %s704_s0 = inlined_call_operand.vmem [shape: bf16[16,128], index: 0, kind: input, shape index: {}]   ;;  %s705_s2 = inlined_call_operand.vmem [shape: f32[16,1], index: 2, kind: input, shape index: {}]   ;;  %s706_s3 = inlined_call_operand.vmem [shape: f32[16,1], index: 3, kind: input, shape index: {}]   ;;  %s707_s4 = inlined_call_operand.vmem [shape: bf16[16,512], index: 4, kind: output, shape index: {}]  }
   0x1   :  { %v497_v0 = vld [vmem:[%s703_s1 + $0xe4] ss:$16 sps:$4 sm:$0xff]   ;;  %250 = vmatprep.mubr.bf16.mxu0 %v550_v1  ;;  %293 = vmatprep.mubr.bf16.mxu1 %v550_v1  ;;  %v499_v2 = vld [vmem:[%s703_s1 + $0xec] ss:$16 sps:$4 sm:$0xff]   ;;  %v501_v3 = vld [vmem:[%s703_s1 + $0xe0] ss:$16 sps:$4 sm:$0xff]  }
   0x2   :  { %496 = vset.pattern.permute.xlu1 %v550_v1  ;;  %495 = vset.pattern.permute.xlu0 %v550_v1  ;;  %v502_v4 = vld [vmem:[%s703_s1 + $0xe8] ss:$16 sps:$4 sm:$0xff]   ;;  %v503_v5 = vld [vmem:[%s703_s1 + $0xc4] ss:$16 sps:$4 sm:$0xff]   ;;  %v505_v6 = vld [vmem:[%s703_s1 + $0xcc] ss:$16 sps:$4 sm:$0xff]  }
   0x3   :  { %218 = vmatprep.subr.bf16.mxu0 %v497_v0  ;;  %261 = vmatprep.subr.bf16.mxu1 %v499_v2  ;;  %v507_v7 = vld [vmem:[%s703_s1 + $0xc0] ss:$16 sps:$4 sm:$0xff]   ;;  %v508_v8 = vld [vmem:[%s703_s1 + $0xc8] ss:$16 sps:$4 sm:$0xff]   ;;  %v509_v9 = vld [vmem:[%s703_s1 + $0xa4] ss:$16 sps:$4 sm:$0xff]  }
   0x4   :  { %219 = vmatpush1.bf16.msra.mxu0 %v501_v3  ;;  %262 = vmatpush1.bf16.msra.mxu1 %v502_v4  ;;  %v511_v10 = vld [vmem:[%s703_s1 + $0xac] ss:$16 sps:$4 sm:$0xff]   ;;  %v513_v11 = vld [vmem:[%s703_s1 + $0xa0] ss:$16 sps:$4 sm:$0xff]   ;;  %v514_v12 = vld [vmem:[%s703_s1 + $0xa8] ss:$16 sps:$4 sm:$0xff]  }
   0x5   :  { %220 = vmatprep.subr.bf16.mxu0 %v503_v5  ;;  %263 = vmatprep.subr.bf16.mxu1 %v505_v6  ;;  %v515_v13 = vld [vmem:[%s703_s1 + $0x84] ss:$16 sps:$4 sm:$0xff]   ;;  %v517_v14 = vld [vmem:[%s703_s1 + $0x8c] ss:$16 sps:$4 sm:$0xff]   ;;  %v519_v15 = vld [vmem:[%s703_s1 + $0x80] ss:$16 sps:$4 sm:$0xff]  }
   0x6   :  { %v520_v16 = vld [vmem:[%s703_s1 + $0x88] ss:$16 sps:$4 sm:$0xff]   ;;  %v521_v17 = vld [vmem:[%s703_s1 + $0x64] ss:$16 sps:$4 sm:$0xff]   ;;  %v523_v18 = vld [vmem:[%s703_s1 + $0x6c] ss:$16 sps:$4 sm:$0xff]  }
   0x7   :  { %v525_v19 = vld [vmem:[%s703_s1 + $0x60] ss:$16 sps:$4 sm:$0xff]   ;;  %v526_v20 = vld [vmem:[%s703_s1 + $0x68] ss:$16 sps:$4 sm:$0xff]   ;;  %v527_v21 = vld [vmem:[%s703_s1 + $0x44] ss:$16 sps:$4 sm:$0xff]  }
   0x8   :  { %221 = vmatpush1.bf16.msra.mxu0 %v507_v7  ;;  %264 = vmatpush1.bf16.msra.mxu1 %v508_v8  ;;  %v529_v22 = vld [vmem:[%s703_s1 + $0x4c] ss:$16 sps:$4 sm:$0xff]   ;;  %v531_v23 = vld [vmem:[%s703_s1 + $0x40] ss:$16 sps:$4 sm:$0xff]   ;;  %v532_v24 = vld [vmem:[%s703_s1 + $0x48] ss:$16 sps:$4 sm:$0xff]  }
   0x9   :  { %222 = vmatprep.subr.bf16.mxu0 %v509_v9  ;;  %265 = vmatprep.subr.bf16.mxu1 %v511_v10  ;;  %v533_v25 = vld [vmem:[%s703_s1 + $0x24] ss:$16 sps:$4 sm:$0xff]   ;;  %v535_v26 = vld [vmem:[%s703_s1 + $0x2c] ss:$16 sps:$4 sm:$0xff]   ;;  %v537_v27 = vld [vmem:[%s703_s1 + $0x20] ss:$16 sps:$4 sm:$0xff]  }
   0xa   :  { %v538_v28 = vld [vmem:[%s703_s1 + $0x28] ss:$16 sps:$4 sm:$0xff]   ;;  %v539_v29 = vld [vmem:[%s703_s1 + $0x4] ss:$16 sps:$4 sm:$0xff]   ;;  %v541_v30 = vld [vmem:[%s703_s1 + $0xc] ss:$16 sps:$4 sm:$0xff]  }
   0xb   :  { %v543_v31 = vld [vmem:[%s703_s1] ss:$16 sps:$4 sm:$0xff]   ;;  %v544_v32 = vld [vmem:[%s703_s1 + $0x8] ss:$16 sps:$4 sm:$0xff]  }
   0xc   :  { %223 = vmatpush1.bf16.msra.mxu0 %v513_v11  ;;  %266 = vmatpush1.bf16.msra.mxu1 %v514_v12  ;;  %v545_v33 = vld [vmem:[%s704_s0] sm:$0xff]   ;;  %v358_v34 = vld [vmem:[%s705_s2 + $0x8] sm:$0xff] }
   0xd   :  { %224 = vmatprep.subr.bf16.mxu0 %v515_v13  ;;  %267 = vmatprep.subr.bf16.mxu1 %v517_v14  ;;  %v377_v35 = vld [vmem:[%s706_s3] sm:$0xff]  ;;  %v378_v13 = vld [vmem:[%s706_s3 + $0x8] sm:$0xff] }
   0xe   :  { %366 = vperm.xlu1 %496, %v358_v34   ;;  %v357_v50 = vld [vmem:[%s705_s2] sm:$0xff] }
  0x10   :  { %225 = vmatpush1.bf16.msra.mxu0 %v519_v15  ;;  %268 = vmatpush1.bf16.msra.mxu1 %v520_v16 }
  0x11   :  { %226 = vmatprep.subr.bf16.mxu0 %v521_v17  ;;  %269 = vmatprep.subr.bf16.mxu1 %v523_v18 }
  0x12   :  { %381 = vperm.xlu1 %496, %v377_v35  }
  0x14   :  { %227 = vmatpush1.bf16.msra.mxu0 %v525_v19  ;;  %270 = vmatpush1.bf16.msra.mxu1 %v526_v20 }
  0x15   :  { %228 = vmatprep.subr.bf16.mxu0 %v527_v21  ;;  %271 = vmatprep.subr.bf16.mxu1 %v529_v22 }
  0x18   :  { %229 = vmatpush1.bf16.msra.mxu0 %v531_v23  ;;  %272 = vmatpush1.bf16.msra.mxu1 %v532_v24 }
  0x19   :  { %230 = vmatprep.subr.bf16.mxu0 %v533_v25  ;;  %273 = vmatprep.subr.bf16.mxu1 %v535_v26 }
  0x1c   :  { %231 = vmatpush1.bf16.msra.mxu0 %v537_v27  ;;  %274 = vmatpush1.bf16.msra.mxu1 %v538_v28 }
  0x1d   :  { %232 = vmatprep.subr.bf16.mxu0 %v539_v29  ;;  %275 = vmatprep.subr.bf16.mxu1 %v541_v30 }
  0x20   :  { %233 = vmatpush1.bf16.msra.mxu0 %v543_v31  ;;  %276 = vmatpush1.bf16.msra.mxu1 %v544_v32 }
  0x23   :  { %251 = vmatmul.mubr.bf16.vlgmr.msra.gmra.mxu0 %v545_v33  ;;  %294 = vmatmul.mubr.bf16.vlgmr.msra.gmra.mxu1 %v545_v33 }
  0x89   :  { %v367_v14 = vpop.permute.xlu1 %366 }
  0x8d   :  { %v382_v15 = vpop.permute.xlu1 %381 }
  0xe3   :  { %v252_v36 = vpop.f32.mrf.mxu0  ;;  %v295_v37 = vpop.f32.mrf.mxu1 }
  0xe5   :  { %v254_v38 = vpop.f32.mrf.mxu0  ;;  %v297_v39 = vpop.f32.mrf.mxu1 }
  0xe6   :  { %v304_v40 = vadd.f32 %v254_v38, %v252_v36 }
  0xe7   :  { %v256_v41 = vpop.f32.mrf.mxu0  ;;  %v299_v43 = vpop.f32.mrf.mxu1 }
  0xe8   :  { %v305_v42 = vadd.f32 %v304_v40, %v295_v37 }
  0xe9   :  { %v258_v44 = vpop.f32.mrf.mxu0  ;;  %v301_v48 = vpop.f32.mrf.mxu1 }
  0xea   :  { %v309_v45 = vadd.f32 %v258_v44, %v256_v41  ;;  %v306_v46 = vadd.f32 %v305_v42, %v297_v39 }
  0xec   :  { %v310_v47 = vadd.f32 %v309_v45, %v299_v43  ;;  %307 = vadd.xlane.f32.xlu0 %v306_v46 }
  0xee   :  { %v311_v49 = vadd.f32 %v310_v47, %v301_v48 }
  0xf0   :  { %312 = vadd.xlane.f32.xlu0 %v311_v49 }
 0x106   :  { %361 = vperm.xlu0 %495, %v357_v50  }
 0x175   :  { %v308_v51 = vpop.xlane.xlu0 %307 }
 0x176   :  { %v315_v52 = vmul.f32 0.001953125, %v308_v51 }
 0x178   :  { %v317_v53 = vsub.f32 %v252_v36, %v315_v52  ;;  %v318_v54 = vsub.f32 %v254_v38, %v315_v52  ;;  %v319_v55 = vsub.f32 %v295_v37, %v315_v52  ;;  %v320_v57 = vsub.f32 %v297_v39, %v315_v52 }
 0x179   :  { %v313_v56 = vpop.xlane.xlu0 %312 }
 0x17a   :  { %v316_v58 = vmul.f32 0.001953125, %v313_v56  ;;  %v325_v59 = vmul.f32 %v317_v53, %v317_v53  ;;  %v326_v60 = vmul.f32 %v318_v54, %v318_v54  ;;  %v327_v61 = vmul.f32 %v319_v55, %v319_v55 }
 0x17b   :  { %v328_v2 = vmul.f32 %v320_v57, %v320_v57 }
 0x17c   :  { %v321_v62 = vsub.f32 %v256_v41, %v316_v58  ;;  %v322_v63 = vsub.f32 %v258_v44, %v316_v58  ;;  %v333_v0 = vadd.f32 %v326_v60, %v325_v59  ;;  %v323_v1 = vsub.f32 %v299_v43, %v316_v58 }
 0x17d   :  { %v324_v4 = vsub.f32 %v301_v48, %v316_v58 }
 0x17e   :  { %v334_v3 = vadd.f32 %v333_v0, %v327_v61  ;;  %v329_v5 = vmul.f32 %v321_v62, %v321_v62  ;;  %v330_v6 = vmul.f32 %v322_v63, %v322_v63  ;;  %v331_v8 = vmul.f32 %v323_v1, %v323_v1 }
 0x17f   :  { %v332_v10 = vmul.f32 %v324_v4, %v324_v4 }
 0x180   :  { %v335_v7 = vadd.f32 %v334_v3, %v328_v2  ;;  %v338_v9 = vadd.f32 %v330_v6, %v329_v5 }
 0x181   :  { %v362_v23 = vpop.permute.xlu0 %361 }
 0x182   :  { %336 = vadd.xlane.f32.xlu1 %v335_v7  ;;  %v339_v11 = vadd.f32 %v338_v9, %v331_v8 }
 0x184   :  { %v340_v12 = vadd.f32 %v339_v11, %v332_v10 }
 0x186   :  { %341 = vadd.xlane.f32.xlu1 %v340_v12 }
 0x197   :  { %386 = vperm.xlu1 %496, %v378_v13  }
 0x20b   :  { %v337_v16 = vpop.xlane.xlu1 %336 }
 0x20c   :  { %v343_v17 = vmul.f32 0.001953125, %v337_v16 }
 0x20e   :  { %v345_v18 = vadd.f32 1e-05, %v343_v17 }
 0x20f   :  { %v342_v19 = vpop.xlane.xlu1 %341 }
 0x210   :  { %546 = vrsqrt.f32 %v345_v18  ;;  %v344_v20 = vmul.f32 0.001953125, %v342_v19 }
 0x212   :  { %v346_v21 = vadd.f32 1e-05, %v344_v20 }
 0x213   :  { %v387_v45 = vpop.permute.xlu1 %386 }
 0x214   :  { %548 = vrsqrt.f32 %v346_v21 }
 0x21d   :  { %v547_v22 = vpop.eup %546 }
 0x21e   :  { %v349_v24 = vmul.f32 %v547_v22, %v317_v53  ;;  %v350_v25 = vmul.f32 %v547_v22, %v318_v54  ;;  %v351_v26 = vmul.f32 %v547_v22, %v319_v55  ;;  %v352_v27 = vmul.f32 %v547_v22, %v320_v57 }
 0x220   :  { %v369_v28 = vmul.f32 %v362_v23, %v349_v24  ;;  %v370_v29 = vmul.f32 %v362_v23, %v350_v25  ;;  %v371_v30 = vmul.f32 %v362_v23, %v351_v26  ;;  %v372_v31 = vmul.f32 %v362_v23, %v352_v27 }
 0x221   :  { %v549_v32 = vpop.eup %548 }
 0x222   :  { %v353_v33 = vmul.f32 %v549_v32, %v321_v62  ;;  %v354_v34 = vmul.f32 %v549_v32, %v322_v63  ;;  %v355_v35 = vmul.f32 %v549_v32, %v323_v1  ;;  %v356_v36 = vmul.f32 %v549_v32, %v324_v4 }
 0x223   :  { %v389_v37 = vadd.f32 %v382_v15, %v369_v28  ;;  %v390_v38 = vadd.f32 %v382_v15, %v370_v29  ;;  %v391_v39 = vadd.f32 %v382_v15, %v371_v30  ;;  %v392_v40 = vadd.f32 %v382_v15, %v372_v31 }
 0x224   :  { %v373_v41 = vmul.f32 %v367_v14, %v353_v33  ;;  %v374_v42 = vmul.f32 %v367_v14, %v354_v34  ;;  %v375_v43 = vmul.f32 %v367_v14, %v355_v35  ;;  %v376_v44 = vmul.f32 %v367_v14, %v356_v36 }
 0x225   :  { %vm397_vm0 = vcmp.gt.f32.partialorder %v389_v37, 0.0  ;;  %vm398_vm1 = vcmp.gt.f32.partialorder %v390_v38, 0.0  ;;  %vm399_vm2 = vcmp.gt.f32.partialorder %v391_v39, 0.0  ;;  %vm400_vm3 = vcmp.gt.f32.partialorder %v392_v40, 0.0 }
 0x226   :  { %v393_v46 = vadd.f32 %v387_v45, %v373_v41  ;;  %v394_v47 = vadd.f32 %v387_v45, %v374_v42  ;;  %v395_v48 = vadd.f32 %v387_v45, %v375_v43  ;;  %v396_v49 = vadd.f32 %v387_v45, %v376_v44 }
 0x227   :  { %v405_v50 = vmul.f32 0.2, %v389_v37  ;;  %v406_v51 = vmul.f32 0.2, %v390_v38  ;;  %v407_v52 = vmul.f32 0.2, %v391_v39 }
 0x228   :  { %vm401_vm4 = vcmp.gt.f32.partialorder %v393_v46, 0.0  ;;  %vm402_vm5 = vcmp.gt.f32.partialorder %v394_v47, 0.0  ;;  %vm403_vm6 = vcmp.gt.f32.partialorder %v395_v48, 0.0  ;;  %vm404_vm7 = vcmp.gt.f32.partialorder %v396_v49, 0.0 }
 0x229   :  { %v409_v53 = vmul.f32 0.2, %v393_v46  ;;  %v410_v54 = vmul.f32 0.2, %v394_v47  ;;  %v411_v55 = vmul.f32 0.2, %v395_v48  ;;  %v413_v56 = vsel %vm397_vm0, %v389_v37, %v405_v50 }
 0x22a   :  { %v412_v57 = vmul.f32 0.2, %v396_v49  ;;  %v408_v58 = vmul.f32 0.2, %v392_v40  ;;  %v414_v59 = vsel %vm398_vm1, %v390_v38, %v406_v51  ;;  %v415_v60 = vsel %vm399_vm2, %v391_v39, %v407_v52 }
 0x22b   :  { %v417_v61 = vsel %vm401_vm4, %v393_v46, %v409_v53  ;;  %v418_v62 = vsel %vm402_vm5, %v394_v47, %v410_v54  ;;  %v419_v63 = vsel %vm403_vm6, %v395_v48, %v411_v55  ;;  %v490_v0 = vpack.c.bf16 %v414_v59, %v413_v56 }
 0x22c   :  { %v420_v1 = vsel %vm404_vm7, %v396_v49, %v412_v57  ;;  %v492_v2 = vpack.c.bf16 %v418_v62, %v417_v61  ;;  %v416_v3 = vsel %vm400_vm3, %v392_v40, %v408_v58 }
 0x22d   :  { %v493_v4 = vpack.c.bf16 %v420_v1, %v419_v63  ;;  %v491_v5 = vpack.c.bf16 %v416_v3, %v415_v60  ;;  %445 = vst [vmem:[%s707_s4] sm:$0xff] %v490_v0 }
 0x22e   :  { %447 = vst [vmem:[%s707_s4 + $0x10] sm:$0xff] %v492_v2 }
 0x22f   :  { %448 = vst [vmem:[%s707_s4 + $0x18] sm:$0xff] %v493_v4  ;;  %446 = vst [vmem:[%s707_s4 + $0x8] sm:$0xff] %v491_v5 }

// kernel: vae_forward.14
= control target key start
LH: loop header
LB: loop body
LE: loop exit
PB: predicated region body
PF: predicated region fallthrough
CT: control target
= control target key end

     0   :  { %v472_v20 = vmov 0   ;;  %s588_s1 = inlined_call_operand.vmem [shape: bf16[256,128], index: 1, kind: input, shape index: {}]   ;;  %s589_s0 = inlined_call_operand.vmem [shape: bf16[32,256], index: 0, kind: input, shape index: {}]   ;;  %s590_s2 = inlined_call_operand.vmem [shape: f32[32,1], index: 2, kind: input, shape index: {}]   ;;  %s591_s3 = inlined_call_operand.vmem [shape: f32[32,1], index: 3, kind: input, shape index: {}]   ;;  %s592_s4 = inlined_call_operand.vmem [shape: bf16[32,128], index: 4, kind: output, shape index: {}]  }
   0x1   :  { %v442_v0 = vld [vmem:[%s588_s1 + $0x78] sm:$0xff]   ;;  %v444_v2 = vld [vmem:[%s588_s1 + $0x70] sm:$0xff]   ;;  %v446_v4 = vld [vmem:[%s588_s1 + $0x68] sm:$0xff]   ;;  %441 = vset.pattern.permute.xlu1 %v472_v20  ;;  %440 = vset.pattern.permute.xlu0 %v472_v20 }
   0x2   :  { %v443_v1 = vld [vmem:[%s588_s1 + $0x38] sm:$0xff]   ;;  %395 = vmatprep.subr.bf16.mxu0 %v442_v0  ;;  %423 = vmatprep.subr.bf16.mxu1 %v442_v0  ;;  %v445_v3 = vld [vmem:[%s588_s1 + $0x30] sm:$0xff]   ;;  %v447_v5 = vld [vmem:[%s588_s1 + $0x28] sm:$0xff]  }
   0x3   :  { %396 = vmatpush3.bf16.msra.mxu0 %v443_v1  ;;  %431 = vmatpush3.bf16.msra.mxu1 %v443_v1  ;;  %v448_v6 = vld [vmem:[%s588_s1 + $0x60] sm:$0xff]   ;;  %v450_v8 = vld [vmem:[%s588_s1 + $0x58] sm:$0xff]   ;;  %v452_v10 = vld [vmem:[%s588_s1 + $0x50] sm:$0xff]  }
   0x4   :  { %397 = vmatprep.subr.bf16.mxu0 %v444_v2  ;;  %424 = vmatprep.subr.bf16.mxu1 %v444_v2  ;;  %v449_v7 = vld [vmem:[%s588_s1 + $0x20] sm:$0xff]   ;;  %v451_v9 = vld [vmem:[%s588_s1 + $0x18] sm:$0xff]   ;;  %v453_v13 = vld [vmem:[%s588_s1 + $0x10] sm:$0xff]  }
   0x5   :  { %v460_v11 = vld [vmem:[%s589_s0 + $0x4] ss:$8 sps:$4 sm:$0xff]   ;;  %v463_v12 = vld [vmem:[%s589_s0 + $0x14] ss:$8 sps:$4 sm:$0xff]   ;;  %v458_v18 = vld [vmem:[%s589_s0] ss:$8 sps:$4 sm:$0xff]  }
   0x6   :  { %v454_v14 = vld [vmem:[%s588_s1 + $0x48] sm:$0xff]   ;;  %202 = vmatprep.mubr.bf16.mxu0 %v460_v11  ;;  %210 = vmatprep.mubr.bf16.mxu1 %v463_v12  ;;  %v456_v16 = vld [vmem:[%s588_s1 + $0x40] sm:$0xff]   ;;  %v461_v19 = vld [vmem:[%s589_s0 + $0x10] ss:$8 sps:$4 sm:$0xff]  }
   0x7   :  { %398 = vmatpush3.bf16.msra.mxu0 %v445_v3  ;;  %432 = vmatpush3.bf16.msra.mxu1 %v445_v3  ;;  %v455_v15 = vld [vmem:[%s588_s1 + $0x8] sm:$0xff]   ;;  %v457_v17 = vld [vmem:[%s588_s1] sm:$0xff]   ;;  %v266_v34 = vld [vmem:[%s590_s2 + $0x10] sm:$0xff] }
   0x8   :  { %399 = vmatprep.subr.bf16.mxu0 %v446_v4  ;;  %425 = vmatprep.subr.bf16.mxu1 %v446_v4  ;;  %v265_v33 = vld [vmem:[%s590_s2 + $0x8] sm:$0xff]  ;;  %v267_v35 = vld [vmem:[%s590_s2 + $0x18] sm:$0xff]  ;;  %v292_v36 = vld [vmem:[%s591_s3] sm:$0xff] }
   0x9   :  { %v293_v37 = vld [vmem:[%s591_s3 + $0x8] sm:$0xff]  ;;  %v294_v38 = vld [vmem:[%s591_s3 + $0x10] sm:$0xff]  ;;  %v295_v55 = vld [vmem:[%s591_s3 + $0x18] sm:$0xff] }
   0xa   :  { %v264_v56 = vld [vmem:[%s590_s2] sm:$0xff] }
   0xb   :  { %400 = vmatpush3.bf16.msra.mxu0 %v447_v5  ;;  %433 = vmatpush3.bf16.msra.mxu1 %v447_v5 }
   0xc   :  { %401 = vmatprep.subr.bf16.mxu0 %v448_v6  ;;  %426 = vmatprep.subr.bf16.mxu1 %v448_v6 }
   0xf   :  { %402 = vmatpush3.bf16.msra.mxu0 %v449_v7  ;;  %434 = vmatpush3.bf16.msra.mxu1 %v449_v7 }
  0x10   :  { %403 = vmatprep.subr.bf16.mxu0 %v450_v8  ;;  %427 = vmatprep.subr.bf16.mxu1 %v450_v8 }
  0x13   :  { %404 = vmatpush3.bf16.msra.mxu0 %v451_v9  ;;  %435 = vmatpush3.bf16.msra.mxu1 %v451_v9 }
  0x14   :  { %405 = vmatprep.subr.bf16.mxu0 %v452_v10  ;;  %428 = vmatprep.subr.bf16.mxu1 %v452_v10 }
  0x17   :  { %406 = vmatpush3.bf16.msra.mxu0 %v453_v13  ;;  %436 = vmatpush3.bf16.msra.mxu1 %v453_v13 }
  0x18   :  { %407 = vmatprep.subr.bf16.mxu0 %v454_v14  ;;  %429 = vmatprep.subr.bf16.mxu1 %v454_v14 }
  0x1b   :  { %408 = vmatpush3.bf16.msra.mxu0 %v455_v15  ;;  %437 = vmatpush3.bf16.msra.mxu1 %v455_v15 }
  0x1c   :  { %409 = vmatprep.subr.bf16.mxu0 %v456_v16  ;;  %430 = vmatprep.subr.bf16.mxu1 %v456_v16 }
  0x1f   :  { %410 = vmatpush3.bf16.msra.mxu0 %v457_v17  ;;  %438 = vmatpush3.bf16.msra.mxu1 %v457_v17 }
  0x22   :  { %203 = vmatmul.mubr.bf16.vlgmr.msra.gmra.mxu0 %v458_v18  ;;  %211 = vmatmul.mubr.bf16.vlgmr.msra.gmra.mxu1 %v461_v19 }
  0xe2   :  { %v411_v21 = vpop.f32.mrf.mxu0  ;;  %v417_v22 = vpop.f32.mrf.mxu1 }
  0xe4   :  { %v412_v23 = vpop.f32.mrf.mxu0  ;;  %v418_v24 = vpop.f32.mrf.mxu1 }
  0xe5   :  { %v413_v25 = vadd.f32 %v412_v23, %v411_v21  ;;  %v419_v26 = vadd.f32 %v418_v24, %v417_v22 }
  0xe6   :  { %v414_v27 = vpop.f32.mrf.mxu0  ;;  %v420_v28 = vpop.f32.mrf.mxu1 }
  0xe7   :  { %223 = vadd.xlane.f32.xlu1 %v419_v26  ;;  %219 = vadd.xlane.f32.xlu0 %v413_v25 }
  0xe8   :  { %v415_v29 = vpop.f32.mrf.mxu0  ;;  %v421_v30 = vpop.f32.mrf.mxu1 }
  0xe9   :  { %v416_v31 = vadd.f32 %v415_v29, %v414_v27  ;;  %v422_v32 = vadd.f32 %v421_v30, %v420_v28 }
  0xeb   :  { %225 = vadd.xlane.f32.xlu1 %v422_v32  ;;  %221 = vadd.xlane.f32.xlu0 %v416_v31 }
  0xfc   :  { %275 = vperm.xlu1 %441, %v265_v33  }
 0x100   :  { %280 = vperm.xlu1 %441, %v266_v34  }
 0x104   :  { %285 = vperm.xlu1 %441, %v267_v35  }
 0x108   :  { %298 = vperm.xlu1 %441, %v292_v36  }
 0x10c   :  { %303 = vperm.xlu1 %441, %v293_v37  }
 0x110   :  { %308 = vperm.xlu1 %441, %v294_v38  }
 0x170   :  { %v224_v39 = vpop.xlane.xlu1 %223  ;;  %v220_v40 = vpop.xlane.xlu0 %219 }
 0x171   :  { %v230_v41 = vmul.f32 0.0078125, %v224_v39  ;;  %v228_v42 = vmul.f32 0.0078125, %v220_v40 }
 0x173   :  { %v232_v43 = vsub.f32 %v413_v25, %v228_v42  ;;  %v234_v46 = vsub.f32 %v419_v26, %v230_v41 }
 0x174   :  { %v226_v44 = vpop.xlane.xlu1 %225  ;;  %v222_v45 = vpop.xlane.xlu0 %221 }
 0x175   :  { %v231_v47 = vmul.f32 0.0078125, %v226_v44  ;;  %v229_v48 = vmul.f32 0.0078125, %v222_v45  ;;  %v236_v49 = vmul.f32 %v232_v43, %v232_v43  ;;  %v238_v52 = vmul.f32 %v234_v46, %v234_v46 }
 0x177   :  { %v233_v50 = vsub.f32 %v416_v31, %v229_v48  ;;  %240 = vadd.xlane.f32.xlu0 %v236_v49  ;;  %v235_v51 = vsub.f32 %v422_v32, %v231_v47 }
 0x178   :  { %v276_v57 = vpop.permute.xlu1 %275 }
 0x179   :  { %v237_v53 = vmul.f32 %v233_v50, %v233_v50  ;;  %v239_v54 = vmul.f32 %v235_v51, %v235_v51 }
 0x17b   :  { %244 = vadd.xlane.f32.xlu0 %v238_v52  ;;  %242 = vadd.xlane.f32.xlu1 %v237_v53 }
 0x17c   :  { %v281_v58 = vpop.permute.xlu1 %280 }
 0x17f   :  { %246 = vadd.xlane.f32.xlu1 %v239_v54 }
 0x180   :  { %v286_v59 = vpop.permute.xlu1 %285 }
 0x184   :  { %v299_v60 = vpop.permute.xlu1 %298 }
 0x188   :  { %v304_v61 = vpop.permute.xlu1 %303 }
 0x18c   :  { %v309_v62 = vpop.permute.xlu1 %308 }
 0x190   :  { %313 = vperm.xlu1 %441, %v295_v55  }
 0x191   :  { %270 = vperm.xlu0 %440, %v264_v56  }
 0x200   :  { %v241_v63 = vpop.xlane.xlu0 %240 }
 0x201   :  { %v248_v0 = vmul.f32 0.0078125, %v241_v63 }
 0x203   :  { %v252_v1 = vadd.f32 1e-05, %v248_v0 }
 0x204   :  { %v243_v2 = vpop.xlane.xlu1 %242  ;;  %v245_v3 = vpop.xlane.xlu0 %244 }
 0x205   :  { %464 = vrsqrt.f32 %v252_v1  ;;  %v249_v4 = vmul.f32 0.0078125, %v243_v2  ;;  %v250_v5 = vmul.f32 0.0078125, %v245_v3 }
 0x207   :  { %v253_v6 = vadd.f32 1e-05, %v249_v4  ;;  %v254_v7 = vadd.f32 1e-05, %v250_v5 }
 0x208   :  { %v247_v8 = vpop.xlane.xlu1 %246 }
 0x209   :  { %466 = vrsqrt.f32 %v253_v6  ;;  %v251_v9 = vmul.f32 0.0078125, %v247_v8 }
 0x20a   :  { %468 = vrsqrt.f32 %v254_v7 }
 0x20b   :  { %v255_v10 = vadd.f32 1e-05, %v251_v9 }
 0x20c   :  { %v271_v12 = vpop.permute.xlu0 %270  ;;  %v314_v29 = vpop.permute.xlu1 %313 }
 0x20d   :  { %470 = vrsqrt.f32 %v255_v10 }
 0x212   :  { %v465_v11 = vpop.eup %464 }
 0x213   :  { %v260_v13 = vmul.f32 %v465_v11, %v232_v43 }
 0x215   :  { %v288_v14 = vmul.f32 %v271_v12, %v260_v13 }
 0x216   :  { %v467_v15 = vpop.eup %466 }
 0x217   :  { %v469_v16 = vpop.eup %468  ;;  %v261_v17 = vmul.f32 %v467_v15, %v233_v50  ;;  %v316_v18 = vadd.f32 %v299_v60, %v288_v14 }
 0x218   :  { %v262_v19 = vmul.f32 %v469_v16, %v234_v46 }
 0x219   :  { %v289_v20 = vmul.f32 %v276_v57, %v261_v17  ;;  %v324_v25 = vmul.f32 0.2, %v316_v18  ;;  %vm320_vm0 = vcmp.gt.f32.partialorder %v316_v18, 0.0 }
 0x21a   :  { %v471_v21 = vpop.eup %470  ;;  %v290_v22 = vmul.f32 %v281_v58, %v262_v19 }
 0x21b   :  { %v263_v23 = vmul.f32 %v471_v21, %v235_v51  ;;  %v317_v24 = vadd.f32 %v304_v61, %v289_v20  ;;  %v328_v33 = vsel %vm320_vm0, %v316_v18, %v324_v25 }
 0x21c   :  { %v318_v26 = vadd.f32 %v309_v62, %v290_v22 }
 0x21d   :  { %v291_v27 = vmul.f32 %v286_v59, %v263_v23  ;;  %vm321_vm1 = vcmp.gt.f32.partialorder %v317_v24, 0.0  ;;  %v325_v28 = vmul.f32 0.2, %v317_v24 }
 0x21e   :  { %v326_v31 = vmul.f32 0.2, %v318_v26  ;;  %vm322_vm2 = vcmp.gt.f32.partialorder %v318_v26, 0.0 }
 0x21f   :  { %v319_v30 = vadd.f32 %v314_v29, %v291_v27  ;;  %v329_v32 = vsel %vm321_vm1, %v317_v24, %v325_v28 }
 0x220   :  { %v387_v34 = vpack.c.bf16 %v329_v32, %v328_v33  ;;  %v330_v36 = vsel %vm322_vm2, %v318_v26, %v326_v31 }
 0x221   :  { %vm323_vm3 = vcmp.gt.f32.partialorder %v319_v30, 0.0  ;;  %v327_v35 = vmul.f32 0.2, %v319_v30 }
 0x222   :  { %388 = vst [vmem:[%s592_s4] sm:$0xff] %v387_v34  }
 0x223   :  { %v331_v37 = vsel %vm323_vm3, %v319_v30, %v327_v35 }
 0x224   :  { %v392_v38 = vpack.c.bf16 %v331_v37, %v330_v36 }
 0x226   :  { %394 = vst [vmem:[%s592_s4 + $0x8] sm:$0xff] %v392_v38  }

// kernel: vae_forward.15
= control target key start
LH: loop header
LB: loop body
LE: loop exit
PB: predicated region body
PF: predicated region fallthrough
CT: control target
= control target key end

     0   :  { %v1006_v48 = vmov 0   ;;  %vm500_vm0 = vcmask 261120   ;;  %vm774_vm2 = vcmask 257024   ;;  %s1364_s1 = inlined_call_operand.vmem [shape: bf16[512,32], index: 1, kind: input, shape index: {}]   ;;  %s1365_s0 = inlined_call_operand.vmem [shape: bf16[64,512], index: 0, kind: input, shape index: {}]   ;;  %s1366_s2 = inlined_call_operand.vmem [shape: f32[64,1], index: 2, kind: input, shape index: {}]   ;;  %s1367_s3 = inlined_call_operand.vmem [shape: f32[64,1], index: 3, kind: input, shape index: {}]   ;;  %s1368_s4 = inlined_call_operand.vmem [shape: bf16[64,32], index: 4, kind: output, shape index: {}]  }
   0x1   :  { %v934_v0 = vld [vmem:[%s1364_s1 + $0x78] sm:$0xff]   ;;  %v938_v4 = vld [vmem:[%s1364_s1 + $0x70] sm:$0xff]   ;;  %v942_v8 = vld [vmem:[%s1364_s1 + $0x68] sm:$0xff]   ;;  %933 = vset.pattern.permute.xlu1 %v1006_v48  ;;  %932 = vset.pattern.permute.xlu0 %v1006_v48 }
   0x2   :  { %v935_v1 = vld [vmem:[%s1364_s1 + $0xf8] sm:$0xff]   ;;  %851 = vmatprep.subr.bf16.mxu0 %v934_v0  ;;  %v939_v5 = vld [vmem:[%s1364_s1 + $0xf0] sm:$0xff]   ;;  %v943_v9 = vld [vmem:[%s1364_s1 + $0xe8] sm:$0xff]  }
   0x3   :  { %v936_v2 = vld [vmem:[%s1364_s1 + $0x38] sm:$0xff]   ;;  %891 = vmatprep.subr.bf16.mxu1 %v935_v1  ;;  %v940_v6 = vld [vmem:[%s1364_s1 + $0x30] sm:$0xff]   ;;  %v944_v10 = vld [vmem:[%s1364_s1 + $0x28] sm:$0xff]  }
   0x4   :  { %v937_v3 = vld [vmem:[%s1364_s1 + $0xb8] sm:$0xff]   ;;  %852 = vmatpush3.bf16.msra.mxu0 %v936_v2  ;;  %v941_v7 = vld [vmem:[%s1364_s1 + $0xb0] sm:$0xff]   ;;  %v945_v11 = vld [vmem:[%s1364_s1 + $0xa8] sm:$0xff]  }
   0x5   :  { %892 = vmatpush3.bf16.msra.mxu1 %v937_v3  ;;  %853 = vmatprep.subr.bf16.mxu0 %v938_v4  ;;  %v946_v12 = vld [vmem:[%s1364_s1 + $0x60] sm:$0xff]   ;;  %v950_v16 = vld [vmem:[%s1364_s1 + $0x58] sm:$0xff]   ;;  %v954_v20 = vld [vmem:[%s1364_s1 + $0x50] sm:$0xff]  }
   0x6   :  { %893 = vmatprep.subr.bf16.mxu1 %v939_v5  ;;  %v947_v13 = vld [vmem:[%s1364_s1 + $0xe0] sm:$0xff]   ;;  %v951_v17 = vld [vmem:[%s1364_s1 + $0xd8] sm:$0xff]   ;;  %v955_v21 = vld [vmem:[%s1364_s1 + $0xd0] sm:$0xff]  }
   0x7   :  { %v948_v14 = vld [vmem:[%s1364_s1 + $0x20] sm:$0xff]   ;;  %v952_v18 = vld [vmem:[%s1364_s1 + $0x18] sm:$0xff]   ;;  %v956_v22 = vld [vmem:[%s1364_s1 + $0x10] sm:$0xff]  }
   0x8   :  { %854 = vmatpush3.bf16.msra.mxu0 %v940_v6  ;;  %v949_v15 = vld [vmem:[%s1364_s1 + $0xa0] sm:$0xff]   ;;  %v953_v19 = vld [vmem:[%s1364_s1 + $0x98] sm:$0xff]   ;;  %v957_v23 = vld [vmem:[%s1364_s1 + $0x90] sm:$0xff]  }
   0x9   :  { %894 = vmatpush3.bf16.msra.mxu1 %v941_v7  ;;  %855 = vmatprep.subr.bf16.mxu0 %v942_v8  ;;  %v958_v24 = vld [vmem:[%s1364_s1 + $0x48] sm:$0xff]   ;;  %v962_v28 = vld [vmem:[%s1364_s1 + $0x40] sm:$0xff]   ;;  %v665_v48 = vld [vmem:[%s1367_s3 + $0x18] sm:$0xff] }
   0xa   :  { %895 = vmatprep.subr.bf16.mxu1 %v943_v9  ;;  %v959_v25 = vld [vmem:[%s1364_s1 + $0xc8] sm:$0xff]   ;;  %v963_v29 = vld [vmem:[%s1364_s1 + $0xc0] sm:$0xff]  }
   0xb   :  { %v960_v26 = vld [vmem:[%s1364_s1 + $0x8] sm:$0xff]   ;;  %v964_v30 = vld [vmem:[%s1364_s1] sm:$0xff]  }
   0xc   :  { %856 = vmatpush3.bf16.msra.mxu0 %v944_v10  ;;  %v961_v27 = vld [vmem:[%s1364_s1 + $0x88] sm:$0xff]   ;;  %v965_v31 = vld [vmem:[%s1364_s1 + $0x80] sm:$0xff]  }
   0xd   :  { %896 = vmatpush3.bf16.msra.mxu1 %v945_v11  ;;  %857 = vmatprep.subr.bf16.mxu0 %v946_v12  ;;  %v966_v32 = vld [vmem:[%s1365_s0] ss:$16 sps:$4 sm:$0xff]   ;;  %v968_v33 = vld [vmem:[%s1365_s0 + $0x4] ss:$16 sps:$4 sm:$0xff]   ;;  %v969_v34 = vld [vmem:[%s1365_s0 + $0x8] ss:$16 sps:$4 sm:$0xff]  }
   0xe   :  { %897 = vmatprep.subr.bf16.mxu1 %v947_v13  ;;  %v971_v35 = vld [vmem:[%s1365_s0 + $0xc] ss:$16 sps:$4 sm:$0xff]   ;;  %402 = vmatprep.mubr.bf16.mxu0 %v968_v33  ;;  %v972_v36 = vld [vmem:[%s1365_s0 + $0x24] ss:$16 sps:$4 sm:$0xff]   ;;  %v976_v38 = vld [vmem:[%s1365_s0 + $0x20] ss:$16 sps:$4 sm:$0xff]  }
   0xf   :  { %467 = vmatprep.mubr.bf16.mxu1 %v971_v35  ;;  %v974_v37 = vld [vmem:[%s1365_s0 + $0x2c] ss:$16 sps:$4 sm:$0xff]   ;;  %v977_v39 = vld [vmem:[%s1365_s0 + $0x28] ss:$16 sps:$4 sm:$0xff]   ;;  %v978_v40 = vld [vmem:[%s1365_s0 + $0x44] ss:$16 sps:$4 sm:$0xff]  }
  0x10   :  { %858 = vmatpush3.bf16.msra.mxu0 %v948_v14  ;;  %v980_v41 = vld [vmem:[%s1365_s0 + $0x4c] ss:$16 sps:$4 sm:$0xff]   ;;  %v982_v42 = vld [vmem:[%s1365_s0 + $0x40] ss:$16 sps:$4 sm:$0xff]   ;;  %v983_v43 = vld [vmem:[%s1365_s0 + $0x48] ss:$16 sps:$4 sm:$0xff]  }
  0x11   :  { %898 = vmatpush3.bf16.msra.mxu1 %v949_v15  ;;  %859 = vmatprep.subr.bf16.mxu0 %v950_v16  ;;  %v984_v44 = vld [vmem:[%s1365_s0 + $0x64] ss:$16 sps:$4 sm:$0xff]   ;;  %v986_v45 = vld [vmem:[%s1365_s0 + $0x6c] ss:$16 sps:$4 sm:$0xff]   ;;  %v988_v46 = vld [vmem:[%s1365_s0 + $0x60] ss:$16 sps:$4 sm:$0xff]  }
  0x12   :  { %899 = vmatprep.subr.bf16.mxu1 %v951_v17  ;;  %v989_v47 = vld [vmem:[%s1365_s0 + $0x68] ss:$16 sps:$4 sm:$0xff]  }
  0x14   :  { %860 = vmatpush3.bf16.msra.mxu0 %v952_v18 }
  0x15   :  { %900 = vmatpush3.bf16.msra.mxu1 %v953_v19  ;;  %861 = vmatprep.subr.bf16.mxu0 %v954_v20 }
  0x16   :  { %901 = vmatprep.subr.bf16.mxu1 %v955_v21 }
  0x18   :  { %862 = vmatpush3.bf16.msra.mxu0 %v956_v22 }
  0x19   :  { %902 = vmatpush3.bf16.msra.mxu1 %v957_v23  ;;  %863 = vmatprep.subr.bf16.mxu0 %v958_v24 }
  0x1a   :  { %903 = vmatprep.subr.bf16.mxu1 %v959_v25 }
  0x1c   :  { %864 = vmatpush3.bf16.msra.mxu0 %v960_v26 }
  0x1d   :  { %904 = vmatpush3.bf16.msra.mxu1 %v961_v27  ;;  %865 = vmatprep.subr.bf16.mxu0 %v962_v28 }
  0x1e   :  { %905 = vmatprep.subr.bf16.mxu1 %v963_v29 }
  0x20   :  { %866 = vmatpush3.bf16.msra.mxu0 %v964_v30 }
  0x21   :  { %906 = vmatpush3.bf16.msra.mxu1 %v965_v31 }
  0x23   :  { %403 = vmatmul.mubr.bf16.vlgmr.msra.gmra.mxu0 %v966_v32 }
  0x24   :  { %468 = vmatmul.mubr.bf16.vlgmr.msra.gmra.mxu1 %v969_v34  ;;  %410 = vmatprep.mubr.bf16.mxu0 %v972_v36 }
  0x25   :  { %475 = vmatprep.mubr.bf16.mxu1 %v974_v37 }
  0x2b   :  { %411 = vmatmul.mubr.bf16.gmra.mxu0 %v976_v38 }
  0x2c   :  { %476 = vmatmul.mubr.bf16.gmra.mxu1 %v977_v39  ;;  %418 = vmatprep.mubr.bf16.mxu0 %v978_v40 }
  0x2d   :  { %483 = vmatprep.mubr.bf16.mxu1 %v980_v41  ;;  %v607_v41 = vld [vmem:[%s1366_s2 + $0x8] sm:$0xff] }
  0x33   :  { %419 = vmatmul.mubr.bf16.gmra.mxu0 %v982_v42  ;;  %v608_v42 = vld [vmem:[%s1366_s2 + $0x10] sm:$0xff] }
  0x34   :  { %484 = vmatmul.mubr.bf16.gmra.mxu1 %v983_v43  ;;  %426 = vmatprep.mubr.bf16.mxu0 %v984_v44  ;;  %v609_v43 = vld [vmem:[%s1366_s2 + $0x18] sm:$0xff]  ;;  %v606_v44 = vld [vmem:[%s1366_s2] sm:$0xff] }
  0x35   :  { %491 = vmatprep.mubr.bf16.mxu1 %v986_v45  ;;  %v610_v45 = vld [vmem:[%s1366_s2 + $0x20] sm:$0xff] }
  0x3b   :  { %427 = vmatmul.mubr.bf16.gmra.mxu0 %v988_v46  ;;  %v663_v46 = vld [vmem:[%s1367_s3 + $0x8] sm:$0xff] }
  0x3c   :  { %492 = vmatmul.mubr.bf16.gmra.mxu1 %v989_v47  ;;  %v611_v47 = vld [vmem:[%s1366_s2 + $0x28] sm:$0xff] }
  0xe3   :  { %v867_v49 = vpop.f32.mrf.mxu0 }
  0xe4   :  { %v907_v50 = vpop.f32.mrf.mxu1 }
  0xe5   :  { %v868_v51 = vpop.f32.mrf.mxu0 }
  0xe6   :  { %v869_v52 = vadd.f32 %v868_v51, %v867_v49  ;;  %v908_v53 = vpop.f32.mrf.mxu1  ;;  %v612_v49 = vld [vmem:[%s1366_s2 + $0x30] sm:$0xff]  ;;  %v613_v51 = vld [vmem:[%s1366_s2 + $0x38] sm:$0xff] }
  0xe7   :  { %v909_v54 = vadd.f32 %v908_v53, %v907_v50  ;;  %v870_v55 = vpop.f32.mrf.mxu0  ;;  %v667_v50 = vld [vmem:[%s1367_s3 + $0x28] sm:$0xff] }
  0xe8   :  { %v910_v56 = vpop.f32.mrf.mxu1 }
  0xe9   :  { %v871_v57 = vpop.f32.mrf.mxu0  ;;  %v1176_v58 = vadd.f32 %v909_v54, %v869_v52 }
  0xea   :  { %v872_v59 = vadd.f32 %v871_v57, %v870_v55  ;;  %v911_v60 = vpop.f32.mrf.mxu1 }
  0xeb   :  { %v912_v61 = vadd.f32 %v911_v60, %v910_v56  ;;  %v873_v62 = vpop.f32.mrf.mxu0  ;;  %v501_v63 = vsel %vm500_vm0, %v1176_v58, 0.0 }
  0xec   :  { %v913_v0 = vpop.f32.mrf.mxu1  ;;  %502 = vadd.xlane.f32.xlu0 %v501_v63  ;;  %v666_v63 = vld [vmem:[%s1367_s3 + $0x20] sm:$0xff] }
  0xed   :  { %v874_v1 = vpop.f32.mrf.mxu0  ;;  %v1180_v2 = vadd.f32 %v912_v61, %v872_v59  ;;  %v662_v61 = vld [vmem:[%s1367_s3] sm:$0xff] }
  0xee   :  { %v875_v3 = vadd.f32 %v874_v1, %v873_v62  ;;  %v914_v4 = vpop.f32.mrf.mxu1  ;;  %v664_v62 = vld [vmem:[%s1367_s3 + $0x10] sm:$0xff] }
  0xef   :  { %v915_v5 = vadd.f32 %v914_v4, %v913_v0  ;;  %v876_v6 = vpop.f32.mrf.mxu0  ;;  %v504_v7 = vsel %vm500_vm0, %v1180_v2, 0.0 }
  0xf0   :  { %v916_v8 = vpop.f32.mrf.mxu1  ;;  %505 = vadd.xlane.f32.xlu0 %v504_v7 }
  0xf1   :  { %v877_v9 = vpop.f32.mrf.mxu0  ;;  %v1184_v10 = vadd.f32 %v915_v5, %v875_v3 }
  0xf2   :  { %v878_v11 = vadd.f32 %v877_v9, %v876_v6  ;;  %v917_v12 = vpop.f32.mrf.mxu1 }
  0xf3   :  { %v918_v13 = vadd.f32 %v917_v12, %v916_v8  ;;  %v879_v14 = vpop.f32.mrf.mxu0  ;;  %v507_v15 = vsel %vm500_vm0, %v1184_v10, 0.0 }
  0xf4   :  { %v919_v16 = vpop.f32.mrf.mxu1  ;;  %508 = vadd.xlane.f32.xlu1 %v507_v15 }
  0xf5   :  { %v880_v17 = vpop.f32.mrf.mxu0  ;;  %v1188_v18 = vadd.f32 %v918_v13, %v878_v11 }
  0xf6   :  { %v881_v19 = vadd.f32 %v880_v17, %v879_v14  ;;  %v920_v20 = vpop.f32.mrf.mxu1 }
  0xf7   :  { %v921_v21 = vadd.f32 %v920_v20, %v919_v16  ;;  %v882_v22 = vpop.f32.mrf.mxu0  ;;  %v510_v23 = vsel %vm500_vm0, %v1188_v18, 0.0 }
  0xf8   :  { %v922_v24 = vpop.f32.mrf.mxu1  ;;  %511 = vadd.xlane.f32.xlu1 %v510_v23 }
  0xf9   :  { %v883_v25 = vpop.f32.mrf.mxu0  ;;  %v1192_v26 = vadd.f32 %v921_v21, %v881_v19 }
  0xfa   :  { %v884_v27 = vadd.f32 %v883_v25, %v882_v22  ;;  %v923_v28 = vpop.f32.mrf.mxu1 }
  0xfb   :  { %v924_v29 = vadd.f32 %v923_v28, %v922_v24  ;;  %v885_v30 = vpop.f32.mrf.mxu0  ;;  %v513_v31 = vsel %vm500_vm0, %v1192_v26, 0.0 }
  0xfc   :  { %v925_v32 = vpop.f32.mrf.mxu1  ;;  %514 = vadd.xlane.f32.xlu0 %v513_v31 }
  0xfd   :  { %v886_v33 = vpop.f32.mrf.mxu0  ;;  %v1196_v34 = vadd.f32 %v924_v29, %v884_v27 }
  0xfe   :  { %v887_v35 = vadd.f32 %v886_v33, %v885_v30  ;;  %v926_v36 = vpop.f32.mrf.mxu1 }
  0xff   :  { %v927_v37 = vadd.f32 %v926_v36, %v925_v32  ;;  %v516_v38 = vsel %vm500_vm0, %v1196_v34, 0.0  ;;  %v888_v52 = vpop.f32.mrf.mxu0 }
 0x100   :  { %517 = vadd.xlane.f32.xlu1 %v516_v38  ;;  %v928_v53 = vpop.f32.mrf.mxu1 }
 0x101   :  { %v1200_v39 = vadd.f32 %v927_v37, %v887_v35  ;;  %v889_v54 = vpop.f32.mrf.mxu0 }
 0x102   :  { %v929_v55 = vpop.f32.mrf.mxu1  ;;  %v890_v56 = vadd.f32 %v889_v54, %v888_v52 }
 0x103   :  { %v519_v40 = vsel %vm500_vm0, %v1200_v39, 0.0  ;;  %v930_v57 = vadd.f32 %v929_v55, %v928_v53 }
 0x104   :  { %520 = vadd.xlane.f32.xlu0 %v519_v40 }
 0x105   :  { %v497_v59 = vadd.f32 %v930_v57, %v890_v56 }
 0x107   :  { %v522_v60 = vsel %vm500_vm0, %v497_v59, 0.0 }
 0x111   :  { %621 = vperm.xlu1 %933, %v607_v41  }
 0x115   :  { %626 = vperm.xlu1 %933, %v608_v42  }
 0x119   :  { %631 = vperm.xlu1 %933, %v609_v43  }
 0x11a   :  { %616 = vperm.xlu0 %932, %v606_v44  }
 0x11d   :  { %636 = vperm.xlu1 %933, %v610_v45  }
 0x11e   :  { %677 = vperm.xlu0 %932, %v663_v46  }
 0x121   :  { %641 = vperm.xlu1 %933, %v611_v47   ;;  %v668_v47 = vld [vmem:[%s1367_s3 + $0x30] sm:$0xff] }
 0x122   :  { %687 = vperm.xlu0 %932, %v665_v48  }
 0x125   :  { %646 = vperm.xlu1 %933, %v612_v49  }
 0x126   :  { %697 = vperm.xlu0 %932, %v667_v50  }
 0x129   :  { %651 = vperm.xlu1 %933, %v613_v51  }
 0x14d   :  { %523 = vadd.xlane.f32.xlu1 %v522_v60 }
 0x15e   :  { %672 = vperm.xlu1 %933, %v662_v61  }
 0x162   :  { %682 = vperm.xlu1 %933, %v664_v62  }
 0x166   :  { %692 = vperm.xlu1 %933, %v666_v63  }
 0x175   :  { %v503_v0 = vpop.xlane.xlu0 %502 }
 0x176   :  { %v526_v1 = vmul.f32 0.03125, %v503_v0 }
 0x178   :  { %v1248_v3 = vsub.f32 %v1176_v58, %v526_v1 }
 0x179   :  { %v506_v4 = vpop.xlane.xlu0 %505 }
 0x17a   :  { %v542_v5 = vmul.f32 %v1248_v3, %v1248_v3  ;;  %v527_v7 = vmul.f32 0.03125, %v506_v4 }
 0x17c   :  { %v550_v6 = vsel %vm500_vm0, %v542_v5, 0.0  ;;  %v1257_v12 = vsub.f32 %v1180_v2, %v527_v7 }
 0x17d   :  { %v509_v8 = vpop.xlane.xlu1 %508  ;;  %551 = vadd.xlane.f32.xlu0 %v550_v6 }
 0x17e   :  { %v528_v9 = vmul.f32 0.03125, %v509_v8  ;;  %v543_v19 = vmul.f32 %v1257_v12, %v1257_v12 }
 0x180   :  { %v1254_v11 = vsub.f32 %v1184_v10, %v528_v9  ;;  %v553_v21 = vsel %vm500_vm0, %v543_v19, 0.0 }
 0x181   :  { %v512_v13 = vpop.xlane.xlu1 %511 }
 0x182   :  { %v529_v14 = vmul.f32 0.03125, %v512_v13  ;;  %v544_v58 = vmul.f32 %v1254_v11, %v1254_v11 }
 0x184   :  { %v556_v15 = vsel %vm500_vm0, %v544_v58, 0.0  ;;  %v1263_v16 = vsub.f32 %v1188_v18, %v529_v14 }
 0x185   :  { %557 = vadd.xlane.f32.xlu0 %v556_v15  ;;  %v515_v17 = vpop.xlane.xlu0 %514 }
 0x186   :  { %v530_v10 = vmul.f32 0.03125, %v515_v17  ;;  %v545_v22 = vmul.f32 %v1263_v16, %v1263_v16 }
 0x188   :  { %v1268_v20 = vsub.f32 %v1192_v26, %v530_v10  ;;  %v559_v26 = vsel %vm500_vm0, %v545_v22, 0.0 }
 0x189   :  { %v518_v2 = vpop.xlane.xlu1 %517 }
 0x18a   :  { %v531_v23 = vmul.f32 0.03125, %v518_v2  ;;  %554 = vadd.xlane.f32.xlu1 %v553_v21  ;;  %v546_v18 = vmul.f32 %v1268_v20, %v1268_v20 }
 0x18c   :  { %v1276_v24 = vsub.f32 %v1196_v34, %v531_v23  ;;  %v562_v25 = vsel %vm500_vm0, %v546_v18, 0.0  ;;  %v669_v34 = vld [vmem:[%s1367_s3 + $0x38] sm:$0xff] }
 0x18d   :  { %563 = vadd.xlane.f32.xlu0 %v562_v25  ;;  %v521_v27 = vpop.xlane.xlu0 %520  ;;  %v1292_v35 = vpop.permute.xlu1 %621 }
 0x18e   :  { %v532_v28 = vmul.f32 0.03125, %v521_v27  ;;  %560 = vadd.xlane.f32.xlu1 %v559_v26  ;;  %v547_v29 = vmul.f32 %v1276_v24, %v1276_v24 }
 0x190   :  { %v1283_v30 = vsub.f32 %v1200_v39, %v532_v28  ;;  %v565_v31 = vsel %vm500_vm0, %v547_v29, 0.0 }
 0x191   :  { %v627_v36 = vpop.permute.xlu1 %626 }
 0x192   :  { %566 = vadd.xlane.f32.xlu1 %v565_v31  ;;  %v548_v32 = vmul.f32 %v1283_v30, %v1283_v30 }
 0x194   :  { %v568_v33 = vsel %vm500_vm0, %v548_v32, 0.0 }
 0x195   :  { %569 = vadd.xlane.f32.xlu0 %v568_v33  ;;  %v1294_v37 = vpop.permute.xlu1 %631  ;;  %v617_v48 = vpop.permute.xlu0 %616 }
 0x199   :  { %v1296_v38 = vpop.permute.xlu1 %636  ;;  %v678_v49 = vpop.permute.xlu0 %677 }
 0x19d   :  { %v1298_v39 = vpop.permute.xlu1 %641  ;;  %v1312_v50 = vpop.permute.xlu0 %687 }
 0x1a1   :  { %v1300_v40 = vpop.permute.xlu1 %646  ;;  %v1314_v51 = vpop.permute.xlu0 %697 }
 0x1a5   :  { %v1302_v41 = vpop.permute.xlu1 %651 }
 0x1ab   :  { %707 = vperm.xlu0 %932, %v669_v34  }
 0x1d6   :  { %v524_v42 = vpop.xlane.xlu1 %523 }
 0x1d7   :  { %v533_v43 = vmul.f32 0.03125, %v524_v42 }
 0x1d9   :  { %v1304_v44 = vsub.f32 %v497_v59, %v533_v43 }
 0x1da   :  { %v673_v52 = vpop.permute.xlu1 %672 }
 0x1db   :  { %v549_v45 = vmul.f32 %v1304_v44, %v1304_v44 }
 0x1dd   :  { %v571_v46 = vsel %vm500_vm0, %v549_v45, 0.0 }
 0x1de   :  { %572 = vadd.xlane.f32.xlu1 %v571_v46  ;;  %v683_v55 = vpop.permute.xlu1 %682 }
 0x1e2   :  { %v693_v59 = vpop.permute.xlu1 %692 }
 0x1ef   :  { %702 = vperm.xlu1 %933, %v668_v47  }
 0x206   :  { %v552_v53 = vpop.xlane.xlu0 %551 }
 0x207   :  { %v574_v54 = vmul.f32 0.03125, %v552_v53 }
 0x209   :  { %v582_v56 = vadd.f32 1e-05, %v574_v54 }
 0x20b   :  { %990 = vrsqrt.f32 %v582_v56 }
 0x20e   :  { %v558_v57 = vpop.xlane.xlu0 %557 }
 0x20f   :  { %v576_v60 = vmul.f32 0.03125, %v558_v57 }
 0x211   :  { %v584_v61 = vadd.f32 1e-05, %v576_v60 }
 0x213   :  { %992 = vrsqrt.f32 %v584_v61  ;;  %v555_v62 = vpop.xlane.xlu1 %554 }
 0x214   :  { %v575_v63 = vmul.f32 0.03125, %v555_v62 }
 0x216   :  { %v583_v0 = vadd.f32 1e-05, %v575_v63  ;;  %v564_v1 = vpop.xlane.xlu0 %563 }
 0x217   :  { %v578_v4 = vmul.f32 0.03125, %v564_v1  ;;  %v561_v5 = vpop.xlane.xlu1 %560 }
 0x218   :  { %v991_v6 = vpop.eup %990  ;;  %994 = vrsqrt.f32 %v583_v0  ;;  %v577_v7 = vmul.f32 0.03125, %v561_v5 }
 0x219   :  { %v598_v8 = vmul.f32 %v991_v6, %v1248_v3  ;;  %v586_v9 = vadd.f32 1e-05, %v578_v4 }
 0x21a   :  { %v585_v13 = vadd.f32 1e-05, %v577_v7 }
 0x21b   :  { %v654_v14 = vmul.f32 %v617_v48, %v598_v8  ;;  %996 = vrsqrt.f32 %v586_v9  ;;  %v567_v58 = vpop.xlane.xlu1 %566 }
 0x21c   :  { %998 = vrsqrt.f32 %v585_v13  ;;  %v579_v15 = vmul.f32 0.03125, %v567_v58 }
 0x21d   :  { %v710_v17 = vadd.f32 %v673_v52, %v654_v14 }
 0x21e   :  { %v587_v19 = vadd.f32 1e-05, %v579_v15 }
 0x21f   :  { %vm718_vm1 = vcmp.gt.f32.partialorder %v710_v17, 0.0  ;;  %v726_v10 = vmul.f32 0.2, %v710_v17 }
 0x220   :  { %v993_v2 = vpop.eup %992  ;;  %1000 = vrsqrt.f32 %v587_v19 }
 0x221   :  { %v734_v21 = vsel %vm718_vm1, %v710_v17, %v726_v10  ;;  %v600_v22 = vmul.f32 %v993_v2, %v1254_v11 }
 0x222   :  { %v843_v23 = vpack.c.bf16 %v734_v21, %v734_v21 }
 0x223   :  { %v656_v18 = vmul.f32 %v627_v36, %v600_v22 }
 0x224   :  { %775 = vst.msk [vmem:[%s1368_s4] sm:$0xf] %vm774_vm2, %v843_v23 }
 0x225   :  { %v995_v3 = vpop.eup %994  ;;  %v712_v25 = vadd.f32 %v683_v55, %v656_v18 }
 0x226   :  { %v599_v27 = vmul.f32 %v995_v3, %v1257_v12 }
 0x227   :  { %vm720_vm3 = vcmp.gt.f32.partialorder %v712_v25, 0.0  ;;  %v728_v26 = vmul.f32 0.2, %v712_v25 }
 0x228   :  { %v997_v28 = vpop.eup %996  ;;  %v655_v29 = vmul.f32 %v1292_v35, %v599_v27 }
 0x229   :  { %v999_v31 = vpop.eup %998  ;;  %v736_v32 = vsel %vm720_vm3, %v712_v25, %v728_v26  ;;  %v602_v11 = vmul.f32 %v997_v28, %v1268_v20 }
 0x22a   :  { %v845_v33 = vpack.c.bf16 %v736_v32, %v736_v32  ;;  %v711_v34 = vadd.f32 %v678_v49, %v655_v29  ;;  %v601_v36 = vmul.f32 %v999_v31, %v1263_v16 }
 0x22b   :  { %v658_v42 = vmul.f32 %v1296_v38, %v602_v11 }
 0x22c   :  { %vm719_vm4 = vcmp.gt.f32.partialorder %v711_v34, 0.0  ;;  %v727_v43 = vmul.f32 0.2, %v711_v34  ;;  %v657_v45 = vmul.f32 %v1294_v37, %v601_v36  ;;  %777 = vst.msk [vmem:[%s1368_s4 + $0x8] sm:$0xf] %vm774_vm2, %v845_v33 }
 0x22d   :  { %v1001_v12 = vpop.eup %1000  ;;  %v714_v35 = vadd.f32 %v693_v59, %v658_v42 }
 0x22e   :  { %v735_v46 = vsel %vm719_vm4, %v711_v34, %v727_v43  ;;  %v713_v20 = vadd.f32 %v1312_v50, %v657_v45  ;;  %v603_v47 = vmul.f32 %v1001_v12, %v1276_v24 }
 0x22f   :  { %v844_v48 = vpack.c.bf16 %v735_v46, %v735_v46  ;;  %vm722_vm5 = vcmp.gt.f32.partialorder %v714_v35, 0.0  ;;  %v730_v16 = vmul.f32 0.2, %v714_v35 }
 0x230   :  { %vm721_vm6 = vcmp.gt.f32.partialorder %v713_v20, 0.0  ;;  %v729_v38 = vmul.f32 0.2, %v713_v20  ;;  %v659_v49 = vmul.f32 %v1298_v39, %v603_v47 }
 0x231   :  { %v738_v37 = vsel %vm722_vm5, %v714_v35, %v730_v16  ;;  %776 = vst.msk [vmem:[%s1368_s4 + $0x4] sm:$0xf] %vm774_vm2, %v844_v48 }
 0x232   :  { %v847_v52 = vpack.c.bf16 %v738_v37, %v738_v37  ;;  %v737_v53 = vsel %vm721_vm6, %v713_v20, %v729_v38  ;;  %v715_v54 = vadd.f32 %v1314_v51, %v659_v49  ;;  %v570_v51 = vpop.xlane.xlu0 %569 }
 0x233   :  { %v846_v50 = vpack.c.bf16 %v737_v53, %v737_v53  ;;  %v580_v56 = vmul.f32 0.03125, %v570_v51 }
 0x234   :  { %vm723_vm7 = vcmp.gt.f32.partialorder %v715_v54, 0.0  ;;  %v731_v24 = vmul.f32 0.2, %v715_v54  ;;  %779 = vst.msk [vmem:[%s1368_s4 + $0x10] sm:$0xf] %vm774_vm2, %v847_v52 }
 0x235   :  { %778 = vst.msk [vmem:[%s1368_s4 + $0xc] sm:$0xf] %vm774_vm2, %v846_v50  ;;  %v588_v57 = vadd.f32 1e-05, %v580_v56 }
 0x236   :  { %v739_v39 = vsel %vm723_vm7, %v715_v54, %v731_v24  ;;  %v708_v13 = vpop.permute.xlu0 %707 }
 0x237   :  { %v848_v55 = vpack.c.bf16 %v739_v39, %v739_v39  ;;  %1002 = vrsqrt.f32 %v588_v57 }
 0x239   :  { %780 = vst.msk [vmem:[%s1368_s4 + $0x14] sm:$0xf] %vm774_vm2, %v848_v55 }
 0x244   :  { %v1003_v59 = vpop.eup %1002 }
 0x245   :  { %v604_v60 = vmul.f32 %v1003_v59, %v1283_v30 }
 0x247   :  { %v660_v0 = vmul.f32 %v1300_v40, %v604_v60 }
 0x267   :  { %v573_v61 = vpop.xlane.xlu1 %572 }
 0x268   :  { %v581_v62 = vmul.f32 0.03125, %v573_v61 }
 0x26a   :  { %v589_v63 = vadd.f32 1e-05, %v581_v62 }
 0x26b   :  { %v703_v1 = vpop.permute.xlu1 %702 }
 0x26c   :  { %1004 = vrsqrt.f32 %v589_v63  ;;  %v716_v4 = vadd.f32 %v703_v1, %v660_v0 }
 0x26e   :  { %vm724_vm8 = vcmp.gt.f32.partialorder %v716_v4, 0.0  ;;  %v732_v5 = vmul.f32 0.2, %v716_v4 }
 0x270   :  { %v740_v6 = vsel %vm724_vm8, %v716_v4, %v732_v5 }
 0x271   :  { %v849_v7 = vpack.c.bf16 %v740_v6, %v740_v6 }
 0x273   :  { %781 = vst.msk [vmem:[%s1368_s4 + $0x18] sm:$0xf] %vm774_vm2, %v849_v7 }
 0x279   :  { %v1005_v8 = vpop.eup %1004 }
 0x27a   :  { %v605_v30 = vmul.f32 %v1005_v8, %v1304_v44 }
 0x27c   :  { %v661_v9 = vmul.f32 %v1302_v41, %v605_v30 }
 0x27e   :  { %v717_v14 = vadd.f32 %v708_v13, %v661_v9 }
 0x280   :  { %vm725_vm9 = vcmp.gt.f32.partialorder %v717_v14, 0.0  ;;  %v733_v40 = vmul.f32 0.2, %v717_v14 }
 0x282   :  { %v741_v58 = vsel %vm725_vm9, %v717_v14, %v733_v40 }
 0x283   :  { %v850_v15 = vpack.c.bf16 %v741_v58, %v741_v58 }
 0x285   :  { %782 = vst.msk [vmem:[%s1368_s4 + $0x1c] sm:$0xf] %vm774_vm2, %v850_v15 }

// kernel: vae_forward.17
= control target key start
LH: loop header
LB: loop body
LE: loop exit
PB: predicated region body
PF: predicated region fallthrough
CT: control target
= control target key end

     0   :  { %v279_v6 = vmov 1966171168   ;;  %v67_v8 = vlaneseq  ;;  %vm216_vm0 = vcmask 517120   ;;  %s357_s1 = inlined_call_operand.vmem [shape: bf16[256,64], index: 1, kind: input, shape index: {}]   ;;  %s358_s0 = inlined_call_operand.vmem [shape: bf16[2,256], index: 0, kind: input, shape index: {}]   ;;  %s359_s2 = inlined_call_operand.vmem [shape: f32[1,64], index: 2, kind: input, shape index: {}]   ;;  %s360_s3 = inlined_call_operand.vmem [shape: f32[2,64], index: 3, kind: output, shape index: {}]  }
   0x1   :  { %v263_v0 = vld [vmem:[%s357_s1 + $0x78] sm:$0xff]   ;;  %v265_v2 = vld [vmem:[%s357_s1 + $0x70] sm:$0xff]   ;;  %v267_v4 = vld [vmem:[%s357_s1 + $0x68] sm:$0xff]   ;;  %v65_v7 = vunpack.c.l.s4 %v279_v6 }
   0x2   :  { %v264_v1 = vld [vmem:[%s357_s1 + $0x38] sm:$0xff]   ;;  %240 = vmatprep.subr.bf16.mxu0 %v263_v0  ;;  %v266_v3 = vld [vmem:[%s357_s1 + $0x30] sm:$0xff]   ;;  %v268_v5 = vld [vmem:[%s357_s1 + $0x28] sm:$0xff]   ;;  %v68_v12 = vshrl.u32 %v67_v8, 7 }
   0x3   :  { %241 = vmatpush3.bf16.msra.mxu0 %v264_v1  ;;  %v269_v9 = vld [vmem:[%s357_s1 + $0x60] sm:$0xff]   ;;  %v66_v11 = vunpack.c.0.s8 %v65_v7  ;;  %v271_v13 = vld [vmem:[%s357_s1 + $0x58] sm:$0xff]   ;;  %v273_v16 = vld [vmem:[%s357_s1 + $0x50] sm:$0xff]  }
   0x4   :  { %242 = vmatprep.subr.bf16.mxu0 %v265_v2  ;;  %v270_v10 = vld [vmem:[%s357_s1 + $0x20] sm:$0xff]   ;;  %v272_v14 = vld [vmem:[%s357_s1 + $0x18] sm:$0xff]   ;;  %v274_v19 = vld [vmem:[%s357_s1 + $0x10] sm:$0xff]  }
   0x5   :  { %v69_v15 = vsub.s32 %v66_v11, %v68_v12  ;;  %v223_v17 = vld.sshfl [vmem:[%s358_s0] sm:$0x11 pattern:$0x75316420]  ;;  %v275_v21 = vld [vmem:[%s357_s1 + $0x48] sm:$0xff]  }
   0x6   :  { %v63_v18 = vcombine.high %v223_v17, %v223_v17  ;;  %v276_v22 = vld [vmem:[%s357_s1 + $0x8] sm:$0xff]   ;;  %v277_v23 = vld [vmem:[%s357_s1 + $0x40] sm:$0xff]  }
   0x7   :  { %243 = vmatpush3.bf16.msra.mxu0 %v266_v3  ;;  %v278_v24 = vld [vmem:[%s357_s1] sm:$0xff]   ;;  %v70_v25 = vrot.slane %v223_v17, %v69_v15 }
   0x8   :  { %244 = vmatprep.subr.bf16.mxu0 %v267_v4  ;;  %v77_v20 = vrot.slane %v63_v18, %v69_v15  ;;  %v222_v27 = vld [vmem:[%s359_s2] ss:$0 sm:$0xff] }
   0xa   :  { %208 = vmatprep.mubr.bf16.mxu0 %v77_v20 }
   0xb   :  { %245 = vmatpush3.bf16.msra.mxu0 %v268_v5 }
   0xc   :  { %246 = vmatprep.subr.bf16.mxu0 %v269_v9 }
   0xf   :  { %247 = vmatpush3.bf16.msra.mxu0 %v270_v10 }
  0x10   :  { %248 = vmatprep.subr.bf16.mxu0 %v271_v13 }
  0x13   :  { %249 = vmatpush3.bf16.msra.mxu0 %v272_v14 }
  0x14   :  { %250 = vmatprep.subr.bf16.mxu0 %v273_v16 }
  0x17   :  { %251 = vmatpush3.bf16.msra.mxu0 %v274_v19 }
  0x18   :  { %252 = vmatprep.subr.bf16.mxu0 %v275_v21 }
  0x1b   :  { %253 = vmatpush3.bf16.msra.mxu0 %v276_v22 }
  0x1c   :  { %254 = vmatprep.subr.bf16.mxu0 %v277_v23 }
  0x1f   :  { %255 = vmatpush3.bf16.msra.mxu0 %v278_v24 }
  0x22   :  { %209 = vmatmul.mubr.bf16.vlgmr.msra.gmra.mxu0 %v70_v25 }
  0xe2   :  { %v256_v26 = vpop.f32.mrf.mxu0 }
  0xe4   :  { %v257_v28 = vpop.f32.mrf.mxu0 }
  0xe5   :  { %v258_v29 = vadd.f32 %v257_v28, %v256_v26 }
  0xe6   :  { %v259_v30 = vpop.f32.mrf.mxu0 }
  0xe7   :  { %v211_v31 = vadd.f32 %v258_v29, %v222_v27 }
  0xe8   :  { %v260_v32 = vpop.f32.mrf.mxu0 }
  0xe9   :  { %217 = vst.msk [vmem:[%s360_s3] sm:$0x3] %vm216_vm0, %v211_v31 }

// kernel: vae_forward.18
= control target key start
LH: loop header
LB: loop body
LE: loop exit
PB: predicated region body
PF: predicated region fallthrough
CT: control target
= control target key end

     0   :  { %v139_v1 = vmov 0   ;;  %vm52_vm0 = vcmask 261120   ;;  %v22_v6 = vlaneseq  ;;  %v140_v12 = vmov 1966171168   ;;  %s182_s1 = inlined_call_operand.vmem [shape: bf16[32,256], index: 1, kind: input, shape index: {}]   ;;  %s183_s0 = inlined_call_operand.vmem [shape: bf16[2,32], index: 0, kind: input, shape index: {}]   ;;  %s184_s2 = inlined_call_operand.vmem [shape: f32[1,256], index: 2, kind: input, shape index: {}]   ;;  %s185_s3 = inlined_call_operand.vmem [shape: bf16[2,256], index: 3, kind: output, shape index: {}]  }
   0x1   :  { %v133_v0 = vld [vmem:[%s182_s1 + $0x14] ss:$8 sps:$4 sm:$0xff]   ;;  %88 = vmatprep.mubr.bf16.mxu0 %v139_v1  ;;  %v135_v2 = vld [vmem:[%s182_s1 + $0x10] ss:$8 sps:$4 sm:$0xff]   ;;  %v136_v3 = vld [vmem:[%s182_s1 + $0x4] ss:$8 sps:$4 sm:$0xff]   ;;  %v105_v13 = vunpack.c.l.s4 %v140_v12 }
   0x2   :  { %68 = vmatprep.subr.bf16.mxu0 %v133_v0  ;;  %v138_v4 = vld [vmem:[%s182_s1] ss:$8 sps:$4 sm:$0xff]   ;;  %v23_v7 = vshrl.u32 %v22_v6, 7 }
   0x3   :  { %69 = vmatpush1.bf16.msra.mxu0 %v135_v2  ;;  %v15_v5 = vld [vmem:[%s183_s0] sm:$0x1]  ;;  %v106_v17 = vunpack.c.0.s8 %v105_v13 }
   0x4   :  { %70 = vmatprep.subr.bf16.mxu0 %v136_v3  ;;  %v24_v8 = vsub.s32 0, %v23_v7  ;;  %v20_v9 = vld [vmem:[%s184_s2] sm:$0x3]  ;;  %v28_v10 = vsub.s32 1, %v23_v7 }
   0x5   :  { %v109_v23 = vsub.s32 %v106_v17, %v23_v7 }
   0x6   :  { %v25_v11 = vrot.slane %v20_v9, %v24_v8  ;;  %v29_v14 = vrot.slane %v20_v9, %v28_v10 }
   0x7   :  { %71 = vmatpush1.bf16.msra.mxu0 %v138_v4 }
   0xa   :  { %128 = vmatmul.mubr.msk.bf16.vlgmr.msra.gmra.mxu0 %vm52_vm0, %v15_v5 }
  0xca   :  { %v90_v15 = vpop.f32.mrf.mxu0 }
  0xcb   :  { %v91_v16 = vadd.f32 %v90_v15, %v25_v11 }
  0xcc   :  { %v92_v18 = vpop.f32.mrf.mxu0 }
  0xcd   :  { %v93_v19 = vadd.f32 %v92_v18, %v29_v14  ;;  %v97_v21 = vmax.f32 %v91_v16, 0.0 }
  0xce   :  { %v94_v20 = vpop.f32.mrf.mxu0 }
  0xcf   :  { %v98_v22 = vmax.f32 %v93_v19, 0.0 }
  0xd0   :  { %v95_v24 = vpop.f32.mrf.mxu0 }
  0xd1   :  { %v129_v25 = vpack.c.bf16 %v98_v22, %v97_v21 }
  0xd3   :  { %v110_v26 = vrot.slane %v129_v25, %v109_v23 }
  0xd5   :  { %130 = vst.sshfl [vmem:[%s185_s3] sm:$0x5 pattern:$0x73625140] %v110_v26 }

// kernel: vae_forward.16
= control target key start
LH: loop header
LB: loop body
LE: loop exit
PB: predicated region body
PF: predicated region fallthrough
CT: control target
= control target key end

     0   :  { %vm982_vm0 = vcmask 64512   ;;  %vm1256_vm2 = vcmask 60416   ;;  %s2153_s1 = inlined_call_operand.vmem [shape: bf16[1024,8], index: 1, kind: input, shape index: {}]   ;;  %s2154_s0 = inlined_call_operand.vmem [shape: bf16[64,1024], index: 0, kind: input, shape index: {}]   ;;  %s2155_s2 = inlined_call_operand.vmem [shape: f32[64,1], index: 2, kind: input, shape index: {}]   ;;  %s2156_s3 = inlined_call_operand.vmem [shape: f32[64,1], index: 3, kind: input, shape index: {}]   ;;  %s2157_s4 = inlined_call_operand.vmem [shape: bf16[64,8], index: 4, kind: output, shape index: {}]  }
   0x1   :  { %v1544_v0 = vld [vmem:[%s2153_s1 + $0x78] sm:$0xff]   ;;  %v1548_v4 = vld [vmem:[%s2153_s1 + $0x70] sm:$0xff]   ;;  %v1552_v8 = vld [vmem:[%s2153_s1 + $0x68] sm:$0xff]  }
   0x2   :  { %v1545_v1 = vld [vmem:[%s2153_s1 + $0xf8] sm:$0xff]   ;;  %1381 = vmatprep.subr.bf16.mxu0 %v1544_v0  ;;  %v1549_v5 = vld [vmem:[%s2153_s1 + $0xf0] sm:$0xff]   ;;  %v1553_v9 = vld [vmem:[%s2153_s1 + $0xe8] sm:$0xff]  }
   0x3   :  { %v1546_v2 = vld [vmem:[%s2153_s1 + $0x38] sm:$0xff]   ;;  %1421 = vmatprep.subr.bf16.mxu1 %v1545_v1  ;;  %v1550_v6 = vld [vmem:[%s2153_s1 + $0x30] sm:$0xff]   ;;  %v1554_v10 = vld [vmem:[%s2153_s1 + $0x28] sm:$0xff]  }
   0x4   :  { %v1547_v3 = vld [vmem:[%s2153_s1 + $0xb8] sm:$0xff]   ;;  %1382 = vmatpush3.bf16.msra.mxu0 %v1546_v2  ;;  %v1551_v7 = vld [vmem:[%s2153_s1 + $0xb0] sm:$0xff]   ;;  %v1555_v11 = vld [vmem:[%s2153_s1 + $0xa8] sm:$0xff]  }
   0x5   :  { %1422 = vmatpush3.bf16.msra.mxu1 %v1547_v3  ;;  %1383 = vmatprep.subr.bf16.mxu0 %v1548_v4  ;;  %v1556_v12 = vld [vmem:[%s2153_s1 + $0x60] sm:$0xff]   ;;  %v1560_v16 = vld [vmem:[%s2153_s1 + $0x58] sm:$0xff]   ;;  %v1564_v20 = vld [vmem:[%s2153_s1 + $0x50] sm:$0xff]  }
   0x6   :  { %1423 = vmatprep.subr.bf16.mxu1 %v1549_v5  ;;  %v1557_v13 = vld [vmem:[%s2153_s1 + $0xe0] sm:$0xff]   ;;  %v1561_v17 = vld [vmem:[%s2153_s1 + $0xd8] sm:$0xff]   ;;  %v1565_v21 = vld [vmem:[%s2153_s1 + $0xd0] sm:$0xff]  }
   0x7   :  { %v1558_v14 = vld [vmem:[%s2153_s1 + $0x20] sm:$0xff]   ;;  %v1562_v18 = vld [vmem:[%s2153_s1 + $0x18] sm:$0xff]   ;;  %v1566_v22 = vld [vmem:[%s2153_s1 + $0x10] sm:$0xff]  }
   0x8   :  { %1384 = vmatpush3.bf16.msra.mxu0 %v1550_v6  ;;  %v1559_v15 = vld [vmem:[%s2153_s1 + $0xa0] sm:$0xff]   ;;  %v1563_v19 = vld [vmem:[%s2153_s1 + $0x98] sm:$0xff]   ;;  %v1567_v23 = vld [vmem:[%s2153_s1 + $0x90] sm:$0xff]  }
   0x9   :  { %1424 = vmatpush3.bf16.msra.mxu1 %v1551_v7  ;;  %1385 = vmatprep.subr.bf16.mxu0 %v1552_v8  ;;  %v1568_v24 = vld [vmem:[%s2153_s1 + $0x48] sm:$0xff]   ;;  %v1572_v28 = vld [vmem:[%s2153_s1 + $0x40] sm:$0xff]   ;;  %v1576_v40 = vld [vmem:[%s2153_s1 + $0x178] sm:$0xff]  }
   0xa   :  { %1425 = vmatprep.subr.bf16.mxu1 %v1553_v9  ;;  %v1569_v25 = vld [vmem:[%s2153_s1 + $0xc8] sm:$0xff]   ;;  %v1573_v29 = vld [vmem:[%s2153_s1 + $0xc0] sm:$0xff]   ;;  %v1577_v41 = vld [vmem:[%s2153_s1 + $0x1f8] sm:$0xff]  }
   0xb   :  { %v1570_v26 = vld [vmem:[%s2153_s1 + $0x8] sm:$0xff]   ;;  %v1574_v30 = vld [vmem:[%s2153_s1] sm:$0xff]   ;;  %v1578_v42 = vld [vmem:[%s2153_s1 + $0x138] sm:$0xff]  }
   0xc   :  { %1386 = vmatpush3.bf16.msra.mxu0 %v1554_v10  ;;  %v1571_v27 = vld [vmem:[%s2153_s1 + $0x88] sm:$0xff]   ;;  %v1575_v31 = vld [vmem:[%s2153_s1 + $0x80] sm:$0xff]   ;;  %v1579_v43 = vld [vmem:[%s2153_s1 + $0x1b8] sm:$0xff]  }
   0xd   :  { %1426 = vmatpush3.bf16.msra.mxu1 %v1555_v11  ;;  %1387 = vmatprep.subr.bf16.mxu0 %v1556_v12  ;;  %v18_v32 = vld [vmem:[%s2154_s0] sm:$0xff]  ;;  %v19_v34 = vld [vmem:[%s2154_s0 + $0x8] sm:$0xff]  ;;  %v1580_v44 = vld [vmem:[%s2153_s1 + $0x170] sm:$0xff]  }
   0xe   :  { %1427 = vmatprep.subr.bf16.mxu1 %v1557_v13  ;;  %v22_v33 = vld [vmem:[%s2154_s0 + $0x20] sm:$0xff]  ;;  %v23_v37 = vld [vmem:[%s2154_s0 + $0x28] sm:$0xff]  ;;  %v1581_v45 = vld [vmem:[%s2153_s1 + $0x1f0] sm:$0xff]  }
   0xf   :  { %v1269_v35 = vcombine.low %v18_v32, %v22_v33  ;;  %v1270_v36 = vcombine.high %v18_v32, %v22_v33  ;;  %v1271_v38 = vcombine.low %v19_v34, %v23_v37  ;;  %v1272_v39 = vcombine.high %v19_v34, %v23_v37  ;;  %v1582_v46 = vld [vmem:[%s2153_s1 + $0x130] sm:$0xff]   ;;  %v26_v48 = vld [vmem:[%s2154_s0 + $0x40] sm:$0xff]  ;;  %v27_v51 = vld [vmem:[%s2154_s0 + $0x48] sm:$0xff] }
  0x10   :  { %1388 = vmatpush3.bf16.msra.mxu0 %v1558_v14  ;;  %v1583_v47 = vld [vmem:[%s2153_s1 + $0x1b0] sm:$0xff]   ;;  %v30_v49 = vld [vmem:[%s2154_s0 + $0x60] sm:$0xff]  ;;  %v31_v52 = vld [vmem:[%s2154_s0 + $0x68] sm:$0xff] }
  0x11   :  { %1428 = vmatpush3.bf16.msra.mxu1 %v1559_v15  ;;  %1389 = vmatprep.subr.bf16.mxu0 %v1560_v16  ;;  %v1278_v50 = vcombine.high %v26_v48, %v30_v49  ;;  %v1277_v53 = vcombine.low %v26_v48, %v30_v49  ;;  %v1280_v54 = vcombine.high %v27_v51, %v31_v52  ;;  %v1584_v56 = vld [vmem:[%s2153_s1 + $0x168] sm:$0xff]   ;;  %v1588_v60 = vld [vmem:[%s2153_s1 + $0x160] sm:$0xff]   ;;  %v1592_v8 = vld [vmem:[%s2153_s1 + $0x158] sm:$0xff]  }
  0x12   :  { %1429 = vmatprep.subr.bf16.mxu1 %v1561_v17  ;;  %754 = vmatprep.mubr.bf16.mxu0 %v1270_v36  ;;  %v1279_v55 = vcombine.low %v27_v51, %v31_v52  ;;  %v1585_v57 = vld [vmem:[%s2153_s1 + $0x1e8] sm:$0xff]   ;;  %v1589_v61 = vld [vmem:[%s2153_s1 + $0x1e0] sm:$0xff]   ;;  %v1593_v9 = vld [vmem:[%s2153_s1 + $0x1d8] sm:$0xff]  }
  0x13   :  { %819 = vmatprep.mubr.bf16.mxu1 %v1272_v39  ;;  %v1586_v58 = vld [vmem:[%s2153_s1 + $0x128] sm:$0xff]   ;;  %v1590_v62 = vld [vmem:[%s2153_s1 + $0x120] sm:$0xff]   ;;  %v1594_v10 = vld [vmem:[%s2153_s1 + $0x118] sm:$0xff]  }
  0x14   :  { %1390 = vmatpush3.bf16.msra.mxu0 %v1562_v18  ;;  %v1587_v59 = vld [vmem:[%s2153_s1 + $0x1a8] sm:$0xff]   ;;  %v1591_v63 = vld [vmem:[%s2153_s1 + $0x1a0] sm:$0xff]   ;;  %v1595_v11 = vld [vmem:[%s2153_s1 + $0x198] sm:$0xff]  }
  0x15   :  { %1430 = vmatpush3.bf16.msra.mxu1 %v1563_v19  ;;  %1391 = vmatprep.subr.bf16.mxu0 %v1564_v20  ;;  %v34_v0 = vld [vmem:[%s2154_s0 + $0x80] sm:$0xff]  ;;  %v35_v2 = vld [vmem:[%s2154_s0 + $0x88] sm:$0xff]  ;;  %v1596_v12 = vld [vmem:[%s2153_s1 + $0x150] sm:$0xff]  }
  0x16   :  { %1431 = vmatprep.subr.bf16.mxu1 %v1565_v21  ;;  %v38_v1 = vld [vmem:[%s2154_s0 + $0xa0] sm:$0xff]  ;;  %v39_v3 = vld [vmem:[%s2154_s0 + $0xa8] sm:$0xff]  ;;  %v1597_v13 = vld [vmem:[%s2153_s1 + $0x1d0] sm:$0xff]  }
  0x17   :  { %v1286_v4 = vcombine.high %v34_v0, %v38_v1  ;;  %v1288_v5 = vcombine.high %v35_v2, %v39_v3  ;;  %v1285_v6 = vcombine.low %v34_v0, %v38_v1  ;;  %v1287_v7 = vcombine.low %v35_v2, %v39_v3  ;;  %v1598_v14 = vld [vmem:[%s2153_s1 + $0x110] sm:$0xff]   ;;  %v42_v16 = vld [vmem:[%s2154_s0 + $0xc0] sm:$0xff]  ;;  %v43_v18 = vld [vmem:[%s2154_s0 + $0xc8] sm:$0xff] }
  0x18   :  { %1392 = vmatpush3.bf16.msra.mxu0 %v1566_v22  ;;  %v1599_v15 = vld [vmem:[%s2153_s1 + $0x190] sm:$0xff]   ;;  %v46_v17 = vld [vmem:[%s2154_s0 + $0xe0] sm:$0xff]  ;;  %v47_v20 = vld [vmem:[%s2154_s0 + $0xe8] sm:$0xff]  ;;  %v1624_v0 = vmov 0  }
  0x19   :  { %1432 = vmatpush3.bf16.msra.mxu1 %v1567_v23  ;;  %1393 = vmatprep.subr.bf16.mxu0 %v1568_v24  ;;  %v1294_v19 = vcombine.high %v42_v16, %v46_v17  ;;  %v1293_v21 = vcombine.low %v42_v16, %v46_v17  ;;  %v1296_v22 = vcombine.high %v43_v18, %v47_v20  ;;  %v1600_v24 = vld [vmem:[%s2153_s1 + $0x148] sm:$0xff]   ;;  %v20_v32 = vld [vmem:[%s2154_s0 + $0x10] sm:$0xff]  ;;  %v21_v36 = vld [vmem:[%s2154_s0 + $0x18] sm:$0xff] }
  0x1a   :  { %1433 = vmatprep.subr.bf16.mxu1 %v1569_v25  ;;  %v1295_v23 = vcombine.low %v43_v18, %v47_v20  ;;  %v1601_v25 = vld [vmem:[%s2153_s1 + $0x1c8] sm:$0xff]   ;;  %v24_v33 = vld [vmem:[%s2154_s0 + $0x30] sm:$0xff]  ;;  %v25_v37 = vld [vmem:[%s2154_s0 + $0x38] sm:$0xff]  ;;  %1543 = vset.pattern.permute.xlu1 %v1624_v0 }
  0x1b   :  { %v1273_v34 = vcombine.low %v20_v32, %v24_v33  ;;  %v1275_v39 = vcombine.low %v21_v36, %v25_v37  ;;  %v37_v48 = vld [vmem:[%s2154_s0 + $0x98] sm:$0xff]  ;;  %1542 = vset.pattern.permute.xlu0 %v1624_v0 }
  0x1c   :  { %1394 = vmatpush3.bf16.msra.mxu0 %v1570_v26  ;;  %v1602_v26 = vld [vmem:[%s2153_s1 + $0x108] sm:$0xff]   ;;  %v41_v49 = vld [vmem:[%s2154_s0 + $0xb8] sm:$0xff] }
  0x1d   :  { %1434 = vmatpush3.bf16.msra.mxu1 %v1571_v27  ;;  %1395 = vmatprep.subr.bf16.mxu0 %v1572_v28  ;;  %v1603_v27 = vld [vmem:[%s2153_s1 + $0x188] sm:$0xff]   ;;  %v1604_v28 = vld [vmem:[%s2153_s1 + $0x140] sm:$0xff]  }
  0x1e   :  { %1435 = vmatprep.subr.bf16.mxu1 %v1573_v29  ;;  %v1605_v29 = vld [vmem:[%s2153_s1 + $0x1c0] sm:$0xff]  }
  0x20   :  { %1396 = vmatpush3.bf16.msra.mxu0 %v1574_v30  ;;  %v1606_v30 = vld [vmem:[%s2153_s1 + $0x100] sm:$0xff]  }
  0x21   :  { %1436 = vmatpush3.bf16.msra.mxu1 %v1575_v31  ;;  %1461 = vmatprep.subr.bf16.mxu0 %v1576_v40  ;;  %v1607_v31 = vld [vmem:[%s2153_s1 + $0x180] sm:$0xff]   ;;  %v1276_v40 = vcombine.high %v21_v36, %v25_v37 }
  0x22   :  { %1501 = vmatprep.subr.bf16.mxu1 %v1577_v41  ;;  %v32_v41 = vld [vmem:[%s2154_s0 + $0x70] sm:$0xff] }
  0x23   :  { %755 = vmatmul.mubr.bf16.vlgmr.msra.gmra.mxu0 %v1269_v35  ;;  %v1274_v35 = vcombine.high %v20_v32, %v24_v33 }
  0x24   :  { %820 = vmatmul.mubr.bf16.vlgmr.msra.gmra.mxu1 %v1271_v38  ;;  %1462 = vmatpush3.bf16.msra.mxu0 %v1578_v42  ;;  %v28_v38 = vld [vmem:[%s2154_s0 + $0x50] sm:$0xff]  ;;  %v29_v42 = vld [vmem:[%s2154_s0 + $0x58] sm:$0xff] }
  0x25   :  { %1502 = vmatpush3.bf16.msra.mxu1 %v1579_v43  ;;  %1463 = vmatprep.subr.bf16.mxu0 %v1580_v44  ;;  %v33_v43 = vld [vmem:[%s2154_s0 + $0x78] sm:$0xff]  ;;  %v1282_v44 = vcombine.high %v28_v38, %v32_v41 }
  0x26   :  { %1503 = vmatprep.subr.bf16.mxu1 %v1581_v45  ;;  %762 = vmatprep.mubr.bf16.mxu0 %v1278_v50  ;;  %v1284_v45 = vcombine.high %v29_v42, %v33_v43  ;;  %v1281_v50 = vcombine.low %v28_v38, %v32_v41  ;;  %v1283_v51 = vcombine.low %v29_v42, %v33_v43 }
  0x27   :  { %827 = vmatprep.mubr.bf16.mxu1 %v1280_v54  ;;  %v44_v54 = vld [vmem:[%s2154_s0 + $0xd0] sm:$0xff] }
  0x28   :  { %1464 = vmatpush3.bf16.msra.mxu0 %v1582_v46  ;;  %v36_v46 = vld [vmem:[%s2154_s0 + $0x90] sm:$0xff] }
  0x29   :  { %1504 = vmatpush3.bf16.msra.mxu1 %v1583_v47  ;;  %1465 = vmatprep.subr.bf16.mxu0 %v1584_v56  ;;  %v40_v47 = vld [vmem:[%s2154_s0 + $0xb0] sm:$0xff]  ;;  %v45_v56 = vld [vmem:[%s2154_s0 + $0xd8] sm:$0xff] }
  0x2a   :  { %1505 = vmatprep.subr.bf16.mxu1 %v1585_v57  ;;  %v1290_v52 = vcombine.high %v36_v46, %v40_v47  ;;  %v49_v57 = vld [vmem:[%s2154_s0 + $0xf8] sm:$0xff] }
  0x2b   :  { %763 = vmatmul.mubr.bf16.gmra.mxu0 %v1277_v53  ;;  %v1292_v53 = vcombine.high %v37_v48, %v41_v49 }
  0x2c   :  { %828 = vmatmul.mubr.bf16.gmra.mxu1 %v1279_v55  ;;  %1466 = vmatpush3.bf16.msra.mxu0 %v1586_v58  ;;  %v48_v55 = vld [vmem:[%s2154_s0 + $0xf0] sm:$0xff]  ;;  %v1289_v58 = vcombine.low %v36_v46, %v40_v47 }
  0x2d   :  { %1506 = vmatpush3.bf16.msra.mxu1 %v1587_v59  ;;  %1467 = vmatprep.subr.bf16.mxu0 %v1588_v60  ;;  %v1291_v59 = vcombine.low %v37_v48, %v41_v49  ;;  %v1298_v60 = vcombine.high %v44_v54, %v48_v55 }
  0x2e   :  { %1507 = vmatprep.subr.bf16.mxu1 %v1589_v61  ;;  %770 = vmatprep.mubr.bf16.mxu0 %v1286_v4  ;;  %v1300_v61 = vcombine.high %v45_v56, %v49_v57 }
  0x2f   :  { %835 = vmatprep.mubr.bf16.mxu1 %v1288_v5 }
  0x30   :  { %1468 = vmatpush3.bf16.msra.mxu0 %v1590_v62  ;;  %v1297_v62 = vcombine.low %v44_v54, %v48_v55 }
  0x31   :  { %1508 = vmatpush3.bf16.msra.mxu1 %v1591_v63  ;;  %1469 = vmatprep.subr.bf16.mxu0 %v1592_v8  ;;  %v1299_v63 = vcombine.low %v45_v56, %v49_v57 }
  0x32   :  { %1509 = vmatprep.subr.bf16.mxu1 %v1593_v9 }
  0x33   :  { %771 = vmatmul.mubr.bf16.gmra.mxu0 %v1285_v6 }
  0x34   :  { %836 = vmatmul.mubr.bf16.gmra.mxu1 %v1287_v7  ;;  %1470 = vmatpush3.bf16.msra.mxu0 %v1594_v10 }
  0x35   :  { %1510 = vmatpush3.bf16.msra.mxu1 %v1595_v11  ;;  %1471 = vmatprep.subr.bf16.mxu0 %v1596_v12 }
  0x36   :  { %1511 = vmatprep.subr.bf16.mxu1 %v1597_v13  ;;  %778 = vmatprep.mubr.bf16.mxu0 %v1294_v19 }
  0x37   :  { %843 = vmatprep.mubr.bf16.mxu1 %v1296_v22 }
  0x38   :  { %1472 = vmatpush3.bf16.msra.mxu0 %v1598_v14 }
  0x39   :  { %1512 = vmatpush3.bf16.msra.mxu1 %v1599_v15  ;;  %1473 = vmatprep.subr.bf16.mxu0 %v1600_v24 }
  0x3a   :  { %1513 = vmatprep.subr.bf16.mxu1 %v1601_v25 }
  0x3b   :  { %779 = vmatmul.mubr.bf16.gmra.mxu0 %v1293_v21 }
  0x3c   :  { %844 = vmatmul.mubr.bf16.gmra.mxu1 %v1295_v23  ;;  %1474 = vmatpush3.bf16.msra.mxu0 %v1602_v26 }
  0x3d   :  { %1514 = vmatpush3.bf16.msra.mxu1 %v1603_v27  ;;  %1475 = vmatprep.subr.bf16.mxu0 %v1604_v28 }
  0x3e   :  { %1515 = vmatprep.subr.bf16.mxu1 %v1605_v29  ;;  %884 = vmatprep.mubr.bf16.mxu0 %v1274_v35 }
  0x3f   :  { %949 = vmatprep.mubr.bf16.mxu1 %v1276_v40 }
  0x40   :  { %1476 = vmatpush3.bf16.msra.mxu0 %v1606_v30 }
  0x41   :  { %1516 = vmatpush3.bf16.msra.mxu1 %v1607_v31 }
  0x43   :  { %885 = vmatmul.mubr.bf16.vlgmr.msra.gmra.mxu0 %v1273_v34 }
  0x44   :  { %950 = vmatmul.mubr.bf16.vlgmr.msra.gmra.mxu1 %v1275_v39  ;;  %892 = vmatprep.mubr.bf16.mxu0 %v1282_v44 }
  0x45   :  { %957 = vmatprep.mubr.bf16.mxu1 %v1284_v45 }
  0x4b   :  { %893 = vmatmul.mubr.bf16.gmra.mxu0 %v1281_v50 }
  0x4c   :  { %958 = vmatmul.mubr.bf16.gmra.mxu1 %v1283_v51  ;;  %900 = vmatprep.mubr.bf16.mxu0 %v1290_v52 }
  0x4d   :  { %965 = vmatprep.mubr.bf16.mxu1 %v1292_v53 }
  0x53   :  { %901 = vmatmul.mubr.bf16.gmra.mxu0 %v1289_v58 }
  0x54   :  { %966 = vmatmul.mubr.bf16.gmra.mxu1 %v1291_v59  ;;  %908 = vmatprep.mubr.bf16.mxu0 %v1298_v60 }
  0x55   :  { %973 = vmatprep.mubr.bf16.mxu1 %v1300_v61 }
  0x5b   :  { %909 = vmatmul.mubr.bf16.gmra.mxu0 %v1297_v62 }
  0x5c   :  { %974 = vmatmul.mubr.bf16.gmra.mxu1 %v1299_v63 }
  0xe3   :  { %v1397_v1 = vpop.f32.mrf.mxu0 }
  0xe4   :  { %v1437_v2 = vpop.f32.mrf.mxu1 }
  0xe5   :  { %v1398_v3 = vpop.f32.mrf.mxu0 }
  0xe6   :  { %v1438_v4 = vpop.f32.mrf.mxu1  ;;  %v1399_v34 = vadd.f32 %v1398_v3, %v1397_v1 }
  0xe7   :  { %v1400_v5 = vpop.f32.mrf.mxu0  ;;  %v1439_v35 = vadd.f32 %v1438_v4, %v1437_v2 }
  0xe8   :  { %v1440_v6 = vpop.f32.mrf.mxu1 }
  0xe9   :  { %v1401_v7 = vpop.f32.mrf.mxu0  ;;  %v822_v43 = vadd.f32 %v1439_v35, %v1399_v34 }
  0xea   :  { %v1441_v8 = vpop.f32.mrf.mxu1  ;;  %v1402_v40 = vadd.f32 %v1401_v7, %v1400_v5 }
  0xeb   :  { %v1403_v9 = vpop.f32.mrf.mxu0  ;;  %v1442_v41 = vadd.f32 %v1441_v8, %v1440_v6 }
  0xec   :  { %v1443_v10 = vpop.f32.mrf.mxu1 }
  0xed   :  { %v1404_v11 = vpop.f32.mrf.mxu0  ;;  %v825_v50 = vadd.f32 %v1442_v41, %v1402_v40 }
  0xee   :  { %v1444_v12 = vpop.f32.mrf.mxu1  ;;  %v1405_v52 = vadd.f32 %v1404_v11, %v1403_v9 }
  0xef   :  { %v1406_v13 = vpop.f32.mrf.mxu0  ;;  %v1445_v53 = vadd.f32 %v1444_v12, %v1443_v10 }
  0xf0   :  { %v1446_v14 = vpop.f32.mrf.mxu1 }
  0xf1   :  { %v1407_v15 = vpop.f32.mrf.mxu0  ;;  %v830_v1 = vadd.f32 %v1445_v53, %v1405_v52 }
  0xf2   :  { %v1447_v16 = vpop.f32.mrf.mxu1  ;;  %v1408_v62 = vadd.f32 %v1407_v15, %v1406_v13 }
  0xf3   :  { %v1409_v17 = vpop.f32.mrf.mxu0  ;;  %v1448_v63 = vadd.f32 %v1447_v16, %v1446_v14 }
  0xf4   :  { %v1449_v18 = vpop.f32.mrf.mxu1 }
  0xf5   :  { %v1410_v19 = vpop.f32.mrf.mxu0  ;;  %v833_v10 = vadd.f32 %v1448_v63, %v1408_v62  ;;  %v1092_v62 = vld [vmem:[%s2155_s2 + $0x20] sm:$0xff]  ;;  %v1145_v63 = vld [vmem:[%s2156_s3 + $0x8] sm:$0xff] }
  0xf6   :  { %v1450_v20 = vpop.f32.mrf.mxu1  ;;  %v1411_v12 = vadd.f32 %v1410_v19, %v1409_v17 }
  0xf7   :  { %v1938_v21 = vpop.f32.mrf.mxu0  ;;  %v1451_v13 = vadd.f32 %v1450_v20, %v1449_v18 }
  0xf8   :  { %v1940_v22 = vpop.f32.mrf.mxu1 }
  0xf9   :  { %v1942_v23 = vpop.f32.mrf.mxu0  ;;  %v838_v17 = vadd.f32 %v1451_v13, %v1411_v12 }
  0xfa   :  { %v1944_v24 = vpop.f32.mrf.mxu1  ;;  %v1414_v34 = vadd.f32 %v1942_v23, %v1938_v21 }
  0xfb   :  { %v1946_v25 = vpop.f32.mrf.mxu0  ;;  %v1454_v35 = vadd.f32 %v1944_v24, %v1940_v22 }
  0xfc   :  { %v1948_v26 = vpop.f32.mrf.mxu1 }
  0xfd   :  { %v1950_v27 = vpop.f32.mrf.mxu0 }
  0xfe   :  { %v1952_v28 = vpop.f32.mrf.mxu1  ;;  %v1417_v21 = vadd.f32 %v1950_v27, %v1946_v25 }
  0xff   :  { %v1418_v29 = vpop.f32.mrf.mxu0  ;;  %v1457_v22 = vadd.f32 %v1952_v28, %v1948_v26 }
 0x100   :  { %v1458_v30 = vpop.f32.mrf.mxu1 }
 0x101   :  { %v1419_v31 = vpop.f32.mrf.mxu0  ;;  %v846_v52 = vadd.f32 %v1457_v22, %v1417_v21 }
 0x102   :  { %v1420_v32 = vadd.f32 %v1419_v31, %v1418_v29  ;;  %v1459_v33 = vpop.f32.mrf.mxu1 }
 0x103   :  { %v1460_v36 = vadd.f32 %v1459_v33, %v1458_v30  ;;  %v1477_v37 = vpop.f32.mrf.mxu0 }
 0x104   :  { %v1517_v39 = vpop.f32.mrf.mxu1 }
 0x105   :  { %v1954_v38 = vadd.f32 %v1460_v36, %v1420_v32  ;;  %v1478_v42 = vpop.f32.mrf.mxu0 }
 0x106   :  { %v1479_v44 = vadd.f32 %v1478_v42, %v1477_v37  ;;  %v1518_v45 = vpop.f32.mrf.mxu1 }
 0x107   :  { %v1480_v46 = vpop.f32.mrf.mxu0  ;;  %v1519_v48 = vadd.f32 %v1518_v45, %v1517_v39 }
 0x108   :  { %v887_v47 = vadd.f32 %v1479_v44, %v822_v43  ;;  %v1520_v49 = vpop.f32.mrf.mxu1  ;;  %v841_v43 = vadd.f32 %v1454_v35, %v1414_v34 }
 0x109   :  { %v1481_v51 = vpop.f32.mrf.mxu0 }
 0x10a   :  { %v1482_v54 = vadd.f32 %v1481_v51, %v1480_v46  ;;  %v1521_v55 = vpop.f32.mrf.mxu1  ;;  %v1956_v56 = vadd.f32 %v1519_v48, %v887_v47 }
 0x10b   :  { %v1483_v57 = vpop.f32.mrf.mxu0  ;;  %v1522_v59 = vadd.f32 %v1521_v55, %v1520_v49 }
 0x10c   :  { %v890_v58 = vadd.f32 %v1482_v54, %v825_v50  ;;  %v1523_v60 = vpop.f32.mrf.mxu1  ;;  %v983_v61 = vsel %vm982_vm0, %v1956_v56, 0.0 }
 0x10d   :  { %v1484_v0 = vpop.f32.mrf.mxu0  ;;  %984 = vadd.xlane.f32.xlu0 %v983_v61  ;;  %v1088_v61 = vld [vmem:[%s2155_s2] sm:$0xff] }
 0x10e   :  { %v1485_v2 = vadd.f32 %v1484_v0, %v1483_v57  ;;  %v1524_v3 = vpop.f32.mrf.mxu1  ;;  %v1960_v4 = vadd.f32 %v1522_v59, %v890_v58  ;;  %v1089_v58 = vld [vmem:[%s2155_s2 + $0x8] sm:$0xff]  ;;  %v1090_v59 = vld [vmem:[%s2155_s2 + $0x10] sm:$0xff] }
 0x10f   :  { %v1486_v5 = vpop.f32.mrf.mxu0  ;;  %v1525_v7 = vadd.f32 %v1524_v3, %v1523_v60  ;;  %v1091_v60 = vld [vmem:[%s2155_s2 + $0x18] sm:$0xff]  ;;  %v1093_v0 = vld [vmem:[%s2155_s2 + $0x28] sm:$0xff] }
 0x110   :  { %v895_v6 = vadd.f32 %v1485_v2, %v830_v1  ;;  %v1526_v8 = vpop.f32.mrf.mxu1  ;;  %v986_v9 = vsel %vm982_vm0, %v1960_v4, 0.0  ;;  %v1147_v1 = vld [vmem:[%s2156_s3 + $0x18] sm:$0xff]  ;;  %v1094_v2 = vld [vmem:[%s2155_s2 + $0x30] sm:$0xff]  ;;  %v1149_v3 = vld [vmem:[%s2156_s3 + $0x28] sm:$0xff] }
 0x111   :  { %v1487_v11 = vpop.f32.mrf.mxu0  ;;  %987 = vadd.xlane.f32.xlu0 %v986_v9 }
 0x112   :  { %v1488_v14 = vadd.f32 %v1487_v11, %v1486_v5  ;;  %v1527_v15 = vpop.f32.mrf.mxu1  ;;  %v1964_v16 = vadd.f32 %v1525_v7, %v895_v6  ;;  %v1095_v5 = vld [vmem:[%s2155_s2 + $0x38] sm:$0xff] }
 0x113   :  { %v1489_v29 = vpop.f32.mrf.mxu0  ;;  %v1528_v31 = vadd.f32 %v1527_v15, %v1526_v8  ;;  %v1144_v15 = vld [vmem:[%s2156_s3] sm:$0xff] }
 0x114   :  { %v898_v30 = vadd.f32 %v1488_v14, %v833_v10  ;;  %v1529_v32 = vpop.f32.mrf.mxu1  ;;  %v989_v33 = vsel %vm982_vm0, %v1964_v16, 0.0 }
 0x115   :  { %v1490_v36 = vpop.f32.mrf.mxu0  ;;  %990 = vadd.xlane.f32.xlu1 %v989_v33 }
 0x116   :  { %v1491_v18 = vadd.f32 %v1490_v36, %v1489_v29  ;;  %v1530_v19 = vpop.f32.mrf.mxu1  ;;  %v1972_v20 = vadd.f32 %v1528_v31, %v898_v30  ;;  %v1146_v29 = vld [vmem:[%s2156_s3 + $0x10] sm:$0xff]  ;;  %v1148_v30 = vld [vmem:[%s2156_s3 + $0x20] sm:$0xff] }
 0x117   :  { %v1492_v37 = vpop.f32.mrf.mxu0  ;;  %v1531_v40 = vadd.f32 %v1530_v19, %v1529_v32 }
 0x118   :  { %v903_v39 = vadd.f32 %v1491_v18, %v838_v17  ;;  %v1532_v41 = vpop.f32.mrf.mxu1  ;;  %v992_v42 = vsel %vm982_vm0, %v1972_v20, 0.0 }
 0x119   :  { %v1493_v44 = vpop.f32.mrf.mxu0  ;;  %993 = vadd.xlane.f32.xlu1 %v992_v42 }
 0x11a   :  { %v1494_v23 = vadd.f32 %v1493_v44, %v1492_v37  ;;  %v1533_v24 = vpop.f32.mrf.mxu1  ;;  %v1980_v45 = vadd.f32 %v1531_v40, %v903_v39 }
 0x11b   :  { %v1495_v46 = vpop.f32.mrf.mxu0  ;;  %v1534_v48 = vadd.f32 %v1533_v24, %v1532_v41 }
 0x11c   :  { %v906_v47 = vadd.f32 %v1494_v23, %v841_v43  ;;  %v1535_v49 = vpop.f32.mrf.mxu1  ;;  %v995_v50 = vsel %vm982_vm0, %v1980_v45, 0.0 }
 0x11d   :  { %v1496_v51 = vpop.f32.mrf.mxu0  ;;  %996 = vadd.xlane.f32.xlu0 %v995_v50 }
 0x11e   :  { %v1497_v53 = vadd.f32 %v1496_v51, %v1495_v46  ;;  %v1536_v54 = vpop.f32.mrf.mxu1  ;;  %v1984_v25 = vadd.f32 %v1534_v48, %v906_v47 }
 0x11f   :  { %v1537_v27 = vadd.f32 %v1536_v54, %v1535_v49  ;;  %v1498_v6 = vpop.f32.mrf.mxu0 }
 0x120   :  { %v911_v26 = vadd.f32 %v1497_v53, %v846_v52  ;;  %v998_v28 = vsel %vm982_vm0, %v1984_v25, 0.0  ;;  %v1538_v8 = vpop.f32.mrf.mxu1 }
 0x121   :  { %999 = vadd.xlane.f32.xlu1 %v998_v28  ;;  %v1499_v7 = vpop.f32.mrf.mxu0 }
 0x122   :  { %v1988_v55 = vadd.f32 %v1537_v27, %v911_v26  ;;  %v1500_v9 = vadd.f32 %v1499_v7, %v1498_v6  ;;  %v1539_v10 = vpop.f32.mrf.mxu1 }
 0x123   :  { %v1540_v12 = vadd.f32 %v1539_v10, %v1538_v8 }
 0x124   :  { %v1001_v57 = vsel %vm982_vm0, %v1988_v55, 0.0  ;;  %v914_v11 = vadd.f32 %v1500_v9, %v1954_v38 }
 0x125   :  { %1002 = vadd.xlane.f32.xlu0 %v1001_v57 }
 0x126   :  { %v979_v13 = vadd.f32 %v1540_v12, %v914_v11 }
 0x128   :  { %v1004_v14 = vsel %vm982_vm0, %v979_v13, 0.0 }
 0x132   :  { %1103 = vperm.xlu1 %1543, %v1089_v58  }
 0x136   :  { %1108 = vperm.xlu1 %1543, %v1090_v59  }
 0x13a   :  { %1113 = vperm.xlu1 %1543, %v1091_v60  }
 0x13b   :  { %1098 = vperm.xlu0 %1542, %v1088_v61  }
 0x13e   :  { %1118 = vperm.xlu1 %1543, %v1092_v62  }
 0x13f   :  { %1159 = vperm.xlu0 %1542, %v1145_v63  }
 0x142   :  { %1123 = vperm.xlu1 %1543, %v1093_v0  }
 0x143   :  { %1169 = vperm.xlu0 %1542, %v1147_v1   ;;  %v1150_v1 = vld [vmem:[%s2156_s3 + $0x30] sm:$0xff] }
 0x146   :  { %1128 = vperm.xlu1 %1543, %v1094_v2  }
 0x147   :  { %1179 = vperm.xlu0 %1542, %v1149_v3  }
 0x14a   :  { %1133 = vperm.xlu1 %1543, %v1095_v5  }
 0x16e   :  { %1005 = vadd.xlane.f32.xlu1 %v1004_v14 }
 0x17f   :  { %1154 = vperm.xlu1 %1543, %v1144_v15  }
 0x183   :  { %1164 = vperm.xlu1 %1543, %v1146_v29  }
 0x187   :  { %1174 = vperm.xlu1 %1543, %v1148_v30  }
 0x196   :  { %v985_v38 = vpop.xlane.xlu0 %984 }
 0x197   :  { %v1008_v31 = vmul.f32 0.125, %v985_v38 }
 0x199   :  { %v2037_v32 = vsub.f32 %v1956_v56, %v1008_v31 }
 0x19a   :  { %v988_v33 = vpop.xlane.xlu0 %987 }
 0x19b   :  { %v1024_v34 = vmul.f32 %v2037_v32, %v2037_v32  ;;  %v1009_v36 = vmul.f32 0.125, %v988_v33 }
 0x19d   :  { %v1032_v35 = vsel %vm982_vm0, %v1024_v34, 0.0  ;;  %v2046_v37 = vsub.f32 %v1960_v4, %v1009_v36 }
 0x19e   :  { %v991_v17 = vpop.xlane.xlu1 %990  ;;  %1033 = vadd.xlane.f32.xlu0 %v1032_v35 }
 0x19f   :  { %v1010_v18 = vmul.f32 0.125, %v991_v17  ;;  %v1025_v44 = vmul.f32 %v2046_v37, %v2046_v37 }
 0x1a1   :  { %v2043_v19 = vsub.f32 %v1964_v16, %v1010_v18  ;;  %v1035_v22 = vsel %vm982_vm0, %v1025_v44, 0.0 }
 0x1a2   :  { %v994_v39 = vpop.xlane.xlu1 %993 }
 0x1a3   :  { %v1011_v40 = vmul.f32 0.125, %v994_v39  ;;  %v1026_v56 = vmul.f32 %v2043_v19, %v2043_v19 }
 0x1a5   :  { %v1038_v41 = vsel %vm982_vm0, %v1026_v56, 0.0  ;;  %v2052_v42 = vsub.f32 %v1972_v20, %v1011_v40 }
 0x1a6   :  { %1039 = vadd.xlane.f32.xlu0 %v1038_v41  ;;  %v997_v43 = vpop.xlane.xlu0 %996 }
 0x1a7   :  { %v1012_v16 = vmul.f32 0.125, %v997_v43  ;;  %v1027_v23 = vmul.f32 %v2052_v42, %v2052_v42 }
 0x1a9   :  { %v2057_v21 = vsub.f32 %v1980_v45, %v1012_v16  ;;  %v1041_v45 = vsel %vm982_vm0, %v1027_v23, 0.0 }
 0x1aa   :  { %v1000_v4 = vpop.xlane.xlu1 %999 }
 0x1ab   :  { %v1013_v24 = vmul.f32 0.125, %v1000_v4  ;;  %1036 = vadd.xlane.f32.xlu1 %v1035_v22  ;;  %v1028_v20 = vmul.f32 %v2057_v21, %v2057_v21 }
 0x1ad   :  { %v2065_v46 = vsub.f32 %v1984_v25, %v1013_v24  ;;  %v1044_v47 = vsel %vm982_vm0, %v1028_v20, 0.0  ;;  %v1151_v25 = vld [vmem:[%s2156_s3 + $0x38] sm:$0xff] }
 0x1ae   :  { %1045 = vadd.xlane.f32.xlu0 %v1044_v47  ;;  %v1003_v48 = vpop.xlane.xlu0 %1002  ;;  %v2081_v27 = vpop.permute.xlu1 %1103 }
 0x1af   :  { %v1014_v49 = vmul.f32 0.125, %v1003_v48  ;;  %1042 = vadd.xlane.f32.xlu1 %v1041_v45  ;;  %v1029_v50 = vmul.f32 %v2065_v46, %v2065_v46 }
 0x1b1   :  { %v2072_v51 = vsub.f32 %v1988_v55, %v1014_v49  ;;  %v1047_v52 = vsel %vm982_vm0, %v1029_v50, 0.0 }
 0x1b2   :  { %v1109_v26 = vpop.permute.xlu1 %1108 }
 0x1b3   :  { %1048 = vadd.xlane.f32.xlu1 %v1047_v52  ;;  %v1030_v53 = vmul.f32 %v2072_v51, %v2072_v51 }
 0x1b5   :  { %v1050_v54 = vsel %vm982_vm0, %v1030_v53, 0.0 }
 0x1b6   :  { %1051 = vadd.xlane.f32.xlu0 %v1050_v54  ;;  %v2083_v28 = vpop.permute.xlu1 %1113  ;;  %v1099_v2 = vpop.permute.xlu0 %1098 }
 0x1ba   :  { %v2085_v55 = vpop.permute.xlu1 %1118  ;;  %v1160_v3 = vpop.permute.xlu0 %1159 }
 0x1be   :  { %v2087_v57 = vpop.permute.xlu1 %1123  ;;  %v2101_v5 = vpop.permute.xlu0 %1169 }
 0x1c2   :  { %v2089_v58 = vpop.permute.xlu1 %1128  ;;  %v2103_v6 = vpop.permute.xlu0 %1179 }
 0x1c6   :  { %v2091_v59 = vpop.permute.xlu1 %1133 }
 0x1cc   :  { %1189 = vperm.xlu0 %1542, %v1151_v25  }
 0x1f7   :  { %v1006_v60 = vpop.xlane.xlu1 %1005 }
 0x1f8   :  { %v1015_v61 = vmul.f32 0.125, %v1006_v60 }
 0x1fa   :  { %v2093_v62 = vsub.f32 %v979_v13, %v1015_v61 }
 0x1fb   :  { %v1155_v7 = vpop.permute.xlu1 %1154 }
 0x1fc   :  { %v1031_v63 = vmul.f32 %v2093_v62, %v2093_v62 }
 0x1fe   :  { %v1053_v0 = vsel %vm982_vm0, %v1031_v63, 0.0 }
 0x1ff   :  { %1054 = vadd.xlane.f32.xlu1 %v1053_v0  ;;  %v1165_v10 = vpop.permute.xlu1 %1164 }
 0x203   :  { %v1175_v13 = vpop.permute.xlu1 %1174 }
 0x210   :  { %1184 = vperm.xlu1 %1543, %v1150_v1  }
 0x227   :  { %v1034_v8 = vpop.xlane.xlu0 %1033 }
 0x228   :  { %v1056_v9 = vmul.f32 0.125, %v1034_v8 }
 0x22a   :  { %v1064_v11 = vadd.f32 1e-05, %v1056_v9 }
 0x22c   :  { %1608 = vrsqrt.f32 %v1064_v11 }
 0x22f   :  { %v1040_v12 = vpop.xlane.xlu0 %1039 }
 0x230   :  { %v1058_v14 = vmul.f32 0.125, %v1040_v12 }
 0x232   :  { %v1066_v15 = vadd.f32 1e-05, %v1058_v14 }
 0x234   :  { %1610 = vrsqrt.f32 %v1066_v15  ;;  %v1037_v29 = vpop.xlane.xlu1 %1036 }
 0x235   :  { %v1057_v30 = vmul.f32 0.125, %v1037_v29 }
 0x237   :  { %v1065_v38 = vadd.f32 1e-05, %v1057_v30  ;;  %v1046_v31 = vpop.xlane.xlu0 %1045 }
 0x238   :  { %v1060_v33 = vmul.f32 0.125, %v1046_v31  ;;  %v1043_v34 = vpop.xlane.xlu1 %1042 }
 0x239   :  { %v1609_v35 = vpop.eup %1608  ;;  %1612 = vrsqrt.f32 %v1065_v38  ;;  %v1059_v36 = vmul.f32 0.125, %v1043_v34 }
 0x23a   :  { %v1080_v17 = vmul.f32 %v1609_v35, %v2037_v32  ;;  %v1068_v18 = vadd.f32 1e-05, %v1060_v33 }
 0x23b   :  { %v1067_v39 = vadd.f32 1e-05, %v1059_v36 }
 0x23c   :  { %v1136_v40 = vmul.f32 %v1099_v2, %v1080_v17  ;;  %1614 = vrsqrt.f32 %v1068_v18  ;;  %v1049_v56 = vpop.xlane.xlu1 %1048 }
 0x23d   :  { %1616 = vrsqrt.f32 %v1067_v39  ;;  %v1061_v41 = vmul.f32 0.125, %v1049_v56 }
 0x23e   :  { %v1192_v43 = vadd.f32 %v1155_v7, %v1136_v40 }
 0x23f   :  { %v1069_v44 = vadd.f32 1e-05, %v1061_v41 }
 0x240   :  { %vm1200_vm1 = vcmp.gt.f32.partialorder %v1192_v43, 0.0  ;;  %v1208_v16 = vmul.f32 0.2, %v1192_v43 }
 0x241   :  { %v1611_v4 = vpop.eup %1610  ;;  %1618 = vrsqrt.f32 %v1069_v44 }
 0x242   :  { %v1216_v22 = vsel %vm1200_vm1, %v1192_v43, %v1208_v16  ;;  %v1082_v23 = vmul.f32 %v1611_v4, %v2043_v19 }
 0x243   :  { %v1373_v24 = vpack.c.bf16 %v1216_v22, %v1216_v22 }
 0x244   :  { %v1138_v20 = vmul.f32 %v1109_v26, %v1082_v23 }
 0x245   :  { %1257 = vst.msk [vmem:[%s2157_s4] sm:$0xf] %vm1256_vm2, %v1373_v24 }
 0x246   :  { %v1613_v32 = vpop.eup %1612  ;;  %v1194_v47 = vadd.f32 %v1165_v10, %v1138_v20 }
 0x247   :  { %v1081_v48 = vmul.f32 %v1613_v32, %v2046_v37 }
 0x248   :  { %vm1202_vm3 = vcmp.gt.f32.partialorder %v1194_v47, 0.0  ;;  %v1210_v45 = vmul.f32 0.2, %v1194_v47 }
 0x249   :  { %v1615_v49 = vpop.eup %1614  ;;  %v1137_v50 = vmul.f32 %v2081_v27, %v1081_v48 }
 0x24a   :  { %v1617_v52 = vpop.eup %1616  ;;  %v1218_v53 = vsel %vm1202_vm3, %v1194_v47, %v1210_v45  ;;  %v1084_v19 = vmul.f32 %v1615_v49, %v2057_v21 }
 0x24b   :  { %v1375_v54 = vpack.c.bf16 %v1218_v53, %v1218_v53  ;;  %v1193_v25 = vadd.f32 %v1160_v3, %v1137_v50  ;;  %v1083_v26 = vmul.f32 %v1617_v52, %v2052_v42 }
 0x24c   :  { %v1140_v60 = vmul.f32 %v2085_v55, %v1084_v19 }
 0x24d   :  { %vm1201_vm4 = vcmp.gt.f32.partialorder %v1193_v25, 0.0  ;;  %v1209_v61 = vmul.f32 0.2, %v1193_v25  ;;  %v1139_v63 = vmul.f32 %v2083_v28, %v1083_v26  ;;  %1259 = vst.msk [vmem:[%s2157_s4 + $0x8] sm:$0xf] %vm1256_vm2, %v1375_v54 }
 0x24e   :  { %v1619_v37 = vpop.eup %1618  ;;  %v1196_v27 = vadd.f32 %v1175_v13, %v1140_v60 }
 0x24f   :  { %v1217_v0 = vsel %vm1201_vm4, %v1193_v25, %v1209_v61  ;;  %v1195_v21 = vadd.f32 %v2101_v5, %v1139_v63  ;;  %v1085_v1 = vmul.f32 %v1619_v37, %v2065_v46 }
 0x250   :  { %v1374_v2 = vpack.c.bf16 %v1217_v0, %v1217_v0  ;;  %vm1204_vm5 = vcmp.gt.f32.partialorder %v1196_v27, 0.0  ;;  %v1212_v42 = vmul.f32 0.2, %v1196_v27 }
 0x251   :  { %vm1203_vm6 = vcmp.gt.f32.partialorder %v1195_v21, 0.0  ;;  %v1211_v55 = vmul.f32 0.2, %v1195_v21  ;;  %v1141_v3 = vmul.f32 %v2087_v57, %v1085_v1 }
 0x252   :  { %v1220_v28 = vsel %vm1204_vm5, %v1196_v27, %v1212_v42  ;;  %1258 = vst.msk [vmem:[%s2157_s4 + $0x4] sm:$0xf] %vm1256_vm2, %v1374_v2 }
 0x253   :  { %v1377_v7 = vpack.c.bf16 %v1220_v28, %v1220_v28  ;;  %v1219_v8 = vsel %vm1203_vm6, %v1195_v21, %v1211_v55  ;;  %v1197_v9 = vadd.f32 %v2103_v6, %v1141_v3  ;;  %v1052_v6 = vpop.xlane.xlu0 %1051 }
 0x254   :  { %v1376_v5 = vpack.c.bf16 %v1219_v8, %v1219_v8  ;;  %v1062_v11 = vmul.f32 0.125, %v1052_v6 }
 0x255   :  { %vm1205_vm7 = vcmp.gt.f32.partialorder %v1197_v9, 0.0  ;;  %v1213_v46 = vmul.f32 0.2, %v1197_v9  ;;  %1261 = vst.msk [vmem:[%s2157_s4 + $0x10] sm:$0xf] %vm1256_vm2, %v1377_v7 }
 0x256   :  { %1260 = vst.msk [vmem:[%s2157_s4 + $0xc] sm:$0xf] %vm1256_vm2, %v1376_v5  ;;  %v1070_v12 = vadd.f32 1e-05, %v1062_v11 }
 0x257   :  { %v1221_v57 = vsel %vm1205_vm7, %v1197_v9, %v1213_v46  ;;  %v1190_v39 = vpop.permute.xlu0 %1189 }
 0x258   :  { %v1378_v10 = vpack.c.bf16 %v1221_v57, %v1221_v57  ;;  %1620 = vrsqrt.f32 %v1070_v12 }
 0x25a   :  { %1262 = vst.msk [vmem:[%s2157_s4 + $0x14] sm:$0xf] %vm1256_vm2, %v1378_v10 }
 0x265   :  { %v1621_v13 = vpop.eup %1620 }
 0x266   :  { %v1086_v14 = vmul.f32 %v1621_v13, %v2072_v51 }
 0x268   :  { %v1142_v38 = vmul.f32 %v2089_v58, %v1086_v14 }
 0x288   :  { %v1055_v15 = vpop.xlane.xlu1 %1054 }
 0x289   :  { %v1063_v29 = vmul.f32 0.125, %v1055_v15 }
 0x28b   :  { %v1071_v30 = vadd.f32 1e-05, %v1063_v29 }
 0x28c   :  { %v1185_v31 = vpop.permute.xlu1 %1184 }
 0x28d   :  { %1622 = vrsqrt.f32 %v1071_v30  ;;  %v1198_v33 = vadd.f32 %v1185_v31, %v1142_v38 }
 0x28f   :  { %vm1206_vm8 = vcmp.gt.f32.partialorder %v1198_v33, 0.0  ;;  %v1214_v34 = vmul.f32 0.2, %v1198_v33 }
 0x291   :  { %v1222_v35 = vsel %vm1206_vm8, %v1198_v33, %v1214_v34 }
 0x292   :  { %v1379_v36 = vpack.c.bf16 %v1222_v35, %v1222_v35 }
 0x294   :  { %1263 = vst.msk [vmem:[%s2157_s4 + $0x18] sm:$0xf] %vm1256_vm2, %v1379_v36 }
 0x29a   :  { %v1623_v17 = vpop.eup %1622 }
 0x29b   :  { %v1087_v51 = vmul.f32 %v1623_v17, %v2093_v62 }
 0x29d   :  { %v1143_v18 = vmul.f32 %v2091_v59, %v1087_v51 }
 0x29f   :  { %v1199_v40 = vadd.f32 %v1190_v39, %v1143_v18 }
 0x2a1   :  { %vm1207_vm9 = vcmp.gt.f32.partialorder %v1199_v40, 0.0  ;;  %v1215_v58 = vmul.f32 0.2, %v1199_v40 }
 0x2a3   :  { %v1223_v56 = vsel %vm1207_vm9, %v1199_v40, %v1215_v58 }
 0x2a4   :  { %v1380_v41 = vpack.c.bf16 %v1223_v56, %v1223_v56 }
 0x2a6   :  { %1264 = vst.msk [vmem:[%s2157_s4 + $0x1c] sm:$0xf] %vm1256_vm2, %v1380_v41 }

// kernel: vae_forward.19
= control target key start
LH: loop header
LB: loop body
LE: loop exit
PB: predicated region body
PF: predicated region fallthrough
CT: control target
= control target key end

     0   :  { %vm982_vm0 = vcmask 261120   ;;  %vm1256_vm2 = vcmask 257024   ;;  %s2153_s1 = inlined_call_operand.vmem [shape: bf16[1024,32], index: 1, kind: input, shape index: {}]   ;;  %s2154_s0 = inlined_call_operand.vmem [shape: bf16[64,1024], index: 0, kind: input, shape index: {}]   ;;  %s2155_s2 = inlined_call_operand.vmem [shape: f32[64,1], index: 2, kind: input, shape index: {}]   ;;  %s2156_s3 = inlined_call_operand.vmem [shape: f32[64,1], index: 3, kind: input, shape index: {}]   ;;  %s2157_s4 = inlined_call_operand.vmem [shape: bf16[64,32], index: 4, kind: output, shape index: {}]  }
   0x1   :  { %v1544_v0 = vld [vmem:[%s2153_s1 + $0x78] sm:$0xff]   ;;  %v1548_v4 = vld [vmem:[%s2153_s1 + $0x70] sm:$0xff]   ;;  %v1552_v8 = vld [vmem:[%s2153_s1 + $0x68] sm:$0xff]  }
   0x2   :  { %v1545_v1 = vld [vmem:[%s2153_s1 + $0xf8] sm:$0xff]   ;;  %1381 = vmatprep.subr.bf16.mxu0 %v1544_v0  ;;  %v1549_v5 = vld [vmem:[%s2153_s1 + $0xf0] sm:$0xff]   ;;  %v1553_v9 = vld [vmem:[%s2153_s1 + $0xe8] sm:$0xff]  }
   0x3   :  { %v1546_v2 = vld [vmem:[%s2153_s1 + $0x38] sm:$0xff]   ;;  %1421 = vmatprep.subr.bf16.mxu1 %v1545_v1  ;;  %v1550_v6 = vld [vmem:[%s2153_s1 + $0x30] sm:$0xff]   ;;  %v1554_v10 = vld [vmem:[%s2153_s1 + $0x28] sm:$0xff]  }
   0x4   :  { %v1547_v3 = vld [vmem:[%s2153_s1 + $0xb8] sm:$0xff]   ;;  %1382 = vmatpush3.bf16.msra.mxu0 %v1546_v2  ;;  %v1551_v7 = vld [vmem:[%s2153_s1 + $0xb0] sm:$0xff]   ;;  %v1555_v11 = vld [vmem:[%s2153_s1 + $0xa8] sm:$0xff]  }
   0x5   :  { %1422 = vmatpush3.bf16.msra.mxu1 %v1547_v3  ;;  %1383 = vmatprep.subr.bf16.mxu0 %v1548_v4  ;;  %v1556_v12 = vld [vmem:[%s2153_s1 + $0x60] sm:$0xff]   ;;  %v1560_v16 = vld [vmem:[%s2153_s1 + $0x58] sm:$0xff]   ;;  %v1564_v20 = vld [vmem:[%s2153_s1 + $0x50] sm:$0xff]  }
   0x6   :  { %1423 = vmatprep.subr.bf16.mxu1 %v1549_v5  ;;  %v1557_v13 = vld [vmem:[%s2153_s1 + $0xe0] sm:$0xff]   ;;  %v1561_v17 = vld [vmem:[%s2153_s1 + $0xd8] sm:$0xff]   ;;  %v1565_v21 = vld [vmem:[%s2153_s1 + $0xd0] sm:$0xff]  }
   0x7   :  { %v1558_v14 = vld [vmem:[%s2153_s1 + $0x20] sm:$0xff]   ;;  %v1562_v18 = vld [vmem:[%s2153_s1 + $0x18] sm:$0xff]   ;;  %v1566_v22 = vld [vmem:[%s2153_s1 + $0x10] sm:$0xff]  }
   0x8   :  { %1384 = vmatpush3.bf16.msra.mxu0 %v1550_v6  ;;  %v1559_v15 = vld [vmem:[%s2153_s1 + $0xa0] sm:$0xff]   ;;  %v1563_v19 = vld [vmem:[%s2153_s1 + $0x98] sm:$0xff]   ;;  %v1567_v23 = vld [vmem:[%s2153_s1 + $0x90] sm:$0xff]  }
   0x9   :  { %1424 = vmatpush3.bf16.msra.mxu1 %v1551_v7  ;;  %1385 = vmatprep.subr.bf16.mxu0 %v1552_v8  ;;  %v1568_v24 = vld [vmem:[%s2153_s1 + $0x48] sm:$0xff]   ;;  %v1572_v28 = vld [vmem:[%s2153_s1 + $0x40] sm:$0xff]   ;;  %v1576_v40 = vld [vmem:[%s2153_s1 + $0x178] sm:$0xff]  }
   0xa   :  { %1425 = vmatprep.subr.bf16.mxu1 %v1553_v9  ;;  %v1569_v25 = vld [vmem:[%s2153_s1 + $0xc8] sm:$0xff]   ;;  %v1573_v29 = vld [vmem:[%s2153_s1 + $0xc0] sm:$0xff]   ;;  %v1577_v41 = vld [vmem:[%s2153_s1 + $0x1f8] sm:$0xff]  }
   0xb   :  { %v1570_v26 = vld [vmem:[%s2153_s1 + $0x8] sm:$0xff]   ;;  %v1574_v30 = vld [vmem:[%s2153_s1] sm:$0xff]   ;;  %v1578_v42 = vld [vmem:[%s2153_s1 + $0x138] sm:$0xff]  }
   0xc   :  { %1386 = vmatpush3.bf16.msra.mxu0 %v1554_v10  ;;  %v1571_v27 = vld [vmem:[%s2153_s1 + $0x88] sm:$0xff]   ;;  %v1575_v31 = vld [vmem:[%s2153_s1 + $0x80] sm:$0xff]   ;;  %v1579_v43 = vld [vmem:[%s2153_s1 + $0x1b8] sm:$0xff]  }
   0xd   :  { %1426 = vmatpush3.bf16.msra.mxu1 %v1555_v11  ;;  %1387 = vmatprep.subr.bf16.mxu0 %v1556_v12  ;;  %v18_v32 = vld [vmem:[%s2154_s0] sm:$0xff]  ;;  %v19_v34 = vld [vmem:[%s2154_s0 + $0x8] sm:$0xff]  ;;  %v1580_v44 = vld [vmem:[%s2153_s1 + $0x170] sm:$0xff]  }
   0xe   :  { %1427 = vmatprep.subr.bf16.mxu1 %v1557_v13  ;;  %v22_v33 = vld [vmem:[%s2154_s0 + $0x20] sm:$0xff]  ;;  %v23_v37 = vld [vmem:[%s2154_s0 + $0x28] sm:$0xff]  ;;  %v1581_v45 = vld [vmem:[%s2153_s1 + $0x1f0] sm:$0xff]  }
   0xf   :  { %v1269_v35 = vcombine.low %v18_v32, %v22_v33  ;;  %v1270_v36 = vcombine.high %v18_v32, %v22_v33  ;;  %v1271_v38 = vcombine.low %v19_v34, %v23_v37  ;;  %v1272_v39 = vcombine.high %v19_v34, %v23_v37  ;;  %v1582_v46 = vld [vmem:[%s2153_s1 + $0x130] sm:$0xff]   ;;  %v26_v48 = vld [vmem:[%s2154_s0 + $0x40] sm:$0xff]  ;;  %v27_v51 = vld [vmem:[%s2154_s0 + $0x48] sm:$0xff] }
  0x10   :  { %1388 = vmatpush3.bf16.msra.mxu0 %v1558_v14  ;;  %v1583_v47 = vld [vmem:[%s2153_s1 + $0x1b0] sm:$0xff]   ;;  %v30_v49 = vld [vmem:[%s2154_s0 + $0x60] sm:$0xff]  ;;  %v31_v52 = vld [vmem:[%s2154_s0 + $0x68] sm:$0xff] }
  0x11   :  { %1428 = vmatpush3.bf16.msra.mxu1 %v1559_v15  ;;  %1389 = vmatprep.subr.bf16.mxu0 %v1560_v16  ;;  %v1278_v50 = vcombine.high %v26_v48, %v30_v49  ;;  %v1277_v53 = vcombine.low %v26_v48, %v30_v49  ;;  %v1280_v54 = vcombine.high %v27_v51, %v31_v52  ;;  %v1584_v56 = vld [vmem:[%s2153_s1 + $0x168] sm:$0xff]   ;;  %v1588_v60 = vld [vmem:[%s2153_s1 + $0x160] sm:$0xff]   ;;  %v1592_v8 = vld [vmem:[%s2153_s1 + $0x158] sm:$0xff]  }
  0x12   :  { %1429 = vmatprep.subr.bf16.mxu1 %v1561_v17  ;;  %754 = vmatprep.mubr.bf16.mxu0 %v1270_v36  ;;  %v1279_v55 = vcombine.low %v27_v51, %v31_v52  ;;  %v1585_v57 = vld [vmem:[%s2153_s1 + $0x1e8] sm:$0xff]   ;;  %v1589_v61 = vld [vmem:[%s2153_s1 + $0x1e0] sm:$0xff]   ;;  %v1593_v9 = vld [vmem:[%s2153_s1 + $0x1d8] sm:$0xff]  }
  0x13   :  { %819 = vmatprep.mubr.bf16.mxu1 %v1272_v39  ;;  %v1586_v58 = vld [vmem:[%s2153_s1 + $0x128] sm:$0xff]   ;;  %v1590_v62 = vld [vmem:[%s2153_s1 + $0x120] sm:$0xff]   ;;  %v1594_v10 = vld [vmem:[%s2153_s1 + $0x118] sm:$0xff]  }
  0x14   :  { %1390 = vmatpush3.bf16.msra.mxu0 %v1562_v18  ;;  %v1587_v59 = vld [vmem:[%s2153_s1 + $0x1a8] sm:$0xff]   ;;  %v1591_v63 = vld [vmem:[%s2153_s1 + $0x1a0] sm:$0xff]   ;;  %v1595_v11 = vld [vmem:[%s2153_s1 + $0x198] sm:$0xff]  }
  0x15   :  { %1430 = vmatpush3.bf16.msra.mxu1 %v1563_v19  ;;  %1391 = vmatprep.subr.bf16.mxu0 %v1564_v20  ;;  %v34_v0 = vld [vmem:[%s2154_s0 + $0x80] sm:$0xff]  ;;  %v35_v2 = vld [vmem:[%s2154_s0 + $0x88] sm:$0xff]  ;;  %v1596_v12 = vld [vmem:[%s2153_s1 + $0x150] sm:$0xff]  }
  0x16   :  { %1431 = vmatprep.subr.bf16.mxu1 %v1565_v21  ;;  %v38_v1 = vld [vmem:[%s2154_s0 + $0xa0] sm:$0xff]  ;;  %v39_v3 = vld [vmem:[%s2154_s0 + $0xa8] sm:$0xff]  ;;  %v1597_v13 = vld [vmem:[%s2153_s1 + $0x1d0] sm:$0xff]  }
  0x17   :  { %v1286_v4 = vcombine.high %v34_v0, %v38_v1  ;;  %v1288_v5 = vcombine.high %v35_v2, %v39_v3  ;;  %v1285_v6 = vcombine.low %v34_v0, %v38_v1  ;;  %v1287_v7 = vcombine.low %v35_v2, %v39_v3  ;;  %v1598_v14 = vld [vmem:[%s2153_s1 + $0x110] sm:$0xff]   ;;  %v42_v16 = vld [vmem:[%s2154_s0 + $0xc0] sm:$0xff]  ;;  %v43_v18 = vld [vmem:[%s2154_s0 + $0xc8] sm:$0xff] }
  0x18   :  { %1392 = vmatpush3.bf16.msra.mxu0 %v1566_v22  ;;  %v1599_v15 = vld [vmem:[%s2153_s1 + $0x190] sm:$0xff]   ;;  %v46_v17 = vld [vmem:[%s2154_s0 + $0xe0] sm:$0xff]  ;;  %v47_v20 = vld [vmem:[%s2154_s0 + $0xe8] sm:$0xff]  ;;  %v1624_v0 = vmov 0  }
  0x19   :  { %1432 = vmatpush3.bf16.msra.mxu1 %v1567_v23  ;;  %1393 = vmatprep.subr.bf16.mxu0 %v1568_v24  ;;  %v1294_v19 = vcombine.high %v42_v16, %v46_v17  ;;  %v1293_v21 = vcombine.low %v42_v16, %v46_v17  ;;  %v1296_v22 = vcombine.high %v43_v18, %v47_v20  ;;  %v1600_v24 = vld [vmem:[%s2153_s1 + $0x148] sm:$0xff]   ;;  %v20_v32 = vld [vmem:[%s2154_s0 + $0x10] sm:$0xff]  ;;  %v21_v36 = vld [vmem:[%s2154_s0 + $0x18] sm:$0xff] }
  0x1a   :  { %1433 = vmatprep.subr.bf16.mxu1 %v1569_v25  ;;  %v1295_v23 = vcombine.low %v43_v18, %v47_v20  ;;  %v1601_v25 = vld [vmem:[%s2153_s1 + $0x1c8] sm:$0xff]   ;;  %v24_v33 = vld [vmem:[%s2154_s0 + $0x30] sm:$0xff]  ;;  %v25_v37 = vld [vmem:[%s2154_s0 + $0x38] sm:$0xff]  ;;  %1543 = vset.pattern.permute.xlu1 %v1624_v0 }
  0x1b   :  { %v1273_v34 = vcombine.low %v20_v32, %v24_v33  ;;  %v1275_v39 = vcombine.low %v21_v36, %v25_v37  ;;  %v37_v48 = vld [vmem:[%s2154_s0 + $0x98] sm:$0xff]  ;;  %1542 = vset.pattern.permute.xlu0 %v1624_v0 }
  0x1c   :  { %1394 = vmatpush3.bf16.msra.mxu0 %v1570_v26  ;;  %v1602_v26 = vld [vmem:[%s2153_s1 + $0x108] sm:$0xff]   ;;  %v41_v49 = vld [vmem:[%s2154_s0 + $0xb8] sm:$0xff] }
  0x1d   :  { %1434 = vmatpush3.bf16.msra.mxu1 %v1571_v27  ;;  %1395 = vmatprep.subr.bf16.mxu0 %v1572_v28  ;;  %v1603_v27 = vld [vmem:[%s2153_s1 + $0x188] sm:$0xff]   ;;  %v1604_v28 = vld [vmem:[%s2153_s1 + $0x140] sm:$0xff]  }
  0x1e   :  { %1435 = vmatprep.subr.bf16.mxu1 %v1573_v29  ;;  %v1605_v29 = vld [vmem:[%s2153_s1 + $0x1c0] sm:$0xff]  }
  0x20   :  { %1396 = vmatpush3.bf16.msra.mxu0 %v1574_v30  ;;  %v1606_v30 = vld [vmem:[%s2153_s1 + $0x100] sm:$0xff]  }
  0x21   :  { %1436 = vmatpush3.bf16.msra.mxu1 %v1575_v31  ;;  %1461 = vmatprep.subr.bf16.mxu0 %v1576_v40  ;;  %v1607_v31 = vld [vmem:[%s2153_s1 + $0x180] sm:$0xff]   ;;  %v1276_v40 = vcombine.high %v21_v36, %v25_v37 }
  0x22   :  { %1501 = vmatprep.subr.bf16.mxu1 %v1577_v41  ;;  %v32_v41 = vld [vmem:[%s2154_s0 + $0x70] sm:$0xff] }
  0x23   :  { %755 = vmatmul.mubr.bf16.vlgmr.msra.gmra.mxu0 %v1269_v35  ;;  %v1274_v35 = vcombine.high %v20_v32, %v24_v33 }
  0x24   :  { %820 = vmatmul.mubr.bf16.vlgmr.msra.gmra.mxu1 %v1271_v38  ;;  %1462 = vmatpush3.bf16.msra.mxu0 %v1578_v42  ;;  %v28_v38 = vld [vmem:[%s2154_s0 + $0x50] sm:$0xff]  ;;  %v29_v42 = vld [vmem:[%s2154_s0 + $0x58] sm:$0xff] }
  0x25   :  { %1502 = vmatpush3.bf16.msra.mxu1 %v1579_v43  ;;  %1463 = vmatprep.subr.bf16.mxu0 %v1580_v44  ;;  %v33_v43 = vld [vmem:[%s2154_s0 + $0x78] sm:$0xff]  ;;  %v1282_v44 = vcombine.high %v28_v38, %v32_v41 }
  0x26   :  { %1503 = vmatprep.subr.bf16.mxu1 %v1581_v45  ;;  %762 = vmatprep.mubr.bf16.mxu0 %v1278_v50  ;;  %v1284_v45 = vcombine.high %v29_v42, %v33_v43  ;;  %v1281_v50 = vcombine.low %v28_v38, %v32_v41  ;;  %v1283_v51 = vcombine.low %v29_v42, %v33_v43 }
  0x27   :  { %827 = vmatprep.mubr.bf16.mxu1 %v1280_v54  ;;  %v44_v54 = vld [vmem:[%s2154_s0 + $0xd0] sm:$0xff] }
  0x28   :  { %1464 = vmatpush3.bf16.msra.mxu0 %v1582_v46  ;;  %v36_v46 = vld [vmem:[%s2154_s0 + $0x90] sm:$0xff] }
  0x29   :  { %1504 = vmatpush3.bf16.msra.mxu1 %v1583_v47  ;;  %1465 = vmatprep.subr.bf16.mxu0 %v1584_v56  ;;  %v40_v47 = vld [vmem:[%s2154_s0 + $0xb0] sm:$0xff]  ;;  %v45_v56 = vld [vmem:[%s2154_s0 + $0xd8] sm:$0xff] }
  0x2a   :  { %1505 = vmatprep.subr.bf16.mxu1 %v1585_v57  ;;  %v1290_v52 = vcombine.high %v36_v46, %v40_v47  ;;  %v49_v57 = vld [vmem:[%s2154_s0 + $0xf8] sm:$0xff] }
  0x2b   :  { %763 = vmatmul.mubr.bf16.gmra.mxu0 %v1277_v53  ;;  %v1292_v53 = vcombine.high %v37_v48, %v41_v49 }
  0x2c   :  { %828 = vmatmul.mubr.bf16.gmra.mxu1 %v1279_v55  ;;  %1466 = vmatpush3.bf16.msra.mxu0 %v1586_v58  ;;  %v48_v55 = vld [vmem:[%s2154_s0 + $0xf0] sm:$0xff]  ;;  %v1289_v58 = vcombine.low %v36_v46, %v40_v47 }
  0x2d   :  { %1506 = vmatpush3.bf16.msra.mxu1 %v1587_v59  ;;  %1467 = vmatprep.subr.bf16.mxu0 %v1588_v60  ;;  %v1291_v59 = vcombine.low %v37_v48, %v41_v49  ;;  %v1298_v60 = vcombine.high %v44_v54, %v48_v55 }
  0x2e   :  { %1507 = vmatprep.subr.bf16.mxu1 %v1589_v61  ;;  %770 = vmatprep.mubr.bf16.mxu0 %v1286_v4  ;;  %v1300_v61 = vcombine.high %v45_v56, %v49_v57 }
  0x2f   :  { %835 = vmatprep.mubr.bf16.mxu1 %v1288_v5 }
  0x30   :  { %1468 = vmatpush3.bf16.msra.mxu0 %v1590_v62  ;;  %v1297_v62 = vcombine.low %v44_v54, %v48_v55 }
  0x31   :  { %1508 = vmatpush3.bf16.msra.mxu1 %v1591_v63  ;;  %1469 = vmatprep.subr.bf16.mxu0 %v1592_v8  ;;  %v1299_v63 = vcombine.low %v45_v56, %v49_v57 }
  0x32   :  { %1509 = vmatprep.subr.bf16.mxu1 %v1593_v9 }
  0x33   :  { %771 = vmatmul.mubr.bf16.gmra.mxu0 %v1285_v6 }
  0x34   :  { %836 = vmatmul.mubr.bf16.gmra.mxu1 %v1287_v7  ;;  %1470 = vmatpush3.bf16.msra.mxu0 %v1594_v10 }
  0x35   :  { %1510 = vmatpush3.bf16.msra.mxu1 %v1595_v11  ;;  %1471 = vmatprep.subr.bf16.mxu0 %v1596_v12 }
  0x36   :  { %1511 = vmatprep.subr.bf16.mxu1 %v1597_v13  ;;  %778 = vmatprep.mubr.bf16.mxu0 %v1294_v19 }
  0x37   :  { %843 = vmatprep.mubr.bf16.mxu1 %v1296_v22 }
  0x38   :  { %1472 = vmatpush3.bf16.msra.mxu0 %v1598_v14 }
  0x39   :  { %1512 = vmatpush3.bf16.msra.mxu1 %v1599_v15  ;;  %1473 = vmatprep.subr.bf16.mxu0 %v1600_v24 }
  0x3a   :  { %1513 = vmatprep.subr.bf16.mxu1 %v1601_v25 }
  0x3b   :  { %779 = vmatmul.mubr.bf16.gmra.mxu0 %v1293_v21 }
  0x3c   :  { %844 = vmatmul.mubr.bf16.gmra.mxu1 %v1295_v23  ;;  %1474 = vmatpush3.bf16.msra.mxu0 %v1602_v26 }
  0x3d   :  { %1514 = vmatpush3.bf16.msra.mxu1 %v1603_v27  ;;  %1475 = vmatprep.subr.bf16.mxu0 %v1604_v28 }
  0x3e   :  { %1515 = vmatprep.subr.bf16.mxu1 %v1605_v29  ;;  %884 = vmatprep.mubr.bf16.mxu0 %v1274_v35 }
  0x3f   :  { %949 = vmatprep.mubr.bf16.mxu1 %v1276_v40 }
  0x40   :  { %1476 = vmatpush3.bf16.msra.mxu0 %v1606_v30 }
  0x41   :  { %1516 = vmatpush3.bf16.msra.mxu1 %v1607_v31 }
  0x43   :  { %885 = vmatmul.mubr.bf16.vlgmr.msra.gmra.mxu0 %v1273_v34 }
  0x44   :  { %950 = vmatmul.mubr.bf16.vlgmr.msra.gmra.mxu1 %v1275_v39  ;;  %892 = vmatprep.mubr.bf16.mxu0 %v1282_v44 }
  0x45   :  { %957 = vmatprep.mubr.bf16.mxu1 %v1284_v45 }
  0x4b   :  { %893 = vmatmul.mubr.bf16.gmra.mxu0 %v1281_v50 }
  0x4c   :  { %958 = vmatmul.mubr.bf16.gmra.mxu1 %v1283_v51  ;;  %900 = vmatprep.mubr.bf16.mxu0 %v1290_v52 }
  0x4d   :  { %965 = vmatprep.mubr.bf16.mxu1 %v1292_v53 }
  0x53   :  { %901 = vmatmul.mubr.bf16.gmra.mxu0 %v1289_v58 }
  0x54   :  { %966 = vmatmul.mubr.bf16.gmra.mxu1 %v1291_v59  ;;  %908 = vmatprep.mubr.bf16.mxu0 %v1298_v60 }
  0x55   :  { %973 = vmatprep.mubr.bf16.mxu1 %v1300_v61 }
  0x5b   :  { %909 = vmatmul.mubr.bf16.gmra.mxu0 %v1297_v62 }
  0x5c   :  { %974 = vmatmul.mubr.bf16.gmra.mxu1 %v1299_v63 }
  0xe3   :  { %v1397_v1 = vpop.f32.mrf.mxu0 }
  0xe4   :  { %v1437_v2 = vpop.f32.mrf.mxu1 }
  0xe5   :  { %v1398_v3 = vpop.f32.mrf.mxu0 }
  0xe6   :  { %v1438_v4 = vpop.f32.mrf.mxu1  ;;  %v1399_v34 = vadd.f32 %v1398_v3, %v1397_v1 }
  0xe7   :  { %v1400_v5 = vpop.f32.mrf.mxu0  ;;  %v1439_v35 = vadd.f32 %v1438_v4, %v1437_v2 }
  0xe8   :  { %v1440_v6 = vpop.f32.mrf.mxu1 }
  0xe9   :  { %v1401_v7 = vpop.f32.mrf.mxu0  ;;  %v822_v43 = vadd.f32 %v1439_v35, %v1399_v34 }
  0xea   :  { %v1441_v8 = vpop.f32.mrf.mxu1  ;;  %v1402_v40 = vadd.f32 %v1401_v7, %v1400_v5 }
  0xeb   :  { %v1403_v9 = vpop.f32.mrf.mxu0  ;;  %v1442_v41 = vadd.f32 %v1441_v8, %v1440_v6 }
  0xec   :  { %v1443_v10 = vpop.f32.mrf.mxu1 }
  0xed   :  { %v1404_v11 = vpop.f32.mrf.mxu0  ;;  %v825_v50 = vadd.f32 %v1442_v41, %v1402_v40 }
  0xee   :  { %v1444_v12 = vpop.f32.mrf.mxu1  ;;  %v1405_v52 = vadd.f32 %v1404_v11, %v1403_v9 }
  0xef   :  { %v1406_v13 = vpop.f32.mrf.mxu0  ;;  %v1445_v53 = vadd.f32 %v1444_v12, %v1443_v10 }
  0xf0   :  { %v1446_v14 = vpop.f32.mrf.mxu1 }
  0xf1   :  { %v1407_v15 = vpop.f32.mrf.mxu0  ;;  %v830_v1 = vadd.f32 %v1445_v53, %v1405_v52 }
  0xf2   :  { %v1447_v16 = vpop.f32.mrf.mxu1  ;;  %v1408_v62 = vadd.f32 %v1407_v15, %v1406_v13 }
  0xf3   :  { %v1409_v17 = vpop.f32.mrf.mxu0  ;;  %v1448_v63 = vadd.f32 %v1447_v16, %v1446_v14 }
  0xf4   :  { %v1449_v18 = vpop.f32.mrf.mxu1 }
  0xf5   :  { %v1410_v19 = vpop.f32.mrf.mxu0  ;;  %v833_v10 = vadd.f32 %v1448_v63, %v1408_v62  ;;  %v1092_v62 = vld [vmem:[%s2155_s2 + $0x20] sm:$0xff]  ;;  %v1145_v63 = vld [vmem:[%s2156_s3 + $0x8] sm:$0xff] }
  0xf6   :  { %v1450_v20 = vpop.f32.mrf.mxu1  ;;  %v1411_v12 = vadd.f32 %v1410_v19, %v1409_v17 }
  0xf7   :  { %v1938_v21 = vpop.f32.mrf.mxu0  ;;  %v1451_v13 = vadd.f32 %v1450_v20, %v1449_v18 }
  0xf8   :  { %v1940_v22 = vpop.f32.mrf.mxu1 }
  0xf9   :  { %v1942_v23 = vpop.f32.mrf.mxu0  ;;  %v838_v17 = vadd.f32 %v1451_v13, %v1411_v12 }
  0xfa   :  { %v1944_v24 = vpop.f32.mrf.mxu1  ;;  %v1414_v34 = vadd.f32 %v1942_v23, %v1938_v21 }
  0xfb   :  { %v1946_v25 = vpop.f32.mrf.mxu0  ;;  %v1454_v35 = vadd.f32 %v1944_v24, %v1940_v22 }
  0xfc   :  { %v1948_v26 = vpop.f32.mrf.mxu1 }
  0xfd   :  { %v1950_v27 = vpop.f32.mrf.mxu0 }
  0xfe   :  { %v1952_v28 = vpop.f32.mrf.mxu1  ;;  %v1417_v21 = vadd.f32 %v1950_v27, %v1946_v25 }
  0xff   :  { %v1418_v29 = vpop.f32.mrf.mxu0  ;;  %v1457_v22 = vadd.f32 %v1952_v28, %v1948_v26 }
 0x100   :  { %v1458_v30 = vpop.f32.mrf.mxu1 }
 0x101   :  { %v1419_v31 = vpop.f32.mrf.mxu0  ;;  %v846_v52 = vadd.f32 %v1457_v22, %v1417_v21 }
 0x102   :  { %v1420_v32 = vadd.f32 %v1419_v31, %v1418_v29  ;;  %v1459_v33 = vpop.f32.mrf.mxu1 }
 0x103   :  { %v1460_v36 = vadd.f32 %v1459_v33, %v1458_v30  ;;  %v1477_v37 = vpop.f32.mrf.mxu0 }
 0x104   :  { %v1517_v39 = vpop.f32.mrf.mxu1 }
 0x105   :  { %v1954_v38 = vadd.f32 %v1460_v36, %v1420_v32  ;;  %v1478_v42 = vpop.f32.mrf.mxu0 }
 0x106   :  { %v1479_v44 = vadd.f32 %v1478_v42, %v1477_v37  ;;  %v1518_v45 = vpop.f32.mrf.mxu1 }
 0x107   :  { %v1480_v46 = vpop.f32.mrf.mxu0  ;;  %v1519_v48 = vadd.f32 %v1518_v45, %v1517_v39 }
 0x108   :  { %v887_v47 = vadd.f32 %v1479_v44, %v822_v43  ;;  %v1520_v49 = vpop.f32.mrf.mxu1  ;;  %v841_v43 = vadd.f32 %v1454_v35, %v1414_v34 }
 0x109   :  { %v1481_v51 = vpop.f32.mrf.mxu0 }
 0x10a   :  { %v1482_v54 = vadd.f32 %v1481_v51, %v1480_v46  ;;  %v1521_v55 = vpop.f32.mrf.mxu1  ;;  %v1956_v56 = vadd.f32 %v1519_v48, %v887_v47 }
 0x10b   :  { %v1483_v57 = vpop.f32.mrf.mxu0  ;;  %v1522_v59 = vadd.f32 %v1521_v55, %v1520_v49 }
 0x10c   :  { %v890_v58 = vadd.f32 %v1482_v54, %v825_v50  ;;  %v1523_v60 = vpop.f32.mrf.mxu1  ;;  %v983_v61 = vsel %vm982_vm0, %v1956_v56, 0.0 }
 0x10d   :  { %v1484_v0 = vpop.f32.mrf.mxu0  ;;  %984 = vadd.xlane.f32.xlu0 %v983_v61  ;;  %v1088_v61 = vld [vmem:[%s2155_s2] sm:$0xff] }
 0x10e   :  { %v1485_v2 = vadd.f32 %v1484_v0, %v1483_v57  ;;  %v1524_v3 = vpop.f32.mrf.mxu1  ;;  %v1960_v4 = vadd.f32 %v1522_v59, %v890_v58  ;;  %v1089_v58 = vld [vmem:[%s2155_s2 + $0x8] sm:$0xff]  ;;  %v1090_v59 = vld [vmem:[%s2155_s2 + $0x10] sm:$0xff] }
 0x10f   :  { %v1486_v5 = vpop.f32.mrf.mxu0  ;;  %v1525_v7 = vadd.f32 %v1524_v3, %v1523_v60  ;;  %v1091_v60 = vld [vmem:[%s2155_s2 + $0x18] sm:$0xff]  ;;  %v1093_v0 = vld [vmem:[%s2155_s2 + $0x28] sm:$0xff] }
 0x110   :  { %v895_v6 = vadd.f32 %v1485_v2, %v830_v1  ;;  %v1526_v8 = vpop.f32.mrf.mxu1  ;;  %v986_v9 = vsel %vm982_vm0, %v1960_v4, 0.0  ;;  %v1147_v1 = vld [vmem:[%s2156_s3 + $0x18] sm:$0xff]  ;;  %v1094_v2 = vld [vmem:[%s2155_s2 + $0x30] sm:$0xff]  ;;  %v1149_v3 = vld [vmem:[%s2156_s3 + $0x28] sm:$0xff] }
 0x111   :  { %v1487_v11 = vpop.f32.mrf.mxu0  ;;  %987 = vadd.xlane.f32.xlu0 %v986_v9 }
 0x112   :  { %v1488_v14 = vadd.f32 %v1487_v11, %v1486_v5  ;;  %v1527_v15 = vpop.f32.mrf.mxu1  ;;  %v1964_v16 = vadd.f32 %v1525_v7, %v895_v6  ;;  %v1095_v5 = vld [vmem:[%s2155_s2 + $0x38] sm:$0xff] }
 0x113   :  { %v1489_v29 = vpop.f32.mrf.mxu0  ;;  %v1528_v31 = vadd.f32 %v1527_v15, %v1526_v8  ;;  %v1144_v15 = vld [vmem:[%s2156_s3] sm:$0xff] }
 0x114   :  { %v898_v30 = vadd.f32 %v1488_v14, %v833_v10  ;;  %v1529_v32 = vpop.f32.mrf.mxu1  ;;  %v989_v33 = vsel %vm982_vm0, %v1964_v16, 0.0 }
 0x115   :  { %v1490_v36 = vpop.f32.mrf.mxu0  ;;  %990 = vadd.xlane.f32.xlu1 %v989_v33 }
 0x116   :  { %v1491_v18 = vadd.f32 %v1490_v36, %v1489_v29  ;;  %v1530_v19 = vpop.f32.mrf.mxu1  ;;  %v1972_v20 = vadd.f32 %v1528_v31, %v898_v30  ;;  %v1146_v29 = vld [vmem:[%s2156_s3 + $0x10] sm:$0xff]  ;;  %v1148_v30 = vld [vmem:[%s2156_s3 + $0x20] sm:$0xff] }
 0x117   :  { %v1492_v37 = vpop.f32.mrf.mxu0  ;;  %v1531_v40 = vadd.f32 %v1530_v19, %v1529_v32 }
 0x118   :  { %v903_v39 = vadd.f32 %v1491_v18, %v838_v17  ;;  %v1532_v41 = vpop.f32.mrf.mxu1  ;;  %v992_v42 = vsel %vm982_vm0, %v1972_v20, 0.0 }
 0x119   :  { %v1493_v44 = vpop.f32.mrf.mxu0  ;;  %993 = vadd.xlane.f32.xlu1 %v992_v42 }
 0x11a   :  { %v1494_v23 = vadd.f32 %v1493_v44, %v1492_v37  ;;  %v1533_v24 = vpop.f32.mrf.mxu1  ;;  %v1980_v45 = vadd.f32 %v1531_v40, %v903_v39 }
 0x11b   :  { %v1495_v46 = vpop.f32.mrf.mxu0  ;;  %v1534_v48 = vadd.f32 %v1533_v24, %v1532_v41 }
 0x11c   :  { %v906_v47 = vadd.f32 %v1494_v23, %v841_v43  ;;  %v1535_v49 = vpop.f32.mrf.mxu1  ;;  %v995_v50 = vsel %vm982_vm0, %v1980_v45, 0.0 }
 0x11d   :  { %v1496_v51 = vpop.f32.mrf.mxu0  ;;  %996 = vadd.xlane.f32.xlu0 %v995_v50 }
 0x11e   :  { %v1497_v53 = vadd.f32 %v1496_v51, %v1495_v46  ;;  %v1536_v54 = vpop.f32.mrf.mxu1  ;;  %v1984_v25 = vadd.f32 %v1534_v48, %v906_v47 }
 0x11f   :  { %v1537_v27 = vadd.f32 %v1536_v54, %v1535_v49  ;;  %v1498_v6 = vpop.f32.mrf.mxu0 }
 0x120   :  { %v911_v26 = vadd.f32 %v1497_v53, %v846_v52  ;;  %v998_v28 = vsel %vm982_vm0, %v1984_v25, 0.0  ;;  %v1538_v8 = vpop.f32.mrf.mxu1 }
 0x121   :  { %999 = vadd.xlane.f32.xlu1 %v998_v28  ;;  %v1499_v7 = vpop.f32.mrf.mxu0 }
 0x122   :  { %v1988_v55 = vadd.f32 %v1537_v27, %v911_v26  ;;  %v1500_v9 = vadd.f32 %v1499_v7, %v1498_v6  ;;  %v1539_v10 = vpop.f32.mrf.mxu1 }
 0x123   :  { %v1540_v12 = vadd.f32 %v1539_v10, %v1538_v8 }
 0x124   :  { %v1001_v57 = vsel %vm982_vm0, %v1988_v55, 0.0  ;;  %v914_v11 = vadd.f32 %v1500_v9, %v1954_v38 }
 0x125   :  { %1002 = vadd.xlane.f32.xlu0 %v1001_v57 }
 0x126   :  { %v979_v13 = vadd.f32 %v1540_v12, %v914_v11 }
 0x128   :  { %v1004_v14 = vsel %vm982_vm0, %v979_v13, 0.0 }
 0x132   :  { %1103 = vperm.xlu1 %1543, %v1089_v58  }
 0x136   :  { %1108 = vperm.xlu1 %1543, %v1090_v59  }
 0x13a   :  { %1113 = vperm.xlu1 %1543, %v1091_v60  }
 0x13b   :  { %1098 = vperm.xlu0 %1542, %v1088_v61  }
 0x13e   :  { %1118 = vperm.xlu1 %1543, %v1092_v62  }
 0x13f   :  { %1159 = vperm.xlu0 %1542, %v1145_v63  }
 0x142   :  { %1123 = vperm.xlu1 %1543, %v1093_v0  }
 0x143   :  { %1169 = vperm.xlu0 %1542, %v1147_v1   ;;  %v1150_v1 = vld [vmem:[%s2156_s3 + $0x30] sm:$0xff] }
 0x146   :  { %1128 = vperm.xlu1 %1543, %v1094_v2  }
 0x147   :  { %1179 = vperm.xlu0 %1542, %v1149_v3  }
 0x14a   :  { %1133 = vperm.xlu1 %1543, %v1095_v5  }
 0x16e   :  { %1005 = vadd.xlane.f32.xlu1 %v1004_v14 }
 0x17f   :  { %1154 = vperm.xlu1 %1543, %v1144_v15  }
 0x183   :  { %1164 = vperm.xlu1 %1543, %v1146_v29  }
 0x187   :  { %1174 = vperm.xlu1 %1543, %v1148_v30  }
 0x196   :  { %v985_v38 = vpop.xlane.xlu0 %984 }
 0x197   :  { %v1008_v31 = vmul.f32 0.03125, %v985_v38 }
 0x199   :  { %v2037_v32 = vsub.f32 %v1956_v56, %v1008_v31 }
 0x19a   :  { %v988_v33 = vpop.xlane.xlu0 %987 }
 0x19b   :  { %v1024_v34 = vmul.f32 %v2037_v32, %v2037_v32  ;;  %v1009_v36 = vmul.f32 0.03125, %v988_v33 }
 0x19d   :  { %v1032_v35 = vsel %vm982_vm0, %v1024_v34, 0.0  ;;  %v2046_v37 = vsub.f32 %v1960_v4, %v1009_v36 }
 0x19e   :  { %v991_v17 = vpop.xlane.xlu1 %990  ;;  %1033 = vadd.xlane.f32.xlu0 %v1032_v35 }
 0x19f   :  { %v1010_v18 = vmul.f32 0.03125, %v991_v17  ;;  %v1025_v44 = vmul.f32 %v2046_v37, %v2046_v37 }
 0x1a1   :  { %v2043_v19 = vsub.f32 %v1964_v16, %v1010_v18  ;;  %v1035_v22 = vsel %vm982_vm0, %v1025_v44, 0.0 }
 0x1a2   :  { %v994_v39 = vpop.xlane.xlu1 %993 }
 0x1a3   :  { %v1011_v40 = vmul.f32 0.03125, %v994_v39  ;;  %v1026_v56 = vmul.f32 %v2043_v19, %v2043_v19 }
 0x1a5   :  { %v1038_v41 = vsel %vm982_vm0, %v1026_v56, 0.0  ;;  %v2052_v42 = vsub.f32 %v1972_v20, %v1011_v40 }
 0x1a6   :  { %1039 = vadd.xlane.f32.xlu0 %v1038_v41  ;;  %v997_v43 = vpop.xlane.xlu0 %996 }
 0x1a7   :  { %v1012_v16 = vmul.f32 0.03125, %v997_v43  ;;  %v1027_v23 = vmul.f32 %v2052_v42, %v2052_v42 }
 0x1a9   :  { %v2057_v21 = vsub.f32 %v1980_v45, %v1012_v16  ;;  %v1041_v45 = vsel %vm982_vm0, %v1027_v23, 0.0 }
 0x1aa   :  { %v1000_v4 = vpop.xlane.xlu1 %999 }
 0x1ab   :  { %v1013_v24 = vmul.f32 0.03125, %v1000_v4  ;;  %1036 = vadd.xlane.f32.xlu1 %v1035_v22  ;;  %v1028_v20 = vmul.f32 %v2057_v21, %v2057_v21 }
 0x1ad   :  { %v2065_v46 = vsub.f32 %v1984_v25, %v1013_v24  ;;  %v1044_v47 = vsel %vm982_vm0, %v1028_v20, 0.0  ;;  %v1151_v25 = vld [vmem:[%s2156_s3 + $0x38] sm:$0xff] }
 0x1ae   :  { %1045 = vadd.xlane.f32.xlu0 %v1044_v47  ;;  %v1003_v48 = vpop.xlane.xlu0 %1002  ;;  %v2081_v27 = vpop.permute.xlu1 %1103 }
 0x1af   :  { %v1014_v49 = vmul.f32 0.03125, %v1003_v48  ;;  %1042 = vadd.xlane.f32.xlu1 %v1041_v45  ;;  %v1029_v50 = vmul.f32 %v2065_v46, %v2065_v46 }
 0x1b1   :  { %v2072_v51 = vsub.f32 %v1988_v55, %v1014_v49  ;;  %v1047_v52 = vsel %vm982_vm0, %v1029_v50, 0.0 }
 0x1b2   :  { %v1109_v26 = vpop.permute.xlu1 %1108 }
 0x1b3   :  { %1048 = vadd.xlane.f32.xlu1 %v1047_v52  ;;  %v1030_v53 = vmul.f32 %v2072_v51, %v2072_v51 }
 0x1b5   :  { %v1050_v54 = vsel %vm982_vm0, %v1030_v53, 0.0 }
 0x1b6   :  { %1051 = vadd.xlane.f32.xlu0 %v1050_v54  ;;  %v2083_v28 = vpop.permute.xlu1 %1113  ;;  %v1099_v2 = vpop.permute.xlu0 %1098 }
 0x1ba   :  { %v2085_v55 = vpop.permute.xlu1 %1118  ;;  %v1160_v3 = vpop.permute.xlu0 %1159 }
 0x1be   :  { %v2087_v57 = vpop.permute.xlu1 %1123  ;;  %v2101_v5 = vpop.permute.xlu0 %1169 }
 0x1c2   :  { %v2089_v58 = vpop.permute.xlu1 %1128  ;;  %v2103_v6 = vpop.permute.xlu0 %1179 }
 0x1c6   :  { %v2091_v59 = vpop.permute.xlu1 %1133 }
 0x1cc   :  { %1189 = vperm.xlu0 %1542, %v1151_v25  }
 0x1f7   :  { %v1006_v60 = vpop.xlane.xlu1 %1005 }
 0x1f8   :  { %v1015_v61 = vmul.f32 0.03125, %v1006_v60 }
 0x1fa   :  { %v2093_v62 = vsub.f32 %v979_v13, %v1015_v61 }
 0x1fb   :  { %v1155_v7 = vpop.permute.xlu1 %1154 }
 0x1fc   :  { %v1031_v63 = vmul.f32 %v2093_v62, %v2093_v62 }
 0x1fe   :  { %v1053_v0 = vsel %vm982_vm0, %v1031_v63, 0.0 }
 0x1ff   :  { %1054 = vadd.xlane.f32.xlu1 %v1053_v0  ;;  %v1165_v10 = vpop.permute.xlu1 %1164 }
 0x203   :  { %v1175_v13 = vpop.permute.xlu1 %1174 }
 0x210   :  { %1184 = vperm.xlu1 %1543, %v1150_v1  }
 0x227   :  { %v1034_v8 = vpop.xlane.xlu0 %1033 }
 0x228   :  { %v1056_v9 = vmul.f32 0.03125, %v1034_v8 }
 0x22a   :  { %v1064_v11 = vadd.f32 1e-05, %v1056_v9 }
 0x22c   :  { %1608 = vrsqrt.f32 %v1064_v11 }
 0x22f   :  { %v1040_v12 = vpop.xlane.xlu0 %1039 }
 0x230   :  { %v1058_v14 = vmul.f32 0.03125, %v1040_v12 }
 0x232   :  { %v1066_v15 = vadd.f32 1e-05, %v1058_v14 }
 0x234   :  { %1610 = vrsqrt.f32 %v1066_v15  ;;  %v1037_v29 = vpop.xlane.xlu1 %1036 }
 0x235   :  { %v1057_v30 = vmul.f32 0.03125, %v1037_v29 }
 0x237   :  { %v1065_v38 = vadd.f32 1e-05, %v1057_v30  ;;  %v1046_v31 = vpop.xlane.xlu0 %1045 }
 0x238   :  { %v1060_v33 = vmul.f32 0.03125, %v1046_v31  ;;  %v1043_v34 = vpop.xlane.xlu1 %1042 }
 0x239   :  { %v1609_v35 = vpop.eup %1608  ;;  %1612 = vrsqrt.f32 %v1065_v38  ;;  %v1059_v36 = vmul.f32 0.03125, %v1043_v34 }
 0x23a   :  { %v1080_v17 = vmul.f32 %v1609_v35, %v2037_v32  ;;  %v1068_v18 = vadd.f32 1e-05, %v1060_v33 }
 0x23b   :  { %v1067_v39 = vadd.f32 1e-05, %v1059_v36 }
 0x23c   :  { %v1136_v40 = vmul.f32 %v1099_v2, %v1080_v17  ;;  %1614 = vrsqrt.f32 %v1068_v18  ;;  %v1049_v56 = vpop.xlane.xlu1 %1048 }
 0x23d   :  { %1616 = vrsqrt.f32 %v1067_v39  ;;  %v1061_v41 = vmul.f32 0.03125, %v1049_v56 }
 0x23e   :  { %v1192_v43 = vadd.f32 %v1155_v7, %v1136_v40 }
 0x23f   :  { %v1069_v44 = vadd.f32 1e-05, %v1061_v41 }
 0x240   :  { %vm1200_vm1 = vcmp.gt.f32.partialorder %v1192_v43, 0.0  ;;  %v1208_v16 = vmul.f32 0.2, %v1192_v43 }
 0x241   :  { %v1611_v4 = vpop.eup %1610  ;;  %1618 = vrsqrt.f32 %v1069_v44 }
 0x242   :  { %v1216_v22 = vsel %vm1200_vm1, %v1192_v43, %v1208_v16  ;;  %v1082_v23 = vmul.f32 %v1611_v4, %v2043_v19 }
 0x243   :  { %v1373_v24 = vpack.c.bf16 %v1216_v22, %v1216_v22 }
 0x244   :  { %v1138_v20 = vmul.f32 %v1109_v26, %v1082_v23 }
 0x245   :  { %1257 = vst.msk [vmem:[%s2157_s4] sm:$0xf] %vm1256_vm2, %v1373_v24 }
 0x246   :  { %v1613_v32 = vpop.eup %1612  ;;  %v1194_v47 = vadd.f32 %v1165_v10, %v1138_v20 }
 0x247   :  { %v1081_v48 = vmul.f32 %v1613_v32, %v2046_v37 }
 0x248   :  { %vm1202_vm3 = vcmp.gt.f32.partialorder %v1194_v47, 0.0  ;;  %v1210_v45 = vmul.f32 0.2, %v1194_v47 }
 0x249   :  { %v1615_v49 = vpop.eup %1614  ;;  %v1137_v50 = vmul.f32 %v2081_v27, %v1081_v48 }
 0x24a   :  { %v1617_v52 = vpop.eup %1616  ;;  %v1218_v53 = vsel %vm1202_vm3, %v1194_v47, %v1210_v45  ;;  %v1084_v19 = vmul.f32 %v1615_v49, %v2057_v21 }
 0x24b   :  { %v1375_v54 = vpack.c.bf16 %v1218_v53, %v1218_v53  ;;  %v1193_v25 = vadd.f32 %v1160_v3, %v1137_v50  ;;  %v1083_v26 = vmul.f32 %v1617_v52, %v2052_v42 }
 0x24c   :  { %v1140_v60 = vmul.f32 %v2085_v55, %v1084_v19 }
 0x24d   :  { %vm1201_vm4 = vcmp.gt.f32.partialorder %v1193_v25, 0.0  ;;  %v1209_v61 = vmul.f32 0.2, %v1193_v25  ;;  %v1139_v63 = vmul.f32 %v2083_v28, %v1083_v26  ;;  %1259 = vst.msk [vmem:[%s2157_s4 + $0x8] sm:$0xf] %vm1256_vm2, %v1375_v54 }
 0x24e   :  { %v1619_v37 = vpop.eup %1618  ;;  %v1196_v27 = vadd.f32 %v1175_v13, %v1140_v60 }
 0x24f   :  { %v1217_v0 = vsel %vm1201_vm4, %v1193_v25, %v1209_v61  ;;  %v1195_v21 = vadd.f32 %v2101_v5, %v1139_v63  ;;  %v1085_v1 = vmul.f32 %v1619_v37, %v2065_v46 }
 0x250   :  { %v1374_v2 = vpack.c.bf16 %v1217_v0, %v1217_v0  ;;  %vm1204_vm5 = vcmp.gt.f32.partialorder %v1196_v27, 0.0  ;;  %v1212_v42 = vmul.f32 0.2, %v1196_v27 }
 0x251   :  { %vm1203_vm6 = vcmp.gt.f32.partialorder %v1195_v21, 0.0  ;;  %v1211_v55 = vmul.f32 0.2, %v1195_v21  ;;  %v1141_v3 = vmul.f32 %v2087_v57, %v1085_v1 }
 0x252   :  { %v1220_v28 = vsel %vm1204_vm5, %v1196_v27, %v1212_v42  ;;  %1258 = vst.msk [vmem:[%s2157_s4 + $0x4] sm:$0xf] %vm1256_vm2, %v1374_v2 }
 0x253   :  { %v1377_v7 = vpack.c.bf16 %v1220_v28, %v1220_v28  ;;  %v1219_v8 = vsel %vm1203_vm6, %v1195_v21, %v1211_v55  ;;  %v1197_v9 = vadd.f32 %v2103_v6, %v1141_v3  ;;  %v1052_v6 = vpop.xlane.xlu0 %1051 }
 0x254   :  { %v1376_v5 = vpack.c.bf16 %v1219_v8, %v1219_v8  ;;  %v1062_v11 = vmul.f32 0.03125, %v1052_v6 }
 0x255   :  { %vm1205_vm7 = vcmp.gt.f32.partialorder %v1197_v9, 0.0  ;;  %v1213_v46 = vmul.f32 0.2, %v1197_v9  ;;  %1261 = vst.msk [vmem:[%s2157_s4 + $0x10] sm:$0xf] %vm1256_vm2, %v1377_v7 }
 0x256   :  { %1260 = vst.msk [vmem:[%s2157_s4 + $0xc] sm:$0xf] %vm1256_vm2, %v1376_v5  ;;  %v1070_v12 = vadd.f32 1e-05, %v1062_v11 }
 0x257   :  { %v1221_v57 = vsel %vm1205_vm7, %v1197_v9, %v1213_v46  ;;  %v1190_v39 = vpop.permute.xlu0 %1189 }
 0x258   :  { %v1378_v10 = vpack.c.bf16 %v1221_v57, %v1221_v57  ;;  %1620 = vrsqrt.f32 %v1070_v12 }
 0x25a   :  { %1262 = vst.msk [vmem:[%s2157_s4 + $0x14] sm:$0xf] %vm1256_vm2, %v1378_v10 }
 0x265   :  { %v1621_v13 = vpop.eup %1620 }
 0x266   :  { %v1086_v14 = vmul.f32 %v1621_v13, %v2072_v51 }
 0x268   :  { %v1142_v38 = vmul.f32 %v2089_v58, %v1086_v14 }
 0x288   :  { %v1055_v15 = vpop.xlane.xlu1 %1054 }
 0x289   :  { %v1063_v29 = vmul.f32 0.03125, %v1055_v15 }
 0x28b   :  { %v1071_v30 = vadd.f32 1e-05, %v1063_v29 }
 0x28c   :  { %v1185_v31 = vpop.permute.xlu1 %1184 }
 0x28d   :  { %1622 = vrsqrt.f32 %v1071_v30  ;;  %v1198_v33 = vadd.f32 %v1185_v31, %v1142_v38 }
 0x28f   :  { %vm1206_vm8 = vcmp.gt.f32.partialorder %v1198_v33, 0.0  ;;  %v1214_v34 = vmul.f32 0.2, %v1198_v33 }
 0x291   :  { %v1222_v35 = vsel %vm1206_vm8, %v1198_v33, %v1214_v34 }
 0x292   :  { %v1379_v36 = vpack.c.bf16 %v1222_v35, %v1222_v35 }
 0x294   :  { %1263 = vst.msk [vmem:[%s2157_s4 + $0x18] sm:$0xf] %vm1256_vm2, %v1379_v36 }
 0x29a   :  { %v1623_v17 = vpop.eup %1622 }
 0x29b   :  { %v1087_v51 = vmul.f32 %v1623_v17, %v2093_v62 }
 0x29d   :  { %v1143_v18 = vmul.f32 %v2091_v59, %v1087_v51 }
 0x29f   :  { %v1199_v40 = vadd.f32 %v1190_v39, %v1143_v18 }
 0x2a1   :  { %vm1207_vm9 = vcmp.gt.f32.partialorder %v1199_v40, 0.0  ;;  %v1215_v58 = vmul.f32 0.2, %v1199_v40 }
 0x2a3   :  { %v1223_v56 = vsel %vm1207_vm9, %v1199_v40, %v1215_v58 }
 0x2a4   :  { %v1380_v41 = vpack.c.bf16 %v1223_v56, %v1223_v56 }
 0x2a6   :  { %1264 = vst.msk [vmem:[%s2157_s4 + $0x1c] sm:$0xf] %vm1256_vm2, %v1380_v41 }

// kernel: vae_forward.20
= control target key start
LH: loop header
LB: loop body
LE: loop exit
PB: predicated region body
PF: predicated region fallthrough
CT: control target
= control target key end

     0   :  { %s1546_s1 = inlined_call_operand.vmem [shape: bf16[1024,128], index: 1, kind: input, shape index: {}]   ;;  %s1547_s0 = inlined_call_operand.vmem [shape: bf16[32,1024], index: 0, kind: input, shape index: {}]   ;;  %s1548_s2 = inlined_call_operand.vmem [shape: f32[32,1], index: 2, kind: input, shape index: {}]   ;;  %s1549_s3 = inlined_call_operand.vmem [shape: f32[32,1], index: 3, kind: input, shape index: {}]   ;;  %s1550_s4 = inlined_call_operand.vmem [shape: bf16[32,128], index: 4, kind: output, shape index: {}]  }
   0x1   :  { %v1173_v0 = vld [vmem:[%s1546_s1 + $0x78] sm:$0xff]   ;;  %v1177_v4 = vld [vmem:[%s1546_s1 + $0x70] sm:$0xff]   ;;  %v1181_v8 = vld [vmem:[%s1546_s1 + $0x68] sm:$0xff]  }
   0x2   :  { %v1174_v1 = vld [vmem:[%s1546_s1 + $0xf8] sm:$0xff]   ;;  %1058 = vmatprep.subr.bf16.mxu0 %v1173_v0  ;;  %v1178_v5 = vld [vmem:[%s1546_s1 + $0xf0] sm:$0xff]   ;;  %v1182_v9 = vld [vmem:[%s1546_s1 + $0xe8] sm:$0xff]  }
   0x3   :  { %v1175_v2 = vld [vmem:[%s1546_s1 + $0x38] sm:$0xff]   ;;  %1086 = vmatprep.subr.bf16.mxu1 %v1174_v1  ;;  %v1179_v6 = vld [vmem:[%s1546_s1 + $0x30] sm:$0xff]   ;;  %v1183_v10 = vld [vmem:[%s1546_s1 + $0x28] sm:$0xff]  }
   0x4   :  { %v1176_v3 = vld [vmem:[%s1546_s1 + $0xb8] sm:$0xff]   ;;  %1059 = vmatpush3.bf16.msra.mxu0 %v1175_v2  ;;  %v1180_v7 = vld [vmem:[%s1546_s1 + $0xb0] sm:$0xff]   ;;  %v1184_v11 = vld [vmem:[%s1546_s1 + $0xa8] sm:$0xff]  }
   0x5   :  { %1087 = vmatpush3.bf16.msra.mxu1 %v1176_v3  ;;  %1060 = vmatprep.subr.bf16.mxu0 %v1177_v4  ;;  %v1185_v12 = vld [vmem:[%s1546_s1 + $0x60] sm:$0xff]   ;;  %v1189_v16 = vld [vmem:[%s1546_s1 + $0x58] sm:$0xff]   ;;  %v1193_v20 = vld [vmem:[%s1546_s1 + $0x50] sm:$0xff]  }
   0x6   :  { %1088 = vmatprep.subr.bf16.mxu1 %v1178_v5  ;;  %v1186_v13 = vld [vmem:[%s1546_s1 + $0xe0] sm:$0xff]   ;;  %v1190_v17 = vld [vmem:[%s1546_s1 + $0xd8] sm:$0xff]   ;;  %v1194_v21 = vld [vmem:[%s1546_s1 + $0xd0] sm:$0xff]  }
   0x7   :  { %v1187_v14 = vld [vmem:[%s1546_s1 + $0x20] sm:$0xff]   ;;  %v1191_v18 = vld [vmem:[%s1546_s1 + $0x18] sm:$0xff]   ;;  %v1195_v22 = vld [vmem:[%s1546_s1 + $0x10] sm:$0xff]  }
   0x8   :  { %1061 = vmatpush3.bf16.msra.mxu0 %v1179_v6  ;;  %v1188_v15 = vld [vmem:[%s1546_s1 + $0xa0] sm:$0xff]   ;;  %v1192_v19 = vld [vmem:[%s1546_s1 + $0x98] sm:$0xff]   ;;  %v1196_v23 = vld [vmem:[%s1546_s1 + $0x90] sm:$0xff]  }
   0x9   :  { %1089 = vmatpush3.bf16.msra.mxu1 %v1180_v7  ;;  %1062 = vmatprep.subr.bf16.mxu0 %v1181_v8  ;;  %v1197_v24 = vld [vmem:[%s1546_s1 + $0x48] sm:$0xff]   ;;  %v1201_v28 = vld [vmem:[%s1546_s1 + $0x40] sm:$0xff]   ;;  %v1205_v40 = vld [vmem:[%s1546_s1 + $0x178] sm:$0xff]  }
   0xa   :  { %1090 = vmatprep.subr.bf16.mxu1 %v1182_v9  ;;  %v1198_v25 = vld [vmem:[%s1546_s1 + $0xc8] sm:$0xff]   ;;  %v1202_v29 = vld [vmem:[%s1546_s1 + $0xc0] sm:$0xff]   ;;  %v1206_v41 = vld [vmem:[%s1546_s1 + $0x1f8] sm:$0xff]  }
   0xb   :  { %v1199_v26 = vld [vmem:[%s1546_s1 + $0x8] sm:$0xff]   ;;  %v1203_v30 = vld [vmem:[%s1546_s1] sm:$0xff]   ;;  %v1207_v42 = vld [vmem:[%s1546_s1 + $0x138] sm:$0xff]  }
   0xc   :  { %1063 = vmatpush3.bf16.msra.mxu0 %v1183_v10  ;;  %v1200_v27 = vld [vmem:[%s1546_s1 + $0x88] sm:$0xff]   ;;  %v1204_v31 = vld [vmem:[%s1546_s1 + $0x80] sm:$0xff]   ;;  %v1208_v43 = vld [vmem:[%s1546_s1 + $0x1b8] sm:$0xff]  }
   0xd   :  { %1091 = vmatpush3.bf16.msra.mxu1 %v1184_v11  ;;  %1064 = vmatprep.subr.bf16.mxu0 %v1185_v12  ;;  %v18_v32 = vld [vmem:[%s1547_s0] sm:$0xff]  ;;  %v19_v34 = vld [vmem:[%s1547_s0 + $0x8] sm:$0xff]  ;;  %v1209_v44 = vld [vmem:[%s1546_s1 + $0x170] sm:$0xff]  }
   0xe   :  { %1092 = vmatprep.subr.bf16.mxu1 %v1186_v13  ;;  %v22_v33 = vld [vmem:[%s1547_s0 + $0x20] sm:$0xff]  ;;  %v23_v37 = vld [vmem:[%s1547_s0 + $0x28] sm:$0xff]  ;;  %v1210_v45 = vld [vmem:[%s1546_s1 + $0x1f0] sm:$0xff]  }
   0xf   :  { %v959_v35 = vcombine.low %v18_v32, %v22_v33  ;;  %v960_v36 = vcombine.high %v18_v32, %v22_v33  ;;  %v961_v38 = vcombine.low %v19_v34, %v23_v37  ;;  %v962_v39 = vcombine.high %v19_v34, %v23_v37  ;;  %v1211_v46 = vld [vmem:[%s1546_s1 + $0x130] sm:$0xff]   ;;  %v1213_v48 = vld [vmem:[%s1546_s1 + $0x168] sm:$0xff]   ;;  %v1217_v52 = vld [vmem:[%s1546_s1 + $0x160] sm:$0xff]  }
  0x10   :  { %1065 = vmatpush3.bf16.msra.mxu0 %v1187_v14  ;;  %v1212_v47 = vld [vmem:[%s1546_s1 + $0x1b0] sm:$0xff]   ;;  %v1214_v49 = vld [vmem:[%s1546_s1 + $0x1e8] sm:$0xff]   ;;  %v1218_v53 = vld [vmem:[%s1546_s1 + $0x1e0] sm:$0xff]  }
  0x11   :  { %1093 = vmatpush3.bf16.msra.mxu1 %v1188_v15  ;;  %1066 = vmatprep.subr.bf16.mxu0 %v1189_v16  ;;  %v1215_v50 = vld [vmem:[%s1546_s1 + $0x128] sm:$0xff]   ;;  %v1219_v54 = vld [vmem:[%s1546_s1 + $0x120] sm:$0xff]   ;;  %v1221_v56 = vld [vmem:[%s1546_s1 + $0x158] sm:$0xff]  }
  0x12   :  { %1094 = vmatprep.subr.bf16.mxu1 %v1190_v17  ;;  %658 = vmatprep.mubr.bf16.mxu0 %v960_v36  ;;  %v1216_v51 = vld [vmem:[%s1546_s1 + $0x1a8] sm:$0xff]   ;;  %v1220_v55 = vld [vmem:[%s1546_s1 + $0x1a0] sm:$0xff]   ;;  %v1222_v57 = vld [vmem:[%s1546_s1 + $0x1d8] sm:$0xff]  }
  0x13   :  { %707 = vmatprep.mubr.bf16.mxu1 %v962_v39  ;;  %v26_v58 = vld [vmem:[%s1547_s0 + $0x40] sm:$0xff]  ;;  %v27_v61 = vld [vmem:[%s1547_s0 + $0x48] sm:$0xff]  ;;  %v1223_v1 = vld [vmem:[%s1546_s1 + $0x118] sm:$0xff]  }
  0x14   :  { %1067 = vmatpush3.bf16.msra.mxu0 %v1191_v18  ;;  %v30_v59 = vld [vmem:[%s1547_s0 + $0x60] sm:$0xff]  ;;  %v31_v62 = vld [vmem:[%s1547_s0 + $0x68] sm:$0xff]  ;;  %v1224_v3 = vld [vmem:[%s1546_s1 + $0x198] sm:$0xff]  }
  0x15   :  { %1095 = vmatpush3.bf16.msra.mxu1 %v1192_v19  ;;  %1068 = vmatprep.subr.bf16.mxu0 %v1193_v20  ;;  %v968_v60 = vcombine.high %v26_v58, %v30_v59  ;;  %v967_v63 = vcombine.low %v26_v58, %v30_v59  ;;  %v970_v0 = vcombine.high %v27_v61, %v31_v62  ;;  %v1225_v4 = vld [vmem:[%s1546_s1 + $0x150] sm:$0xff]   ;;  %v1229_v8 = vld [vmem:[%s1546_s1 + $0x148] sm:$0xff]   ;;  %v1233_v12 = vld [vmem:[%s1546_s1 + $0x140] sm:$0xff]  }
  0x16   :  { %1096 = vmatprep.subr.bf16.mxu1 %v1194_v21  ;;  %v969_v2 = vcombine.low %v27_v61, %v31_v62  ;;  %v1226_v5 = vld [vmem:[%s1546_s1 + $0x1d0] sm:$0xff]   ;;  %v1230_v9 = vld [vmem:[%s1546_s1 + $0x1c8] sm:$0xff]   ;;  %v1234_v13 = vld [vmem:[%s1546_s1 + $0x1c0] sm:$0xff]  }
  0x17   :  { %v1227_v6 = vld [vmem:[%s1546_s1 + $0x110] sm:$0xff]   ;;  %v1231_v10 = vld [vmem:[%s1546_s1 + $0x108] sm:$0xff]   ;;  %v1235_v14 = vld [vmem:[%s1546_s1 + $0x100] sm:$0xff]  }
  0x18   :  { %1069 = vmatpush3.bf16.msra.mxu0 %v1195_v22  ;;  %v1228_v7 = vld [vmem:[%s1546_s1 + $0x190] sm:$0xff]   ;;  %v1232_v11 = vld [vmem:[%s1546_s1 + $0x188] sm:$0xff]   ;;  %v1236_v15 = vld [vmem:[%s1546_s1 + $0x180] sm:$0xff]  }
  0x19   :  { %1097 = vmatpush3.bf16.msra.mxu1 %v1196_v23  ;;  %1070 = vmatprep.subr.bf16.mxu0 %v1197_v24  ;;  %v20_v16 = vld [vmem:[%s1547_s0 + $0x10] sm:$0xff]  ;;  %v21_v18 = vld [vmem:[%s1547_s0 + $0x18] sm:$0xff] }
  0x1a   :  { %1098 = vmatprep.subr.bf16.mxu1 %v1198_v25  ;;  %v24_v17 = vld [vmem:[%s1547_s0 + $0x30] sm:$0xff]  ;;  %v25_v19 = vld [vmem:[%s1547_s0 + $0x38] sm:$0xff] }
  0x1b   :  { %v963_v20 = vcombine.low %v20_v16, %v24_v17  ;;  %v964_v21 = vcombine.high %v20_v16, %v24_v17  ;;  %v965_v22 = vcombine.low %v21_v18, %v25_v19  ;;  %v966_v23 = vcombine.high %v21_v18, %v25_v19  ;;  %v28_v24 = vld [vmem:[%s1547_s0 + $0x50] sm:$0xff] }
  0x1c   :  { %1071 = vmatpush3.bf16.msra.mxu0 %v1199_v26  ;;  %v32_v25 = vld [vmem:[%s1547_s0 + $0x70] sm:$0xff]  ;;  %v29_v26 = vld [vmem:[%s1547_s0 + $0x58] sm:$0xff] }
  0x1d   :  { %1099 = vmatpush3.bf16.msra.mxu1 %v1200_v27  ;;  %1072 = vmatprep.subr.bf16.mxu0 %v1201_v28  ;;  %v972_v27 = vcombine.high %v28_v24, %v32_v25  ;;  %v33_v28 = vld [vmem:[%s1547_s0 + $0x78] sm:$0xff] }
  0x1e   :  { %1100 = vmatprep.subr.bf16.mxu1 %v1202_v29  ;;  %v974_v29 = vcombine.high %v29_v26, %v33_v28 }
  0x20   :  { %1073 = vmatpush3.bf16.msra.mxu0 %v1203_v30  ;;  %v971_v30 = vcombine.low %v28_v24, %v32_v25 }
  0x21   :  { %1101 = vmatpush3.bf16.msra.mxu1 %v1204_v31  ;;  %1114 = vmatprep.subr.bf16.mxu0 %v1205_v40  ;;  %v973_v31 = vcombine.low %v29_v26, %v33_v28  ;;  %v1245_v28 = vmov 0  }
  0x22   :  { %1142 = vmatprep.subr.bf16.mxu1 %v1206_v41  ;;  %1172 = vset.pattern.permute.xlu1 %v1245_v28 }
  0x23   :  { %659 = vmatmul.mubr.bf16.vlgmr.msra.gmra.mxu0 %v959_v35  ;;  %1171 = vset.pattern.permute.xlu0 %v1245_v28 }
  0x24   :  { %708 = vmatmul.mubr.bf16.vlgmr.msra.gmra.mxu1 %v961_v38  ;;  %1115 = vmatpush3.bf16.msra.mxu0 %v1207_v42 }
  0x25   :  { %1143 = vmatpush3.bf16.msra.mxu1 %v1208_v43  ;;  %1116 = vmatprep.subr.bf16.mxu0 %v1209_v44 }
  0x26   :  { %1144 = vmatprep.subr.bf16.mxu1 %v1210_v45  ;;  %666 = vmatprep.mubr.bf16.mxu0 %v968_v60 }
  0x27   :  { %715 = vmatprep.mubr.bf16.mxu1 %v970_v0 }
  0x28   :  { %1117 = vmatpush3.bf16.msra.mxu0 %v1211_v46 }
  0x29   :  { %1145 = vmatpush3.bf16.msra.mxu1 %v1212_v47  ;;  %1118 = vmatprep.subr.bf16.mxu0 %v1213_v48 }
  0x2a   :  { %1146 = vmatprep.subr.bf16.mxu1 %v1214_v49 }
  0x2b   :  { %667 = vmatmul.mubr.bf16.gmra.mxu0 %v967_v63 }
  0x2c   :  { %1119 = vmatpush3.bf16.msra.mxu0 %v1215_v50  ;;  %716 = vmatmul.mubr.bf16.gmra.mxu1 %v969_v2 }
  0x2d   :  { %1147 = vmatpush3.bf16.msra.mxu1 %v1216_v51  ;;  %1120 = vmatprep.subr.bf16.mxu0 %v1217_v52 }
  0x2e   :  { %1148 = vmatprep.subr.bf16.mxu1 %v1218_v53  ;;  %756 = vmatprep.mubr.bf16.mxu0 %v964_v21 }
  0x2f   :  { %805 = vmatprep.mubr.bf16.mxu1 %v966_v23 }
  0x30   :  { %1121 = vmatpush3.bf16.msra.mxu0 %v1219_v54 }
  0x31   :  { %1149 = vmatpush3.bf16.msra.mxu1 %v1220_v55  ;;  %1122 = vmatprep.subr.bf16.mxu0 %v1221_v56 }
  0x32   :  { %1150 = vmatprep.subr.bf16.mxu1 %v1222_v57 }
  0x34   :  { %1123 = vmatpush3.bf16.msra.mxu0 %v1223_v1 }
  0x35   :  { %1151 = vmatpush3.bf16.msra.mxu1 %v1224_v3  ;;  %1124 = vmatprep.subr.bf16.mxu0 %v1225_v4 }
  0x36   :  { %1152 = vmatprep.subr.bf16.mxu1 %v1226_v5 }
  0x38   :  { %1125 = vmatpush3.bf16.msra.mxu0 %v1227_v6 }
  0x39   :  { %1153 = vmatpush3.bf16.msra.mxu1 %v1228_v7  ;;  %1126 = vmatprep.subr.bf16.mxu0 %v1229_v8 }
  0x3a   :  { %1154 = vmatprep.subr.bf16.mxu1 %v1230_v9 }
  0x3c   :  { %1127 = vmatpush3.bf16.msra.mxu0 %v1231_v10 }
  0x3d   :  { %1155 = vmatpush3.bf16.msra.mxu1 %v1232_v11  ;;  %1128 = vmatprep.subr.bf16.mxu0 %v1233_v12 }
  0x3e   :  { %1156 = vmatprep.subr.bf16.mxu1 %v1234_v13 }
  0x40   :  { %1129 = vmatpush3.bf16.msra.mxu0 %v1235_v14 }
  0x41   :  { %1157 = vmatpush3.bf16.msra.mxu1 %v1236_v15 }
  0x43   :  { %757 = vmatmul.mubr.bf16.vlgmr.msra.gmra.mxu0 %v963_v20 }
  0x44   :  { %806 = vmatmul.mubr.bf16.vlgmr.msra.gmra.mxu1 %v965_v22  ;;  %764 = vmatprep.mubr.bf16.mxu0 %v972_v27 }
  0x45   :  { %813 = vmatprep.mubr.bf16.mxu1 %v974_v29 }
  0x4b   :  { %765 = vmatmul.mubr.bf16.gmra.mxu0 %v971_v30 }
  0x4c   :  { %814 = vmatmul.mubr.bf16.gmra.mxu1 %v973_v31 }
  0xe3   :  { %v1074_v32 = vpop.f32.mrf.mxu0 }
  0xe4   :  { %v1102_v33 = vpop.f32.mrf.mxu1 }
  0xe5   :  { %v1075_v34 = vpop.f32.mrf.mxu0 }
  0xe6   :  { %v1103_v35 = vpop.f32.mrf.mxu1  ;;  %v1076_v48 = vadd.f32 %v1075_v34, %v1074_v32 }
  0xe7   :  { %v1077_v36 = vpop.f32.mrf.mxu0  ;;  %v1104_v49 = vadd.f32 %v1103_v35, %v1102_v33 }
  0xe8   :  { %v1105_v37 = vpop.f32.mrf.mxu1 }
  0xe9   :  { %v1078_v38 = vpop.f32.mrf.mxu0  ;;  %v710_v54 = vadd.f32 %v1104_v49, %v1076_v48 }
  0xea   :  { %v1106_v39 = vpop.f32.mrf.mxu1  ;;  %v1079_v55 = vadd.f32 %v1078_v38, %v1077_v36 }
  0xeb   :  { %v1080_v40 = vpop.f32.mrf.mxu0  ;;  %v1107_v56 = vadd.f32 %v1106_v39, %v1105_v37 }
  0xec   :  { %v1108_v41 = vpop.f32.mrf.mxu1 }
  0xed   :  { %v1081_v42 = vpop.f32.mrf.mxu0  ;;  %v713_v2 = vadd.f32 %v1107_v56, %v1079_v55 }
  0xee   :  { %v1109_v43 = vpop.f32.mrf.mxu1  ;;  %v1082_v62 = vadd.f32 %v1081_v42, %v1080_v40  ;;  %v869_v42 = vld [vmem:[%s1548_s2 + $0x10] sm:$0xff] }
  0xef   :  { %v1083_v44 = vpop.f32.mrf.mxu0  ;;  %v1110_v63 = vadd.f32 %v1109_v43, %v1108_v41  ;;  %v868_v41 = vld [vmem:[%s1548_s2 + $0x8] sm:$0xff]  ;;  %v870_v43 = vld [vmem:[%s1548_s2 + $0x18] sm:$0xff] }
  0xf0   :  { %v1111_v45 = vpop.f32.mrf.mxu1 }
  0xf1   :  { %v1084_v46 = vpop.f32.mrf.mxu0  ;;  %v718_v9 = vadd.f32 %v1110_v63, %v1082_v62 }
  0xf2   :  { %v1112_v47 = vpop.f32.mrf.mxu1  ;;  %v1085_v10 = vadd.f32 %v1084_v46, %v1083_v44  ;;  %v867_v44 = vld [vmem:[%s1548_s2] sm:$0xff]  ;;  %v896_v46 = vld [vmem:[%s1549_s3 + $0x8] sm:$0xff] }
  0xf3   :  { %v1113_v13 = vadd.f32 %v1112_v47, %v1111_v45  ;;  %v895_v45 = vld [vmem:[%s1549_s3] sm:$0xff]  ;;  %v897_v47 = vld [vmem:[%s1549_s3 + $0x10] sm:$0xff] }
  0xf5   :  { %v721_v22 = vadd.f32 %v1113_v13, %v1085_v10 }
 0x103   :  { %v1130_v50 = vpop.f32.mrf.mxu0 }
 0x104   :  { %v1158_v51 = vpop.f32.mrf.mxu1 }
 0x105   :  { %v1131_v52 = vpop.f32.mrf.mxu0 }
 0x106   :  { %v1159_v53 = vpop.f32.mrf.mxu1  ;;  %v1132_v57 = vadd.f32 %v1131_v52, %v1130_v50  ;;  %v898_v52 = vld [vmem:[%s1549_s3 + $0x18] sm:$0xff] }
 0x107   :  { %v1133_v58 = vpop.f32.mrf.mxu0  ;;  %v1160_v61 = vadd.f32 %v1159_v53, %v1158_v51 }
 0x108   :  { %v1161_v59 = vpop.f32.mrf.mxu1  ;;  %v759_v60 = vadd.f32 %v1132_v57, %v710_v54 }
 0x109   :  { %v1134_v0 = vpop.f32.mrf.mxu0 }
 0x10a   :  { %v1162_v1 = vpop.f32.mrf.mxu1  ;;  %v1135_v3 = vadd.f32 %v1134_v0, %v1133_v58  ;;  %v808_v4 = vadd.f32 %v1160_v61, %v759_v60 }
 0x10b   :  { %v1136_v5 = vpop.f32.mrf.mxu0  ;;  %v1163_v8 = vadd.f32 %v1162_v1, %v1161_v59 }
 0x10c   :  { %v1164_v6 = vpop.f32.mrf.mxu1  ;;  %v762_v7 = vadd.f32 %v1135_v3, %v713_v2  ;;  %822 = vadd.xlane.f32.xlu0 %v808_v4 }
 0x10d   :  { %v1137_v11 = vpop.f32.mrf.mxu0 }
 0x10e   :  { %v1165_v12 = vpop.f32.mrf.mxu1  ;;  %v1138_v14 = vadd.f32 %v1137_v11, %v1136_v5  ;;  %v811_v16 = vadd.f32 %v1163_v8, %v762_v7 }
 0x10f   :  { %v1166_v15 = vadd.f32 %v1165_v12, %v1164_v6  ;;  %v1139_v17 = vpop.f32.mrf.mxu0 }
 0x110   :  { %v1167_v18 = vpop.f32.mrf.mxu1  ;;  %v767_v19 = vadd.f32 %v1138_v14, %v718_v9  ;;  %824 = vadd.xlane.f32.xlu0 %v811_v16 }
 0x111   :  { %v1140_v20 = vpop.f32.mrf.mxu0 }
 0x112   :  { %v1168_v21 = vpop.f32.mrf.mxu1  ;;  %v1141_v23 = vadd.f32 %v1140_v20, %v1139_v17  ;;  %v816_v25 = vadd.f32 %v1166_v15, %v767_v19 }
 0x113   :  { %v1169_v24 = vadd.f32 %v1168_v21, %v1167_v18 }
 0x114   :  { %v770_v26 = vadd.f32 %v1141_v23, %v721_v22  ;;  %826 = vadd.xlane.f32.xlu1 %v816_v25 }
 0x116   :  { %v819_v27 = vadd.f32 %v1169_v24, %v770_v26 }
 0x118   :  { %828 = vadd.xlane.f32.xlu1 %v819_v27 }
 0x195   :  { %v823_v29 = vpop.xlane.xlu0 %822 }
 0x196   :  { %v831_v30 = vmul.f32 0.0078125, %v823_v29 }
 0x198   :  { %v835_v31 = vsub.f32 %v808_v4, %v831_v30 }
 0x199   :  { %v825_v32 = vpop.xlane.xlu0 %824 }
 0x19a   :  { %v832_v33 = vmul.f32 0.0078125, %v825_v32  ;;  %v839_v34 = vmul.f32 %v835_v31, %v835_v31 }
 0x19c   :  { %v836_v35 = vsub.f32 %v811_v16, %v832_v33  ;;  %843 = vadd.xlane.f32.xlu0 %v839_v34 }
 0x19d   :  { %v827_v36 = vpop.xlane.xlu1 %826 }
 0x19e   :  { %v833_v37 = vmul.f32 0.0078125, %v827_v36  ;;  %v840_v38 = vmul.f32 %v836_v35, %v836_v35 }
 0x1a0   :  { %v1511_v39 = vsub.f32 %v816_v25, %v833_v37  ;;  %845 = vadd.xlane.f32.xlu1 %v840_v38 }
 0x1a1   :  { %v829_v48 = vpop.xlane.xlu1 %828 }
 0x1a2   :  { %v841_v40 = vmul.f32 %v1511_v39, %v1511_v39  ;;  %v834_v49 = vmul.f32 0.0078125, %v829_v48 }
 0x1a4   :  { %847 = vadd.xlane.f32.xlu0 %v841_v40  ;;  %v838_v50 = vsub.f32 %v819_v27, %v834_v49 }
 0x1a6   :  { %v842_v51 = vmul.f32 %v838_v50, %v838_v50 }
 0x1b1   :  { %878 = vperm.xlu1 %1172, %v868_v41  }
 0x1b5   :  { %883 = vperm.xlu1 %1172, %v869_v42  }
 0x1b9   :  { %888 = vperm.xlu1 %1172, %v870_v43  }
 0x1ba   :  { %873 = vperm.xlu0 %1171, %v867_v44  }
 0x1bd   :  { %901 = vperm.xlu1 %1172, %v895_v45  }
 0x1c1   :  { %906 = vperm.xlu1 %1172, %v896_v46  }
 0x1c5   :  { %911 = vperm.xlu1 %1172, %v897_v47  }
 0x1e9   :  { %849 = vadd.xlane.f32.xlu1 %v842_v51 }
 0x1fa   :  { %916 = vperm.xlu1 %1172, %v898_v52  }
 0x225   :  { %v844_v53 = vpop.xlane.xlu0 %843 }
 0x226   :  { %v851_v54 = vmul.f32 0.0078125, %v844_v53 }
 0x228   :  { %v855_v55 = vadd.f32 1e-05, %v851_v54 }
 0x229   :  { %v846_v56 = vpop.xlane.xlu1 %845 }
 0x22a   :  { %1237 = vrsqrt.f32 %v855_v55  ;;  %v852_v57 = vmul.f32 0.0078125, %v846_v56 }
 0x22c   :  { %v856_v58 = vadd.f32 1e-05, %v852_v57 }
 0x22d   :  { %v879_v59 = vpop.permute.xlu1 %878  ;;  %v848_v61 = vpop.xlane.xlu0 %847 }
 0x22e   :  { %1239 = vrsqrt.f32 %v856_v58  ;;  %v853_v15 = vmul.f32 0.0078125, %v848_v61 }
 0x230   :  { %v857_v16 = vadd.f32 1e-05, %v853_v15 }
 0x231   :  { %v884_v60 = vpop.permute.xlu1 %883 }
 0x232   :  { %1241 = vrsqrt.f32 %v857_v16 }
 0x235   :  { %v889_v62 = vpop.permute.xlu1 %888  ;;  %v874_v0 = vpop.permute.xlu0 %873 }
 0x237   :  { %v1238_v63 = vpop.eup %1237 }
 0x238   :  { %v863_v1 = vmul.f32 %v1238_v63, %v835_v31 }
 0x239   :  { %v902_v2 = vpop.permute.xlu1 %901 }
 0x23a   :  { %v891_v3 = vmul.f32 %v874_v0, %v863_v1 }
 0x23b   :  { %v1240_v4 = vpop.eup %1239 }
 0x23c   :  { %v864_v5 = vmul.f32 %v1240_v4, %v836_v35  ;;  %v919_v6 = vadd.f32 %v902_v2, %v891_v3 }
 0x23d   :  { %v907_v8 = vpop.permute.xlu1 %906 }
 0x23e   :  { %v892_v7 = vmul.f32 %v879_v59, %v864_v5  ;;  %v927_v9 = vmul.f32 0.2, %v919_v6  ;;  %vm923_vm0 = vcmp.gt.f32.partialorder %v919_v6, 0.0 }
 0x23f   :  { %v1242_v21 = vpop.eup %1241 }
 0x240   :  { %v920_v10 = vadd.f32 %v907_v8, %v892_v7  ;;  %v931_v12 = vsel %vm923_vm0, %v919_v6, %v927_v9  ;;  %v865_v22 = vmul.f32 %v1242_v21, %v1511_v39 }
 0x241   :  { %v912_v17 = vpop.permute.xlu1 %911 }
 0x242   :  { %vm924_vm1 = vcmp.gt.f32.partialorder %v920_v10, 0.0  ;;  %v928_v11 = vmul.f32 0.2, %v920_v10  ;;  %v893_v23 = vmul.f32 %v884_v60, %v865_v22 }
 0x244   :  { %v932_v13 = vsel %vm924_vm1, %v920_v10, %v928_v11  ;;  %v921_v25 = vadd.f32 %v912_v17, %v893_v23 }
 0x245   :  { %v1050_v14 = vpack.c.bf16 %v932_v13, %v931_v12 }
 0x246   :  { %v929_v29 = vmul.f32 0.2, %v921_v25  ;;  %vm925_vm2 = vcmp.gt.f32.partialorder %v921_v25, 0.0 }
 0x247   :  { %1051 = vst [vmem:[%s1550_s4] sm:$0xff] %v1050_v14  }
 0x248   :  { %v933_v32 = vsel %vm925_vm2, %v921_v25, %v929_v29 }
 0x272   :  { %v850_v18 = vpop.xlane.xlu1 %849 }
 0x273   :  { %v854_v19 = vmul.f32 0.0078125, %v850_v18 }
 0x275   :  { %v858_v20 = vadd.f32 1e-05, %v854_v19 }
 0x276   :  { %v917_v28 = vpop.permute.xlu1 %916 }
 0x277   :  { %1243 = vrsqrt.f32 %v858_v20 }
 0x284   :  { %v1244_v24 = vpop.eup %1243 }
 0x285   :  { %v866_v26 = vmul.f32 %v1244_v24, %v838_v50 }
 0x287   :  { %v894_v27 = vmul.f32 %v889_v62, %v866_v26 }
 0x289   :  { %v922_v30 = vadd.f32 %v917_v28, %v894_v27 }
 0x28b   :  { %vm926_vm3 = vcmp.gt.f32.partialorder %v922_v30, 0.0  ;;  %v930_v31 = vmul.f32 0.2, %v922_v30 }
 0x28d   :  { %v934_v33 = vsel %vm926_vm3, %v922_v30, %v930_v31 }
 0x28e   :  { %v1055_v34 = vpack.c.bf16 %v934_v33, %v933_v32 }
 0x290   :  { %1057 = vst [vmem:[%s1550_s4 + $0x8] sm:$0xff] %v1055_v34  }

// kernel: vae_forward.21
= control target key start
LH: loop header
LB: loop body
LE: loop exit
PB: predicated region body
PF: predicated region fallthrough
CT: control target
= control target key end

     0   :  { %s1933_s1 = inlined_call_operand.vmem [shape: bf16[512,512], index: 1, kind: input, shape index: {}]   ;;  %s1934_s0 = inlined_call_operand.vmem [shape: bf16[16,512], index: 0, kind: input, shape index: {}]   ;;  %s1935_s2 = inlined_call_operand.vmem [shape: f32[16,1], index: 2, kind: input, shape index: {}]   ;;  %s1936_s3 = inlined_call_operand.vmem [shape: f32[16,1], index: 3, kind: input, shape index: {}]   ;;  %s1937_s4 = inlined_call_operand.vmem [shape: bf16[16,512], index: 4, kind: output, shape index: {}]  }
   0x1   :  { %v1273_v0 = vld [vmem:[%s1933_s1 + $0xe4] ss:$16 sps:$4 sm:$0xff]   ;;  %v1277_v2 = vld [vmem:[%s1933_s1 + $0xe0] ss:$16 sps:$4 sm:$0xff]   ;;  %v1374_v51 = vld [vmem:[%s1934_s0 + $0xc] ss:$16 sps:$4 sm:$0xff]  }
   0x2   :  { %v1275_v1 = vld [vmem:[%s1933_s1 + $0x2e4] ss:$16 sps:$4 sm:$0xff]   ;;  %809 = vmatprep.subr.bf16.mxu0 %v1273_v0  ;;  %v1278_v3 = vld [vmem:[%s1933_s1 + $0x2e0] ss:$16 sps:$4 sm:$0xff]   ;;  %884 = vmatprep.mubr.bf16.mxu1 %v1374_v51 }
   0x3   :  { %852 = vmatprep.subr.bf16.mxu1 %v1275_v1  ;;  %v1279_v4 = vld [vmem:[%s1933_s1 + $0xc4] ss:$16 sps:$4 sm:$0xff]   ;;  %810 = vmatpush1.bf16.msra.mxu0 %v1277_v2  ;;  %v1283_v6 = vld [vmem:[%s1933_s1 + $0xc0] ss:$16 sps:$4 sm:$0xff]   ;;  %v1377_v2 = vld [vmem:[%s1933_s1 + $0xec] ss:$16 sps:$4 sm:$0xff]  }
   0x4   :  { %853 = vmatpush1.bf16.msra.mxu1 %v1278_v3  ;;  %v1281_v5 = vld [vmem:[%s1933_s1 + $0x2c4] ss:$16 sps:$4 sm:$0xff]   ;;  %811 = vmatprep.subr.bf16.mxu0 %v1279_v4  ;;  %v1284_v7 = vld [vmem:[%s1933_s1 + $0x2c0] ss:$16 sps:$4 sm:$0xff]   ;;  %v1380_v3 = vld [vmem:[%s1933_s1 + $0x2ec] ss:$16 sps:$4 sm:$0xff]  }
   0x5   :  { %854 = vmatprep.subr.bf16.mxu1 %v1281_v5  ;;  %v1285_v8 = vld [vmem:[%s1933_s1 + $0xa4] ss:$16 sps:$4 sm:$0xff]   ;;  %v1289_v10 = vld [vmem:[%s1933_s1 + $0xa0] ss:$16 sps:$4 sm:$0xff]   ;;  %v1713_v5 = vld [vmem:[%s1934_s0 + $0x8] ss:$16 sps:$4 sm:$0xff]  }
   0x6   :  { %v1287_v9 = vld [vmem:[%s1933_s1 + $0x2a4] ss:$16 sps:$4 sm:$0xff]   ;;  %v1290_v11 = vld [vmem:[%s1933_s1 + $0x2a0] ss:$16 sps:$4 sm:$0xff]  }
   0x7   :  { %812 = vmatpush1.bf16.msra.mxu0 %v1283_v6  ;;  %v1291_v12 = vld [vmem:[%s1933_s1 + $0x84] ss:$16 sps:$4 sm:$0xff]   ;;  %v1295_v14 = vld [vmem:[%s1933_s1 + $0x80] ss:$16 sps:$4 sm:$0xff]   ;;  %v1375_v6 = vld [vmem:[%s1933_s1 + $0xe8] ss:$16 sps:$4 sm:$0xff]  }
   0x8   :  { %855 = vmatpush1.bf16.msra.mxu1 %v1284_v7  ;;  %813 = vmatprep.subr.bf16.mxu0 %v1285_v8  ;;  %v1293_v13 = vld [vmem:[%s1933_s1 + $0x284] ss:$16 sps:$4 sm:$0xff]   ;;  %v1296_v15 = vld [vmem:[%s1933_s1 + $0x280] ss:$16 sps:$4 sm:$0xff]   ;;  %v1378_v7 = vld [vmem:[%s1933_s1 + $0x2e8] ss:$16 sps:$4 sm:$0xff]  }
   0x9   :  { %856 = vmatprep.subr.bf16.mxu1 %v1287_v9  ;;  %v1297_v16 = vld [vmem:[%s1933_s1 + $0x64] ss:$16 sps:$4 sm:$0xff]   ;;  %v1301_v18 = vld [vmem:[%s1933_s1 + $0x60] ss:$16 sps:$4 sm:$0xff]   ;;  %v1383_v8 = vld [vmem:[%s1933_s1 + $0xcc] ss:$16 sps:$4 sm:$0xff]  }
   0xa   :  { %v1299_v17 = vld [vmem:[%s1933_s1 + $0x264] ss:$16 sps:$4 sm:$0xff]   ;;  %v1302_v19 = vld [vmem:[%s1933_s1 + $0x260] ss:$16 sps:$4 sm:$0xff]   ;;  %v1386_v9 = vld [vmem:[%s1933_s1 + $0x2cc] ss:$16 sps:$4 sm:$0xff]  }
   0xb   :  { %814 = vmatpush1.bf16.msra.mxu0 %v1289_v10  ;;  %v1303_v20 = vld [vmem:[%s1933_s1 + $0x44] ss:$16 sps:$4 sm:$0xff]   ;;  %v1307_v22 = vld [vmem:[%s1933_s1 + $0x40] ss:$16 sps:$4 sm:$0xff]   ;;  %v1381_v10 = vld [vmem:[%s1933_s1 + $0xc8] ss:$16 sps:$4 sm:$0xff]  }
   0xc   :  { %857 = vmatpush1.bf16.msra.mxu1 %v1290_v11  ;;  %815 = vmatprep.subr.bf16.mxu0 %v1291_v12  ;;  %v1305_v21 = vld [vmem:[%s1933_s1 + $0x244] ss:$16 sps:$4 sm:$0xff]   ;;  %v1308_v23 = vld [vmem:[%s1933_s1 + $0x240] ss:$16 sps:$4 sm:$0xff]   ;;  %v1384_v11 = vld [vmem:[%s1933_s1 + $0x2c8] ss:$16 sps:$4 sm:$0xff]  }
   0xd   :  { %858 = vmatprep.subr.bf16.mxu1 %v1293_v13  ;;  %v1309_v24 = vld [vmem:[%s1933_s1 + $0x24] ss:$16 sps:$4 sm:$0xff]   ;;  %v1313_v26 = vld [vmem:[%s1933_s1 + $0x20] ss:$16 sps:$4 sm:$0xff]   ;;  %v1389_v12 = vld [vmem:[%s1933_s1 + $0xac] ss:$16 sps:$4 sm:$0xff]  }
   0xe   :  { %v1311_v25 = vld [vmem:[%s1933_s1 + $0x224] ss:$16 sps:$4 sm:$0xff]   ;;  %v1314_v27 = vld [vmem:[%s1933_s1 + $0x220] ss:$16 sps:$4 sm:$0xff]   ;;  %v1392_v13 = vld [vmem:[%s1933_s1 + $0x2ac] ss:$16 sps:$4 sm:$0xff]  }
   0xf   :  { %816 = vmatpush1.bf16.msra.mxu0 %v1295_v14  ;;  %v1315_v28 = vld [vmem:[%s1933_s1 + $0x4] ss:$16 sps:$4 sm:$0xff]   ;;  %v1319_v30 = vld [vmem:[%s1933_s1] ss:$16 sps:$4 sm:$0xff]   ;;  %v1387_v14 = vld [vmem:[%s1933_s1 + $0xa8] ss:$16 sps:$4 sm:$0xff]  }
  0x10   :  { %859 = vmatpush1.bf16.msra.mxu1 %v1296_v15  ;;  %817 = vmatprep.subr.bf16.mxu0 %v1297_v16  ;;  %v1317_v29 = vld [vmem:[%s1933_s1 + $0x204] ss:$16 sps:$4 sm:$0xff]   ;;  %v1320_v31 = vld [vmem:[%s1933_s1 + $0x200] ss:$16 sps:$4 sm:$0xff]   ;;  %v1390_v15 = vld [vmem:[%s1933_s1 + $0x2a8] ss:$16 sps:$4 sm:$0xff]  }
  0x11   :  { %860 = vmatprep.subr.bf16.mxu1 %v1299_v17  ;;  %v1321_v32 = vld [vmem:[%s1933_s1 + $0x1e4] ss:$16 sps:$4 sm:$0xff]   ;;  %v1325_v34 = vld [vmem:[%s1933_s1 + $0x1e0] ss:$16 sps:$4 sm:$0xff]   ;;  %v1395_v16 = vld [vmem:[%s1933_s1 + $0x8c] ss:$16 sps:$4 sm:$0xff]  }
  0x12   :  { %v1323_v33 = vld [vmem:[%s1933_s1 + $0x3e4] ss:$16 sps:$4 sm:$0xff]   ;;  %v1326_v35 = vld [vmem:[%s1933_s1 + $0x3e0] ss:$16 sps:$4 sm:$0xff]   ;;  %v1398_v17 = vld [vmem:[%s1933_s1 + $0x28c] ss:$16 sps:$4 sm:$0xff]  }
  0x13   :  { %818 = vmatpush1.bf16.msra.mxu0 %v1301_v18  ;;  %v1327_v36 = vld [vmem:[%s1933_s1 + $0x1c4] ss:$16 sps:$4 sm:$0xff]   ;;  %v1331_v38 = vld [vmem:[%s1933_s1 + $0x1c0] ss:$16 sps:$4 sm:$0xff]   ;;  %v1393_v18 = vld [vmem:[%s1933_s1 + $0x88] ss:$16 sps:$4 sm:$0xff]  }
  0x14   :  { %861 = vmatpush1.bf16.msra.mxu1 %v1302_v19  ;;  %819 = vmatprep.subr.bf16.mxu0 %v1303_v20  ;;  %v1329_v37 = vld [vmem:[%s1933_s1 + $0x3c4] ss:$16 sps:$4 sm:$0xff]   ;;  %v1332_v39 = vld [vmem:[%s1933_s1 + $0x3c0] ss:$16 sps:$4 sm:$0xff]   ;;  %v1396_v19 = vld [vmem:[%s1933_s1 + $0x288] ss:$16 sps:$4 sm:$0xff]  }
  0x15   :  { %862 = vmatprep.subr.bf16.mxu1 %v1305_v21  ;;  %v1333_v40 = vld [vmem:[%s1933_s1 + $0x1a4] ss:$16 sps:$4 sm:$0xff]   ;;  %v1337_v42 = vld [vmem:[%s1933_s1 + $0x1a0] ss:$16 sps:$4 sm:$0xff]   ;;  %v1401_v20 = vld [vmem:[%s1933_s1 + $0x6c] ss:$16 sps:$4 sm:$0xff]  }
  0x16   :  { %v1335_v41 = vld [vmem:[%s1933_s1 + $0x3a4] ss:$16 sps:$4 sm:$0xff]   ;;  %v1338_v43 = vld [vmem:[%s1933_s1 + $0x3a0] ss:$16 sps:$4 sm:$0xff]   ;;  %v1404_v21 = vld [vmem:[%s1933_s1 + $0x26c] ss:$16 sps:$4 sm:$0xff]  }
  0x17   :  { %820 = vmatpush1.bf16.msra.mxu0 %v1307_v22  ;;  %v1339_v44 = vld [vmem:[%s1933_s1 + $0x184] ss:$16 sps:$4 sm:$0xff]   ;;  %v1343_v46 = vld [vmem:[%s1933_s1 + $0x180] ss:$16 sps:$4 sm:$0xff]   ;;  %v1399_v22 = vld [vmem:[%s1933_s1 + $0x68] ss:$16 sps:$4 sm:$0xff]  }
  0x18   :  { %863 = vmatpush1.bf16.msra.mxu1 %v1308_v23  ;;  %821 = vmatprep.subr.bf16.mxu0 %v1309_v24  ;;  %v1341_v45 = vld [vmem:[%s1933_s1 + $0x384] ss:$16 sps:$4 sm:$0xff]   ;;  %v1344_v47 = vld [vmem:[%s1933_s1 + $0x380] ss:$16 sps:$4 sm:$0xff]   ;;  %v1402_v23 = vld [vmem:[%s1933_s1 + $0x268] ss:$16 sps:$4 sm:$0xff]  }
  0x19   :  { %864 = vmatprep.subr.bf16.mxu1 %v1311_v25  ;;  %v1345_v48 = vld [vmem:[%s1933_s1 + $0x164] ss:$16 sps:$4 sm:$0xff]   ;;  %v1349_v52 = vld [vmem:[%s1933_s1 + $0x160] ss:$16 sps:$4 sm:$0xff]   ;;  %v1407_v24 = vld [vmem:[%s1933_s1 + $0x4c] ss:$16 sps:$4 sm:$0xff]  }
  0x1a   :  { %v1371_v49 = vld [vmem:[%s1934_s0 + $0x4] ss:$16 sps:$4 sm:$0xff]   ;;  %v1350_v53 = vld [vmem:[%s1933_s1 + $0x360] ss:$16 sps:$4 sm:$0xff]   ;;  %v1410_v25 = vld [vmem:[%s1933_s1 + $0x24c] ss:$16 sps:$4 sm:$0xff]  }
  0x1b   :  { %822 = vmatpush1.bf16.msra.mxu0 %v1313_v26  ;;  %v1347_v50 = vld [vmem:[%s1933_s1 + $0x364] ss:$16 sps:$4 sm:$0xff]   ;;  %841 = vmatprep.mubr.bf16.mxu0 %v1371_v49  ;;  %v1355_v56 = vld [vmem:[%s1933_s1 + $0x140] ss:$16 sps:$4 sm:$0xff]   ;;  %v1405_v26 = vld [vmem:[%s1933_s1 + $0x48] ss:$16 sps:$4 sm:$0xff]  }
  0x1c   :  { %865 = vmatpush1.bf16.msra.mxu1 %v1314_v27  ;;  %823 = vmatprep.subr.bf16.mxu0 %v1315_v28  ;;  %v1351_v54 = vld [vmem:[%s1933_s1 + $0x144] ss:$16 sps:$4 sm:$0xff]   ;;  %v1356_v57 = vld [vmem:[%s1933_s1 + $0x340] ss:$16 sps:$4 sm:$0xff]   ;;  %v1408_v27 = vld [vmem:[%s1933_s1 + $0x248] ss:$16 sps:$4 sm:$0xff]  }
  0x1d   :  { %866 = vmatprep.subr.bf16.mxu1 %v1317_v29  ;;  %v1353_v55 = vld [vmem:[%s1933_s1 + $0x344] ss:$16 sps:$4 sm:$0xff]   ;;  %v1361_v60 = vld [vmem:[%s1933_s1 + $0x120] ss:$16 sps:$4 sm:$0xff]   ;;  %v1413_v28 = vld [vmem:[%s1933_s1 + $0x2c] ss:$16 sps:$4 sm:$0xff]  }
  0x1e   :  { %v1357_v58 = vld [vmem:[%s1933_s1 + $0x124] ss:$16 sps:$4 sm:$0xff]   ;;  %v1362_v61 = vld [vmem:[%s1933_s1 + $0x320] ss:$16 sps:$4 sm:$0xff]   ;;  %v1416_v29 = vld [vmem:[%s1933_s1 + $0x22c] ss:$16 sps:$4 sm:$0xff]  }
  0x1f   :  { %824 = vmatpush1.bf16.msra.mxu0 %v1319_v30  ;;  %v1359_v59 = vld [vmem:[%s1933_s1 + $0x324] ss:$16 sps:$4 sm:$0xff]   ;;  %v1367_v0 = vld [vmem:[%s1933_s1 + $0x100] ss:$16 sps:$4 sm:$0xff]   ;;  %v1411_v30 = vld [vmem:[%s1933_s1 + $0x28] ss:$16 sps:$4 sm:$0xff]  }
  0x20   :  { %867 = vmatpush1.bf16.msra.mxu1 %v1320_v31  ;;  %825 = vmatprep.subr.bf16.mxu0 %v1321_v32  ;;  %v1363_v62 = vld [vmem:[%s1933_s1 + $0x104] ss:$16 sps:$4 sm:$0xff]   ;;  %v1368_v1 = vld [vmem:[%s1933_s1 + $0x300] ss:$16 sps:$4 sm:$0xff]   ;;  %v1414_v31 = vld [vmem:[%s1933_s1 + $0x228] ss:$16 sps:$4 sm:$0xff]  }
  0x21   :  { %868 = vmatprep.subr.bf16.mxu1 %v1323_v33  ;;  %v1365_v63 = vld [vmem:[%s1933_s1 + $0x304] ss:$16 sps:$4 sm:$0xff]   ;;  %v1708_v4 = vld [vmem:[%s1934_s0] ss:$16 sps:$4 sm:$0xff]   ;;  %v1419_v32 = vld [vmem:[%s1933_s1 + $0xc] ss:$16 sps:$4 sm:$0xff]  }
  0x22   :  { %v1422_v33 = vld [vmem:[%s1933_s1 + $0x20c] ss:$16 sps:$4 sm:$0xff]  }
  0x23   :  { %826 = vmatpush2.bf16.msra.mxu0 %v1325_v34  ;;  %v1417_v34 = vld [vmem:[%s1933_s1 + $0x8] ss:$16 sps:$4 sm:$0xff]  }
  0x24   :  { %869 = vmatpush2.bf16.msra.mxu1 %v1326_v35  ;;  %827 = vmatprep.subr.bf16.mxu0 %v1327_v36  ;;  %v1420_v35 = vld [vmem:[%s1933_s1 + $0x208] ss:$16 sps:$4 sm:$0xff]   ;;  %v1425_v36 = vld [vmem:[%s1933_s1 + $0x1ec] ss:$16 sps:$4 sm:$0xff]  }
  0x25   :  { %870 = vmatprep.subr.bf16.mxu1 %v1329_v37  ;;  %v1428_v37 = vld [vmem:[%s1933_s1 + $0x3ec] ss:$16 sps:$4 sm:$0xff]  }
  0x27   :  { %828 = vmatpush2.bf16.msra.mxu0 %v1331_v38  ;;  %v1423_v38 = vld [vmem:[%s1933_s1 + $0x1e8] ss:$16 sps:$4 sm:$0xff]  }
  0x28   :  { %871 = vmatpush2.bf16.msra.mxu1 %v1332_v39  ;;  %829 = vmatprep.subr.bf16.mxu0 %v1333_v40  ;;  %v1426_v39 = vld [vmem:[%s1933_s1 + $0x3e8] ss:$16 sps:$4 sm:$0xff]   ;;  %v1431_v40 = vld [vmem:[%s1933_s1 + $0x1cc] ss:$16 sps:$4 sm:$0xff]  }
  0x29   :  { %872 = vmatprep.subr.bf16.mxu1 %v1335_v41  ;;  %v1434_v41 = vld [vmem:[%s1933_s1 + $0x3cc] ss:$16 sps:$4 sm:$0xff]  }
  0x2b   :  { %830 = vmatpush2.bf16.msra.mxu0 %v1337_v42  ;;  %v1429_v42 = vld [vmem:[%s1933_s1 + $0x1c8] ss:$16 sps:$4 sm:$0xff]  }
  0x2c   :  { %873 = vmatpush2.bf16.msra.mxu1 %v1338_v43  ;;  %831 = vmatprep.subr.bf16.mxu0 %v1339_v44  ;;  %v1432_v43 = vld [vmem:[%s1933_s1 + $0x3c8] ss:$16 sps:$4 sm:$0xff]   ;;  %v1437_v44 = vld [vmem:[%s1933_s1 + $0x1ac] ss:$16 sps:$4 sm:$0xff]  }
  0x2d   :  { %874 = vmatprep.subr.bf16.mxu1 %v1341_v45  ;;  %v1440_v45 = vld [vmem:[%s1933_s1 + $0x3ac] ss:$16 sps:$4 sm:$0xff]  }
  0x2f   :  { %832 = vmatpush2.bf16.msra.mxu0 %v1343_v46  ;;  %v1435_v46 = vld [vmem:[%s1933_s1 + $0x1a8] ss:$16 sps:$4 sm:$0xff]  }
  0x30   :  { %875 = vmatpush2.bf16.msra.mxu1 %v1344_v47  ;;  %833 = vmatprep.subr.bf16.mxu0 %v1345_v48  ;;  %v1438_v47 = vld [vmem:[%s1933_s1 + $0x3a8] ss:$16 sps:$4 sm:$0xff]   ;;  %v1443_v48 = vld [vmem:[%s1933_s1 + $0x18c] ss:$16 sps:$4 sm:$0xff]  }
  0x31   :  { %876 = vmatprep.subr.bf16.mxu1 %v1347_v50  ;;  %v1441_v50 = vld [vmem:[%s1933_s1 + $0x188] ss:$16 sps:$4 sm:$0xff]  }
  0x33   :  { %834 = vmatpush2.bf16.msra.mxu0 %v1349_v52  ;;  %v1449_v52 = vld [vmem:[%s1933_s1 + $0x16c] ss:$16 sps:$4 sm:$0xff]  }
  0x34   :  { %877 = vmatpush2.bf16.msra.mxu1 %v1350_v53  ;;  %835 = vmatprep.subr.bf16.mxu0 %v1351_v54  ;;  %v1452_v53 = vld [vmem:[%s1933_s1 + $0x36c] ss:$16 sps:$4 sm:$0xff]   ;;  %v1447_v54 = vld [vmem:[%s1933_s1 + $0x168] ss:$16 sps:$4 sm:$0xff]  }
  0x35   :  { %878 = vmatprep.subr.bf16.mxu1 %v1353_v55  ;;  %v1450_v55 = vld [vmem:[%s1933_s1 + $0x368] ss:$16 sps:$4 sm:$0xff]  }
  0x37   :  { %836 = vmatpush2.bf16.msra.mxu0 %v1355_v56  ;;  %v1455_v56 = vld [vmem:[%s1933_s1 + $0x14c] ss:$16 sps:$4 sm:$0xff]  }
  0x38   :  { %879 = vmatpush2.bf16.msra.mxu1 %v1356_v57  ;;  %837 = vmatprep.subr.bf16.mxu0 %v1357_v58  ;;  %v1458_v57 = vld [vmem:[%s1933_s1 + $0x34c] ss:$16 sps:$4 sm:$0xff]   ;;  %v1453_v58 = vld [vmem:[%s1933_s1 + $0x148] ss:$16 sps:$4 sm:$0xff]  }
  0x39   :  { %880 = vmatprep.subr.bf16.mxu1 %v1359_v59  ;;  %v1456_v59 = vld [vmem:[%s1933_s1 + $0x348] ss:$16 sps:$4 sm:$0xff]  }
  0x3b   :  { %838 = vmatpush2.bf16.msra.mxu0 %v1361_v60  ;;  %v1461_v60 = vld [vmem:[%s1933_s1 + $0x12c] ss:$16 sps:$4 sm:$0xff]  }
  0x3c   :  { %881 = vmatpush2.bf16.msra.mxu1 %v1362_v61  ;;  %839 = vmatprep.subr.bf16.mxu0 %v1363_v62  ;;  %v1464_v61 = vld [vmem:[%s1933_s1 + $0x32c] ss:$16 sps:$4 sm:$0xff]   ;;  %v1459_v62 = vld [vmem:[%s1933_s1 + $0x128] ss:$16 sps:$4 sm:$0xff]  }
  0x3d   :  { %882 = vmatprep.subr.bf16.mxu1 %v1365_v63  ;;  %v1462_v63 = vld [vmem:[%s1933_s1 + $0x328] ss:$16 sps:$4 sm:$0xff]  }
  0x3f   :  { %840 = vmatpush2.bf16.msra.mxu0 %v1367_v0  ;;  %v1467_v0 = vld [vmem:[%s1933_s1 + $0x10c] ss:$16 sps:$4 sm:$0xff]  }
  0x40   :  { %883 = vmatpush2.bf16.msra.mxu1 %v1368_v1  ;;  %895 = vmatprep.subr.bf16.mxu0 %v1377_v2  ;;  %v1470_v1 = vld [vmem:[%s1933_s1 + $0x30c] ss:$16 sps:$4 sm:$0xff]   ;;  %v1465_v2 = vld [vmem:[%s1933_s1 + $0x108] ss:$16 sps:$4 sm:$0xff]  }
  0x41   :  { %938 = vmatprep.subr.bf16.mxu1 %v1380_v3  ;;  %v1468_v3 = vld [vmem:[%s1933_s1 + $0x308] ss:$16 sps:$4 sm:$0xff]  }
  0x42   :  { %842 = vmatmul.mubr.bf16.vlgmr.msra.gmra.mxu0 %v1708_v4 }
  0x43   :  { %885 = vmatmul.mubr.bf16.vlgmr.msra.gmra.mxu1 %v1713_v5  ;;  %896 = vmatpush1.bf16.msra.mxu0 %v1375_v6  ;;  %v1475_v6 = vmov 0  }
  0x44   :  { %939 = vmatpush1.bf16.msra.mxu1 %v1378_v7  ;;  %897 = vmatprep.subr.bf16.mxu0 %v1383_v8  ;;  %v1035_v7 = vld [vmem:[%s1935_s2 + $0x8] sm:$0xff]  ;;  %v1054_v8 = vld [vmem:[%s1936_s3] sm:$0xff] }
  0x45   :  { %940 = vmatprep.subr.bf16.mxu1 %v1386_v9  ;;  %927 = vmatprep.mubr.bf16.mxu0 %v1371_v49  ;;  %v1446_v49 = vld [vmem:[%s1933_s1 + $0x38c] ss:$16 sps:$4 sm:$0xff]  }
  0x46   :  { %970 = vmatprep.mubr.bf16.mxu1 %v1374_v51  ;;  %v1444_v51 = vld [vmem:[%s1933_s1 + $0x388] ss:$16 sps:$4 sm:$0xff]   ;;  %1272 = vset.pattern.permute.xlu1 %v1475_v6 }
  0x47   :  { %898 = vmatpush1.bf16.msra.mxu0 %v1381_v10  ;;  %1271 = vset.pattern.permute.xlu0 %v1475_v6 }
  0x48   :  { %941 = vmatpush1.bf16.msra.mxu1 %v1384_v11  ;;  %899 = vmatprep.subr.bf16.mxu0 %v1389_v12 }
  0x49   :  { %942 = vmatprep.subr.bf16.mxu1 %v1392_v13  ;;  %1043 = vperm.xlu1 %1272, %v1035_v7  }
  0x4b   :  { %900 = vmatpush1.bf16.msra.mxu0 %v1387_v14 }
  0x4c   :  { %943 = vmatpush1.bf16.msra.mxu1 %v1390_v15  ;;  %901 = vmatprep.subr.bf16.mxu0 %v1395_v16 }
  0x4d   :  { %944 = vmatprep.subr.bf16.mxu1 %v1398_v17  ;;  %1058 = vperm.xlu1 %1272, %v1054_v8  }
  0x4f   :  { %902 = vmatpush1.bf16.msra.mxu0 %v1393_v18 }
  0x50   :  { %945 = vmatpush1.bf16.msra.mxu1 %v1396_v19  ;;  %903 = vmatprep.subr.bf16.mxu0 %v1401_v20 }
  0x51   :  { %946 = vmatprep.subr.bf16.mxu1 %v1404_v21 }
  0x53   :  { %904 = vmatpush1.bf16.msra.mxu0 %v1399_v22 }
  0x54   :  { %947 = vmatpush1.bf16.msra.mxu1 %v1402_v23  ;;  %905 = vmatprep.subr.bf16.mxu0 %v1407_v24 }
  0x55   :  { %948 = vmatprep.subr.bf16.mxu1 %v1410_v25 }
  0x57   :  { %906 = vmatpush1.bf16.msra.mxu0 %v1405_v26 }
  0x58   :  { %949 = vmatpush1.bf16.msra.mxu1 %v1408_v27  ;;  %907 = vmatprep.subr.bf16.mxu0 %v1413_v28 }
  0x59   :  { %950 = vmatprep.subr.bf16.mxu1 %v1416_v29 }
  0x5b   :  { %908 = vmatpush1.bf16.msra.mxu0 %v1411_v30 }
  0x5c   :  { %951 = vmatpush1.bf16.msra.mxu1 %v1414_v31  ;;  %909 = vmatprep.subr.bf16.mxu0 %v1419_v32 }
  0x5d   :  { %952 = vmatprep.subr.bf16.mxu1 %v1422_v33 }
  0x5f   :  { %910 = vmatpush1.bf16.msra.mxu0 %v1417_v34 }
  0x60   :  { %953 = vmatpush1.bf16.msra.mxu1 %v1420_v35  ;;  %911 = vmatprep.subr.bf16.mxu0 %v1425_v36 }
  0x61   :  { %954 = vmatprep.subr.bf16.mxu1 %v1428_v37  ;;  %v1034_v37 = vld [vmem:[%s1935_s2] sm:$0xff] }
  0x63   :  { %912 = vmatpush2.bf16.msra.mxu0 %v1423_v38 }
  0x64   :  { %955 = vmatpush2.bf16.msra.mxu1 %v1426_v39  ;;  %913 = vmatprep.subr.bf16.mxu0 %v1431_v40 }
  0x65   :  { %956 = vmatprep.subr.bf16.mxu1 %v1434_v41 }
  0x67   :  { %914 = vmatpush2.bf16.msra.mxu0 %v1429_v42 }
  0x68   :  { %957 = vmatpush2.bf16.msra.mxu1 %v1432_v43  ;;  %915 = vmatprep.subr.bf16.mxu0 %v1437_v44 }
  0x69   :  { %958 = vmatprep.subr.bf16.mxu1 %v1440_v45 }
  0x6b   :  { %916 = vmatpush2.bf16.msra.mxu0 %v1435_v46 }
  0x6c   :  { %959 = vmatpush2.bf16.msra.mxu1 %v1438_v47  ;;  %917 = vmatprep.subr.bf16.mxu0 %v1443_v48 }
  0x6d   :  { %960 = vmatprep.subr.bf16.mxu1 %v1446_v49 }
  0x6f   :  { %918 = vmatpush2.bf16.msra.mxu0 %v1441_v50 }
  0x70   :  { %961 = vmatpush2.bf16.msra.mxu1 %v1444_v51  ;;  %919 = vmatprep.subr.bf16.mxu0 %v1449_v52 }
  0x71   :  { %962 = vmatprep.subr.bf16.mxu1 %v1452_v53 }
  0x73   :  { %920 = vmatpush2.bf16.msra.mxu0 %v1447_v54 }
  0x74   :  { %963 = vmatpush2.bf16.msra.mxu1 %v1450_v55  ;;  %921 = vmatprep.subr.bf16.mxu0 %v1455_v56 }
  0x75   :  { %964 = vmatprep.subr.bf16.mxu1 %v1458_v57 }
  0x77   :  { %922 = vmatpush2.bf16.msra.mxu0 %v1453_v58 }
  0x78   :  { %965 = vmatpush2.bf16.msra.mxu1 %v1456_v59  ;;  %923 = vmatprep.subr.bf16.mxu0 %v1461_v60 }
  0x79   :  { %966 = vmatprep.subr.bf16.mxu1 %v1464_v61 }
  0x7b   :  { %924 = vmatpush2.bf16.msra.mxu0 %v1459_v62 }
  0x7c   :  { %967 = vmatpush2.bf16.msra.mxu1 %v1462_v63  ;;  %925 = vmatprep.subr.bf16.mxu0 %v1467_v0  ;;  %v1055_v0 = vld [vmem:[%s1936_s3 + $0x8] sm:$0xff] }
  0x7d   :  { %968 = vmatprep.subr.bf16.mxu1 %v1470_v1 }
  0x7f   :  { %926 = vmatpush2.bf16.msra.mxu0 %v1465_v2 }
  0x80   :  { %969 = vmatpush2.bf16.msra.mxu1 %v1468_v3 }
  0x82   :  { %928 = vmatmul.mubr.bf16.vlgmr.msra.gmra.mxu0 %v1708_v4 }
  0x83   :  { %971 = vmatmul.mubr.bf16.vlgmr.msra.gmra.mxu1 %v1713_v5 }
  0xc4   :  { %v1044_v1 = vpop.permute.xlu1 %1043 }
  0xc8   :  { %v1059_v2 = vpop.permute.xlu1 %1058 }
 0x102   :  { %v843_v9 = vpop.f32.mrf.mxu0 }
 0x103   :  { %v886_v10 = vpop.f32.mrf.mxu1 }
 0x104   :  { %v845_v11 = vpop.f32.mrf.mxu0  ;;  %v887_v5 = vadd.f32 %v886_v10, %v843_v9 }
 0x105   :  { %v888_v12 = vpop.f32.mrf.mxu1 }
 0x106   :  { %v847_v4 = vpop.f32.mrf.mxu0  ;;  %v889_v14 = vadd.f32 %v888_v12, %v845_v11 }
 0x107   :  { %v890_v13 = vpop.f32.mrf.mxu1 }
 0x108   :  { %v849_v15 = vpop.f32.mrf.mxu0  ;;  %v981_v19 = vadd.f32 %v889_v14, %v887_v5  ;;  %v891_v24 = vadd.f32 %v890_v13, %v847_v4 }
 0x109   :  { %v892_v16 = vpop.f32.mrf.mxu1 }
 0x10a   :  { %v893_v20 = vadd.f32 %v892_v16, %v849_v15 }
 0x10c   :  { %v986_v29 = vadd.f32 %v893_v20, %v891_v24 }
 0x142   :  { %v929_v17 = vpop.f32.mrf.mxu0 }
 0x143   :  { %v972_v18 = vpop.f32.mrf.mxu1 }
 0x144   :  { %v973_v21 = vadd.f32 %v972_v18, %v929_v17  ;;  %v931_v22 = vpop.f32.mrf.mxu0 }
 0x145   :  { %v974_v23 = vpop.f32.mrf.mxu1 }
 0x146   :  { %v975_v25 = vadd.f32 %v974_v23, %v931_v22  ;;  %v982_v26 = vadd.f32 %v981_v19, %v973_v21  ;;  %v933_v27 = vpop.f32.mrf.mxu0 }
 0x147   :  { %v976_v28 = vpop.f32.mrf.mxu1 }
 0x148   :  { %v977_v30 = vadd.f32 %v976_v28, %v933_v27  ;;  %v983_v31 = vadd.f32 %v982_v26, %v975_v25  ;;  %v935_v32 = vpop.f32.mrf.mxu0 }
 0x149   :  { %v978_v33 = vpop.f32.mrf.mxu1 }
 0x14a   :  { %v987_v34 = vadd.f32 %v986_v29, %v977_v30  ;;  %v979_v35 = vadd.f32 %v978_v33, %v935_v32  ;;  %984 = vadd.xlane.f32.xlu0 %v983_v31 }
 0x14c   :  { %v988_v36 = vadd.f32 %v987_v34, %v979_v35 }
 0x14e   :  { %989 = vadd.xlane.f32.xlu0 %v988_v36 }
 0x164   :  { %1038 = vperm.xlu0 %1271, %v1034_v37  }
 0x1d3   :  { %v985_v38 = vpop.xlane.xlu0 %984 }
 0x1d4   :  { %v992_v39 = vmul.f32 0.001953125, %v985_v38 }
 0x1d6   :  { %v994_v40 = vsub.f32 %v887_v5, %v992_v39  ;;  %v995_v41 = vsub.f32 %v889_v14, %v992_v39  ;;  %v996_v42 = vsub.f32 %v973_v21, %v992_v39  ;;  %v997_v44 = vsub.f32 %v975_v25, %v992_v39 }
 0x1d7   :  { %v990_v43 = vpop.xlane.xlu0 %989 }
 0x1d8   :  { %v993_v45 = vmul.f32 0.001953125, %v990_v43  ;;  %v1002_v46 = vmul.f32 %v994_v40, %v994_v40  ;;  %v1003_v47 = vmul.f32 %v995_v41, %v995_v41  ;;  %v1004_v48 = vmul.f32 %v996_v42, %v996_v42 }
 0x1d9   :  { %v1005_v53 = vmul.f32 %v997_v44, %v997_v44 }
 0x1da   :  { %v998_v49 = vsub.f32 %v891_v24, %v993_v45  ;;  %v999_v50 = vsub.f32 %v893_v20, %v993_v45  ;;  %v1010_v51 = vadd.f32 %v1003_v47, %v1002_v46  ;;  %v1000_v52 = vsub.f32 %v977_v30, %v993_v45 }
 0x1db   :  { %v1001_v55 = vsub.f32 %v979_v35, %v993_v45 }
 0x1dc   :  { %v1011_v54 = vadd.f32 %v1010_v51, %v1004_v48  ;;  %v1006_v56 = vmul.f32 %v998_v49, %v998_v49  ;;  %v1007_v57 = vmul.f32 %v999_v50, %v999_v50  ;;  %v1008_v59 = vmul.f32 %v1000_v52, %v1000_v52 }
 0x1dd   :  { %v1009_v61 = vmul.f32 %v1001_v55, %v1001_v55 }
 0x1de   :  { %v1012_v58 = vadd.f32 %v1011_v54, %v1005_v53  ;;  %v1015_v60 = vadd.f32 %v1007_v57, %v1006_v56 }
 0x1df   :  { %v1039_v12 = vpop.permute.xlu0 %1038 }
 0x1e0   :  { %1013 = vadd.xlane.f32.xlu1 %v1012_v58  ;;  %v1016_v62 = vadd.f32 %v1015_v60, %v1008_v59 }
 0x1e2   :  { %v1017_v63 = vadd.f32 %v1016_v62, %v1009_v61 }
 0x1e4   :  { %1018 = vadd.xlane.f32.xlu1 %v1017_v63 }
 0x1f5   :  { %1063 = vperm.xlu1 %1272, %v1055_v0  }
 0x269   :  { %v1014_v3 = vpop.xlane.xlu1 %1013 }
 0x26a   :  { %v1020_v6 = vmul.f32 0.001953125, %v1014_v3 }
 0x26c   :  { %v1022_v7 = vadd.f32 1e-05, %v1020_v6 }
 0x26d   :  { %v1019_v8 = vpop.xlane.xlu1 %1018 }
 0x26e   :  { %1471 = vrsqrt.f32 %v1022_v7  ;;  %v1021_v9 = vmul.f32 0.001953125, %v1019_v8 }
 0x270   :  { %v1023_v10 = vadd.f32 1e-05, %v1021_v9 }
 0x271   :  { %v1064_v32 = vpop.permute.xlu1 %1063 }
 0x272   :  { %1473 = vrsqrt.f32 %v1023_v10 }
 0x27b   :  { %v1472_v11 = vpop.eup %1471 }
 0x27c   :  { %v1026_v4 = vmul.f32 %v1472_v11, %v994_v40  ;;  %v1027_v13 = vmul.f32 %v1472_v11, %v995_v41  ;;  %v1028_v5 = vmul.f32 %v1472_v11, %v996_v42  ;;  %v1029_v14 = vmul.f32 %v1472_v11, %v997_v44 }
 0x27e   :  { %v1046_v15 = vmul.f32 %v1039_v12, %v1026_v4  ;;  %v1047_v16 = vmul.f32 %v1039_v12, %v1027_v13  ;;  %v1048_v17 = vmul.f32 %v1039_v12, %v1028_v5  ;;  %v1049_v18 = vmul.f32 %v1039_v12, %v1029_v14 }
 0x27f   :  { %v1474_v19 = vpop.eup %1473 }
 0x280   :  { %v1030_v20 = vmul.f32 %v1474_v19, %v998_v49  ;;  %v1031_v21 = vmul.f32 %v1474_v19, %v999_v50  ;;  %v1032_v22 = vmul.f32 %v1474_v19, %v1000_v52  ;;  %v1033_v23 = vmul.f32 %v1474_v19, %v1001_v55 }
 0x281   :  { %v1066_v24 = vadd.f32 %v1059_v2, %v1046_v15  ;;  %v1067_v25 = vadd.f32 %v1059_v2, %v1047_v16  ;;  %v1068_v26 = vadd.f32 %v1059_v2, %v1048_v17  ;;  %v1069_v27 = vadd.f32 %v1059_v2, %v1049_v18 }
 0x282   :  { %v1050_v28 = vmul.f32 %v1044_v1, %v1030_v20  ;;  %v1051_v29 = vmul.f32 %v1044_v1, %v1031_v21  ;;  %v1052_v30 = vmul.f32 %v1044_v1, %v1032_v22  ;;  %v1053_v31 = vmul.f32 %v1044_v1, %v1033_v23 }
 0x283   :  { %vm1074_vm0 = vcmp.gt.f32.partialorder %v1066_v24, 0.0  ;;  %vm1075_vm1 = vcmp.gt.f32.partialorder %v1067_v25, 0.0  ;;  %vm1076_vm2 = vcmp.gt.f32.partialorder %v1068_v26, 0.0  ;;  %vm1077_vm3 = vcmp.gt.f32.partialorder %v1069_v27, 0.0 }
 0x284   :  { %v1070_v33 = vadd.f32 %v1064_v32, %v1050_v28  ;;  %v1071_v34 = vadd.f32 %v1064_v32, %v1051_v29  ;;  %v1072_v35 = vadd.f32 %v1064_v32, %v1052_v30  ;;  %v1073_v36 = vadd.f32 %v1064_v32, %v1053_v31 }
 0x285   :  { %v1082_v37 = vmul.f32 0.2, %v1066_v24  ;;  %v1083_v38 = vmul.f32 0.2, %v1067_v25  ;;  %v1084_v39 = vmul.f32 0.2, %v1068_v26 }
 0x286   :  { %vm1078_vm4 = vcmp.gt.f32.partialorder %v1070_v33, 0.0  ;;  %vm1079_vm5 = vcmp.gt.f32.partialorder %v1071_v34, 0.0  ;;  %vm1080_vm6 = vcmp.gt.f32.partialorder %v1072_v35, 0.0  ;;  %vm1081_vm7 = vcmp.gt.f32.partialorder %v1073_v36, 0.0 }
 0x287   :  { %v1086_v40 = vmul.f32 0.2, %v1070_v33  ;;  %v1087_v41 = vmul.f32 0.2, %v1071_v34  ;;  %v1088_v42 = vmul.f32 0.2, %v1072_v35  ;;  %v1090_v43 = vsel %vm1074_vm0, %v1066_v24, %v1082_v37 }
 0x288   :  { %v1089_v44 = vmul.f32 0.2, %v1073_v36  ;;  %v1085_v45 = vmul.f32 0.2, %v1069_v27  ;;  %v1091_v46 = vsel %vm1075_vm1, %v1067_v25, %v1083_v38  ;;  %v1092_v47 = vsel %vm1076_vm2, %v1068_v26, %v1084_v39 }
 0x289   :  { %v1094_v48 = vsel %vm1078_vm4, %v1070_v33, %v1086_v40  ;;  %v1095_v49 = vsel %vm1079_vm5, %v1071_v34, %v1087_v41  ;;  %v1096_v50 = vsel %vm1080_vm6, %v1072_v35, %v1088_v42  ;;  %v1266_v51 = vpack.c.bf16 %v1091_v46, %v1090_v43 }
 0x28a   :  { %v1097_v52 = vsel %vm1081_vm7, %v1073_v36, %v1089_v44  ;;  %v1268_v53 = vpack.c.bf16 %v1095_v49, %v1094_v48  ;;  %v1093_v54 = vsel %vm1077_vm3, %v1069_v27, %v1085_v45 }
 0x28b   :  { %v1269_v55 = vpack.c.bf16 %v1097_v52, %v1096_v50  ;;  %v1267_v56 = vpack.c.bf16 %v1093_v54, %v1092_v47  ;;  %1122 = vst [vmem:[%s1937_s4] sm:$0xff] %v1266_v51 }
 0x28c   :  { %1124 = vst [vmem:[%s1937_s4 + $0x10] sm:$0xff] %v1268_v53 }
 0x28d   :  { %1125 = vst [vmem:[%s1937_s4 + $0x18] sm:$0xff] %v1269_v55  ;;  %1123 = vst [vmem:[%s1937_s4 + $0x8] sm:$0xff] %v1267_v56 }

// kernel: vae_forward.22
= control target key start
LH: loop header
LB: loop body
LE: loop exit
PB: predicated region body
PF: predicated region fallthrough
CT: control target
= control target key end

     0   :  { %s3306_s1 = inlined_call_operand.vmem [shape: bf16[256,2048], index: 1, kind: input, shape index: {}]   ;;  %s3307_s0 = inlined_call_operand.vmem [shape: bf16[8,256], index: 0, kind: input, shape index: {}]   ;;  %s3308_s2 = inlined_call_operand.vmem [shape: f32[8,1], index: 2, kind: input, shape index: {}]   ;;  %s3309_s3 = inlined_call_operand.vmem [shape: f32[8,1], index: 3, kind: input, shape index: {}]   ;;  %s3310_s4 = inlined_call_operand.vmem [shape: bf16[8,2048], index: 4, kind: output, shape index: {}]  }
   0x1   :  { %v130_v0 = vld [vmem:[%s3306_s1 + $0x380] sm:$0xff]  ;;  %v131_v2 = vld [vmem:[%s3306_s1 + $0x388] sm:$0xff] }
   0x2   :  { %v138_v1 = vld [vmem:[%s3306_s1 + $0x3c0] sm:$0xff]  ;;  %v139_v4 = vld [vmem:[%s3306_s1 + $0x3c8] sm:$0xff] }
   0x3   :  { %v2259_v3 = vcombine.high %v130_v0, %v138_v1  ;;  %v2258_v5 = vcombine.low %v130_v0, %v138_v1  ;;  %v114_v6 = vld [vmem:[%s3306_s1 + $0x300] sm:$0xff]  ;;  %v2261_v8 = vcombine.high %v131_v2, %v139_v4  ;;  %v2260_v9 = vcombine.low %v131_v2, %v139_v4  ;;  %v115_v11 = vld [vmem:[%s3306_s1 + $0x308] sm:$0xff] }
   0x4   :  { %v122_v7 = vld [vmem:[%s3306_s1 + $0x340] sm:$0xff]  ;;  %v123_v12 = vld [vmem:[%s3306_s1 + $0x348] sm:$0xff] }
   0x5   :  { %v2243_v10 = vcombine.high %v114_v6, %v122_v7  ;;  %v98_v13 = vld [vmem:[%s3306_s1 + $0x280] sm:$0xff]  ;;  %1561 = vmatprep.subr.bf16.mxu0 %v2259_v3  ;;  %v2245_v14 = vcombine.high %v115_v11, %v123_v12  ;;  %v99_v16 = vld [vmem:[%s3306_s1 + $0x288] sm:$0xff]  ;;  %1602 = vmatprep.subr.bf16.mxu1 %v2261_v8  ;;  %v2242_v18 = vcombine.low %v114_v6, %v122_v7 }
   0x6   :  { %v106_v15 = vld [vmem:[%s3306_s1 + $0x2c0] sm:$0xff]  ;;  %v107_v17 = vld [vmem:[%s3306_s1 + $0x2c8] sm:$0xff]  ;;  %1562 = vmatpush1.bf16.msra.mxu0 %v2258_v5  ;;  %1603 = vmatpush1.bf16.msra.mxu1 %v2260_v9  ;;  %v2244_v19 = vcombine.low %v115_v11, %v123_v12 }
   0x7   :  { %1563 = vmatprep.subr.bf16.mxu0 %v2243_v10  ;;  %v2227_v20 = vcombine.high %v98_v13, %v106_v15  ;;  %1604 = vmatprep.subr.bf16.mxu1 %v2245_v14  ;;  %v2229_v21 = vcombine.high %v99_v16, %v107_v17  ;;  %v82_v22 = vld [vmem:[%s3306_s1 + $0x200] sm:$0xff]  ;;  %v83_v24 = vld [vmem:[%s3306_s1 + $0x208] sm:$0xff]  ;;  %v2226_v26 = vcombine.low %v98_v13, %v106_v15 }
   0x8   :  { %v90_v23 = vld [vmem:[%s3306_s1 + $0x240] sm:$0xff]  ;;  %v91_v25 = vld [vmem:[%s3306_s1 + $0x248] sm:$0xff]  ;;  %v2228_v27 = vcombine.low %v99_v16, %v107_v17 }
   0x9   :  { %v2211_v28 = vcombine.high %v82_v22, %v90_v23  ;;  %v2213_v29 = vcombine.high %v83_v24, %v91_v25  ;;  %v66_v30 = vld [vmem:[%s3306_s1 + $0x180] sm:$0xff]  ;;  %v67_v32 = vld [vmem:[%s3306_s1 + $0x188] sm:$0xff]  ;;  %v2210_v34 = vcombine.low %v82_v22, %v90_v23  ;;  %v2212_v35 = vcombine.low %v83_v24, %v91_v25 }
   0xa   :  { %1564 = vmatpush1.bf16.msra.mxu0 %v2242_v18  ;;  %1605 = vmatpush1.bf16.msra.mxu1 %v2244_v19  ;;  %v74_v31 = vld [vmem:[%s3306_s1 + $0x1c0] sm:$0xff]  ;;  %v75_v33 = vld [vmem:[%s3306_s1 + $0x1c8] sm:$0xff] }
   0xb   :  { %1565 = vmatprep.subr.bf16.mxu0 %v2227_v20  ;;  %1606 = vmatprep.subr.bf16.mxu1 %v2229_v21  ;;  %v2195_v36 = vcombine.high %v66_v30, %v74_v31  ;;  %v2197_v37 = vcombine.high %v67_v32, %v75_v33  ;;  %v50_v38 = vld [vmem:[%s3306_s1 + $0x100] sm:$0xff]  ;;  %v51_v40 = vld [vmem:[%s3306_s1 + $0x108] sm:$0xff]  ;;  %v2194_v42 = vcombine.low %v66_v30, %v74_v31 }
   0xc   :  { %v58_v39 = vld [vmem:[%s3306_s1 + $0x140] sm:$0xff]  ;;  %v59_v41 = vld [vmem:[%s3306_s1 + $0x148] sm:$0xff]  ;;  %v2196_v43 = vcombine.low %v67_v32, %v75_v33 }
   0xd   :  { %v2179_v44 = vcombine.high %v50_v38, %v58_v39  ;;  %v2181_v45 = vcombine.high %v51_v40, %v59_v41  ;;  %v34_v46 = vld [vmem:[%s3306_s1 + $0x80] sm:$0xff]  ;;  %v35_v48 = vld [vmem:[%s3306_s1 + $0x88] sm:$0xff]  ;;  %v2178_v50 = vcombine.low %v50_v38, %v58_v39  ;;  %v2180_v51 = vcombine.low %v51_v40, %v59_v41 }
   0xe   :  { %1566 = vmatpush1.bf16.msra.mxu0 %v2226_v26  ;;  %1607 = vmatpush1.bf16.msra.mxu1 %v2228_v27  ;;  %v42_v47 = vld [vmem:[%s3306_s1 + $0xc0] sm:$0xff]  ;;  %v43_v49 = vld [vmem:[%s3306_s1 + $0xc8] sm:$0xff] }
   0xf   :  { %1567 = vmatprep.subr.bf16.mxu0 %v2211_v28  ;;  %1608 = vmatprep.subr.bf16.mxu1 %v2213_v29  ;;  %v2163_v52 = vcombine.high %v34_v46, %v42_v47  ;;  %v2538_v53 = vld [vmem:[%s3307_s0] sm:$0xff]  ;;  %v2165_v54 = vcombine.high %v35_v48, %v43_v49  ;;  %v19_v58 = vld [vmem:[%s3306_s1 + $0x8] sm:$0xff]  ;;  %v2162_v60 = vcombine.low %v34_v46, %v42_v47 }
  0x10   :  { %v18_v55 = vld [vmem:[%s3306_s1] sm:$0xff]  ;;  %v2548_v57 = vcombine.high %v2538_v53, %v2538_v53  ;;  %v27_v59 = vld [vmem:[%s3306_s1 + $0x48] sm:$0xff]  ;;  %v2164_v61 = vcombine.low %v35_v48, %v43_v49 }
  0x11   :  { %v26_v56 = vld [vmem:[%s3306_s1 + $0x40] sm:$0xff]  ;;  %v2149_v63 = vcombine.high %v19_v58, %v27_v59  ;;  %v259_v2 = vld [vmem:[%s3306_s1 + $0x788] sm:$0xff]  ;;  %v2148_v5 = vcombine.low %v19_v58, %v27_v59 }
  0x12   :  { %1568 = vmatpush1.bf16.msra.mxu0 %v2210_v34  ;;  %1609 = vmatpush1.bf16.msra.mxu1 %v2212_v35  ;;  %v2147_v62 = vcombine.high %v18_v55, %v26_v56  ;;  %v258_v0 = vld [vmem:[%s3306_s1 + $0x780] sm:$0xff]  ;;  %v267_v3 = vld [vmem:[%s3306_s1 + $0x7c8] sm:$0xff]  ;;  %v2146_v4 = vcombine.low %v18_v55, %v26_v56 }
  0x13   :  { %1569 = vmatprep.subr.bf16.mxu0 %v2195_v36  ;;  %1610 = vmatprep.subr.bf16.mxu1 %v2197_v37  ;;  %v266_v1 = vld [vmem:[%s3306_s1 + $0x7c0] sm:$0xff]  ;;  %v2389_v7 = vcombine.high %v259_v2, %v267_v3  ;;  %v243_v10 = vld [vmem:[%s3306_s1 + $0x708] sm:$0xff]  ;;  %v2388_v13 = vcombine.low %v259_v2, %v267_v3  ;;  %v132_v2 = vld [vmem:[%s3306_s1 + $0x390] sm:$0xff] }
  0x14   :  { %1593 = vmatprep.mubr.bf16.mxu0 %v2548_v57  ;;  %1634 = vmatprep.mubr.bf16.mxu1 %v2548_v57  ;;  %v2387_v6 = vcombine.high %v258_v0, %v266_v1  ;;  %v242_v8 = vld [vmem:[%s3306_s1 + $0x700] sm:$0xff]  ;;  %v251_v11 = vld [vmem:[%s3306_s1 + $0x748] sm:$0xff]  ;;  %v2386_v12 = vcombine.low %v258_v0, %v266_v1  ;;  %v140_v3 = vld [vmem:[%s3306_s1 + $0x3d0] sm:$0xff] }
  0x15   :  { %v250_v9 = vld [vmem:[%s3306_s1 + $0x740] sm:$0xff]  ;;  %v2373_v15 = vcombine.high %v243_v10, %v251_v11  ;;  %v227_v18 = vld [vmem:[%s3306_s1 + $0x688] sm:$0xff]  ;;  %v2372_v21 = vcombine.low %v243_v10, %v251_v11  ;;  %v116_v10 = vld [vmem:[%s3306_s1 + $0x310] sm:$0xff] }
  0x16   :  { %1570 = vmatpush1.bf16.msra.mxu0 %v2194_v42  ;;  %1611 = vmatpush1.bf16.msra.mxu1 %v2196_v43  ;;  %v2371_v14 = vcombine.high %v242_v8, %v250_v9  ;;  %v226_v16 = vld [vmem:[%s3306_s1 + $0x680] sm:$0xff]  ;;  %v235_v19 = vld [vmem:[%s3306_s1 + $0x6c8] sm:$0xff]  ;;  %v2370_v20 = vcombine.low %v242_v8, %v250_v9  ;;  %v2263_v8 = vcombine.high %v132_v2, %v140_v3  ;;  %v124_v11 = vld [vmem:[%s3306_s1 + $0x350] sm:$0xff] }
  0x17   :  { %1571 = vmatprep.subr.bf16.mxu0 %v2179_v44  ;;  %1612 = vmatprep.subr.bf16.mxu1 %v2181_v45  ;;  %v234_v17 = vld [vmem:[%s3306_s1 + $0x6c0] sm:$0xff]  ;;  %v2357_v23 = vcombine.high %v227_v18, %v235_v19  ;;  %v211_v26 = vld [vmem:[%s3306_s1 + $0x608] sm:$0xff]  ;;  %v2356_v29 = vcombine.low %v227_v18, %v235_v19  ;;  %v108_v19 = vld [vmem:[%s3306_s1 + $0x2d0] sm:$0xff] }
  0x18   :  { %v2355_v22 = vcombine.high %v226_v16, %v234_v17  ;;  %v210_v24 = vld [vmem:[%s3306_s1 + $0x600] sm:$0xff]  ;;  %v219_v27 = vld [vmem:[%s3306_s1 + $0x648] sm:$0xff]  ;;  %v2354_v28 = vcombine.low %v226_v16, %v234_v17  ;;  %v2247_v17 = vcombine.high %v116_v10, %v124_v11 }
  0x19   :  { %v218_v25 = vld [vmem:[%s3306_s1 + $0x640] sm:$0xff]  ;;  %v2341_v31 = vcombine.high %v211_v26, %v219_v27  ;;  %v195_v34 = vld [vmem:[%s3306_s1 + $0x588] sm:$0xff]  ;;  %v2340_v37 = vcombine.low %v211_v26, %v219_v27  ;;  %v84_v26 = vld [vmem:[%s3306_s1 + $0x210] sm:$0xff] }
  0x1a   :  { %1572 = vmatpush1.bf16.msra.mxu0 %v2178_v50  ;;  %1613 = vmatpush1.bf16.msra.mxu1 %v2180_v51  ;;  %v2339_v30 = vcombine.high %v210_v24, %v218_v25  ;;  %v194_v32 = vld [vmem:[%s3306_s1 + $0x580] sm:$0xff]  ;;  %v203_v35 = vld [vmem:[%s3306_s1 + $0x5c8] sm:$0xff]  ;;  %v2338_v36 = vcombine.low %v210_v24, %v218_v25  ;;  %v92_v27 = vld [vmem:[%s3306_s1 + $0x250] sm:$0xff] }
  0x1b   :  { %1573 = vmatprep.subr.bf16.mxu0 %v2163_v52  ;;  %1614 = vmatprep.subr.bf16.mxu1 %v2165_v54  ;;  %v202_v33 = vld [vmem:[%s3306_s1 + $0x5c0] sm:$0xff]  ;;  %v2325_v39 = vcombine.high %v195_v34, %v203_v35  ;;  %v179_v42 = vld [vmem:[%s3306_s1 + $0x508] sm:$0xff]  ;;  %v2324_v45 = vcombine.low %v195_v34, %v203_v35  ;;  %v68_v34 = vld [vmem:[%s3306_s1 + $0x190] sm:$0xff] }
  0x1c   :  { %v2323_v38 = vcombine.high %v194_v32, %v202_v33  ;;  %v178_v40 = vld [vmem:[%s3306_s1 + $0x500] sm:$0xff]  ;;  %v187_v43 = vld [vmem:[%s3306_s1 + $0x548] sm:$0xff]  ;;  %v2322_v44 = vcombine.low %v194_v32, %v202_v33  ;;  %v2215_v32 = vcombine.high %v84_v26, %v92_v27  ;;  %v76_v35 = vld [vmem:[%s3306_s1 + $0x1d0] sm:$0xff] }
  0x1d   :  { %v186_v41 = vld [vmem:[%s3306_s1 + $0x540] sm:$0xff]  ;;  %v2309_v47 = vcombine.high %v179_v42, %v187_v43  ;;  %v163_v50 = vld [vmem:[%s3306_s1 + $0x488] sm:$0xff]  ;;  %v2308_v54 = vcombine.low %v179_v42, %v187_v43  ;;  %v52_v42 = vld [vmem:[%s3306_s1 + $0x110] sm:$0xff] }
  0x1e   :  { %1574 = vmatpush1.bf16.msra.mxu0 %v2162_v60  ;;  %1615 = vmatpush1.bf16.msra.mxu1 %v2164_v61  ;;  %v2307_v46 = vcombine.high %v178_v40, %v186_v41  ;;  %v162_v48 = vld [vmem:[%s3306_s1 + $0x480] sm:$0xff]  ;;  %v171_v51 = vld [vmem:[%s3306_s1 + $0x4c8] sm:$0xff]  ;;  %v2306_v52 = vcombine.low %v178_v40, %v186_v41  ;;  %v2199_v40 = vcombine.high %v68_v34, %v76_v35  ;;  %v60_v43 = vld [vmem:[%s3306_s1 + $0x150] sm:$0xff] }
  0x1f   :  { %1575 = vmatprep.subr.bf16.mxu0 %v2147_v62  ;;  %1616 = vmatprep.subr.bf16.mxu1 %v2149_v63  ;;  %v170_v49 = vld [vmem:[%s3306_s1 + $0x4c0] sm:$0xff]  ;;  %v2293_v56 = vcombine.high %v163_v50, %v171_v51  ;;  %v147_v60 = vld [vmem:[%s3306_s1 + $0x408] sm:$0xff]  ;;  %v2292_v63 = vcombine.low %v163_v50, %v171_v51  ;;  %v36_v50 = vld [vmem:[%s3306_s1 + $0x90] sm:$0xff] }
  0x20   :  { %v2291_v55 = vcombine.high %v162_v48, %v170_v49  ;;  %v146_v58 = vld [vmem:[%s3306_s1 + $0x400] sm:$0xff]  ;;  %v155_v61 = vld [vmem:[%s3306_s1 + $0x448] sm:$0xff]  ;;  %v2290_v62 = vcombine.low %v162_v48, %v170_v49  ;;  %v2183_v48 = vcombine.high %v52_v42, %v60_v43  ;;  %v44_v51 = vld [vmem:[%s3306_s1 + $0xd0] sm:$0xff] }
  0x21   :  { %v154_v59 = vld [vmem:[%s3306_s1 + $0x440] sm:$0xff]  ;;  %v2277_v1 = vcombine.high %v147_v60, %v155_v61 }
  0x22   :  { %1576 = vmatpush1.bf16.msra.mxu0 %v2146_v4  ;;  %1617 = vmatpush1.bf16.msra.mxu1 %v2148_v5  ;;  %v2275_v0 = vcombine.high %v146_v58, %v154_v59  ;;  %v133_v4 = vld [vmem:[%s3306_s1 + $0x398] sm:$0xff] }
  0x23   :  { %1577 = vmatprep.subr.bf16.mxu0 %v2387_v6  ;;  %1618 = vmatprep.subr.bf16.mxu1 %v2389_v7  ;;  %v141_v5 = vld [vmem:[%s3306_s1 + $0x3d8] sm:$0xff]  ;;  %v2274_v6 = vcombine.low %v146_v58, %v154_v59  ;;  %v2276_v7 = vcombine.low %v147_v60, %v155_v61  ;;  %v2167_v58 = vcombine.high %v36_v50, %v44_v51  ;;  %v20_v60 = vld [vmem:[%s3306_s1 + $0x10] sm:$0xff] }
  0x24   :  { %v2265_v9 = vcombine.high %v133_v4, %v141_v5  ;;  %v2264_v16 = vcombine.low %v133_v4, %v141_v5  ;;  %v28_v61 = vld [vmem:[%s3306_s1 + $0x50] sm:$0xff] }
  0x25   :  { %v260_v4 = vld [vmem:[%s3306_s1 + $0x790] sm:$0xff] }
  0x26   :  { %1578 = vmatpush2.bf16.msra.mxu0 %v2386_v12  ;;  %1619 = vmatpush2.bf16.msra.mxu1 %v2388_v13  ;;  %v2674_v12 = vcombine.low %v2538_v53, %v2538_v53  ;;  %v117_v13 = vld [vmem:[%s3306_s1 + $0x318] sm:$0xff]  ;;  %v100_v53 = vld [vmem:[%s3306_s1 + $0x290] sm:$0xff] }
  0x27   :  { %1579 = vmatprep.subr.bf16.mxu0 %v2371_v14  ;;  %1620 = vmatprep.subr.bf16.mxu1 %v2373_v15  ;;  %v125_v14 = vld [vmem:[%s3306_s1 + $0x358] sm:$0xff]  ;;  %v2262_v15 = vcombine.low %v132_v2, %v140_v3  ;;  %v2231_v24 = vcombine.high %v100_v53, %v108_v19  ;;  %v2151_v2 = vcombine.high %v20_v60, %v28_v61  ;;  %v268_v5 = vld [vmem:[%s3306_s1 + $0x7d0] sm:$0xff] }
  0x28   :  { %v2249_v18 = vcombine.high %v117_v13, %v125_v14 }
  0x2a   :  { %1580 = vmatpush2.bf16.msra.mxu0 %v2370_v20  ;;  %1621 = vmatpush2.bf16.msra.mxu1 %v2372_v21  ;;  %v101_v20 = vld [vmem:[%s3306_s1 + $0x298] sm:$0xff] }
  0x2b   :  { %1581 = vmatprep.subr.bf16.mxu0 %v2355_v22  ;;  %1622 = vmatprep.subr.bf16.mxu1 %v2357_v23  ;;  %v109_v21 = vld [vmem:[%s3306_s1 + $0x2d8] sm:$0xff]  ;;  %v2246_v22 = vcombine.low %v116_v10, %v124_v11  ;;  %v2248_v23 = vcombine.low %v117_v13, %v125_v14  ;;  %v2391_v10 = vcombine.high %v260_v4, %v268_v5  ;;  %v244_v13 = vld [vmem:[%s3306_s1 + $0x710] sm:$0xff] }
  0x2c   :  { %v2233_v25 = vcombine.high %v101_v20, %v109_v21  ;;  %v252_v14 = vld [vmem:[%s3306_s1 + $0x750] sm:$0xff] }
  0x2e   :  { %1582 = vmatpush2.bf16.msra.mxu0 %v2354_v28  ;;  %1623 = vmatpush2.bf16.msra.mxu1 %v2356_v29  ;;  %v85_v28 = vld [vmem:[%s3306_s1 + $0x218] sm:$0xff] }
  0x2f   :  { %1583 = vmatprep.subr.bf16.mxu0 %v2339_v30  ;;  %1624 = vmatprep.subr.bf16.mxu1 %v2341_v31  ;;  %v93_v29 = vld [vmem:[%s3306_s1 + $0x258] sm:$0xff]  ;;  %v2230_v30 = vcombine.low %v100_v53, %v108_v19  ;;  %v2232_v31 = vcombine.low %v101_v20, %v109_v21  ;;  %v2375_v53 = vcombine.high %v244_v13, %v252_v14  ;;  %v228_v20 = vld [vmem:[%s3306_s1 + $0x690] sm:$0xff] }
  0x30   :  { %v2217_v33 = vcombine.high %v85_v28, %v93_v29  ;;  %v236_v21 = vld [vmem:[%s3306_s1 + $0x6d0] sm:$0xff] }
  0x32   :  { %1584 = vmatpush2.bf16.msra.mxu0 %v2338_v36  ;;  %1625 = vmatpush2.bf16.msra.mxu1 %v2340_v37  ;;  %v69_v36 = vld [vmem:[%s3306_s1 + $0x198] sm:$0xff] }
  0x33   :  { %1585 = vmatprep.subr.bf16.mxu0 %v2323_v38  ;;  %1626 = vmatprep.subr.bf16.mxu1 %v2325_v39  ;;  %v77_v37 = vld [vmem:[%s3306_s1 + $0x1d8] sm:$0xff]  ;;  %v2214_v38 = vcombine.low %v84_v26, %v92_v27  ;;  %v2216_v39 = vcombine.low %v85_v28, %v93_v29  ;;  %v2359_v26 = vcombine.high %v228_v20, %v236_v21  ;;  %v212_v28 = vld [vmem:[%s3306_s1 + $0x610] sm:$0xff] }
  0x34   :  { %v2201_v41 = vcombine.high %v69_v36, %v77_v37  ;;  %v220_v29 = vld [vmem:[%s3306_s1 + $0x650] sm:$0xff] }
  0x36   :  { %1586 = vmatpush2.bf16.msra.mxu0 %v2322_v44  ;;  %1627 = vmatpush2.bf16.msra.mxu1 %v2324_v45  ;;  %v53_v44 = vld [vmem:[%s3306_s1 + $0x118] sm:$0xff] }
  0x37   :  { %1587 = vmatprep.subr.bf16.mxu0 %v2307_v46  ;;  %1628 = vmatprep.subr.bf16.mxu1 %v2309_v47  ;;  %v61_v45 = vld [vmem:[%s3306_s1 + $0x158] sm:$0xff]  ;;  %v2198_v46 = vcombine.low %v68_v34, %v76_v35  ;;  %v2200_v47 = vcombine.low %v69_v36, %v77_v37  ;;  %v2343_v34 = vcombine.high %v212_v28, %v220_v29  ;;  %v196_v36 = vld [vmem:[%s3306_s1 + $0x590] sm:$0xff] }
  0x38   :  { %v2185_v49 = vcombine.high %v53_v44, %v61_v45  ;;  %v204_v37 = vld [vmem:[%s3306_s1 + $0x5d0] sm:$0xff] }
  0x3a   :  { %1588 = vmatpush2.bf16.msra.mxu0 %v2306_v52  ;;  %1629 = vmatpush2.bf16.msra.mxu1 %v2308_v54  ;;  %v37_v52 = vld [vmem:[%s3306_s1 + $0x98] sm:$0xff] }
  0x3b   :  { %1589 = vmatprep.subr.bf16.mxu0 %v2291_v55  ;;  %1630 = vmatprep.subr.bf16.mxu1 %v2293_v56  ;;  %v45_v54 = vld [vmem:[%s3306_s1 + $0xd8] sm:$0xff]  ;;  %v2182_v55 = vcombine.low %v52_v42, %v60_v43  ;;  %v2184_v56 = vcombine.low %v53_v44, %v61_v45  ;;  %v2327_v42 = vcombine.high %v196_v36, %v204_v37  ;;  %v180_v44 = vld [vmem:[%s3306_s1 + $0x510] sm:$0xff] }
  0x3c   :  { %v2169_v59 = vcombine.high %v37_v52, %v45_v54  ;;  %v188_v45 = vld [vmem:[%s3306_s1 + $0x550] sm:$0xff] }
  0x3e   :  { %1590 = vmatpush2.bf16.msra.mxu0 %v2290_v62  ;;  %1631 = vmatpush2.bf16.msra.mxu1 %v2292_v63  ;;  %v21_v62 = vld [vmem:[%s3306_s1 + $0x18] sm:$0xff] }
  0x3f   :  { %1591 = vmatprep.subr.bf16.mxu0 %v2275_v0  ;;  %1632 = vmatprep.subr.bf16.mxu1 %v2277_v1  ;;  %v29_v63 = vld [vmem:[%s3306_s1 + $0x58] sm:$0xff]  ;;  %v2166_v0 = vcombine.low %v36_v50, %v44_v51  ;;  %v2168_v1 = vcombine.low %v37_v52, %v45_v54  ;;  %v2311_v50 = vcombine.high %v180_v44, %v188_v45  ;;  %v164_v52 = vld [vmem:[%s3306_s1 + $0x490] sm:$0xff] }
  0x40   :  { %v2153_v3 = vcombine.high %v21_v62, %v29_v63  ;;  %v172_v54 = vld [vmem:[%s3306_s1 + $0x4d0] sm:$0xff] }
  0x42   :  { %1592 = vmatpush2.bf16.msra.mxu0 %v2274_v6  ;;  %1633 = vmatpush2.bf16.msra.mxu1 %v2276_v7  ;;  %v261_v6 = vld [vmem:[%s3306_s1 + $0x798] sm:$0xff] }
  0x43   :  { %1643 = vmatprep.subr.bf16.mxu0 %v2263_v8  ;;  %1684 = vmatprep.subr.bf16.mxu1 %v2265_v9  ;;  %v269_v7 = vld [vmem:[%s3306_s1 + $0x7d8] sm:$0xff]  ;;  %v2150_v8 = vcombine.low %v20_v60, %v28_v61  ;;  %v2152_v9 = vcombine.low %v21_v62, %v29_v63  ;;  %v2295_v60 = vcombine.high %v164_v52, %v172_v54  ;;  %v148_v62 = vld [vmem:[%s3306_s1 + $0x410] sm:$0xff] }
  0x44   :  { %v2393_v11 = vcombine.high %v261_v6, %v269_v7  ;;  %v156_v63 = vld [vmem:[%s3306_s1 + $0x450] sm:$0xff] }
  0x45   :  { %1594 = vmatmul.mubr.bf16.vlgmr.msra.gmra.mxu0 %v2674_v12  ;;  %1635 = vmatmul.mubr.bf16.vlgmr.msra.gmra.mxu1 %v2674_v12 }
  0x46   :  { %1644 = vmatpush1.bf16.msra.mxu0 %v2262_v15  ;;  %1685 = vmatpush1.bf16.msra.mxu1 %v2264_v16  ;;  %v245_v15 = vld [vmem:[%s3306_s1 + $0x718] sm:$0xff] }
  0x47   :  { %1645 = vmatprep.subr.bf16.mxu0 %v2247_v17  ;;  %1686 = vmatprep.subr.bf16.mxu1 %v2249_v18  ;;  %v253_v16 = vld [vmem:[%s3306_s1 + $0x758] sm:$0xff]  ;;  %v2390_v17 = vcombine.low %v260_v4, %v268_v5  ;;  %v2392_v18 = vcombine.low %v261_v6, %v269_v7  ;;  %v2279_v4 = vcombine.high %v148_v62, %v156_v63  ;;  %v134_v6 = vld [vmem:[%s3306_s1 + $0x3a0] sm:$0xff] }
  0x48   :  { %1675 = vmatprep.mubr.bf16.mxu0 %v2548_v57  ;;  %1716 = vmatprep.mubr.bf16.mxu1 %v2548_v57  ;;  %v2377_v19 = vcombine.high %v245_v15, %v253_v16  ;;  %v142_v7 = vld [vmem:[%s3306_s1 + $0x3e0] sm:$0xff] }
  0x4a   :  { %1646 = vmatpush1.bf16.msra.mxu0 %v2246_v22  ;;  %1687 = vmatpush1.bf16.msra.mxu1 %v2248_v23  ;;  %v229_v22 = vld [vmem:[%s3306_s1 + $0x698] sm:$0xff] }
  0x4b   :  { %1647 = vmatprep.subr.bf16.mxu0 %v2231_v24  ;;  %1688 = vmatprep.subr.bf16.mxu1 %v2233_v25  ;;  %v237_v23 = vld [vmem:[%s3306_s1 + $0x6d8] sm:$0xff]  ;;  %v2374_v24 = vcombine.low %v244_v13, %v252_v14  ;;  %v2376_v25 = vcombine.low %v245_v15, %v253_v16  ;;  %v2267_v13 = vcombine.high %v134_v6, %v142_v7  ;;  %v118_v15 = vld [vmem:[%s3306_s1 + $0x320] sm:$0xff] }
  0x4c   :  { %v2361_v27 = vcombine.high %v229_v22, %v237_v23  ;;  %v126_v16 = vld [vmem:[%s3306_s1 + $0x360] sm:$0xff] }
  0x4e   :  { %1648 = vmatpush1.bf16.msra.mxu0 %v2230_v30  ;;  %1689 = vmatpush1.bf16.msra.mxu1 %v2232_v31  ;;  %v213_v30 = vld [vmem:[%s3306_s1 + $0x618] sm:$0xff] }
  0x4f   :  { %1649 = vmatprep.subr.bf16.mxu0 %v2215_v32  ;;  %1690 = vmatprep.subr.bf16.mxu1 %v2217_v33  ;;  %v221_v31 = vld [vmem:[%s3306_s1 + $0x658] sm:$0xff]  ;;  %v2358_v32 = vcombine.low %v228_v20, %v236_v21  ;;  %v2360_v33 = vcombine.low %v229_v22, %v237_v23  ;;  %v2251_v20 = vcombine.high %v118_v15, %v126_v16  ;;  %v102_v22 = vld [vmem:[%s3306_s1 + $0x2a0] sm:$0xff] }
  0x50   :  { %v2345_v35 = vcombine.high %v213_v30, %v221_v31  ;;  %v110_v23 = vld [vmem:[%s3306_s1 + $0x2e0] sm:$0xff] }
  0x52   :  { %1650 = vmatpush1.bf16.msra.mxu0 %v2214_v38  ;;  %1691 = vmatpush1.bf16.msra.mxu1 %v2216_v39  ;;  %v197_v38 = vld [vmem:[%s3306_s1 + $0x598] sm:$0xff] }
  0x53   :  { %1651 = vmatprep.subr.bf16.mxu0 %v2199_v40  ;;  %1692 = vmatprep.subr.bf16.mxu1 %v2201_v41  ;;  %v205_v39 = vld [vmem:[%s3306_s1 + $0x5d8] sm:$0xff]  ;;  %v2342_v40 = vcombine.low %v212_v28, %v220_v29  ;;  %v2344_v41 = vcombine.low %v213_v30, %v221_v31  ;;  %v2235_v28 = vcombine.high %v102_v22, %v110_v23  ;;  %v86_v30 = vld [vmem:[%s3306_s1 + $0x220] sm:$0xff] }
  0x54   :  { %v2329_v43 = vcombine.high %v197_v38, %v205_v39  ;;  %v94_v31 = vld [vmem:[%s3306_s1 + $0x260] sm:$0xff] }
  0x56   :  { %1652 = vmatpush1.bf16.msra.mxu0 %v2198_v46  ;;  %1693 = vmatpush1.bf16.msra.mxu1 %v2200_v47  ;;  %v181_v46 = vld [vmem:[%s3306_s1 + $0x518] sm:$0xff] }
  0x57   :  { %1653 = vmatprep.subr.bf16.mxu0 %v2183_v48  ;;  %1694 = vmatprep.subr.bf16.mxu1 %v2185_v49  ;;  %v189_v47 = vld [vmem:[%s3306_s1 + $0x558] sm:$0xff]  ;;  %v2326_v48 = vcombine.low %v196_v36, %v204_v37  ;;  %v2328_v49 = vcombine.low %v197_v38, %v205_v39  ;;  %v2219_v36 = vcombine.high %v86_v30, %v94_v31  ;;  %v70_v38 = vld [vmem:[%s3306_s1 + $0x1a0] sm:$0xff] }
  0x58   :  { %v2313_v51 = vcombine.high %v181_v46, %v189_v47  ;;  %v78_v39 = vld [vmem:[%s3306_s1 + $0x1e0] sm:$0xff] }
  0x5a   :  { %1654 = vmatpush1.bf16.msra.mxu0 %v2182_v55  ;;  %1695 = vmatpush1.bf16.msra.mxu1 %v2184_v56  ;;  %v165_v55 = vld [vmem:[%s3306_s1 + $0x498] sm:$0xff] }
  0x5b   :  { %1655 = vmatprep.subr.bf16.mxu0 %v2167_v58  ;;  %1696 = vmatprep.subr.bf16.mxu1 %v2169_v59  ;;  %v173_v56 = vld [vmem:[%s3306_s1 + $0x4d8] sm:$0xff]  ;;  %v2310_v58 = vcombine.low %v180_v44, %v188_v45  ;;  %v2312_v59 = vcombine.low %v181_v46, %v189_v47  ;;  %v2203_v44 = vcombine.high %v70_v38, %v78_v39  ;;  %v54_v46 = vld [vmem:[%s3306_s1 + $0x120] sm:$0xff] }
  0x5c   :  { %v2297_v61 = vcombine.high %v165_v55, %v173_v56  ;;  %v62_v47 = vld [vmem:[%s3306_s1 + $0x160] sm:$0xff] }
  0x5e   :  { %1656 = vmatpush1.bf16.msra.mxu0 %v2166_v0  ;;  %1697 = vmatpush1.bf16.msra.mxu1 %v2168_v1  ;;  %v149_v0 = vld [vmem:[%s3306_s1 + $0x418] sm:$0xff] }
  0x5f   :  { %1657 = vmatprep.subr.bf16.mxu0 %v2151_v2  ;;  %1698 = vmatprep.subr.bf16.mxu1 %v2153_v3  ;;  %v157_v1 = vld [vmem:[%s3306_s1 + $0x458] sm:$0xff]  ;;  %v2294_v2 = vcombine.low %v164_v52, %v172_v54  ;;  %v2296_v3 = vcombine.low %v165_v55, %v173_v56  ;;  %v2187_v52 = vcombine.high %v54_v46, %v62_v47  ;;  %v38_v55 = vld [vmem:[%s3306_s1 + $0xa0] sm:$0xff] }
  0x60   :  { %v2281_v5 = vcombine.high %v149_v0, %v157_v1  ;;  %v46_v56 = vld [vmem:[%s3306_s1 + $0xe0] sm:$0xff] }
  0x62   :  { %1658 = vmatpush1.bf16.msra.mxu0 %v2150_v8  ;;  %1699 = vmatpush1.bf16.msra.mxu1 %v2152_v9  ;;  %v135_v8 = vld [vmem:[%s3306_s1 + $0x3a8] sm:$0xff] }
  0x63   :  { %1659 = vmatprep.subr.bf16.mxu0 %v2391_v10  ;;  %1700 = vmatprep.subr.bf16.mxu1 %v2393_v11  ;;  %v143_v9 = vld [vmem:[%s3306_s1 + $0x3e8] sm:$0xff]  ;;  %v2278_v10 = vcombine.low %v148_v62, %v156_v63  ;;  %v2280_v11 = vcombine.low %v149_v0, %v157_v1  ;;  %v2171_v62 = vcombine.high %v38_v55, %v46_v56  ;;  %v22_v0 = vld [vmem:[%s3306_s1 + $0x20] sm:$0xff] }
  0x64   :  { %v2269_v14 = vcombine.high %v135_v8, %v143_v9  ;;  %v30_v1 = vld [vmem:[%s3306_s1 + $0x60] sm:$0xff] }
  0x66   :  { %1660 = vmatpush2.bf16.msra.mxu0 %v2390_v17  ;;  %1701 = vmatpush2.bf16.msra.mxu1 %v2392_v18  ;;  %v119_v17 = vld [vmem:[%s3306_s1 + $0x328] sm:$0xff] }
  0x67   :  { %1661 = vmatprep.subr.bf16.mxu0 %v2375_v53  ;;  %1702 = vmatprep.subr.bf16.mxu1 %v2377_v19  ;;  %v127_v18 = vld [vmem:[%s3306_s1 + $0x368] sm:$0xff]  ;;  %v2266_v53 = vcombine.low %v134_v6, %v142_v7  ;;  %v2268_v19 = vcombine.low %v135_v8, %v143_v9  ;;  %v2155_v6 = vcombine.high %v22_v0, %v30_v1  ;;  %v262_v8 = vld [vmem:[%s3306_s1 + $0x7a0] sm:$0xff] }
  0x68   :  { %v2253_v21 = vcombine.high %v119_v17, %v127_v18  ;;  %v270_v9 = vld [vmem:[%s3306_s1 + $0x7e0] sm:$0xff] }
  0x6a   :  { %1662 = vmatpush2.bf16.msra.mxu0 %v2374_v24  ;;  %1703 = vmatpush2.bf16.msra.mxu1 %v2376_v25  ;;  %v103_v24 = vld [vmem:[%s3306_s1 + $0x2a8] sm:$0xff] }
  0x6b   :  { %1663 = vmatprep.subr.bf16.mxu0 %v2359_v26  ;;  %1704 = vmatprep.subr.bf16.mxu1 %v2361_v27  ;;  %v111_v25 = vld [vmem:[%s3306_s1 + $0x2e8] sm:$0xff]  ;;  %v2250_v26 = vcombine.low %v118_v15, %v126_v16  ;;  %v2252_v27 = vcombine.low %v119_v17, %v127_v18  ;;  %v2395_v15 = vcombine.high %v262_v8, %v270_v9  ;;  %v246_v17 = vld [vmem:[%s3306_s1 + $0x720] sm:$0xff] }
  0x6c   :  { %v2237_v29 = vcombine.high %v103_v24, %v111_v25  ;;  %v254_v18 = vld [vmem:[%s3306_s1 + $0x760] sm:$0xff] }
  0x6e   :  { %1664 = vmatpush2.bf16.msra.mxu0 %v2358_v32  ;;  %1705 = vmatpush2.bf16.msra.mxu1 %v2360_v33  ;;  %v87_v32 = vld [vmem:[%s3306_s1 + $0x228] sm:$0xff] }
  0x6f   :  { %1665 = vmatprep.subr.bf16.mxu0 %v2343_v34  ;;  %1706 = vmatprep.subr.bf16.mxu1 %v2345_v35  ;;  %v95_v33 = vld [vmem:[%s3306_s1 + $0x268] sm:$0xff]  ;;  %v2234_v34 = vcombine.low %v102_v22, %v110_v23  ;;  %v2236_v35 = vcombine.low %v103_v24, %v111_v25  ;;  %v2379_v22 = vcombine.high %v246_v17, %v254_v18  ;;  %v230_v24 = vld [vmem:[%s3306_s1 + $0x6a0] sm:$0xff] }
  0x70   :  { %v2221_v37 = vcombine.high %v87_v32, %v95_v33  ;;  %v238_v25 = vld [vmem:[%s3306_s1 + $0x6e0] sm:$0xff] }
  0x72   :  { %1666 = vmatpush2.bf16.msra.mxu0 %v2342_v40  ;;  %1707 = vmatpush2.bf16.msra.mxu1 %v2344_v41  ;;  %v71_v40 = vld [vmem:[%s3306_s1 + $0x1a8] sm:$0xff] }
  0x73   :  { %1667 = vmatprep.subr.bf16.mxu0 %v2327_v42  ;;  %1708 = vmatprep.subr.bf16.mxu1 %v2329_v43  ;;  %v79_v41 = vld [vmem:[%s3306_s1 + $0x1e8] sm:$0xff]  ;;  %v2218_v42 = vcombine.low %v86_v30, %v94_v31  ;;  %v2220_v43 = vcombine.low %v87_v32, %v95_v33  ;;  %v2363_v30 = vcombine.high %v230_v24, %v238_v25  ;;  %v214_v32 = vld [vmem:[%s3306_s1 + $0x620] sm:$0xff] }
  0x74   :  { %v2205_v45 = vcombine.high %v71_v40, %v79_v41  ;;  %v222_v33 = vld [vmem:[%s3306_s1 + $0x660] sm:$0xff] }
  0x76   :  { %1668 = vmatpush2.bf16.msra.mxu0 %v2326_v48  ;;  %1709 = vmatpush2.bf16.msra.mxu1 %v2328_v49  ;;  %v55_v48 = vld [vmem:[%s3306_s1 + $0x128] sm:$0xff] }
  0x77   :  { %1669 = vmatprep.subr.bf16.mxu0 %v2311_v50  ;;  %1710 = vmatprep.subr.bf16.mxu1 %v2313_v51  ;;  %v63_v49 = vld [vmem:[%s3306_s1 + $0x168] sm:$0xff]  ;;  %v2202_v50 = vcombine.low %v70_v38, %v78_v39  ;;  %v2204_v51 = vcombine.low %v71_v40, %v79_v41  ;;  %v2347_v38 = vcombine.high %v214_v32, %v222_v33  ;;  %v198_v40 = vld [vmem:[%s3306_s1 + $0x5a0] sm:$0xff] }
  0x78   :  { %v2189_v54 = vcombine.high %v55_v48, %v63_v49  ;;  %v206_v41 = vld [vmem:[%s3306_s1 + $0x5e0] sm:$0xff] }
  0x7a   :  { %1670 = vmatpush2.bf16.msra.mxu0 %v2310_v58  ;;  %1711 = vmatpush2.bf16.msra.mxu1 %v2312_v59  ;;  %v39_v58 = vld [vmem:[%s3306_s1 + $0xa8] sm:$0xff] }
  0x7b   :  { %1671 = vmatprep.subr.bf16.mxu0 %v2295_v60  ;;  %1712 = vmatprep.subr.bf16.mxu1 %v2297_v61  ;;  %v47_v59 = vld [vmem:[%s3306_s1 + $0xe8] sm:$0xff]  ;;  %v2186_v60 = vcombine.low %v54_v46, %v62_v47  ;;  %v2188_v61 = vcombine.low %v55_v48, %v63_v49  ;;  %v2331_v46 = vcombine.high %v198_v40, %v206_v41  ;;  %v182_v48 = vld [vmem:[%s3306_s1 + $0x520] sm:$0xff] }
  0x7c   :  { %v2173_v63 = vcombine.high %v39_v58, %v47_v59  ;;  %v190_v49 = vld [vmem:[%s3306_s1 + $0x560] sm:$0xff] }
  0x7e   :  { %1672 = vmatpush2.bf16.msra.mxu0 %v2294_v2  ;;  %1713 = vmatpush2.bf16.msra.mxu1 %v2296_v3  ;;  %v23_v2 = vld [vmem:[%s3306_s1 + $0x28] sm:$0xff] }
  0x7f   :  { %1673 = vmatprep.subr.bf16.mxu0 %v2279_v4  ;;  %1714 = vmatprep.subr.bf16.mxu1 %v2281_v5  ;;  %v31_v3 = vld [vmem:[%s3306_s1 + $0x68] sm:$0xff]  ;;  %v2170_v4 = vcombine.low %v38_v55, %v46_v56  ;;  %v2172_v5 = vcombine.low %v39_v58, %v47_v59  ;;  %v2315_v55 = vcombine.high %v182_v48, %v190_v49  ;;  %v166_v58 = vld [vmem:[%s3306_s1 + $0x4a0] sm:$0xff] }
  0x80   :  { %v2157_v7 = vcombine.high %v23_v2, %v31_v3  ;;  %v174_v59 = vld [vmem:[%s3306_s1 + $0x4e0] sm:$0xff] }
  0x82   :  { %1674 = vmatpush2.bf16.msra.mxu0 %v2278_v10  ;;  %1715 = vmatpush2.bf16.msra.mxu1 %v2280_v11  ;;  %v263_v10 = vld [vmem:[%s3306_s1 + $0x7a8] sm:$0xff] }
  0x83   :  { %1725 = vmatprep.subr.bf16.mxu0 %v2267_v13  ;;  %1766 = vmatprep.subr.bf16.mxu1 %v2269_v14  ;;  %v271_v11 = vld [vmem:[%s3306_s1 + $0x7e8] sm:$0xff]  ;;  %v2154_v13 = vcombine.low %v22_v0, %v30_v1  ;;  %v2156_v14 = vcombine.low %v23_v2, %v31_v3  ;;  %v2299_v0 = vcombine.high %v166_v58, %v174_v59  ;;  %v150_v2 = vld [vmem:[%s3306_s1 + $0x420] sm:$0xff] }
  0x84   :  { %v2397_v16 = vcombine.high %v263_v10, %v271_v11  ;;  %v158_v3 = vld [vmem:[%s3306_s1 + $0x460] sm:$0xff] }
  0x85   :  { %1676 = vmatmul.mubr.bf16.vlgmr.msra.gmra.mxu0 %v2674_v12  ;;  %1717 = vmatmul.mubr.bf16.vlgmr.msra.gmra.mxu1 %v2674_v12 }
  0x86   :  { %1726 = vmatpush1.bf16.msra.mxu0 %v2266_v53  ;;  %1767 = vmatpush1.bf16.msra.mxu1 %v2268_v19  ;;  %v247_v53 = vld [vmem:[%s3306_s1 + $0x728] sm:$0xff] }
  0x87   :  { %1727 = vmatprep.subr.bf16.mxu0 %v2251_v20  ;;  %1768 = vmatprep.subr.bf16.mxu1 %v2253_v21  ;;  %v255_v19 = vld [vmem:[%s3306_s1 + $0x768] sm:$0xff]  ;;  %v2394_v20 = vcombine.low %v262_v8, %v270_v9  ;;  %v2396_v21 = vcombine.low %v263_v10, %v271_v11  ;;  %v2283_v8 = vcombine.high %v150_v2, %v158_v3  ;;  %v136_v10 = vld [vmem:[%s3306_s1 + $0x3b0] sm:$0xff] }
  0x88   :  { %1757 = vmatprep.mubr.bf16.mxu0 %v2548_v57  ;;  %1798 = vmatprep.mubr.bf16.mxu1 %v2548_v57  ;;  %v2381_v23 = vcombine.high %v247_v53, %v255_v19  ;;  %v144_v11 = vld [vmem:[%s3306_s1 + $0x3f0] sm:$0xff] }
  0x8a   :  { %1728 = vmatpush1.bf16.msra.mxu0 %v2250_v26  ;;  %1769 = vmatpush1.bf16.msra.mxu1 %v2252_v27  ;;  %v231_v26 = vld [vmem:[%s3306_s1 + $0x6a8] sm:$0xff] }
  0x8b   :  { %1729 = vmatprep.subr.bf16.mxu0 %v2235_v28  ;;  %1770 = vmatprep.subr.bf16.mxu1 %v2237_v29  ;;  %v239_v27 = vld [vmem:[%s3306_s1 + $0x6e8] sm:$0xff]  ;;  %v2378_v28 = vcombine.low %v246_v17, %v254_v18  ;;  %v2380_v29 = vcombine.low %v247_v53, %v255_v19  ;;  %v2271_v17 = vcombine.high %v136_v10, %v144_v11  ;;  %v120_v53 = vld [vmem:[%s3306_s1 + $0x330] sm:$0xff] }
  0x8c   :  { %v2365_v31 = vcombine.high %v231_v26, %v239_v27  ;;  %v128_v19 = vld [vmem:[%s3306_s1 + $0x370] sm:$0xff] }
  0x8e   :  { %1730 = vmatpush1.bf16.msra.mxu0 %v2234_v34  ;;  %1771 = vmatpush1.bf16.msra.mxu1 %v2236_v35  ;;  %v215_v34 = vld [vmem:[%s3306_s1 + $0x628] sm:$0xff] }
  0x8f   :  { %1731 = vmatprep.subr.bf16.mxu0 %v2219_v36  ;;  %1772 = vmatprep.subr.bf16.mxu1 %v2221_v37  ;;  %v223_v35 = vld [vmem:[%s3306_s1 + $0x668] sm:$0xff]  ;;  %v2362_v36 = vcombine.low %v230_v24, %v238_v25  ;;  %v2364_v37 = vcombine.low %v231_v26, %v239_v27  ;;  %v2255_v24 = vcombine.high %v120_v53, %v128_v19  ;;  %v104_v26 = vld [vmem:[%s3306_s1 + $0x2b0] sm:$0xff] }
  0x90   :  { %v2349_v39 = vcombine.high %v215_v34, %v223_v35  ;;  %v112_v27 = vld [vmem:[%s3306_s1 + $0x2f0] sm:$0xff] }
  0x92   :  { %1732 = vmatpush1.bf16.msra.mxu0 %v2218_v42  ;;  %1773 = vmatpush1.bf16.msra.mxu1 %v2220_v43  ;;  %v199_v42 = vld [vmem:[%s3306_s1 + $0x5a8] sm:$0xff] }
  0x93   :  { %1733 = vmatprep.subr.bf16.mxu0 %v2203_v44  ;;  %1774 = vmatprep.subr.bf16.mxu1 %v2205_v45  ;;  %v207_v43 = vld [vmem:[%s3306_s1 + $0x5e8] sm:$0xff]  ;;  %v2346_v44 = vcombine.low %v214_v32, %v222_v33  ;;  %v2348_v45 = vcombine.low %v215_v34, %v223_v35  ;;  %v2239_v32 = vcombine.high %v104_v26, %v112_v27  ;;  %v88_v34 = vld [vmem:[%s3306_s1 + $0x230] sm:$0xff] }
  0x94   :  { %v2333_v47 = vcombine.high %v199_v42, %v207_v43  ;;  %v96_v35 = vld [vmem:[%s3306_s1 + $0x270] sm:$0xff] }
  0x96   :  { %1734 = vmatpush1.bf16.msra.mxu0 %v2202_v50  ;;  %1775 = vmatpush1.bf16.msra.mxu1 %v2204_v51  ;;  %v183_v50 = vld [vmem:[%s3306_s1 + $0x528] sm:$0xff] }
  0x97   :  { %1735 = vmatprep.subr.bf16.mxu0 %v2187_v52  ;;  %1776 = vmatprep.subr.bf16.mxu1 %v2189_v54  ;;  %v191_v51 = vld [vmem:[%s3306_s1 + $0x568] sm:$0xff]  ;;  %v2330_v52 = vcombine.low %v198_v40, %v206_v41  ;;  %v2332_v54 = vcombine.low %v199_v42, %v207_v43  ;;  %v2223_v40 = vcombine.high %v88_v34, %v96_v35  ;;  %v72_v42 = vld [vmem:[%s3306_s1 + $0x1b0] sm:$0xff] }
  0x98   :  { %v2317_v56 = vcombine.high %v183_v50, %v191_v51  ;;  %v80_v43 = vld [vmem:[%s3306_s1 + $0x1f0] sm:$0xff] }
  0x9a   :  { %1736 = vmatpush1.bf16.msra.mxu0 %v2186_v60  ;;  %1777 = vmatpush1.bf16.msra.mxu1 %v2188_v61  ;;  %v167_v60 = vld [vmem:[%s3306_s1 + $0x4a8] sm:$0xff] }
  0x9b   :  { %1737 = vmatprep.subr.bf16.mxu0 %v2171_v62  ;;  %1778 = vmatprep.subr.bf16.mxu1 %v2173_v63  ;;  %v175_v61 = vld [vmem:[%s3306_s1 + $0x4e8] sm:$0xff]  ;;  %v2314_v62 = vcombine.low %v182_v48, %v190_v49  ;;  %v2316_v63 = vcombine.low %v183_v50, %v191_v51  ;;  %v56_v49 = vld [vmem:[%s3306_s1 + $0x130] sm:$0xff]  ;;  %v57_v51 = vld [vmem:[%s3306_s1 + $0x138] sm:$0xff] }
  0x9c   :  { %v2301_v1 = vcombine.high %v167_v60, %v175_v61  ;;  %v64_v50 = vld [vmem:[%s3306_s1 + $0x170] sm:$0xff] }
  0x9e   :  { %1738 = vmatpush1.bf16.msra.mxu0 %v2170_v4  ;;  %1779 = vmatpush1.bf16.msra.mxu1 %v2172_v5  ;;  %v151_v4 = vld [vmem:[%s3306_s1 + $0x428] sm:$0xff] }
  0x9f   :  { %1739 = vmatprep.subr.bf16.mxu0 %v2155_v6  ;;  %1780 = vmatprep.subr.bf16.mxu1 %v2157_v7  ;;  %v159_v5 = vld [vmem:[%s3306_s1 + $0x468] sm:$0xff]  ;;  %v2298_v6 = vcombine.low %v166_v58, %v174_v59  ;;  %v2300_v7 = vcombine.low %v167_v60, %v175_v61  ;;  %v40_v59 = vld [vmem:[%s3306_s1 + $0xb0] sm:$0xff]  ;;  %v41_v61 = vld [vmem:[%s3306_s1 + $0xb8] sm:$0xff] }
  0xa0   :  { %v2285_v9 = vcombine.high %v151_v4, %v159_v5  ;;  %v48_v60 = vld [vmem:[%s3306_s1 + $0xf0] sm:$0xff] }
  0xa2   :  { %1740 = vmatpush1.bf16.msra.mxu0 %v2154_v13  ;;  %1781 = vmatpush1.bf16.msra.mxu1 %v2156_v14  ;;  %v137_v13 = vld [vmem:[%s3306_s1 + $0x3b8] sm:$0xff] }
  0xa3   :  { %1741 = vmatprep.subr.bf16.mxu0 %v2395_v15  ;;  %1782 = vmatprep.subr.bf16.mxu1 %v2397_v16  ;;  %v145_v14 = vld [vmem:[%s3306_s1 + $0x3f8] sm:$0xff]  ;;  %v2282_v15 = vcombine.low %v150_v2, %v158_v3  ;;  %v2284_v16 = vcombine.low %v151_v4, %v159_v5  ;;  %v24_v3 = vld [vmem:[%s3306_s1 + $0x30] sm:$0xff] }
  0xa4   :  { %v2273_v18 = vcombine.high %v137_v13, %v145_v14  ;;  %v32_v4 = vld [vmem:[%s3306_s1 + $0x70] sm:$0xff]  ;;  %v25_v5 = vld [vmem:[%s3306_s1 + $0x38] sm:$0xff] }
  0xa6   :  { %1742 = vmatpush2.bf16.msra.mxu0 %v2394_v20  ;;  %1783 = vmatpush2.bf16.msra.mxu1 %v2396_v21  ;;  %v121_v20 = vld [vmem:[%s3306_s1 + $0x338] sm:$0xff] }
  0xa7   :  { %1743 = vmatprep.subr.bf16.mxu0 %v2379_v22  ;;  %1784 = vmatprep.subr.bf16.mxu1 %v2381_v23  ;;  %v129_v21 = vld [vmem:[%s3306_s1 + $0x378] sm:$0xff]  ;;  %v2270_v22 = vcombine.low %v136_v10, %v144_v11  ;;  %v2272_v23 = vcombine.low %v137_v13, %v145_v14  ;;  %v264_v11 = vld [vmem:[%s3306_s1 + $0x7b0] sm:$0xff] }
  0xa8   :  { %v2257_v25 = vcombine.high %v121_v20, %v129_v21  ;;  %v272_v13 = vld [vmem:[%s3306_s1 + $0x7f0] sm:$0xff]  ;;  %v265_v14 = vld [vmem:[%s3306_s1 + $0x7b8] sm:$0xff] }
  0xaa   :  { %1744 = vmatpush2.bf16.msra.mxu0 %v2378_v28  ;;  %1785 = vmatpush2.bf16.msra.mxu1 %v2380_v29  ;;  %v105_v28 = vld [vmem:[%s3306_s1 + $0x2b8] sm:$0xff] }
  0xab   :  { %1745 = vmatprep.subr.bf16.mxu0 %v2363_v30  ;;  %1786 = vmatprep.subr.bf16.mxu1 %v2365_v31  ;;  %v113_v29 = vld [vmem:[%s3306_s1 + $0x2f8] sm:$0xff]  ;;  %v2254_v30 = vcombine.low %v120_v53, %v128_v19  ;;  %v2256_v31 = vcombine.low %v121_v20, %v129_v21  ;;  %v248_v19 = vld [vmem:[%s3306_s1 + $0x730] sm:$0xff] }
  0xac   :  { %v2241_v33 = vcombine.high %v105_v28, %v113_v29  ;;  %v256_v20 = vld [vmem:[%s3306_s1 + $0x770] sm:$0xff]  ;;  %v249_v21 = vld [vmem:[%s3306_s1 + $0x738] sm:$0xff] }
  0xae   :  { %1746 = vmatpush2.bf16.msra.mxu0 %v2362_v36  ;;  %1787 = vmatpush2.bf16.msra.mxu1 %v2364_v37  ;;  %v89_v36 = vld [vmem:[%s3306_s1 + $0x238] sm:$0xff] }
  0xaf   :  { %1747 = vmatprep.subr.bf16.mxu0 %v2347_v38  ;;  %1788 = vmatprep.subr.bf16.mxu1 %v2349_v39  ;;  %v97_v37 = vld [vmem:[%s3306_s1 + $0x278] sm:$0xff]  ;;  %v2238_v38 = vcombine.low %v104_v26, %v112_v27  ;;  %v2240_v39 = vcombine.low %v105_v28, %v113_v29  ;;  %v232_v27 = vld [vmem:[%s3306_s1 + $0x6b0] sm:$0xff] }
  0xb0   :  { %v2225_v41 = vcombine.high %v89_v36, %v97_v37  ;;  %v240_v28 = vld [vmem:[%s3306_s1 + $0x6f0] sm:$0xff]  ;;  %v233_v29 = vld [vmem:[%s3306_s1 + $0x6b8] sm:$0xff] }
  0xb2   :  { %1748 = vmatpush2.bf16.msra.mxu0 %v2346_v44  ;;  %1789 = vmatpush2.bf16.msra.mxu1 %v2348_v45  ;;  %v81_v44 = vld [vmem:[%s3306_s1 + $0x1f8] sm:$0xff]  ;;  %v2222_v45 = vcombine.low %v88_v34, %v96_v35  ;;  %v216_v35 = vld [vmem:[%s3306_s1 + $0x630] sm:$0xff] }
  0xb3   :  { %1749 = vmatprep.subr.bf16.mxu0 %v2331_v46  ;;  %1790 = vmatprep.subr.bf16.mxu1 %v2333_v47  ;;  %v2224_v46 = vcombine.low %v89_v36, %v97_v37  ;;  %v2207_v47 = vcombine.high %v72_v42, %v80_v43  ;;  %v224_v36 = vld [vmem:[%s3306_s1 + $0x670] sm:$0xff]  ;;  %v217_v37 = vld [vmem:[%s3306_s1 + $0x638] sm:$0xff] }
  0xb6   :  { %1750 = vmatpush2.bf16.msra.mxu0 %v2330_v52  ;;  %1791 = vmatpush2.bf16.msra.mxu1 %v2332_v54  ;;  %v65_v52 = vld [vmem:[%s3306_s1 + $0x178] sm:$0xff]  ;;  %v2206_v54 = vcombine.low %v72_v42, %v80_v43  ;;  %v200_v43 = vld [vmem:[%s3306_s1 + $0x5b0] sm:$0xff] }
  0xb7   :  { %1751 = vmatprep.subr.bf16.mxu0 %v2315_v55  ;;  %1792 = vmatprep.subr.bf16.mxu1 %v2317_v56  ;;  %v2191_v56 = vcombine.high %v56_v49, %v64_v50  ;;  %v2193_v58 = vcombine.high %v57_v51, %v65_v52 }
  0xba   :  { %1752 = vmatpush2.bf16.msra.mxu0 %v2314_v62  ;;  %1793 = vmatpush2.bf16.msra.mxu1 %v2316_v63  ;;  %v49_v62 = vld [vmem:[%s3306_s1 + $0xf8] sm:$0xff]  ;;  %v2190_v63 = vcombine.low %v56_v49, %v64_v50  ;;  %v184_v50 = vld [vmem:[%s3306_s1 + $0x530] sm:$0xff] }
  0xbb   :  { %1753 = vmatprep.subr.bf16.mxu0 %v2299_v0  ;;  %1794 = vmatprep.subr.bf16.mxu1 %v2301_v1  ;;  %v2192_v0 = vcombine.low %v57_v51, %v65_v52  ;;  %v2175_v1 = vcombine.high %v40_v59, %v48_v60  ;;  %v2177_v2 = vcombine.high %v41_v61, %v49_v62  ;;  %v192_v51 = vld [vmem:[%s3306_s1 + $0x570] sm:$0xff]  ;;  %v185_v52 = vld [vmem:[%s3306_s1 + $0x538] sm:$0xff] }
  0xbe   :  { %1754 = vmatpush2.bf16.msra.mxu0 %v2298_v6  ;;  %1795 = vmatpush2.bf16.msra.mxu1 %v2300_v7  ;;  %v33_v6 = vld [vmem:[%s3306_s1 + $0x78] sm:$0xff]  ;;  %v2174_v7 = vcombine.low %v40_v59, %v48_v60  ;;  %v168_v60 = vld [vmem:[%s3306_s1 + $0x4b0] sm:$0xff] }
  0xbf   :  { %1755 = vmatprep.subr.bf16.mxu0 %v2283_v8  ;;  %1796 = vmatprep.subr.bf16.mxu1 %v2285_v9  ;;  %v2176_v8 = vcombine.low %v41_v61, %v49_v62  ;;  %v2159_v9 = vcombine.high %v24_v3, %v32_v4  ;;  %v2161_v10 = vcombine.high %v25_v5, %v33_v6  ;;  %v176_v61 = vld [vmem:[%s3306_s1 + $0x4f0] sm:$0xff]  ;;  %v169_v62 = vld [vmem:[%s3306_s1 + $0x4b8] sm:$0xff] }
  0xc2   :  { %1756 = vmatpush2.bf16.msra.mxu0 %v2282_v15  ;;  %1797 = vmatpush2.bf16.msra.mxu1 %v2284_v16  ;;  %v273_v15 = vld [vmem:[%s3306_s1 + $0x7f8] sm:$0xff]  ;;  %v2158_v16 = vcombine.low %v24_v3, %v32_v4  ;;  %v152_v4 = vld [vmem:[%s3306_s1 + $0x430] sm:$0xff] }
  0xc3   :  { %1807 = vmatprep.subr.bf16.mxu0 %v2271_v17  ;;  %1848 = vmatprep.subr.bf16.mxu1 %v2273_v18  ;;  %v2160_v17 = vcombine.low %v25_v5, %v33_v6  ;;  %v2399_v18 = vcombine.high %v264_v11, %v272_v13  ;;  %v2401_v53 = vcombine.high %v265_v14, %v273_v15  ;;  %v160_v5 = vld [vmem:[%s3306_s1 + $0x470] sm:$0xff]  ;;  %v153_v6 = vld [vmem:[%s3306_s1 + $0x438] sm:$0xff] }
  0xc5   :  { %1758 = vmatmul.mubr.bf16.vlgmr.msra.gmra.mxu0 %v2674_v12  ;;  %1799 = vmatmul.mubr.bf16.vlgmr.msra.gmra.mxu1 %v2674_v12 }
  0xc6   :  { %1808 = vmatpush1.bf16.msra.mxu0 %v2270_v22  ;;  %1849 = vmatpush1.bf16.msra.mxu1 %v2272_v23  ;;  %v257_v22 = vld [vmem:[%s3306_s1 + $0x778] sm:$0xff]  ;;  %v2398_v23 = vcombine.low %v264_v11, %v272_v13  ;;  %v2286_v13 = vcombine.low %v152_v4, %v160_v5 }
  0xc7   :  { %1809 = vmatprep.subr.bf16.mxu0 %v2255_v24  ;;  %1850 = vmatprep.subr.bf16.mxu1 %v2257_v25  ;;  %v2400_v24 = vcombine.low %v265_v14, %v273_v15  ;;  %v2383_v25 = vcombine.high %v248_v19, %v256_v20  ;;  %v2385_v26 = vcombine.high %v249_v21, %v257_v22 }
  0xc8   :  { %1839 = vmatprep.mubr.bf16.mxu0 %v2548_v57  ;;  %1880 = vmatprep.mubr.bf16.mxu1 %v2548_v57  ;;  %v73_v57 = vld [vmem:[%s3306_s1 + $0x1b8] sm:$0xff] }
  0xc9   :  { %v2209_v48 = vcombine.high %v73_v57, %v81_v44  ;;  %v2208_v55 = vcombine.low %v73_v57, %v81_v44  ;;  %v208_v57 = vld [vmem:[%s3306_s1 + $0x5f0] sm:$0xff]  ;;  %v201_v44 = vld [vmem:[%s3306_s1 + $0x5b8] sm:$0xff] }
  0xca   :  { %1810 = vmatpush1.bf16.msra.mxu0 %v2254_v30  ;;  %1851 = vmatpush1.bf16.msra.mxu1 %v2256_v31  ;;  %v241_v30 = vld [vmem:[%s3306_s1 + $0x6f8] sm:$0xff]  ;;  %v2382_v31 = vcombine.low %v248_v19, %v256_v20 }
  0xcb   :  { %1811 = vmatprep.subr.bf16.mxu0 %v2239_v32  ;;  %1852 = vmatprep.subr.bf16.mxu1 %v2241_v33  ;;  %v2384_v32 = vcombine.low %v249_v21, %v257_v22  ;;  %v2367_v33 = vcombine.high %v232_v27, %v240_v28  ;;  %v2369_v34 = vcombine.high %v233_v29, %v241_v30 }
  0xce   :  { %1812 = vmatpush1.bf16.msra.mxu0 %v2238_v38  ;;  %1853 = vmatpush1.bf16.msra.mxu1 %v2240_v39  ;;  %v225_v38 = vld [vmem:[%s3306_s1 + $0x678] sm:$0xff]  ;;  %v2366_v39 = vcombine.low %v232_v27, %v240_v28 }
  0xcf   :  { %1813 = vmatprep.subr.bf16.mxu0 %v2223_v40  ;;  %1854 = vmatprep.subr.bf16.mxu1 %v2225_v41  ;;  %v2368_v40 = vcombine.low %v233_v29, %v241_v30  ;;  %v2351_v41 = vcombine.high %v216_v35, %v224_v36  ;;  %v2353_v42 = vcombine.high %v217_v37, %v225_v38 }
  0xd2   :  { %1814 = vmatpush1.bf16.msra.mxu0 %v2222_v45  ;;  %1855 = vmatpush1.bf16.msra.mxu1 %v2224_v46  ;;  %v209_v45 = vld [vmem:[%s3306_s1 + $0x5f8] sm:$0xff]  ;;  %v2350_v46 = vcombine.low %v216_v35, %v224_v36 }
  0xd3   :  { %1815 = vmatprep.subr.bf16.mxu0 %v2207_v47  ;;  %1856 = vmatprep.subr.bf16.mxu1 %v2209_v48  ;;  %v2352_v47 = vcombine.low %v217_v37, %v225_v38  ;;  %v2335_v48 = vcombine.high %v200_v43, %v208_v57  ;;  %v2337_v49 = vcombine.high %v201_v44, %v209_v45 }
  0xd6   :  { %1816 = vmatpush1.bf16.msra.mxu0 %v2206_v54  ;;  %1857 = vmatpush1.bf16.msra.mxu1 %v2208_v55  ;;  %v193_v54 = vld [vmem:[%s3306_s1 + $0x578] sm:$0xff]  ;;  %v2334_v55 = vcombine.low %v200_v43, %v208_v57 }
  0xd7   :  { %1817 = vmatprep.subr.bf16.mxu0 %v2191_v56  ;;  %1858 = vmatprep.subr.bf16.mxu1 %v2193_v58  ;;  %v2336_v56 = vcombine.low %v201_v44, %v209_v45  ;;  %v2319_v58 = vcombine.high %v184_v50, %v192_v51  ;;  %v2321_v59 = vcombine.high %v185_v52, %v193_v54 }
  0xda   :  { %1818 = vmatpush1.bf16.msra.mxu0 %v2190_v63  ;;  %1859 = vmatpush1.bf16.msra.mxu1 %v2192_v0  ;;  %v177_v63 = vld [vmem:[%s3306_s1 + $0x4f8] sm:$0xff]  ;;  %v2318_v0 = vcombine.low %v184_v50, %v192_v51 }
  0xdb   :  { %1819 = vmatprep.subr.bf16.mxu0 %v2175_v1  ;;  %1860 = vmatprep.subr.bf16.mxu1 %v2177_v2  ;;  %v2320_v1 = vcombine.low %v185_v52, %v193_v54  ;;  %v2303_v2 = vcombine.high %v168_v60, %v176_v61  ;;  %v2305_v3 = vcombine.high %v169_v62, %v177_v63 }
  0xde   :  { %1820 = vmatpush1.bf16.msra.mxu0 %v2174_v7  ;;  %1861 = vmatpush1.bf16.msra.mxu1 %v2176_v8  ;;  %v161_v7 = vld [vmem:[%s3306_s1 + $0x478] sm:$0xff]  ;;  %v2302_v8 = vcombine.low %v168_v60, %v176_v61  ;;  %v2425_v61 = vmov 0  }
  0xdf   :  { %1821 = vmatprep.subr.bf16.mxu0 %v2159_v9  ;;  %1862 = vmatprep.subr.bf16.mxu1 %v2161_v10  ;;  %v2304_v9 = vcombine.low %v169_v62, %v177_v63  ;;  %v2287_v10 = vcombine.high %v152_v4, %v160_v5  ;;  %v2289_v11 = vcombine.high %v153_v6, %v161_v7  ;;  %v1976_v62 = vld [vmem:[%s3308_s2] sm:$0xff] }
  0xe0   :  { %v2288_v14 = vcombine.low %v153_v6, %v161_v7  ;;  %2419 = vset.pattern.permute.xlu1 %v2425_v61  ;;  %2420 = vset.pattern.permute.xlu0 %v2425_v61  ;;  %v1998_v63 = vld [vmem:[%s3309_s3] sm:$0xff] }
  0xe1   :  { %1979 = vperm.xlu1 %2419, %v1976_v62  }
  0xe2   :  { %1822 = vmatpush1.bf16.msra.mxu0 %v2158_v16  ;;  %1863 = vmatpush1.bf16.msra.mxu1 %v2160_v17 }
  0xe3   :  { %1823 = vmatprep.subr.bf16.mxu0 %v2399_v18  ;;  %1864 = vmatprep.subr.bf16.mxu1 %v2401_v53 }
  0xe5   :  { %2001 = vperm.xlu1 %2419, %v1998_v63  }
  0xe6   :  { %1824 = vmatpush2.bf16.msra.mxu0 %v2398_v23  ;;  %1865 = vmatpush2.bf16.msra.mxu1 %v2400_v24 }
  0xe7   :  { %1825 = vmatprep.subr.bf16.mxu0 %v2383_v25  ;;  %1866 = vmatprep.subr.bf16.mxu1 %v2385_v26 }
  0xea   :  { %1826 = vmatpush2.bf16.msra.mxu0 %v2382_v31  ;;  %1867 = vmatpush2.bf16.msra.mxu1 %v2384_v32 }
  0xeb   :  { %1827 = vmatprep.subr.bf16.mxu0 %v2367_v33  ;;  %1868 = vmatprep.subr.bf16.mxu1 %v2369_v34 }
  0xee   :  { %1828 = vmatpush2.bf16.msra.mxu0 %v2366_v39  ;;  %1869 = vmatpush2.bf16.msra.mxu1 %v2368_v40 }
  0xef   :  { %1829 = vmatprep.subr.bf16.mxu0 %v2351_v41  ;;  %1870 = vmatprep.subr.bf16.mxu1 %v2353_v42 }
  0xf2   :  { %1830 = vmatpush2.bf16.msra.mxu0 %v2350_v46  ;;  %1871 = vmatpush2.bf16.msra.mxu1 %v2352_v47 }
  0xf3   :  { %1831 = vmatprep.subr.bf16.mxu0 %v2335_v48  ;;  %1872 = vmatprep.subr.bf16.mxu1 %v2337_v49 }
  0xf6   :  { %1832 = vmatpush2.bf16.msra.mxu0 %v2334_v55  ;;  %1873 = vmatpush2.bf16.msra.mxu1 %v2336_v56 }
  0xf7   :  { %1833 = vmatprep.subr.bf16.mxu0 %v2319_v58  ;;  %1874 = vmatprep.subr.bf16.mxu1 %v2321_v59 }
  0xfa   :  { %1834 = vmatpush2.bf16.msra.mxu0 %v2318_v0  ;;  %1875 = vmatpush2.bf16.msra.mxu1 %v2320_v1 }
  0xfb   :  { %1835 = vmatprep.subr.bf16.mxu0 %v2303_v2  ;;  %1876 = vmatprep.subr.bf16.mxu1 %v2305_v3 }
  0xfe   :  { %1836 = vmatpush2.bf16.msra.mxu0 %v2302_v8  ;;  %1877 = vmatpush2.bf16.msra.mxu1 %v2304_v9 }
  0xff   :  { %1837 = vmatprep.subr.bf16.mxu0 %v2287_v10  ;;  %1878 = vmatprep.subr.bf16.mxu1 %v2289_v11 }
 0x102   :  { %1838 = vmatpush2.bf16.msra.mxu0 %v2286_v13  ;;  %1879 = vmatpush2.bf16.msra.mxu1 %v2288_v14 }
 0x105   :  { %v1595_v15 = vpop.f32.mrf.mxu0  ;;  %1840 = vmatmul.mubr.bf16.vlgmr.msra.gmra.mxu0 %v2674_v12  ;;  %v1636_v16 = vpop.f32.mrf.mxu1  ;;  %1881 = vmatmul.mubr.bf16.vlgmr.msra.gmra.mxu1 %v2674_v12 }
 0x107   :  { %v1597_v17 = vpop.f32.mrf.mxu0  ;;  %v1638_v18 = vpop.f32.mrf.mxu1 }
 0x108   :  { %v1889_v37 = vadd.f32 %v1597_v17, %v1595_v15 }
 0x109   :  { %v1599_v53 = vpop.f32.mrf.mxu0  ;;  %v1640_v19 = vpop.f32.mrf.mxu1 }
 0x10a   :  { %v1890_v38 = vadd.f32 %v1889_v37, %v1636_v16 }
 0x10b   :  { %v1600_v20 = vpop.f32.mrf.mxu0  ;;  %v1641_v21 = vpop.f32.mrf.mxu1 }
 0x10c   :  { %v1891_v39 = vadd.f32 %v1890_v38, %v1638_v18 }
 0x145   :  { %v1677_v22 = vpop.f32.mrf.mxu0  ;;  %v1718_v23 = vpop.f32.mrf.mxu1 }
 0x146   :  { %v1892_v40 = vadd.f32 %v1891_v39, %v1677_v22 }
 0x147   :  { %v1679_v24 = vpop.f32.mrf.mxu0  ;;  %v3248_v25 = vpop.f32.mrf.mxu1 }
 0x148   :  { %v1893_v41 = vadd.f32 %v1892_v40, %v1679_v24 }
 0x149   :  { %v1681_v26 = vpop.f32.mrf.mxu0  ;;  %v1722_v27 = vpop.f32.mrf.mxu1 }
 0x14a   :  { %v1894_v42 = vadd.f32 %v1893_v41, %v1718_v23 }
 0x14b   :  { %v1682_v28 = vpop.f32.mrf.mxu0  ;;  %v1723_v29 = vpop.f32.mrf.mxu1 }
 0x14c   :  { %v1895_v43 = vadd.f32 %v1894_v42, %v3248_v25 }
 0x185   :  { %v1759_v30 = vpop.f32.mrf.mxu0  ;;  %v3250_v31 = vpop.f32.mrf.mxu1 }
 0x186   :  { %v1896_v57 = vadd.f32 %v1895_v43, %v1759_v30 }
 0x187   :  { %v1761_v32 = vpop.f32.mrf.mxu0  ;;  %v3252_v12 = vpop.f32.mrf.mxu1 }
 0x188   :  { %v1897_v44 = vadd.f32 %v1896_v57, %v1761_v32 }
 0x189   :  { %v1763_v33 = vpop.f32.mrf.mxu0  ;;  %v1804_v34 = vpop.f32.mrf.mxu1 }
 0x18a   :  { %v1898_v45 = vadd.f32 %v1897_v44, %v3250_v31 }
 0x18b   :  { %v1764_v35 = vpop.f32.mrf.mxu0  ;;  %v1805_v36 = vpop.f32.mrf.mxu1 }
 0x18c   :  { %v1899_v46 = vadd.f32 %v1898_v45, %v3252_v12 }
 0x1c5   :  { %v1841_v47 = vpop.f32.mrf.mxu0  ;;  %v1882_v49 = vpop.f32.mrf.mxu1 }
 0x1c6   :  { %v1900_v48 = vadd.f32 %v1899_v46, %v1841_v47 }
 0x1c7   :  { %v1843_v50 = vpop.f32.mrf.mxu0  ;;  %v1884_v52 = vpop.f32.mrf.mxu1 }
 0x1c8   :  { %v1901_v51 = vadd.f32 %v1900_v48, %v1843_v50 }
 0x1c9   :  { %v1845_v54 = vpop.f32.mrf.mxu0  ;;  %v1886_v55 = vpop.f32.mrf.mxu1 }
 0x1ca   :  { %v1902_v56 = vadd.f32 %v1901_v51, %v1882_v49 }
 0x1cb   :  { %v1846_v58 = vpop.f32.mrf.mxu0  ;;  %v1887_v59 = vpop.f32.mrf.mxu1 }
 0x1cc   :  { %v1903_v60 = vadd.f32 %v1902_v56, %v1884_v52  ;;  %v1980_v58 = vpop.permute.xlu1 %1979 }
 0x1ce   :  { %1904 = vadd.xlane.f32.xlu0 %v1903_v60 }
 0x257   :  { %v1905_v0 = vpop.xlane.xlu0 %1904 }
 0x258   :  { %v1907_v1 = vmul.f32 0.00048828125, %v1905_v0 }
 0x25a   :  { %v1908_v2 = vsub.f32 %v1595_v15, %v1907_v1  ;;  %v1909_v3 = vsub.f32 %v1597_v17, %v1907_v1  ;;  %v1910_v4 = vsub.f32 %v1636_v16, %v1907_v1  ;;  %v1911_v7 = vsub.f32 %v1638_v18, %v1907_v1 }
 0x25b   :  { %v1912_v8 = vsub.f32 %v1677_v22, %v1907_v1  ;;  %v1913_v11 = vsub.f32 %v1679_v24, %v1907_v1  ;;  %v1914_v53 = vsub.f32 %v1718_v23, %v1907_v1  ;;  %v1915_v21 = vsub.f32 %v3248_v25, %v1907_v1 }
 0x25c   :  { %v1924_v5 = vmul.f32 %v1908_v2, %v1908_v2  ;;  %v1925_v6 = vmul.f32 %v1909_v3, %v1909_v3  ;;  %v1926_v9 = vmul.f32 %v1910_v4, %v1910_v4  ;;  %v1927_v13 = vmul.f32 %v1911_v7, %v1911_v7 }
 0x25d   :  { %v1928_v19 = vmul.f32 %v1912_v8, %v1912_v8  ;;  %v1929_v26 = vmul.f32 %v1913_v11, %v1913_v11  ;;  %v1916_v28 = vsub.f32 %v1759_v30, %v1907_v1  ;;  %v1930_v15 = vmul.f32 %v1914_v53, %v1914_v53 }
 0x25e   :  { %v1940_v10 = vadd.f32 %v1925_v6, %v1924_v5  ;;  %v1917_v16 = vsub.f32 %v1761_v32, %v1907_v1  ;;  %v1931_v29 = vmul.f32 %v1915_v21, %v1915_v21  ;;  %v1918_v18 = vsub.f32 %v3250_v31, %v1907_v1 }
 0x25f   :  { %v1932_v22 = vmul.f32 %v1916_v28, %v1916_v28  ;;  %v1919_v24 = vsub.f32 %v3252_v12, %v1907_v1  ;;  %v1920_v36 = vsub.f32 %v1841_v47, %v1907_v1  ;;  %v1921_v25 = vsub.f32 %v1843_v50, %v1907_v1 }
 0x260   :  { %v1941_v14 = vadd.f32 %v1940_v10, %v1926_v9  ;;  %v1933_v35 = vmul.f32 %v1917_v16, %v1917_v16  ;;  %v1934_v37 = vmul.f32 %v1918_v18, %v1918_v18  ;;  %v1922_v30 = vsub.f32 %v1882_v49, %v1907_v1 }
 0x261   :  { %v1935_v39 = vmul.f32 %v1919_v24, %v1919_v24  ;;  %v1936_v41 = vmul.f32 %v1920_v36, %v1920_v36  ;;  %v1923_v32 = vsub.f32 %v1884_v52, %v1907_v1  ;;  %v1937_v43 = vmul.f32 %v1921_v25, %v1921_v25 }
 0x262   :  { %v1942_v20 = vadd.f32 %v1941_v14, %v1927_v13  ;;  %v1938_v44 = vmul.f32 %v1922_v30, %v1922_v30 }
 0x263   :  { %v1939_v45 = vmul.f32 %v1923_v32, %v1923_v32 }
 0x264   :  { %v1943_v27 = vadd.f32 %v1942_v20, %v1928_v19 }
 0x266   :  { %v1944_v17 = vadd.f32 %v1943_v27, %v1929_v26  ;;  %v2002_v26 = vpop.permute.xlu1 %2001 }
 0x268   :  { %v1945_v33 = vadd.f32 %v1944_v17, %v1930_v15 }
 0x26a   :  { %v1946_v34 = vadd.f32 %v1945_v33, %v1931_v29 }
 0x26c   :  { %v1947_v23 = vadd.f32 %v1946_v34, %v1932_v22 }
 0x26e   :  { %v1948_v38 = vadd.f32 %v1947_v23, %v1933_v35 }
 0x270   :  { %v1949_v40 = vadd.f32 %v1948_v38, %v1934_v37 }
 0x272   :  { %v1950_v42 = vadd.f32 %v1949_v40, %v1935_v39 }
 0x274   :  { %v1951_v57 = vadd.f32 %v1950_v42, %v1936_v41 }
 0x276   :  { %v1952_v31 = vadd.f32 %v1951_v57, %v1937_v43 }
 0x278   :  { %v1953_v46 = vadd.f32 %v1952_v31, %v1938_v44 }
 0x27a   :  { %v1954_v48 = vadd.f32 %v1953_v46, %v1939_v45 }
 0x27c   :  { %1955 = vadd.xlane.f32.xlu0 %v1954_v48 }
 0x305   :  { %v1956_v12 = vpop.xlane.xlu0 %1955 }
 0x306   :  { %v1957_v51 = vmul.f32 0.00048828125, %v1956_v12 }
 0x308   :  { %v1958_v47 = vadd.f32 1e-05, %v1957_v51 }
 0x30a   :  { %2423 = vrsqrt.f32 %v1958_v47 }
 0x317   :  { %v2424_v54 = vpop.eup %2423 }
 0x318   :  { %v1960_v50 = vmul.f32 %v2424_v54, %v1908_v2  ;;  %v1961_v55 = vmul.f32 %v2424_v54, %v1909_v3  ;;  %v1962_v56 = vmul.f32 %v2424_v54, %v1910_v4  ;;  %v1963_v49 = vmul.f32 %v2424_v54, %v1911_v7 }
 0x319   :  { %v1964_v59 = vmul.f32 %v2424_v54, %v1912_v8  ;;  %v1965_v52 = vmul.f32 %v2424_v54, %v1913_v11  ;;  %v1966_v60 = vmul.f32 %v2424_v54, %v1914_v53  ;;  %v1967_v61 = vmul.f32 %v2424_v54, %v1915_v21 }
 0x31a   :  { %v1968_v62 = vmul.f32 %v2424_v54, %v1916_v28  ;;  %v1969_v63 = vmul.f32 %v2424_v54, %v1917_v16  ;;  %v1970_v0 = vmul.f32 %v2424_v54, %v1918_v18  ;;  %v1971_v1 = vmul.f32 %v2424_v54, %v1919_v24 }
 0x31b   :  { %v1972_v5 = vmul.f32 %v2424_v54, %v1920_v36  ;;  %v1973_v6 = vmul.f32 %v2424_v54, %v1921_v25  ;;  %v1974_v9 = vmul.f32 %v2424_v54, %v1922_v30  ;;  %v1975_v10 = vmul.f32 %v2424_v54, %v1923_v32 }
 0x31c   :  { %v1982_v13 = vmul.f32 %v1980_v58, %v1960_v50  ;;  %v1983_v14 = vmul.f32 %v1980_v58, %v1961_v55  ;;  %v1984_v19 = vmul.f32 %v1980_v58, %v1962_v56  ;;  %v1985_v2 = vmul.f32 %v1980_v58, %v1963_v49 }
 0x31d   :  { %v1986_v3 = vmul.f32 %v1980_v58, %v1964_v59  ;;  %v1987_v4 = vmul.f32 %v1980_v58, %v1965_v52  ;;  %v1988_v7 = vmul.f32 %v1980_v58, %v1966_v60  ;;  %v1989_v20 = vmul.f32 %v1980_v58, %v1967_v61 }
 0x31e   :  { %v1990_v8 = vmul.f32 %v1980_v58, %v1968_v62  ;;  %v1991_v11 = vmul.f32 %v1980_v58, %v1969_v63  ;;  %v1992_v53 = vmul.f32 %v1980_v58, %v1970_v0  ;;  %v1993_v21 = vmul.f32 %v1980_v58, %v1971_v1 }
 0x31f   :  { %v1994_v27 = vmul.f32 %v1980_v58, %v1972_v5  ;;  %v1995_v28 = vmul.f32 %v1980_v58, %v1973_v6  ;;  %v1996_v15 = vmul.f32 %v1980_v58, %v1974_v9  ;;  %v1997_v17 = vmul.f32 %v1980_v58, %v1975_v10 }
 0x320   :  { %v2004_v16 = vadd.f32 %v2002_v26, %v1982_v13  ;;  %v2005_v29 = vadd.f32 %v2002_v26, %v1983_v14  ;;  %v2006_v33 = vadd.f32 %v2002_v26, %v1984_v19  ;;  %v2007_v18 = vadd.f32 %v2002_v26, %v1985_v2 }
 0x321   :  { %v2008_v22 = vadd.f32 %v2002_v26, %v1986_v3  ;;  %v2009_v34 = vadd.f32 %v2002_v26, %v1987_v4  ;;  %v2010_v24 = vadd.f32 %v2002_v26, %v1988_v7  ;;  %v2011_v35 = vadd.f32 %v2002_v26, %v1989_v20 }
 0x322   :  { %v2012_v23 = vadd.f32 %v2002_v26, %v1990_v8  ;;  %v2013_v36 = vadd.f32 %v2002_v26, %v1991_v11  ;;  %v2014_v37 = vadd.f32 %v2002_v26, %v1992_v53  ;;  %v2015_v38 = vadd.f32 %v2002_v26, %v1993_v21 }
 0x323   :  { %v2016_v25 = vadd.f32 %v2002_v26, %v1994_v27  ;;  %v2017_v39 = vadd.f32 %v2002_v26, %v1995_v28  ;;  %v2018_v40 = vadd.f32 %v2002_v26, %v1996_v15  ;;  %v2019_v30 = vadd.f32 %v2002_v26, %v1997_v17 }
 0x324   :  { %vm2020_vm0 = vcmp.gt.f32.partialorder %v2004_v16, 0.0  ;;  %vm2021_vm1 = vcmp.gt.f32.partialorder %v2005_v29, 0.0  ;;  %vm2022_vm2 = vcmp.gt.f32.partialorder %v2006_v33, 0.0  ;;  %vm2023_vm3 = vcmp.gt.f32.partialorder %v2007_v18, 0.0 }
 0x325   :  { %vm2024_vm4 = vcmp.gt.f32.partialorder %v2008_v22, 0.0  ;;  %vm2025_vm5 = vcmp.gt.f32.partialorder %v2009_v34, 0.0  ;;  %vm2026_vm6 = vcmp.gt.f32.partialorder %v2010_v24, 0.0  ;;  %vm2027_vm7 = vcmp.gt.f32.partialorder %v2011_v35, 0.0 }
 0x326   :  { %vm2028_vm8 = vcmp.gt.f32.partialorder %v2012_v23, 0.0  ;;  %vm2029_vm9 = vcmp.gt.f32.partialorder %v2013_v36, 0.0  ;;  %vm2030_vm10 = vcmp.gt.f32.partialorder %v2014_v37, 0.0  ;;  %vm2031_vm11 = vcmp.gt.f32.partialorder %v2015_v38, 0.0 }
 0x327   :  { %vm2032_vm12 = vcmp.gt.f32.partialorder %v2016_v25, 0.0  ;;  %vm2033_vm13 = vcmp.gt.f32.partialorder %v2017_v39, 0.0  ;;  %vm2034_vm14 = vcmp.gt.f32.partialorder %v2018_v40, 0.0  ;;  %vm2035_vm15 = vcmp.gt.f32.partialorder %v2019_v30, 0.0 }
 0x328   :  { %v2036_v41 = vmul.f32 0.2, %v2004_v16  ;;  %v2037_v42 = vmul.f32 0.2, %v2005_v29  ;;  %v2038_v32 = vmul.f32 0.2, %v2006_v33 }
 0x329   :  { %v2039_v43 = vmul.f32 0.2, %v2007_v18  ;;  %v2040_v57 = vmul.f32 0.2, %v2008_v22  ;;  %v2041_v44 = vmul.f32 0.2, %v2009_v34 }
 0x32a   :  { %v2042_v31 = vmul.f32 0.2, %v2010_v24  ;;  %v2043_v45 = vmul.f32 0.2, %v2011_v35  ;;  %v2044_v46 = vmul.f32 0.2, %v2012_v23  ;;  %v2052_v48 = vsel %vm2020_vm0, %v2004_v16, %v2036_v41 }
 0x32b   :  { %v2045_v12 = vmul.f32 0.2, %v2013_v36  ;;  %v2046_v51 = vmul.f32 0.2, %v2014_v37  ;;  %v2047_v47 = vmul.f32 0.2, %v2015_v38  ;;  %v2053_v54 = vsel %vm2021_vm1, %v2005_v29, %v2037_v42 }
 0x32c   :  { %v2048_v50 = vmul.f32 0.2, %v2016_v25  ;;  %v2049_v55 = vmul.f32 0.2, %v2017_v39  ;;  %v2050_v56 = vmul.f32 0.2, %v2018_v40  ;;  %v2054_v49 = vsel %vm2022_vm2, %v2006_v33, %v2038_v32 }
 0x32d   :  { %v2051_v58 = vmul.f32 0.2, %v2019_v30  ;;  %v2055_v59 = vsel %vm2023_vm3, %v2007_v18, %v2039_v43  ;;  %v2056_v52 = vsel %vm2024_vm4, %v2008_v22, %v2040_v57  ;;  %v2057_v60 = vsel %vm2025_vm5, %v2009_v34, %v2041_v44 }
 0x32e   :  { %v2058_v61 = vsel %vm2026_vm6, %v2010_v24, %v2042_v31  ;;  %v2059_v62 = vsel %vm2027_vm7, %v2011_v35, %v2043_v45  ;;  %v2060_v63 = vsel %vm2028_vm8, %v2012_v23, %v2044_v46  ;;  %v2061_v0 = vsel %vm2029_vm9, %v2013_v36, %v2045_v12 }
 0x32f   :  { %v2062_v1 = vsel %vm2030_vm10, %v2014_v37, %v2046_v51  ;;  %v2063_v5 = vsel %vm2031_vm11, %v2015_v38, %v2047_v47  ;;  %v2064_v6 = vsel %vm2032_vm12, %v2016_v25, %v2048_v50  ;;  %v2065_v9 = vsel %vm2033_vm13, %v2017_v39, %v2049_v55 }
 0x330   :  { %v2066_v10 = vsel %vm2034_vm14, %v2018_v40, %v2050_v56  ;;  %v2067_v13 = vsel %vm2035_vm15, %v2019_v30, %v2051_v58  ;;  %v2410_v14 = vpack.c.bf16 %v2053_v54, %v2052_v48  ;;  %v2411_v19 = vpack.c.bf16 %v2055_v59, %v2054_v49 }
 0x331   :  { %v2412_v2 = vpack.c.bf16 %v2057_v60, %v2056_v52  ;;  %v2413_v3 = vpack.c.bf16 %v2059_v62, %v2058_v61  ;;  %v2414_v4 = vpack.c.bf16 %v2061_v0, %v2060_v63  ;;  %v2415_v7 = vpack.c.bf16 %v2063_v5, %v2062_v1 }
 0x332   :  { %v2416_v20 = vpack.c.bf16 %v2065_v9, %v2064_v6  ;;  %v2417_v8 = vpack.c.bf16 %v2067_v13, %v2066_v10  ;;  %2132 = vst [vmem:[%s3310_s4] sm:$0xff] %v2410_v14  ;;  %2133 = vst [vmem:[%s3310_s4 + $0x8] sm:$0xff] %v2411_v19 }
 0x333   :  { %2134 = vst [vmem:[%s3310_s4 + $0x10] sm:$0xff] %v2412_v2  ;;  %2135 = vst [vmem:[%s3310_s4 + $0x18] sm:$0xff] %v2413_v3 }
 0x334   :  { %2136 = vst [vmem:[%s3310_s4 + $0x20] sm:$0xff] %v2414_v4  ;;  %2137 = vst [vmem:[%s3310_s4 + $0x28] sm:$0xff] %v2415_v7 }
 0x335   :  { %2138 = vst [vmem:[%s3310_s4 + $0x30] sm:$0xff] %v2416_v20  ;;  %2139 = vst [vmem:[%s3310_s4 + $0x38] sm:$0xff] %v2417_v8 }

// kernel: vae_forward.23
= control target key start
LH: loop header
LB: loop body
LE: loop exit
PB: predicated region body
PF: predicated region fallthrough
CT: control target
= control target key end

     0   :  { %s1171_s9 = smov 0   ;;  %s1173_s10 = smov 0   ;;  %s1434_s0 = inlined_call_operand.vmem [shape: bf16[1,128], index: 0, kind: input, shape index: {}]   ;;  %s1435_s1 = inlined_call_operand.vmem [shape: bf16[128,8192], index: 1, kind: input, shape index: {}]   ;;  %s1436_s2 = inlined_call_operand.vmem [shape: f32[1,8192], index: 2, kind: output, shape index: {}]  }
   0x1   :  { %s1175_s11 = smov 0  }
   0x2 LB: > { %s995_s12 = sadd.s32 4294967295, %s1152_s11   ;;  %s1188_s13 = sadd.s32 1, %s1152_s11   ;;  %s1152_s11 = sphi %s1175_s11, %s1439_s11   ;;  %s1148_s10 = sphi %s1173_s10, %s1438_s10   ;;  %s1144_s9 = sphi %s1171_s9, %s1437_s9  }
   0x3   : > { %s37_s14 = ssub.s32 %s1152_s11, %s1188_s13  ;;  %s40_s15 = sadd.s32 1, %s1148_s10 }
   0x4   : > { %p38_p0 = scmp.eq.s32.totalorder %s37_s14, 0  ;;  %p47_p1 = scmp.ne.s32.totalorder %s1148_s10, %s1144_s9 }
   0x5   : > { %p48_p2 = scmp.eq.s32.totalorder %s1152_s11, 0  ;;  %p998_p4 = scmp.ge.s32.totalorder %s1152_s11, 8 }
   0x6   : > { %s1197_s16 = scalar_select %p38_p0, %s1148_s10, %s40_s15  }
   0x7   : > { %p49_p3 = por %p48_p2, %p47_p1  ;;  %102 = sbr.rel (%p998_p4) target bundleno = 48 (0x30), region = 20 }
   0xc   : > { %105 = sbr.rel (!%p49_p3) target bundleno = 48 (0x30), region = 24  ;;  %s107_s17 = sand.u32 (%p49_p3), 1, %s1148_s10  }
   0xd   : > { %s1071_s18 = sshll.u32 (%p49_p3), %s1152_s11, 5  ;;  %s999_s19 = sshll.u32 (%p49_p3), %s107_s17, 9 }
   0xe   : > { %s1205_s22 = scalar_lea.vmem (%p49_p3), %s1435_s1, %s1071_s18  ;;  %s1210_s23 = scalar_lea.vmem (%p49_p3), [#allocation2], %s999_s19 }
   0xf   : > { %v125_v0 = vld [vmem:[%s1205_s22] sm:$0xff] (%p49_p3)  ;;  %v127_v1 = vld [vmem:[%s1205_s22 + $0x8] sm:$0xff] (%p49_p3)  ;;  %v129_v2 = vld [vmem:[%s1205_s22 + $0x10] sm:$0xff] (%p49_p3) }
  0x10   : > { %126 = vst [vmem:[%s1210_s23] sm:$0xff] (%p49_p3), %v125_v0  ;;  %128 = vst [vmem:[%s1210_s23 + $0x8] sm:$0xff] (%p49_p3), %v127_v1  ;;  %v131_v3 = vld [vmem:[%s1205_s22 + $0x18] sm:$0xff] (%p49_p3)  ;;  %v133_v4 = vld [vmem:[%s1205_s22 + $0x100] sm:$0xff] (%p49_p3) }
  0x11   : > { %130 = vst [vmem:[%s1210_s23 + $0x10] sm:$0xff] %v129_v2  ;;  %v135_v5 = vld [vmem:[%s1205_s22 + $0x108] sm:$0xff]  ;;  %132 = vst [vmem:[%s1210_s23 + $0x18] sm:$0xff] %v131_v3  ;;  %v137_v6 = vld [vmem:[%s1205_s22 + $0x110] sm:$0xff] }
  0x12   : > { %134 = vst [vmem:[%s1210_s23 + $0x20] sm:$0xff] %v133_v4  ;;  %136 = vst [vmem:[%s1210_s23 + $0x28] sm:$0xff] %v135_v5  ;;  %v139_v7 = vld [vmem:[%s1205_s22 + $0x118] sm:$0xff]  ;;  %v141_v8 = vld [vmem:[%s1205_s22 + $0x200] sm:$0xff] }
  0x13   : > { %138 = vst [vmem:[%s1210_s23 + $0x30] sm:$0xff] %v137_v6  ;;  %140 = vst [vmem:[%s1210_s23 + $0x38] sm:$0xff] %v139_v7  ;;  %v143_v9 = vld [vmem:[%s1205_s22 + $0x208] sm:$0xff]  ;;  %v145_v10 = vld [vmem:[%s1205_s22 + $0x210] sm:$0xff] }
  0x14   : > { %142 = vst [vmem:[%s1210_s23 + $0x40] sm:$0xff] %v141_v8  ;;  %v147_v11 = vld [vmem:[%s1205_s22 + $0x218] sm:$0xff]  ;;  %144 = vst [vmem:[%s1210_s23 + $0x48] sm:$0xff] %v143_v9  ;;  %v149_v12 = vld [vmem:[%s1205_s22 + $0x300] sm:$0xff] }
  0x15   : > { %146 = vst [vmem:[%s1210_s23 + $0x50] sm:$0xff] %v145_v10  ;;  %148 = vst [vmem:[%s1210_s23 + $0x58] sm:$0xff] %v147_v11  ;;  %v151_v13 = vld [vmem:[%s1205_s22 + $0x308] sm:$0xff]  ;;  %v153_v14 = vld [vmem:[%s1205_s22 + $0x310] sm:$0xff] }
  0x16   : > { %150 = vst [vmem:[%s1210_s23 + $0x60] sm:$0xff] %v149_v12  ;;  %152 = vst [vmem:[%s1210_s23 + $0x68] sm:$0xff] %v151_v13  ;;  %v155_v15 = vld [vmem:[%s1205_s22 + $0x318] sm:$0xff]  ;;  %v157_v16 = vld [vmem:[%s1205_s22 + $0x400] sm:$0xff] }
  0x17   : > { %154 = vst [vmem:[%s1210_s23 + $0x70] sm:$0xff] %v153_v14  ;;  %v159_v17 = vld [vmem:[%s1205_s22 + $0x408] sm:$0xff]  ;;  %156 = vst [vmem:[%s1210_s23 + $0x78] sm:$0xff] %v155_v15  ;;  %v161_v18 = vld [vmem:[%s1205_s22 + $0x410] sm:$0xff] }
  0x18   : > { %158 = vst [vmem:[%s1210_s23 + $0x80] sm:$0xff] %v157_v16  ;;  %160 = vst [vmem:[%s1210_s23 + $0x88] sm:$0xff] %v159_v17  ;;  %v163_v19 = vld [vmem:[%s1205_s22 + $0x418] sm:$0xff]  ;;  %v165_v20 = vld [vmem:[%s1205_s22 + $0x500] sm:$0xff] }
  0x19   : > { %162 = vst [vmem:[%s1210_s23 + $0x90] sm:$0xff] %v161_v18  ;;  %164 = vst [vmem:[%s1210_s23 + $0x98] sm:$0xff] %v163_v19  ;;  %v167_v21 = vld [vmem:[%s1205_s22 + $0x508] sm:$0xff]  ;;  %v169_v22 = vld [vmem:[%s1205_s22 + $0x510] sm:$0xff] }
  0x1a   : > { %166 = vst [vmem:[%s1210_s23 + $0xa0] sm:$0xff] %v165_v20  ;;  %v171_v23 = vld [vmem:[%s1205_s22 + $0x518] sm:$0xff]  ;;  %168 = vst [vmem:[%s1210_s23 + $0xa8] sm:$0xff] %v167_v21  ;;  %v173_v24 = vld [vmem:[%s1205_s22 + $0x600] sm:$0xff] }
  0x1b   : > { %170 = vst [vmem:[%s1210_s23 + $0xb0] sm:$0xff] %v169_v22  ;;  %172 = vst [vmem:[%s1210_s23 + $0xb8] sm:$0xff] %v171_v23  ;;  %v175_v25 = vld [vmem:[%s1205_s22 + $0x608] sm:$0xff]  ;;  %v177_v26 = vld [vmem:[%s1205_s22 + $0x610] sm:$0xff] }
  0x1c   : > { %174 = vst [vmem:[%s1210_s23 + $0xc0] sm:$0xff] %v173_v24  ;;  %176 = vst [vmem:[%s1210_s23 + $0xc8] sm:$0xff] %v175_v25  ;;  %v179_v27 = vld [vmem:[%s1205_s22 + $0x618] sm:$0xff]  ;;  %v181_v28 = vld [vmem:[%s1205_s22 + $0x700] sm:$0xff] }
  0x1d   : > { %178 = vst [vmem:[%s1210_s23 + $0xd0] sm:$0xff] %v177_v26  ;;  %v183_v29 = vld [vmem:[%s1205_s22 + $0x708] sm:$0xff]  ;;  %180 = vst [vmem:[%s1210_s23 + $0xd8] sm:$0xff] %v179_v27  ;;  %v185_v30 = vld [vmem:[%s1205_s22 + $0x710] sm:$0xff] }
  0x1e   : > { %182 = vst [vmem:[%s1210_s23 + $0xe0] sm:$0xff] %v181_v28  ;;  %184 = vst [vmem:[%s1210_s23 + $0xe8] sm:$0xff] %v183_v29  ;;  %v187_v31 = vld [vmem:[%s1205_s22 + $0x718] sm:$0xff]  ;;  %v189_v32 = vld [vmem:[%s1205_s22 + $0x800] sm:$0xff] }
  0x1f   : > { %186 = vst [vmem:[%s1210_s23 + $0xf0] sm:$0xff] %v185_v30  ;;  %188 = vst [vmem:[%s1210_s23 + $0xf8] sm:$0xff] %v187_v31  ;;  %v191_v33 = vld [vmem:[%s1205_s22 + $0x808] sm:$0xff]  ;;  %v193_v34 = vld [vmem:[%s1205_s22 + $0x810] sm:$0xff] }
  0x20   : > { %190 = vst [vmem:[%s1210_s23 + $0x100] sm:$0xff] %v189_v32  ;;  %v195_v35 = vld [vmem:[%s1205_s22 + $0x818] sm:$0xff]  ;;  %192 = vst [vmem:[%s1210_s23 + $0x108] sm:$0xff] %v191_v33  ;;  %v197_v36 = vld [vmem:[%s1205_s22 + $0x900] sm:$0xff] }
  0x21   : > { %194 = vst [vmem:[%s1210_s23 + $0x110] sm:$0xff] %v193_v34  ;;  %196 = vst [vmem:[%s1210_s23 + $0x118] sm:$0xff] %v195_v35  ;;  %v199_v37 = vld [vmem:[%s1205_s22 + $0x908] sm:$0xff]  ;;  %v201_v38 = vld [vmem:[%s1205_s22 + $0x910] sm:$0xff] }
  0x22   : > { %198 = vst [vmem:[%s1210_s23 + $0x120] sm:$0xff] %v197_v36  ;;  %200 = vst [vmem:[%s1210_s23 + $0x128] sm:$0xff] %v199_v37  ;;  %v203_v39 = vld [vmem:[%s1205_s22 + $0x918] sm:$0xff]  ;;  %v205_v40 = vld [vmem:[%s1205_s22 + $0xa00] sm:$0xff] }
  0x23   : > { %202 = vst [vmem:[%s1210_s23 + $0x130] sm:$0xff] %v201_v38  ;;  %v207_v41 = vld [vmem:[%s1205_s22 + $0xa08] sm:$0xff]  ;;  %204 = vst [vmem:[%s1210_s23 + $0x138] sm:$0xff] %v203_v39  ;;  %v209_v42 = vld [vmem:[%s1205_s22 + $0xa10] sm:$0xff] }
  0x24   : > { %206 = vst [vmem:[%s1210_s23 + $0x140] sm:$0xff] %v205_v40  ;;  %208 = vst [vmem:[%s1210_s23 + $0x148] sm:$0xff] %v207_v41  ;;  %v211_v43 = vld [vmem:[%s1205_s22 + $0xa18] sm:$0xff]  ;;  %v213_v44 = vld [vmem:[%s1205_s22 + $0xb00] sm:$0xff] }
  0x25   : > { %210 = vst [vmem:[%s1210_s23 + $0x150] sm:$0xff] %v209_v42  ;;  %212 = vst [vmem:[%s1210_s23 + $0x158] sm:$0xff] %v211_v43  ;;  %v215_v45 = vld [vmem:[%s1205_s22 + $0xb08] sm:$0xff]  ;;  %v217_v46 = vld [vmem:[%s1205_s22 + $0xb10] sm:$0xff] }
  0x26   : > { %214 = vst [vmem:[%s1210_s23 + $0x160] sm:$0xff] %v213_v44  ;;  %v219_v47 = vld [vmem:[%s1205_s22 + $0xb18] sm:$0xff]  ;;  %216 = vst [vmem:[%s1210_s23 + $0x168] sm:$0xff] %v215_v45  ;;  %v221_v48 = vld [vmem:[%s1205_s22 + $0xc00] sm:$0xff] }
  0x27   : > { %218 = vst [vmem:[%s1210_s23 + $0x170] sm:$0xff] %v217_v46  ;;  %220 = vst [vmem:[%s1210_s23 + $0x178] sm:$0xff] %v219_v47  ;;  %v223_v49 = vld [vmem:[%s1205_s22 + $0xc08] sm:$0xff]  ;;  %v225_v50 = vld [vmem:[%s1205_s22 + $0xc10] sm:$0xff] }
  0x28   : > { %222 = vst [vmem:[%s1210_s23 + $0x180] sm:$0xff] %v221_v48  ;;  %224 = vst [vmem:[%s1210_s23 + $0x188] sm:$0xff] %v223_v49  ;;  %v227_v51 = vld [vmem:[%s1205_s22 + $0xc18] sm:$0xff]  ;;  %v229_v52 = vld [vmem:[%s1205_s22 + $0xd00] sm:$0xff] }
  0x29   : > { %226 = vst [vmem:[%s1210_s23 + $0x190] sm:$0xff] %v225_v50  ;;  %v231_v53 = vld [vmem:[%s1205_s22 + $0xd08] sm:$0xff]  ;;  %228 = vst [vmem:[%s1210_s23 + $0x198] sm:$0xff] %v227_v51  ;;  %v233_v54 = vld [vmem:[%s1205_s22 + $0xd10] sm:$0xff] }
  0x2a   : > { %230 = vst [vmem:[%s1210_s23 + $0x1a0] sm:$0xff] %v229_v52  ;;  %232 = vst [vmem:[%s1210_s23 + $0x1a8] sm:$0xff] %v231_v53  ;;  %v235_v55 = vld [vmem:[%s1205_s22 + $0xd18] sm:$0xff]  ;;  %v237_v56 = vld [vmem:[%s1205_s22 + $0xe00] sm:$0xff] }
  0x2b   : > { %234 = vst [vmem:[%s1210_s23 + $0x1b0] sm:$0xff] %v233_v54  ;;  %236 = vst [vmem:[%s1210_s23 + $0x1b8] sm:$0xff] %v235_v55  ;;  %v239_v57 = vld [vmem:[%s1205_s22 + $0xe08] sm:$0xff]  ;;  %v241_v58 = vld [vmem:[%s1205_s22 + $0xe10] sm:$0xff] }
  0x2c   : > { %238 = vst [vmem:[%s1210_s23 + $0x1c0] sm:$0xff] %v237_v56  ;;  %v243_v59 = vld [vmem:[%s1205_s22 + $0xe18] sm:$0xff]  ;;  %240 = vst [vmem:[%s1210_s23 + $0x1c8] sm:$0xff] %v239_v57  ;;  %v245_v60 = vld [vmem:[%s1205_s22 + $0xf00] sm:$0xff] }
  0x2d   : > { %242 = vst [vmem:[%s1210_s23 + $0x1d0] sm:$0xff] %v241_v58  ;;  %244 = vst [vmem:[%s1210_s23 + $0x1d8] sm:$0xff] %v243_v59  ;;  %v247_v61 = vld [vmem:[%s1205_s22 + $0xf08] sm:$0xff]  ;;  %v249_v62 = vld [vmem:[%s1205_s22 + $0xf10] sm:$0xff] }
  0x2e   : > { %246 = vst [vmem:[%s1210_s23 + $0x1e0] sm:$0xff] %v245_v60  ;;  %248 = vst [vmem:[%s1210_s23 + $0x1e8] sm:$0xff] %v247_v61  ;;  %v251_v63 = vld [vmem:[%s1205_s22 + $0xf18] sm:$0xff] }
  0x2f   : > { %250 = vst [vmem:[%s1210_s23 + $0x1f0] sm:$0xff] %v249_v62  ;;  %252 = vst [vmem:[%s1210_s23 + $0x1f8] sm:$0xff] %v251_v63 }
  0x30 PF: > { %p1002_p5 = scmp.ge.s32.totalorder %s1152_s11, 1  ;;  %p257_p6 = scmp.lt.s32.totalorder %s1152_s11, 9 }
  0x32   : > { %p258_p7 = pnand %p1002_p5, %p257_p6 }
  0x33   : > { %s264_s24 = sand.u32 (!%p258_p7), 1, %s1144_s9   ;;  %s1004_s29 = sshll.u32 (!%p258_p7), %s995_s12, 3 }
  0x34   : > { %261 = sbr.rel (%p258_p7) target bundleno = 366 (0x16e), region = 47  ;;  %s1003_s25 = sshll.u32 (!%p258_p7), %s264_s24, 9 }
  0x35   : > { %s1342_s26 = scalar_lea.vmem (!%p258_p7), [#allocation2], %s1003_s25  ;;  %p286_p8 = scmp.lt.s32.totalorder (!%p258_p7), %s1004_s29, 63 }
  0x39   : > { %v1154_v0 = vmov 0   ;;  %v348_v1 = vld [vmem:[%s1342_s26 + $0x1c0] sm:$0xff]  ;;  %v349_v3 = vld [vmem:[%s1342_s26 + $0x1c8] sm:$0xff]  ;;  %v350_v63 = vld [vmem:[%s1342_s26 + $0x1d0] sm:$0xff]  ;;  %s1441_s29 = smov (!%p286_p8, %s1004_s29), 63 }
  0x3a   : > { %708 = vmatprep.mubr.bf16.mxu0 %v1154_v0  ;;  %749 = vmatprep.mubr.bf16.mxu1 %v1154_v0  ;;  %v352_v2 = vld [vmem:[%s1342_s26 + $0x1e0] sm:$0xff]  ;;  %v353_v5 = vld [vmem:[%s1342_s26 + $0x1e8] sm:$0xff]  ;;  %s288_s4 = scalar_lea.vmem %s1436_s2, %s1441_s29 }
  0x3b   : > { %v1062_v4 = vcombine.high %v348_v1, %v352_v2  ;;  %v1061_v6 = vcombine.low %v348_v1, %v352_v2  ;;  %v340_v7 = vld [vmem:[%s1342_s26 + $0x180] sm:$0xff]  ;;  %v1064_v9 = vcombine.high %v349_v3, %v353_v5  ;;  %v1063_v10 = vcombine.low %v349_v3, %v353_v5  ;;  %v341_v12 = vld [vmem:[%s1342_s26 + $0x188] sm:$0xff]  ;;  %v354_v1 = vld [vmem:[%s1342_s26 + $0x1f0] sm:$0xff] }
  0x3c   : > { %v344_v8 = vld [vmem:[%s1342_s26 + $0x1a0] sm:$0xff]  ;;  %v345_v13 = vld [vmem:[%s1342_s26 + $0x1a8] sm:$0xff]  ;;  %v351_v2 = vld [vmem:[%s1342_s26 + $0x1d8] sm:$0xff] }
  0x3d   : > { %v1054_v11 = vcombine.high %v340_v7, %v344_v8  ;;  %v332_v14 = vld [vmem:[%s1342_s26 + $0x140] sm:$0xff]  ;;  %676 = vmatprep.subr.bf16.mxu0 %v1062_v4  ;;  %v1056_v15 = vcombine.high %v341_v12, %v345_v13  ;;  %v333_v17 = vld [vmem:[%s1342_s26 + $0x148] sm:$0xff]  ;;  %717 = vmatprep.subr.bf16.mxu1 %v1064_v9  ;;  %v1053_v19 = vcombine.low %v340_v7, %v344_v8  ;;  %v355_v3 = vld [vmem:[%s1342_s26 + $0x1f8] sm:$0xff] }
  0x3e   : > { %v336_v16 = vld [vmem:[%s1342_s26 + $0x160] sm:$0xff]  ;;  %v337_v18 = vld [vmem:[%s1342_s26 + $0x168] sm:$0xff]  ;;  %677 = vmatpush1.bf16.msra.mxu0 %v1061_v6  ;;  %718 = vmatpush1.bf16.msra.mxu1 %v1063_v10  ;;  %v1055_v20 = vcombine.low %v341_v12, %v345_v13  ;;  %v1066_v6 = vcombine.high %v350_v63, %v354_v1  ;;  %v1068_v7 = vcombine.high %v351_v2, %v355_v3  ;;  %v342_v8 = vld [vmem:[%s1342_s26 + $0x190] sm:$0xff] }
  0x3f   : > { %678 = vmatprep.subr.bf16.mxu0 %v1054_v11  ;;  %v1046_v21 = vcombine.high %v332_v14, %v336_v16  ;;  %719 = vmatprep.subr.bf16.mxu1 %v1056_v15  ;;  %v1048_v22 = vcombine.high %v333_v17, %v337_v18  ;;  %v324_v23 = vld [vmem:[%s1342_s26 + $0x100] sm:$0xff]  ;;  %v325_v25 = vld [vmem:[%s1342_s26 + $0x108] sm:$0xff]  ;;  %v1045_v27 = vcombine.low %v332_v14, %v336_v16  ;;  %v346_v9 = vld [vmem:[%s1342_s26 + $0x1b0] sm:$0xff] }
  0x40   : > { %v328_v24 = vld [vmem:[%s1342_s26 + $0x120] sm:$0xff]  ;;  %v329_v26 = vld [vmem:[%s1342_s26 + $0x128] sm:$0xff]  ;;  %v1047_v28 = vcombine.low %v333_v17, %v337_v18  ;;  %v343_v10 = vld [vmem:[%s1342_s26 + $0x198] sm:$0xff]  ;;  %v1065_v13 = vcombine.low %v350_v63, %v354_v1  ;;  %v1067_v14 = vcombine.low %v351_v2, %v355_v3  ;;  %v1058_v15 = vcombine.high %v342_v8, %v346_v9 }
  0x41   : > { %v1038_v29 = vcombine.high %v324_v23, %v328_v24  ;;  %v1040_v30 = vcombine.high %v325_v25, %v329_v26  ;;  %v316_v31 = vld [vmem:[%s1342_s26 + $0xc0] sm:$0xff]  ;;  %v317_v33 = vld [vmem:[%s1342_s26 + $0xc8] sm:$0xff]  ;;  %v1037_v35 = vcombine.low %v324_v23, %v328_v24  ;;  %v1039_v36 = vcombine.low %v325_v25, %v329_v26  ;;  %v347_v11 = vld [vmem:[%s1342_s26 + $0x1b8] sm:$0xff] }
  0x42   : > { %679 = vmatpush1.bf16.msra.mxu0 %v1053_v19  ;;  %720 = vmatpush1.bf16.msra.mxu1 %v1055_v20  ;;  %v320_v32 = vld [vmem:[%s1342_s26 + $0xe0] sm:$0xff]  ;;  %v321_v34 = vld [vmem:[%s1342_s26 + $0xe8] sm:$0xff]  ;;  %v1060_v16 = vcombine.high %v343_v10, %v347_v11  ;;  %v334_v17 = vld [vmem:[%s1342_s26 + $0x150] sm:$0xff] }
  0x43   : > { %680 = vmatprep.subr.bf16.mxu0 %v1046_v21  ;;  %721 = vmatprep.subr.bf16.mxu1 %v1048_v22  ;;  %v1030_v37 = vcombine.high %v316_v31, %v320_v32  ;;  %v1032_v38 = vcombine.high %v317_v33, %v321_v34  ;;  %v308_v39 = vld [vmem:[%s1342_s26 + $0x80] sm:$0xff]  ;;  %v309_v41 = vld [vmem:[%s1342_s26 + $0x88] sm:$0xff]  ;;  %v1029_v43 = vcombine.low %v316_v31, %v320_v32  ;;  %v338_v18 = vld [vmem:[%s1342_s26 + $0x170] sm:$0xff] }
  0x44   : > { %v312_v40 = vld [vmem:[%s1342_s26 + $0xa0] sm:$0xff]  ;;  %v313_v42 = vld [vmem:[%s1342_s26 + $0xa8] sm:$0xff]  ;;  %v1031_v44 = vcombine.low %v317_v33, %v321_v34  ;;  %v335_v19 = vld [vmem:[%s1342_s26 + $0x158] sm:$0xff]  ;;  %v1057_v21 = vcombine.low %v342_v8, %v346_v9  ;;  %v1059_v22 = vcombine.low %v343_v10, %v347_v11  ;;  %v1050_v23 = vcombine.high %v334_v17, %v338_v18 }
  0x45   : > { %v1022_v45 = vcombine.high %v308_v39, %v312_v40  ;;  %v1024_v46 = vcombine.high %v309_v41, %v313_v42  ;;  %v300_v47 = vld [vmem:[%s1342_s26 + $0x40] sm:$0xff]  ;;  %v301_v49 = vld [vmem:[%s1342_s26 + $0x48] sm:$0xff]  ;;  %v1021_v51 = vcombine.low %v308_v39, %v312_v40  ;;  %v1023_v52 = vcombine.low %v309_v41, %v313_v42  ;;  %v339_v20 = vld [vmem:[%s1342_s26 + $0x178] sm:$0xff] }
  0x46   : > { %681 = vmatpush1.bf16.msra.mxu0 %v1045_v27  ;;  %722 = vmatpush1.bf16.msra.mxu1 %v1047_v28  ;;  %v304_v48 = vld [vmem:[%s1342_s26 + $0x60] sm:$0xff]  ;;  %v305_v50 = vld [vmem:[%s1342_s26 + $0x68] sm:$0xff]  ;;  %v1052_v24 = vcombine.high %v335_v19, %v339_v20  ;;  %v326_v25 = vld [vmem:[%s1342_s26 + $0x110] sm:$0xff] }
  0x47   : > { %682 = vmatprep.subr.bf16.mxu0 %v1038_v29  ;;  %723 = vmatprep.subr.bf16.mxu1 %v1040_v30  ;;  %v1014_v53 = vcombine.high %v300_v47, %v304_v48  ;;  %v1016_v54 = vcombine.high %v301_v49, %v305_v50  ;;  %v292_v55 = vld [vmem:[%s1342_s26] sm:$0xff]  ;;  %v293_v57 = vld [vmem:[%s1342_s26 + $0x8] sm:$0xff]  ;;  %v1013_v59 = vcombine.low %v300_v47, %v304_v48  ;;  %v330_v26 = vld [vmem:[%s1342_s26 + $0x130] sm:$0xff] }
  0x48   : > { %v296_v56 = vld [vmem:[%s1342_s26 + $0x20] sm:$0xff]  ;;  %v297_v58 = vld [vmem:[%s1342_s26 + $0x28] sm:$0xff]  ;;  %v1015_v60 = vcombine.low %v301_v49, %v305_v50  ;;  %v327_v27 = vld [vmem:[%s1342_s26 + $0x118] sm:$0xff]  ;;  %v1049_v29 = vcombine.low %v334_v17, %v338_v18  ;;  %v1051_v30 = vcombine.low %v335_v19, %v339_v20  ;;  %v1042_v31 = vcombine.high %v326_v25, %v330_v26 }
  0x49   : > { %v1006_v61 = vcombine.high %v292_v55, %v296_v56  ;;  %v1008_v62 = vcombine.high %v293_v57, %v297_v58  ;;  %v1005_v4 = vcombine.low %v292_v55, %v296_v56  ;;  %v1007_v5 = vcombine.low %v293_v57, %v297_v58  ;;  %v1387_v12 = vld [vmem:[%s1434_s0] sm:$0x1]  ;;  %v331_v28 = vld [vmem:[%s1342_s26 + $0x138] sm:$0xff]  ;;  %v318_v33 = vld [vmem:[%s1342_s26 + $0xd0] sm:$0xff] }
  0x4a   : > { %683 = vmatpush1.bf16.msra.mxu0 %v1037_v35  ;;  %724 = vmatpush1.bf16.msra.mxu1 %v1039_v36  ;;  %v1044_v32 = vcombine.high %v327_v27, %v331_v28  ;;  %v322_v34 = vld [vmem:[%s1342_s26 + $0xf0] sm:$0xff]  ;;  %v319_v35 = vld [vmem:[%s1342_s26 + $0xd8] sm:$0xff] }
  0x4b   : > { %684 = vmatprep.subr.bf16.mxu0 %v1030_v37  ;;  %725 = vmatprep.subr.bf16.mxu1 %v1032_v38  ;;  %v323_v36 = vld [vmem:[%s1342_s26 + $0xf8] sm:$0xff]  ;;  %v1041_v37 = vcombine.low %v326_v25, %v330_v26  ;;  %v1034_v38 = vcombine.high %v318_v33, %v322_v34  ;;  %v310_v40 = vld [vmem:[%s1342_s26 + $0x90] sm:$0xff] }
  0x4c   : > { %v1036_v39 = vcombine.high %v319_v35, %v323_v36  ;;  %v314_v41 = vld [vmem:[%s1342_s26 + $0xb0] sm:$0xff]  ;;  %v311_v42 = vld [vmem:[%s1342_s26 + $0x98] sm:$0xff] }
  0x4d   : > { %v302_v48 = vld [vmem:[%s1342_s26 + $0x50] sm:$0xff]  ;;  %v303_v50 = vld [vmem:[%s1342_s26 + $0x58] sm:$0xff] }
  0x4e   : > { %685 = vmatpush1.bf16.msra.mxu0 %v1029_v43  ;;  %726 = vmatpush1.bf16.msra.mxu1 %v1031_v44  ;;  %v315_v43 = vld [vmem:[%s1342_s26 + $0xb8] sm:$0xff]  ;;  %v1033_v44 = vcombine.low %v318_v33, %v322_v34  ;;  %v306_v49 = vld [vmem:[%s1342_s26 + $0x70] sm:$0xff] }
  0x4f   : > { %686 = vmatprep.subr.bf16.mxu0 %v1022_v45  ;;  %727 = vmatprep.subr.bf16.mxu1 %v1024_v46  ;;  %v1035_v45 = vcombine.low %v319_v35, %v323_v36  ;;  %v1026_v46 = vcombine.high %v310_v40, %v314_v41  ;;  %v1028_v47 = vcombine.high %v311_v42, %v315_v43  ;;  %v294_v56 = vld [vmem:[%s1342_s26 + $0x10] sm:$0xff]  ;;  %v295_v58 = vld [vmem:[%s1342_s26 + $0x18] sm:$0xff] }
  0x50   : > { %v298_v57 = vld [vmem:[%s1342_s26 + $0x30] sm:$0xff] }
  0x51   : > { %v1009_v1 = vcombine.low %v294_v56, %v298_v57 }
  0x52   : > { %687 = vmatpush1.bf16.msra.mxu0 %v1021_v51  ;;  %728 = vmatpush1.bf16.msra.mxu1 %v1023_v52  ;;  %v307_v51 = vld [vmem:[%s1342_s26 + $0x78] sm:$0xff]  ;;  %v1025_v52 = vcombine.low %v310_v40, %v314_v41 }
  0x53   : > { %688 = vmatprep.subr.bf16.mxu0 %v1014_v53  ;;  %729 = vmatprep.subr.bf16.mxu1 %v1016_v54  ;;  %v1027_v53 = vcombine.low %v311_v42, %v315_v43  ;;  %v1018_v54 = vcombine.high %v302_v48, %v306_v49  ;;  %v1020_v55 = vcombine.high %v303_v50, %v307_v51 }
  0x56   : > { %689 = vmatpush1.bf16.msra.mxu0 %v1013_v59  ;;  %730 = vmatpush1.bf16.msra.mxu1 %v1015_v60  ;;  %v299_v59 = vld [vmem:[%s1342_s26 + $0x38] sm:$0xff]  ;;  %v1017_v60 = vcombine.low %v302_v48, %v306_v49 }
  0x57   : > { %690 = vmatprep.subr.bf16.mxu0 %v1006_v61  ;;  %731 = vmatprep.subr.bf16.mxu1 %v1008_v62  ;;  %v1019_v61 = vcombine.low %v303_v50, %v307_v51  ;;  %v1010_v62 = vcombine.high %v294_v56, %v298_v57  ;;  %v1012_v63 = vcombine.high %v295_v58, %v299_v59  ;;  %v1155_v50 = vmov 1966171168  }
  0x58   : > { %v1011_v2 = vcombine.low %v295_v58, %v299_v59  ;;  %v893_v51 = vunpack.c.l.s4 %v1155_v50 }
  0x5a   : > { %691 = vmatpush1.bf16.msra.mxu0 %v1005_v4  ;;  %732 = vmatpush1.bf16.msra.mxu1 %v1007_v5  ;;  %v894_v56 = vunpack.c.0.s8 %v893_v51 }
  0x5b   : > { %758 = vmatprep.subr.bf16.mxu0 %v1066_v6  ;;  %799 = vmatprep.subr.bf16.mxu1 %v1068_v7 }
  0x5d   : > { %709 = vmatmul.mubr.bf16.vlgmr.msra.gmra.mxu0 %v1387_v12  ;;  %750 = vmatmul.mubr.bf16.vlgmr.msra.gmra.mxu1 %v1387_v12 }
  0x5e   : > { %759 = vmatpush1.bf16.msra.mxu0 %v1065_v13  ;;  %800 = vmatpush1.bf16.msra.mxu1 %v1067_v14 }
  0x5f   : > { %760 = vmatprep.subr.bf16.mxu0 %v1058_v15  ;;  %801 = vmatprep.subr.bf16.mxu1 %v1060_v16 }
  0x60   : > { %790 = vmatprep.mubr.bf16.mxu0 %v1154_v0  ;;  %831 = vmatprep.mubr.bf16.mxu1 %v1154_v0  ;;  %v1043_v0 = vcombine.low %v327_v27, %v331_v28 }
  0x62   : > { %761 = vmatpush1.bf16.msra.mxu0 %v1057_v21  ;;  %802 = vmatpush1.bf16.msra.mxu1 %v1059_v22 }
  0x63   : > { %762 = vmatprep.subr.bf16.mxu0 %v1050_v23  ;;  %803 = vmatprep.subr.bf16.mxu1 %v1052_v24 }
  0x66   : > { %763 = vmatpush1.bf16.msra.mxu0 %v1049_v29  ;;  %804 = vmatpush1.bf16.msra.mxu1 %v1051_v30 }
  0x67   : > { %764 = vmatprep.subr.bf16.mxu0 %v1042_v31  ;;  %805 = vmatprep.subr.bf16.mxu1 %v1044_v32 }
  0x6a   : > { %765 = vmatpush1.bf16.msra.mxu0 %v1041_v37  ;;  %806 = vmatpush1.bf16.msra.mxu1 %v1043_v0 }
  0x6b   : > { %766 = vmatprep.subr.bf16.mxu0 %v1034_v38  ;;  %807 = vmatprep.subr.bf16.mxu1 %v1036_v39 }
  0x6e   : > { %767 = vmatpush1.bf16.msra.mxu0 %v1033_v44  ;;  %808 = vmatpush1.bf16.msra.mxu1 %v1035_v45 }
  0x6f   : > { %768 = vmatprep.subr.bf16.mxu0 %v1026_v46  ;;  %809 = vmatprep.subr.bf16.mxu1 %v1028_v47 }
  0x72   : > { %769 = vmatpush1.bf16.msra.mxu0 %v1025_v52  ;;  %810 = vmatpush1.bf16.msra.mxu1 %v1027_v53  ;;  %v895_v52 = vlaneseq }
  0x73   : > { %770 = vmatprep.subr.bf16.mxu0 %v1018_v54  ;;  %811 = vmatprep.subr.bf16.mxu1 %v1020_v55 }
  0x74   : > { %v896_v57 = vshrl.u32 %v895_v52, 7 }
  0x76   : > { %771 = vmatpush1.bf16.msra.mxu0 %v1017_v60  ;;  %812 = vmatpush1.bf16.msra.mxu1 %v1019_v61  ;;  %v897_v60 = vsub.s32 %v894_v56, %v896_v57 }
  0x77   : > { %772 = vmatprep.subr.bf16.mxu0 %v1010_v62  ;;  %813 = vmatprep.subr.bf16.mxu1 %v1012_v63 }
  0x7a   : > { %773 = vmatpush1.bf16.msra.mxu0 %v1009_v1  ;;  %814 = vmatpush1.bf16.msra.mxu1 %v1011_v2 }
  0x7d   : > { %791 = vmatmul.mubr.bf16.vlgmr.msra.gmra.mxu0 %v1387_v12  ;;  %832 = vmatmul.mubr.bf16.vlgmr.msra.gmra.mxu1 %v1387_v12 }
 0x11d   : > { %v710_v3 = vpop.f32.mrf.mxu0  ;;  %v751_v4 = vpop.f32.mrf.mxu1 }
 0x11e   : > { %v840_v11 = vsub.f32 0.0, %v710_v3  ;;  %v842_v13 = vsub.f32 0.0, %v751_v4 }
 0x11f   : > { %v712_v5 = vpop.f32.mrf.mxu0  ;;  %v753_v6 = vpop.f32.mrf.mxu1 }
 0x120   : > { %v841_v14 = vsub.f32 0.0, %v712_v5  ;;  %v843_v15 = vsub.f32 0.0, %v753_v6  ;;  %v848_v16 = vmul.f32 1.442695, %v840_v11  ;;  %v852_v17 = vmul.f32 1.442695, %v842_v13 }
 0x121   : > { %v714_v7 = vpop.f32.mrf.mxu0  ;;  %v755_v8 = vpop.f32.mrf.mxu1 }
 0x122   : > { %v850_v18 = vmul.f32 1.442695, %v841_v14  ;;  %v854_v19 = vmul.f32 1.442695, %v843_v15  ;;  %1098 = vpow2.f32 %v848_v16 }
 0x123   : > { %v715_v9 = vpop.f32.mrf.mxu0  ;;  %v756_v10 = vpop.f32.mrf.mxu1  ;;  %1100 = vpow2.f32 %v852_v17 }
 0x124   : > { %1102 = vpow2.f32 %v850_v18 }
 0x125   : > { %1104 = vpow2.f32 %v854_v19 }
 0x12f   : > { %v1099_v32 = vpop.eup %1098 }
 0x130   : > { %v1101_v35 = vpop.eup %1100  ;;  %v864_v38 = vadd.f32 1.0, %v1099_v32 }
 0x131   : > { %v1103_v37 = vpop.eup %1102  ;;  %v866_v39 = vadd.f32 1.0, %v1101_v35 }
 0x132   : > { %v1105_v0 = vpop.eup %1104  ;;  %v865_v40 = vadd.f32 1.0, %v1103_v37 }
 0x133   : > { %v867_v41 = vadd.f32 1.0, %v1105_v0 }
 0x13d   : > { %v792_v12 = vpop.f32.mrf.mxu0  ;;  %v833_v21 = vpop.f32.mrf.mxu1 }
 0x13e   : > { %v844_v20 = vsub.f32 0.0, %v792_v12  ;;  %v846_v22 = vsub.f32 0.0, %v833_v21 }
 0x13f   : > { %v794_v23 = vpop.f32.mrf.mxu0  ;;  %v835_v26 = vpop.f32.mrf.mxu1 }
 0x140   : > { %v856_v24 = vmul.f32 1.442695, %v844_v20  ;;  %v845_v25 = vsub.f32 0.0, %v794_v23  ;;  %v860_v27 = vmul.f32 1.442695, %v846_v22  ;;  %v847_v28 = vsub.f32 0.0, %v835_v26 }
 0x141   : > { %v796_v29 = vpop.f32.mrf.mxu0  ;;  %v837_v31 = vpop.f32.mrf.mxu1 }
 0x142   : > { %1106 = vpow2.f32 %v856_v24  ;;  %v858_v30 = vmul.f32 1.442695, %v845_v25  ;;  %v862_v33 = vmul.f32 1.442695, %v847_v28 }
 0x143   : > { %1108 = vpow2.f32 %v860_v27  ;;  %v797_v34 = vpop.f32.mrf.mxu0  ;;  %v838_v36 = vpop.f32.mrf.mxu1 }
 0x144   : > { %1110 = vpow2.f32 %v858_v30 }
 0x145   : > { %1112 = vpow2.f32 %v862_v33 }
 0x146   : > { %1114 = vrcp.f32 %v864_v38 }
 0x147   : > { %1116 = vrcp.f32 %v866_v39 }
 0x148   : > { %1118 = vrcp.f32 %v865_v40 }
 0x149   : > { %1120 = vrcp.f32 %v867_v41 }
 0x14f   : > { %v1107_v42 = vpop.eup %1106 }
 0x150   : > { %v1109_v43 = vpop.eup %1108  ;;  %v868_v44 = vadd.f32 1.0, %v1107_v42 }
 0x151   : > { %v1111_v45 = vpop.eup %1110  ;;  %v870_v46 = vadd.f32 1.0, %v1109_v43 }
 0x152   : > { %v1113_v47 = vpop.eup %1112  ;;  %1122 = vrcp.f32 %v868_v44  ;;  %v869_v48 = vadd.f32 1.0, %v1111_v45 }
 0x153   : > { %1124 = vrcp.f32 %v870_v46  ;;  %v871_v49 = vadd.f32 1.0, %v1113_v47  ;;  %v1115_v53 = vpop.eup %1114 }
 0x154   : > { %1126 = vrcp.f32 %v869_v48  ;;  %v1117_v54 = vpop.eup %1116 }
 0x155   : > { %1128 = vrcp.f32 %v871_v49  ;;  %v1119_v55 = vpop.eup %1118 }
 0x156   : > { %v1121_v58 = vpop.eup %1120  ;;  %v888_v59 = vcombine.low %v1115_v53, %v1119_v55 }
 0x157   : > { %v889_v61 = vcombine.low %v1117_v54, %v1121_v58 }
 0x158   : > { %v898_v2 = vrot.slane %v888_v59, %v897_v60 }
 0x159   : > { %v905_v3 = vrot.slane %v889_v61, %v897_v60 }
 0x15b   : > { %v920_v8 = vcombine.low %v898_v2, %v905_v3 }
 0x15d   : > { %v928_v11 = vrot.slane %v920_v8, %v897_v60 }
 0x15f   : > { %v1123_v62 = vpop.eup %1122 }
 0x160   : > { %v1125_v63 = vpop.eup %1124 }
 0x161   : > { %v1127_v1 = vpop.eup %1126 }
 0x162   : > { %v1129_v4 = vpop.eup %1128  ;;  %v890_v5 = vcombine.low %v1123_v62, %v1127_v1 }
 0x163   : > { %v891_v6 = vcombine.low %v1125_v63, %v1129_v4 }
 0x164   : > { %v912_v7 = vrot.slane %v890_v5, %v897_v60 }
 0x165   : > { %v919_v9 = vrot.slane %v891_v6, %v897_v60 }
 0x167   : > { %v921_v10 = vcombine.low %v912_v7, %v919_v9 }
 0x169   : > { %v935_v13 = vrot.slane %v921_v10, %v897_v60 }
 0x16b   : > { %v936_v14 = vcombine.low %v928_v11, %v935_v13 }
 0x16d   : > { %938 = vst [vmem:[%s288_s4] sm:$0xff] %v936_v14 }
 0x16e PF: > { %p9_p9 = scmp.ge.s32.totalorder %s1188_s13, 10   ;;  %s1437_s9 = smov %s1148_s10 }
 0x16f   : > { %s1438_s10 = smov %s1197_s16  ;;  %s1439_s11 = smov %s1188_s13 }
 0x170   :  { %11 = sbr.rel (!%p9_p9) target bundleno = 2 (0x2), region = 86 }

</bundles_post_ra>
